<compile_context>
chip_gen: v5e
topology: v5e:2x2
jax: 0.10.0
libtpu: 0.0.40
codegen_flags: <defaults>
</compile_context>

<pallas_src>
import functools

import numpy as np
import jax
import jax.numpy as jnp
from jax.experimental import pallas as pl
from jax.experimental.pallas import tpu as pltpu

CP = 128            # channel padding to the TPU lane width (lane-dense I/O)
LRELU_SLOPE = 0.2   # TODO(synk): verify against AesFA reference (torch default is 0.01)


def _round_up(x, m):
    return (x + m - 1) // m * m


def _lrelu(x):
    return jnp.where(x >= 0.0, x, LRELU_SLOPE * x)


# -----------------------------------------------------------------------------
# Pallas kernels
# -----------------------------------------------------------------------------
def _mm_kernel(a_ref, w_ref, b_ref, o_ref, *, act):
    """(tm,K)x(K,N) matmul with fused bias + activation; bf16 in, f32 accumulate."""
    acc = jnp.dot(a_ref[...], w_ref[...], preferred_element_type=jnp.float32)
    acc = acc + b_ref[...]
    if act == "lrelu":
        acc = _lrelu(acc)
    o_ref[...] = acc.astype(o_ref.dtype)


def _enc_mix_kernel(h_ref, l_ref, lu_ref, hd_ref, whh_ref, whl_ref, bh_ref,
                    wlh_ref, wll_ref, bl_ref,
                    ho_ref, lo_ref, mh_ref, sh_ref, ml_ref, sl_ref):
    """Encoder octave 1x1 mixing + fused style stats, one batch element per step.

    up2 / avgpool2 are commuted past the 1x1 conv and precomputed in XLA
    (lu = up2(l), hd = avgpool2(h)), so the kernel is pure lane-dense matmuls:
        hmix = lrelu(h @ Whh + up2(l) @ Whl + bh)
        lmix = lrelu(avgpool2(h) @ Wlh + l @ Wll + bl)
    """
    hmix = _lrelu(jnp.dot(h_ref[0], whh_ref[...], preferred_element_type=jnp.float32)
                  + jnp.dot(lu_ref[0], whl_ref[...], preferred_element_type=jnp.float32)
                  + bh_ref[...])
    lmix = _lrelu(jnp.dot(hd_ref[0], wlh_ref[...], preferred_element_type=jnp.float32)
                  + jnp.dot(l_ref[0], wll_ref[...], preferred_element_type=jnp.float32)
                  + bl_ref[...])
    ho_ref[0] = hmix.astype(ho_ref.dtype)
    lo_ref[0] = lmix.astype(lo_ref.dtype)
    # per-channel spatial mean/std (style path) fused into the epilogue
    # TODO(synk): verify the reference takes style stats post-activation.
    mh = jnp.mean(hmix, axis=0, keepdims=True)
    mh_ref[0] = mh
    sh_ref[0] = jnp.sqrt(jnp.mean((hmix - mh) ** 2, axis=0, keepdims=True) + 1e-5)
    ml = jnp.mean(lmix, axis=0, keepdims=True)
    ml_ref[0] = ml
    sl_ref[0] = jnp.sqrt(jnp.mean((lmix - ml) ** 2, axis=0, keepdims=True) + 1e-5)


def _gen_kernel(ch_ref, cl_ref, clu_ref, smh_ref, ssh_ref, sml_ref, ssl_ref,
                wdcat_ref, wdh_lo_ref, bdh_ref, wdl_lo_ref, bdl_ref,
                wrh_ref, wrl_ref, brgb_ref, qdn_ref,
                oh_ref, ol_ref, *, fr0, fr1):
    """Generator for one batch element.

    AdaIN (instance-norm + style affine + lrelu) is the matmul prologue.  The
    high band feeds both output bands, so its two 1x1 weights are concatenated
    along N to 2*CP = 256 lanes (one full-width MXU matmul on v6e/v7x).  The low
    band's up2 was precomputed in XLA (clu) — AdaIN with the low band's stats is
    applied to it in-kernel, which is exactly up2(AdaIN(l)) since up2 is pure
    replication.  Only the avgpool needed *after* the AdaIN lrelu remains as a
    tiny bf16 operator matmul (qdn).  RGB projection (freq-ratio + bias folded)
    is emitted at native band resolution; the final nearest 2x merges are cheap
    XLA broadcasts.
    """
    h = ch_ref[0].astype(jnp.float32)               # (HWh, C)
    l = cl_ref[0].astype(jnp.float32)               # (HWl, C)
    lu = clu_ref[0].astype(jnp.float32)             # (HWh, C) = up2(l)
    # instance-norm stats + style affine + lrelu  (AdaIN prologue)
    mu_h = jnp.mean(h, axis=0, keepdims=True)
    inv_h = jax.lax.rsqrt(jnp.mean((h - mu_h) ** 2, axis=0, keepdims=True) + 1e-5)
    mu_l = jnp.mean(l, axis=0, keepdims=True)
    inv_l = jax.lax.rsqrt(jnp.mean((l - mu_l) ** 2, axis=0, keepdims=True) + 1e-5)
    hA = _lrelu((h - mu_h) * inv_h * ssh_ref[0] + smh_ref[0]).astype(jnp.bfloat16)
    lA = _lrelu((l - mu_l) * inv_l * ssl_ref[0] + sml_ref[0]).astype(jnp.bfloat16)
    lAu = _lrelu((lu - mu_l) * inv_l * ssl_ref[0] + sml_ref[0]).astype(jnp.bfloat16)
    # octave 1x1 mixing; hA -> both bands via one (C, 2C) matmul
    acc = jnp.dot(hA, wdcat_ref[...], preferred_element_type=jnp.float32)  # (HWh, 2C)
    hh = acc[:, :CP]                                  # high -> high contribution
    hl = acc[:, CP:]                                  # high -> low (pre-avgpool)
    hmix = _lrelu(hh
                  + jnp.dot(lAu, wdh_lo_ref[...], preferred_element_type=jnp.float32)
                  + bdh_ref[...])
    hl_dn = jnp.dot(qdn_ref[...], hl.astype(jnp.bfloat16),
                    preferred_element_type=jnp.float32)                    # (HWl, C)
    lmix = _lrelu(hl_dn
                  + jnp.dot(lA, wdl_lo_ref[...], preferred_element_type=jnp.float32)
                  + bdl_ref[...])
    # RGB projection at native band resolution; freq-ratio + bias folded here.
    oh_ref[0] = (fr0 * jnp.dot(hmix.astype(jnp.bfloat16), wrh_ref[...],
                               preferred_element_type=jnp.float32)
                 + brgb_ref[...])
    ol_ref[0] = fr1 * jnp.dot(lmix.astype(jnp.bfloat16), wrl_ref[...],
                              preferred_element_type=jnp.float32)


# -----------------------------------------------------------------------------
# Pallas wrappers
# -----------------------------------------------------------------------------
def _choose_tm(Mp):
    # Largest tile (<=1024 rows) dividing the (16-padded) M.  Big tiles amortize
    # the ~0.35us per-grid-step overhead; no forced >=2-step split at small M
    # (pure overhead on single-TC v5e/v6e) — large M naturally yields multiple
    # "parallel" steps for v7x's two TensorCores.
    for tm in (1024, 512, 256, 128, 64, 32, 16):
        if Mp % tm == 0:
            return tm
    return Mp


def matmul_bias_act(a, w, b, act="lrelu", out_dtype=jnp.bfloat16):
    M, K = a.shape
    N = w.shape[1]
    Mp = _round_up(M, 16)               # bf16 sublane pack
    tm = _choose_tm(Mp)
    if Mp != M:
        a = jnp.pad(a, ((0, Mp - M), (0, 0)))
    kern = functools.partial(_mm_kernel, act=act)
    out = pl.pallas_call(
        kern,
        out_shape=jax.ShapeDtypeStruct((Mp, N), out_dtype),
        grid=(Mp // tm,),
        in_specs=[
            pl.BlockSpec((tm, K), lambda i: (i, 0)),
            pl.BlockSpec((K, N), lambda i: (0, 0)),
            pl.BlockSpec((1, N), lambda i: (0, 0)),
        ],
        out_specs=pl.BlockSpec((tm, N), lambda i: (i, 0)),
        compiler_params=pltpu.CompilerParams(dimension_semantics=("parallel",)),
    )(a.astype(jnp.bfloat16), w, b.reshape(1, N).astype(jnp.float32))
    return out if Mp == M else out[:M]


def octave_mix_stats(high, low, low_up, high_dn, whh, whl, bh, wlh, wll, bl):
    B, HWh, C = high.shape
    _, HWl, _ = low.shape
    out_shape = (
        jax.ShapeDtypeStruct((B, HWh, C), jnp.bfloat16),
        jax.ShapeDtypeStruct((B, HWl, C), jnp.bfloat16),
        jax.ShapeDtypeStruct((B, 1, C), jnp.float32),
        jax.ShapeDtypeStruct((B, 1, C), jnp.float32),
        jax.ShapeDtypeStruct((B, 1, C), jnp.float32),
        jax.ShapeDtypeStruct((B, 1, C), jnp.float32),
    )
    wspec = pl.BlockSpec((C, C), lambda b: (0, 0))
    bspec = pl.BlockSpec((1, C), lambda b: (0, 0))
    return pl.pallas_call(
        _enc_mix_kernel,
        out_shape=out_shape,
        grid=(B,),
        in_specs=[
            pl.BlockSpec((1, HWh, C), lambda b: (b, 0, 0)),   # high
            pl.BlockSpec((1, HWl, C), lambda b: (b, 0, 0)),   # low
            pl.BlockSpec((1, HWh, C), lambda b: (b, 0, 0)),   # up2(low)
            pl.BlockSpec((1, HWl, C), lambda b: (b, 0, 0)),   # avgpool2(high)
            wspec, wspec, bspec,
            wspec, wspec, bspec,
        ],
        out_specs=(
            pl.BlockSpec((1, HWh, C), lambda b: (b, 0, 0)),
            pl.BlockSpec((1, HWl, C), lambda b: (b, 0, 0)),
            pl.BlockSpec((1, 1, C), lambda b: (b, 0, 0)),
            pl.BlockSpec((1, 1, C), lambda b: (b, 0, 0)),
            pl.BlockSpec((1, 1, C), lambda b: (b, 0, 0)),
            pl.BlockSpec((1, 1, C), lambda b: (b, 0, 0)),
        ),
        compiler_params=pltpu.CompilerParams(dimension_semantics=("parallel",)),
    )(high, low, low_up, high_dn,
      whh, whl, bh.reshape(1, C).astype(jnp.float32),
      wlh, wll, bl.reshape(1, C).astype(jnp.float32))


# -----------------------------------------------------------------------------
# JAX glue (padding, patch extraction, resampling)
# -----------------------------------------------------------------------------
def reflect_pad(x, p):
    return jnp.pad(x, ((0, 0), (p, p), (p, p), (0, 0)), mode="reflect")


def im2col(x, k, stride, k_pad):
    # x: (B, H, W, C) already padded.  Patch ordering: (di, dj, C), C fastest.
    B, H, W, C = x.shape
    Ho = (H - k) // stride + 1
    Wo = (W - k) // stride + 1
    cols = []
    for di in range(k):
        for dj in range(k):
            cols.append(x[:, di:di + stride * Ho:stride, dj:dj + stride * Wo:stride, :])
    patches = jnp.concatenate(cols, axis=-1).reshape(B * Ho * Wo, k * k * C)
    if k * k * C < k_pad:  # pad contraction dim to a lane multiple (unmasked loads)
        patches = jnp.pad(patches, ((0, 0), (0, k_pad - k * k * C)))
    return patches, (B, Ho, Wo)


def avgpool2(x):
    B, H, W, C = x.shape
    return x.reshape(B, H // 2, 2, W // 2, 2, C).mean(axis=(2, 4))


def up2_nhwc(x):
    # Nearest-neighbor 2x upsample as a pure broadcast/reshape (no matmul).
    B, H, W, C = x.shape
    x = jnp.broadcast_to(x[:, :, None, :, None, :], (B, H, 2, W, 2, C))
    return x.reshape(B, 2 * H, 2 * W, C)


def _avgpool2_matrix(h, w):
    # (h*w/4, h*w) 2x2-average-pool operator on row-major flattened maps.
    # Entries are 0 / 0.25 — exact in bf16.
    ho, wo = h // 2, w // 2
    rows = np.arange(ho * wo)
    i, j = rows // wo, rows % wo
    Q = np.zeros((ho * wo, h * w), np.float32)
    for a in range(2):
        for b in range(2):
            Q[rows, (2 * i + a) * w + (2 * j + b)] = 0.25
    return jnp.asarray(Q).astype(jnp.bfloat16)


# -----------------------------------------------------------------------------
# Networks (Encoder used for netE / netS, octave Generator for netG)
# -----------------------------------------------------------------------------
def encoder_forward(params, x, nf):
    """Returns ((high, low) content maps, ((mh, sh), (ml, sl)) style stats)."""
    x = x.astype(jnp.bfloat16)
    # conv0: 3x3 stride 1 (host im2col, K zero-padded to a lane multiple)
    a, (B, H0, W0_) = im2col(reflect_pad(x, 1), 3, 1, params["W0"].shape[0])
    out = matmul_bias_act(a, params["W0"], params["b0"]).reshape(B, H0, W0_, CP)
    out = out[..., :nf]  # drop padding lanes before the next im2col
    # octave "first" conv: 3x3 stride 2 -> high band; avgpool2 + 3x3 stride 2 -> low band
    kpf = params["Wfh"].shape[0]
    ah, (B, Hh, Wh_) = im2col(reflect_pad(out, 1), 3, 2, kpf)
    high = matmul_bias_act(ah, params["Wfh"], params["bfh"]).reshape(B, Hh, Wh_, CP)
    al, (B, Hl, Wl_) = im2col(reflect_pad(avgpool2(out), 1), 3, 2, kpf)
    low = matmul_bias_act(al, params["Wfl"], params["bfl"]).reshape(B, Hl, Wl_, CP)
    # up2 / avgpool2 commuted past the 1x1 mix: cheap linear-size XLA ops instead
    # of O(HW^2) operator matmuls inside the kernel.
    low_up = up2_nhwc(low)                       # (B, Hh, Wh, CP) bf16
    high_dn = avgpool2(high)                     # (B, Hl, Wl, CP) bf16
    # fused octave 1x1 mixing + per-channel style statistics (one kernel, grid over B)
    h_out, l_out, mh, sh, ml, sl = octave_mix_stats(
        high.reshape(B, Hh * Wh_, CP), low.reshape(B, Hl * Wl_, CP),
        low_up.reshape(B, Hh * Wh_, CP), high_dn.reshape(B, Hl * Wl_, CP),
        params["Wh_hi"], params["Wh_lo"], params["bh"],
        params["Wl_hi"], params["Wl_lo"], params["bl"])
    content = (h_out.reshape(B, Hh, Wh_, CP), l_out.reshape(B, Hl, Wl_, CP))
    style = ((mh, sh), (ml, sl))
    return content, style


def generator_forward(params, content, style, freq_ratio, output_nc):
    high, low = content
    (mh, sh), (ml, sl) = style
    B, Hh, Wh_, C = high.shape
    _, Hl, Wl_, _ = low.shape
    HWh, HWl = Hh * Wh_, Hl * Wl_
    low_up = up2_nhwc(low)                       # up2 commutes with AdaIN (replication)
    qdn = _avgpool2_matrix(Hh, Wh_)              # (HWl, HWh) bf16
    kern = functools.partial(_gen_kernel, fr0=float(freq_ratio[0]),
                             fr1=float(freq_ratio[1]))
    wspec = pl.BlockSpec((C, C), lambda b: (0, 0))
    bspec = pl.BlockSpec((1, C), lambda b: (0, 0))
    sspec = pl.BlockSpec((1, 1, C), lambda b: (b, 0, 0))
    rgb_h, rgb_l = pl.pallas_call(
        kern,
        out_shape=(jax.ShapeDtypeStruct((B, HWh, C), jnp.float32),
                   jax.ShapeDtypeStruct((B, HWl, C), jnp.float32)),
        grid=(B,),
        in_specs=[
            pl.BlockSpec((1, HWh, C), lambda b: (b, 0, 0)),   # content high
            pl.BlockSpec((1, HWl, C), lambda b: (b, 0, 0)),   # content low
            pl.BlockSpec((1, HWh, C), lambda b: (b, 0, 0)),   # up2(content low)
            sspec, sspec, sspec, sspec,                       # style mean/std hi, lo
            pl.BlockSpec((C, 2 * C), lambda b: (0, 0)),       # [Wdh_hi | Wdl_hi]
            wspec, bspec,                                     # Wdh_lo, bdh
            wspec, bspec,                                     # Wdl_lo, bdl
            wspec, wspec, bspec,                              # Wrgb_hi, Wrgb_lo, brgb
            pl.BlockSpec((HWl, HWh), lambda b: (0, 0)),       # qdn (bf16 avgpool op)
        ],
        out_specs=(
            pl.BlockSpec((1, HWh, C), lambda b: (b, 0, 0)),
            pl.BlockSpec((1, HWl, C), lambda b: (b, 0, 0)),
        ),
        compiler_params=pltpu.CompilerParams(dimension_semantics=("parallel",)),
    )(high.reshape(B, HWh, C), low.reshape(B, HWl, C), low_up.reshape(B, HWh, C),
      mh, sh, ml, sl,
      params["Wd_hi_cat"], params["Wdh_lo"], params["bdh"].reshape(1, C),
      params["Wdl_lo"], params["bdl"].reshape(1, C),
      params["Wrgb_hi"], params["Wrgb_lo"], params["brgb"].reshape(1, C),
      qdn)
    # freq-ratio merge + final nearest 2x upsample as pure XLA broadcasts
    merged = rgb_h.reshape(B, Hh, Wh_, C) + up2_nhwc(rgb_l.reshape(B, Hl, Wl_, C))
    out = up2_nhwc(merged)
    return out[..., :output_nc]


def _forward_impl(netE, netS, netG, real_A, real_B, *, nf, output_nc, freq_ratio):
    A = jnp.transpose(real_A, (0, 2, 3, 1)).astype(jnp.float32)
    Bi = jnp.transpose(real_B, (0, 2, 3, 1)).astype(jnp.float32)
    content_A, _ = encoder_forward(netE, A, nf)        # forward_test(real_A, 'content')
    _, style_B = encoder_forward(netS, Bi, nf)         # forward_test(real_B, 'style')
    out = generator_forward(netG, content_A, style_B, freq_ratio, output_nc)
    return jnp.transpose(out, (0, 3, 1, 2))            # back to NCHW


# -----------------------------------------------------------------------------
# Parameter init (deterministic, synthetic; zero-padded to lane multiples)
# -----------------------------------------------------------------------------
def _w(key, shape):
    fan_in = shape[0]
    return jax.random.normal(key, shape, jnp.float32) / jnp.sqrt(float(fan_in))


def _pad_w(w, kpad=CP, npad=CP):
    k, n = w.shape
    return jnp.pad(w, ((0, kpad - k), (0, npad - n))).astype(jnp.bfloat16)


def _zb():
    return jnp.zeros((CP,), jnp.float32)


def init_encoder_params(key, in_nc, nf):
    ks = jax.random.split(key, 5)
    ch = nf // 2
    W0 = _w(ks[0], (9 * in_nc, nf))
    Wfh = _w(ks[1], (9 * nf, ch))
    Wfl = _w(ks[2], (9 * nf, ch))
    Wh = _w(ks[3], (nf, nf))     # rows: [high band (ch) ; low band (ch)]
    Wl = _w(ks[4], (nf, nf))
    return dict(
        W0=_pad_w(W0, _round_up(9 * in_nc, 128), CP), b0=_zb(),
        Wfh=_pad_w(Wfh, _round_up(9 * nf, 128), CP), bfh=_zb(),
        Wfl=_pad_w(Wfl, _round_up(9 * nf, 128), CP), bfl=_zb(),
        Wh_hi=_pad_w(Wh[:ch]), Wh_lo=_pad_w(Wh[ch:]), bh=_zb(),
        Wl_hi=_pad_w(Wl[:ch]), Wl_lo=_pad_w(Wl[ch:]), bl=_zb(),
    )


def init_generator_params(key, nf, out_nc):
    ks = jax.random.split(key, 3)
    Wdh = _w(ks[0], (2 * nf, nf // 2))   # rows: [high band (nf) ; low band (nf)]
    Wdl = _w(ks[1], (2 * nf, nf // 2))
    Wrgb = _w(ks[2], (nf, out_nc))       # rows: [high band (nf//2) ; low band (nf//2)]
    wdh_hi = _pad_w(Wdh[:nf])
    wdl_hi = _pad_w(Wdl[:nf])
    return dict(
        # high-band input feeds both output bands: concat along N to 2*CP = 256
        # lanes so v6e/v7x's 256-wide MXU runs one full-width matmul.
        Wd_hi_cat=jnp.concatenate([wdh_hi, wdl_hi], axis=1),
        Wdh_lo=_pad_w(Wdh[nf:]), bdh=_zb(),
        Wdl_lo=_pad_w(Wdl[nf:]), bdl=_zb(),
        Wrgb_hi=_pad_w(Wrgb[:nf // 2]), Wrgb_lo=_pad_w(Wrgb[nf // 2:]), brgb=_zb(),
    )


class AesFATest:
    """JAX/Pallas port of AesFA_test.forward (content_A + style_B -> trs_AtoB)."""

    def __init__(self, key, alpha_in, alpha_out, style_kernel, input_nc, nf,
                 output_nc, freq_ratio):
        del alpha_in, alpha_out, style_kernel  # alpha=0.5 band split baked in (see header TODO)
        kE, kS, kG = jax.random.split(key, 3)
        self.netE = init_encoder_params(kE, input_nc, nf)
        self.netS = init_encoder_params(kS, input_nc, nf)
        self.netG = init_generator_params(kG, nf, output_nc)
        self._fwd = jax.jit(functools.partial(
            _forward_impl, nf=nf, output_nc=output_nc,
            freq_ratio=tuple(float(f) for f in freq_ratio)))

    def forward(self, real_A, real_B):
        return self._fwd(self.netE, self.netS, self.netG, real_A, real_B)


if __name__ == "__main__":
    key = jax.random.PRNGKey(0)
    kA, kB, kP = jax.random.split(key, 3)
    real_A = jax.random.normal(kA, (2, 3, 32, 32), jnp.float32)
    real_B = jax.random.normal(kB, (2, 3, 32, 32), jnp.float32)

    model = AesFATest(kP, alpha_in=0.5, alpha_out=0.5, style_kernel=3,
                      input_nc=3, nf=16, output_nc=3, freq_ratio=(1.0, 1.0))

    out = model.forward(real_A, real_B)
    out = jax.block_until_ready(out)
    assert out.shape == (2, 3, 32, 32), out.shape
    assert bool(jnp.all(jnp.isfinite(out)))
    print("KERNEL_OK")
</pallas_src>

<mosaic_0001>
module attributes {stable_mosaic.version = 11 : i64} {
  func.func @_mm_kernel(%arg0: i32, %arg1: memref<1024x128xbf16, #tpu.memory_space<vmem>>, %arg2: memref<128x128xbf16, #tpu.memory_space<vmem>>, %arg3: memref<1x128xf32, #tpu.memory_space<vmem>>, %arg4: memref<1024x128xbf16, #tpu.memory_space<vmem>>) attributes {dimension_semantics = [#tpu.dimension_semantics<parallel>], iteration_bounds = array<i64: 2>, scalar_prefetch = 0 : i64, scratch_operands = 0 : i64, tpu.core_type = #tpu.core_type<tc>, window_params = [{transform_indices = @transform_0, window_bounds = array<i64: 1024, 128>}, {pipeline_mode = #tpu.pipeline_mode<synchronous>, transform_indices = @transform_1, window_bounds = array<i64: 128, 128>}, {pipeline_mode = #tpu.pipeline_mode<synchronous>, transform_indices = @transform_2, window_bounds = array<i64: 1, 128>}, {transform_indices = @transform_3, window_bounds = array<i64: 1024, 128>}]} {
    %c0 = arith.constant 0 : index
    %c0_0 = arith.constant 0 : index
    %0 = vector.load %arg1[%c0, %c0_0] : memref<1024x128xbf16, #tpu.memory_space<vmem>>, vector<1024x128xbf16>
    %c0_1 = arith.constant 0 : index
    %c0_2 = arith.constant 0 : index
    %1 = vector.load %arg2[%c0_1, %c0_2] : memref<128x128xbf16, #tpu.memory_space<vmem>>, vector<128x128xbf16>
    %cst = arith.constant dense<0.000000e+00> : vector<1024x128xf32>
    %2 = tpu.matmul %0, %1, %cst {dimension_numbers = #tpu.dot_dimension_numbers<[1], [0], [0], [1], [0, 0, 1, 1], [], []>} : vector<1024x128xbf16>, vector<128x128xbf16>, vector<1024x128xf32> -> vector<1024x128xf32>
    %c0_3 = arith.constant 0 : index
    %c0_4 = arith.constant 0 : index
    %3 = vector.load %arg3[%c0_3, %c0_4] : memref<1x128xf32, #tpu.memory_space<vmem>>, vector<1x128xf32>
    %4 = vector.broadcast %3 : vector<1x128xf32> to vector<1024x128xf32>
    %5 = arith.addf %2, %4 : vector<1024x128xf32>
    %cst_5 = arith.constant 0.000000e+00 : f32
    %6 = vector.broadcast %cst_5 : f32 to vector<1024x128xf32>
    %7 = arith.cmpf oge, %5, %6 : vector<1024x128xf32>
    %cst_6 = arith.constant 2.000000e-01 : f32
    %8 = vector.broadcast %cst_6 : f32 to vector<1024x128xf32>
    %9 = arith.mulf %8, %5 : vector<1024x128xf32>
    %10 = arith.select %7, %5, %9 : vector<1024x128xi1>, vector<1024x128xf32>
    %11 = arith.truncf %10 : vector<1024x128xf32> to vector<1024x128xbf16>
    %c0_7 = arith.constant 0 : index
    %c0_8 = arith.constant 0 : index
    %12 = vector.load %arg4[%c0_7, %c0_8] : memref<1024x128xbf16, #tpu.memory_space<vmem>>, vector<1024x128xbf16>
    tpu.vector_store %arg4[%c0_7, %c0_8], %11 {strides = array<i32>} : memref<1024x128xbf16, #tpu.memory_space<vmem>>, vector<1024x128xbf16>,
    return
  }
  func.func @transform_0(%arg0: i32) -> (i32, i32) {
    %c0_i32 = arith.constant 0 : i32
    %c0_i32_0 = arith.constant 0 : i32
    return %arg0, %c0_i32 : i32, i32
  }
  func.func @transform_1(%arg0: i32) -> (i32, i32) {
    %c0_i32 = arith.constant 0 : i32
    %c0_i32_0 = arith.constant 0 : i32
    %c0_i32_1 = arith.constant 0 : i32
    return %c0_i32, %c0_i32_0 : i32, i32
  }
  func.func @transform_2(%arg0: i32) -> (i32, i32) {
    %c0_i32 = arith.constant 0 : i32
    %c0_i32_0 = arith.constant 0 : i32
    %c0_i32_1 = arith.constant 0 : i32
    return %c0_i32, %c0_i32_0 : i32, i32
  }
  func.func @transform_3(%arg0: i32) -> (i32, i32) {
    %c0_i32 = arith.constant 0 : i32
    %c0_i32_0 = arith.constant 0 : i32
    return %arg0, %c0_i32 : i32, i32
  }
}

module attributes {stable_mosaic.version = 11 : i64} {
  func.func @_mm_kernel(%arg0: i32, %arg1: memref<128x256xbf16, #tpu.memory_space<vmem>>, %arg2: memref<256x128xbf16, #tpu.memory_space<vmem>>, %arg3: memref<1x128xf32, #tpu.memory_space<vmem>>, %arg4: memref<128x128xbf16, #tpu.memory_space<vmem>>) attributes {dimension_semantics = [#tpu.dimension_semantics<parallel>], iteration_bounds = array<i64: 1>, scalar_prefetch = 0 : i64, scratch_operands = 0 : i64, tpu.core_type = #tpu.core_type<tc>, window_params = [{transform_indices = @transform_0, window_bounds = array<i64: 128, 256>}, {pipeline_mode = #tpu.pipeline_mode<synchronous>, transform_indices = @transform_1, window_bounds = array<i64: 256, 128>}, {pipeline_mode = #tpu.pipeline_mode<synchronous>, transform_indices = @transform_2, window_bounds = array<i64: 1, 128>}, {transform_indices = @transform_3, window_bounds = array<i64: 128, 128>}]} {
    %c0 = arith.constant 0 : index
    %c0_0 = arith.constant 0 : index
    %0 = vector.load %arg1[%c0, %c0_0] : memref<128x256xbf16, #tpu.memory_space<vmem>>, vector<128x256xbf16>
    %c0_1 = arith.constant 0 : index
    %c0_2 = arith.constant 0 : index
    %1 = vector.load %arg2[%c0_1, %c0_2] : memref<256x128xbf16, #tpu.memory_space<vmem>>, vector<256x128xbf16>
    %cst = arith.constant dense<0.000000e+00> : vector<128x128xf32>
    %2 = tpu.matmul %0, %1, %cst {dimension_numbers = #tpu.dot_dimension_numbers<[1], [0], [0], [1], [0, 0, 1, 1], [], []>} : vector<128x256xbf16>, vector<256x128xbf16>, vector<128x128xf32> -> vector<128x128xf32>
    %c0_3 = arith.constant 0 : index
    %c0_4 = arith.constant 0 : index
    %3 = vector.load %arg3[%c0_3, %c0_4] : memref<1x128xf32, #tpu.memory_space<vmem>>, vector<1x128xf32>
    %4 = vector.broadcast %3 : vector<1x128xf32> to vector<128x128xf32>
    %5 = arith.addf %2, %4 : vector<128x128xf32>
    %cst_5 = arith.constant 0.000000e+00 : f32
    %6 = vector.broadcast %cst_5 : f32 to vector<128x128xf32>
    %7 = arith.cmpf oge, %5, %6 : vector<128x128xf32>
    %cst_6 = arith.constant 2.000000e-01 : f32
    %8 = vector.broadcast %cst_6 : f32 to vector<128x128xf32>
    %9 = arith.mulf %8, %5 : vector<128x128xf32>
    %10 = arith.select %7, %5, %9 : vector<128x128xi1>, vector<128x128xf32>
    %11 = arith.truncf %10 : vector<128x128xf32> to vector<128x128xbf16>
    %c0_7 = arith.constant 0 : index
    %c0_8 = arith.constant 0 : index
    %12 = vector.load %arg4[%c0_7, %c0_8] : memref<128x128xbf16, #tpu.memory_space<vmem>>, vector<128x128xbf16>
    tpu.vector_store %arg4[%c0_7, %c0_8], %11 {strides = array<i32>} : memref<128x128xbf16, #tpu.memory_space<vmem>>, vector<128x128xbf16>,
    return
  }
  func.func @transform_0(%arg0: i32) -> (i32, i32) {
    %c0_i32 = arith.constant 0 : i32
    %c0_i32_0 = arith.constant 0 : i32
    return %arg0, %c0_i32 : i32, i32
  }
  func.func @transform_1(%arg0: i32) -> (i32, i32) {
    %c0_i32 = arith.constant 0 : i32
    %c0_i32_0 = arith.constant 0 : i32
    %c0_i32_1 = arith.constant 0 : i32
    return %c0_i32, %c0_i32_0 : i32, i32
  }
  func.func @transform_2(%arg0: i32) -> (i32, i32) {
    %c0_i32 = arith.constant 0 : i32
    %c0_i32_0 = arith.constant 0 : i32
    %c0_i32_1 = arith.constant 0 : i32
    return %c0_i32, %c0_i32_0 : i32, i32
  }
  func.func @transform_3(%arg0: i32) -> (i32, i32) {
    %c0_i32 = arith.constant 0 : i32
    %c0_i32_0 = arith.constant 0 : i32
    return %arg0, %c0_i32 : i32, i32
  }
}

module attributes {stable_mosaic.version = 11 : i64} {
  func.func @_mm_kernel(%arg0: i32, %arg1: memref<512x256xbf16, #tpu.memory_space<vmem>>, %arg2: memref<256x128xbf16, #tpu.memory_space<vmem>>, %arg3: memref<1x128xf32, #tpu.memory_space<vmem>>, %arg4: memref<512x128xbf16, #tpu.memory_space<vmem>>) attributes {dimension_semantics = [#tpu.dimension_semantics<parallel>], iteration_bounds = array<i64: 1>, scalar_prefetch = 0 : i64, scratch_operands = 0 : i64, tpu.core_type = #tpu.core_type<tc>, window_params = [{transform_indices = @transform_0, window_bounds = array<i64: 512, 256>}, {pipeline_mode = #tpu.pipeline_mode<synchronous>, transform_indices = @transform_1, window_bounds = array<i64: 256, 128>}, {pipeline_mode = #tpu.pipeline_mode<synchronous>, transform_indices = @transform_2, window_bounds = array<i64: 1, 128>}, {transform_indices = @transform_3, window_bounds = array<i64: 512, 128>}]} {
    %c0 = arith.constant 0 : index
    %c0_0 = arith.constant 0 : index
    %0 = vector.load %arg1[%c0, %c0_0] : memref<512x256xbf16, #tpu.memory_space<vmem>>, vector<512x256xbf16>
    %c0_1 = arith.constant 0 : index
    %c0_2 = arith.constant 0 : index
    %1 = vector.load %arg2[%c0_1, %c0_2] : memref<256x128xbf16, #tpu.memory_space<vmem>>, vector<256x128xbf16>
    %cst = arith.constant dense<0.000000e+00> : vector<512x128xf32>
    %2 = tpu.matmul %0, %1, %cst {dimension_numbers = #tpu.dot_dimension_numbers<[1], [0], [0], [1], [0, 0, 1, 1], [], []>} : vector<512x256xbf16>, vector<256x128xbf16>, vector<512x128xf32> -> vector<512x128xf32>
    %c0_3 = arith.constant 0 : index
    %c0_4 = arith.constant 0 : index
    %3 = vector.load %arg3[%c0_3, %c0_4] : memref<1x128xf32, #tpu.memory_space<vmem>>, vector<1x128xf32>
    %4 = vector.broadcast %3 : vector<1x128xf32> to vector<512x128xf32>
    %5 = arith.addf %2, %4 : vector<512x128xf32>
    %cst_5 = arith.constant 0.000000e+00 : f32
    %6 = vector.broadcast %cst_5 : f32 to vector<512x128xf32>
    %7 = arith.cmpf oge, %5, %6 : vector<512x128xf32>
    %cst_6 = arith.constant 2.000000e-01 : f32
    %8 = vector.broadcast %cst_6 : f32 to vector<512x128xf32>
    %9 = arith.mulf %8, %5 : vector<512x128xf32>
    %10 = arith.select %7, %5, %9 : vector<512x128xi1>, vector<512x128xf32>
    %11 = arith.truncf %10 : vector<512x128xf32> to vector<512x128xbf16>
    %c0_7 = arith.constant 0 : index
    %c0_8 = arith.constant 0 : index
    %12 = vector.load %arg4[%c0_7, %c0_8] : memref<512x128xbf16, #tpu.memory_space<vmem>>, vector<512x128xbf16>
    tpu.vector_store %arg4[%c0_7, %c0_8], %11 {strides = array<i32>} : memref<512x128xbf16, #tpu.memory_space<vmem>>, vector<512x128xbf16>,
    return
  }
  func.func @transform_0(%arg0: i32) -> (i32, i32) {
    %c0_i32 = arith.constant 0 : i32
    %c0_i32_0 = arith.constant 0 : i32
    return %arg0, %c0_i32 : i32, i32
  }
  func.func @transform_1(%arg0: i32) -> (i32, i32) {
    %c0_i32 = arith.constant 0 : i32
    %c0_i32_0 = arith.constant 0 : i32
    %c0_i32_1 = arith.constant 0 : i32
    return %c0_i32, %c0_i32_0 : i32, i32
  }
  func.func @transform_2(%arg0: i32) -> (i32, i32) {
    %c0_i32 = arith.constant 0 : i32
    %c0_i32_0 = arith.constant 0 : i32
    %c0_i32_1 = arith.constant 0 : i32
    return %c0_i32, %c0_i32_0 : i32, i32
  }
  func.func @transform_3(%arg0: i32) -> (i32, i32) {
    %c0_i32 = arith.constant 0 : i32
    %c0_i32_0 = arith.constant 0 : i32
    return %arg0, %c0_i32 : i32, i32
  }
}

module attributes {stable_mosaic.version = 11 : i64} {
  func.func @_enc_mix_kernel(%arg0: i32, %arg1: memref<1x256x128xbf16, #tpu.memory_space<vmem>>, %arg2: memref<1x64x128xbf16, #tpu.memory_space<vmem>>, %arg3: memref<1x256x128xbf16, #tpu.memory_space<vmem>>, %arg4: memref<1x64x128xbf16, #tpu.memory_space<vmem>>, %arg5: memref<128x128xbf16, #tpu.memory_space<vmem>>, %arg6: memref<128x128xbf16, #tpu.memory_space<vmem>>, %arg7: memref<1x128xf32, #tpu.memory_space<vmem>>, %arg8: memref<128x128xbf16, #tpu.memory_space<vmem>>, %arg9: memref<128x128xbf16, #tpu.memory_space<vmem>>, %arg10: memref<1x128xf32, #tpu.memory_space<vmem>>, %arg11: memref<1x256x128xbf16, #tpu.memory_space<vmem>>, %arg12: memref<1x64x128xbf16, #tpu.memory_space<vmem>>, %arg13: memref<1x1x128xf32, #tpu.memory_space<vmem>>, %arg14: memref<1x1x128xf32, #tpu.memory_space<vmem>>, %arg15: memref<1x1x128xf32, #tpu.memory_space<vmem>>, %arg16: memref<1x1x128xf32, #tpu.memory_space<vmem>>) attributes {dimension_semantics = [#tpu.dimension_semantics<parallel>], iteration_bounds = array<i64: 2>, scalar_prefetch = 0 : i64, scratch_operands = 0 : i64, tpu.core_type = #tpu.core_type<tc>, window_params = [{transform_indices = @transform_0, window_bounds = array<i64: 1, 256, 128>}, {transform_indices = @transform_1, window_bounds = array<i64: 1, 64, 128>}, {transform_indices = @transform_2, window_bounds = array<i64: 1, 256, 128>}, {transform_indices = @transform_3, window_bounds = array<i64: 1, 64, 128>}, {pipeline_mode = #tpu.pipeline_mode<synchronous>, transform_indices = @transform_4, window_bounds = array<i64: 128, 128>}, {pipeline_mode = #tpu.pipeline_mode<synchronous>, transform_indices = @transform_5, window_bounds = array<i64: 128, 128>}, {pipeline_mode = #tpu.pipeline_mode<synchronous>, transform_indices = @transform_6, window_bounds = array<i64: 1, 128>}, {pipeline_mode = #tpu.pipeline_mode<synchronous>, transform_indices = @transform_7, window_bounds = array<i64: 128, 128>}, {pipeline_mode = #tpu.pipeline_mode<synchronous>, transform_indices = @transform_8, window_bounds = array<i64: 128, 128>}, {pipeline_mode = #tpu.pipeline_mode<synchronous>, transform_indices = @transform_9, window_bounds = array<i64: 1, 128>}, {transform_indices = @transform_10, window_bounds = array<i64: 1, 256, 128>}, {transform_indices = @transform_11, window_bounds = array<i64: 1, 64, 128>}, {transform_indices = @transform_12, window_bounds = array<i64: 1, 1, 128>}, {transform_indices = @transform_13, window_bounds = array<i64: 1, 1, 128>}, {transform_indices = @transform_14, window_bounds = array<i64: 1, 1, 128>}, {transform_indices = @transform_15, window_bounds = array<i64: 1, 1, 128>}]} {
    %c0 = arith.constant 0 : index
    %c0_0 = arith.constant 0 : index
    %c0_1 = arith.constant 0 : index
    %0 = vector.load %arg1[%c0, %c0_0, %c0_1] : memref<1x256x128xbf16, #tpu.memory_space<vmem>>, vector<1x256x128xbf16>
    %1 = vector.shape_cast %0 : vector<1x256x128xbf16> to vector<256x128xbf16>
    %c0_2 = arith.constant 0 : index
    %c0_3 = arith.constant 0 : index
    %2 = vector.load %arg5[%c0_2, %c0_3] : memref<128x128xbf16, #tpu.memory_space<vmem>>, vector<128x128xbf16>
    %cst = arith.constant dense<0.000000e+00> : vector<256x128xf32>
    %3 = tpu.matmul %1, %2, %cst {dimension_numbers = #tpu.dot_dimension_numbers<[1], [0], [0], [1], [0, 0, 1, 1], [], []>} : vector<256x128xbf16>, vector<128x128xbf16>, vector<256x128xf32> -> vector<256x128xf32>
    %c0_4 = arith.constant 0 : index
    %c0_5 = arith.constant 0 : index
    %c0_6 = arith.constant 0 : index
    %4 = vector.load %arg3[%c0_4, %c0_5, %c0_6] : memref<1x256x128xbf16, #tpu.memory_space<vmem>>, vector<1x256x128xbf16>
    %5 = vector.shape_cast %4 : vector<1x256x128xbf16> to vector<256x128xbf16>
    %c0_7 = arith.constant 0 : index
    %c0_8 = arith.constant 0 : index
    %6 = vector.load %arg6[%c0_7, %c0_8] : memref<128x128xbf16, #tpu.memory_space<vmem>>, vector<128x128xbf16>
    %cst_9 = arith.constant dense<0.000000e+00> : vector<256x128xf32>
    %7 = tpu.matmul %5, %6, %cst_9 {dimension_numbers = #tpu.dot_dimension_numbers<[1], [0], [0], [1], [0, 0, 1, 1], [], []>} : vector<256x128xbf16>, vector<128x128xbf16>, vector<256x128xf32> -> vector<256x128xf32>
    %8 = arith.addf %3, %7 : vector<256x128xf32>
    %c0_10 = arith.constant 0 : index
    %c0_11 = arith.constant 0 : index
    %9 = vector.load %arg7[%c0_10, %c0_11] : memref<1x128xf32, #tpu.memory_space<vmem>>, vector<1x128xf32>
    %10 = vector.broadcast %9 : vector<1x128xf32> to vector<256x128xf32>
    %11 = arith.addf %8, %10 : vector<256x128xf32>
    %cst_12 = arith.constant 0.000000e+00 : f32
    %12 = vector.broadcast %cst_12 : f32 to vector<256x128xf32>
    %13 = arith.cmpf oge, %11, %12 : vector<256x128xf32>
    %cst_13 = arith.constant 2.000000e-01 : f32
    %14 = vector.broadcast %cst_13 : f32 to vector<256x128xf32>
    %15 = arith.mulf %14, %11 : vector<256x128xf32>
    %16 = arith.select %13, %11, %15 : vector<256x128xi1>, vector<256x128xf32>
    %c0_14 = arith.constant 0 : index
    %c0_15 = arith.constant 0 : index
    %c0_16 = arith.constant 0 : index
    %17 = vector.load %arg4[%c0_14, %c0_15, %c0_16] : memref<1x64x128xbf16, #tpu.memory_space<vmem>>, vector<1x64x128xbf16>
    %18 = vector.shape_cast %17 : vector<1x64x128xbf16> to vector<64x128xbf16>
    %c0_17 = arith.constant 0 : index
    %c0_18 = arith.constant 0 : index
    %19 = vector.load %arg8[%c0_17, %c0_18] : memref<128x128xbf16, #tpu.memory_space<vmem>>, vector<128x128xbf16>
    %cst_19 = arith.constant dense<0.000000e+00> : vector<64x128xf32>
    %20 = tpu.matmul %18, %19, %cst_19 {dimension_numbers = #tpu.dot_dimension_numbers<[1], [0], [0], [1], [0, 0, 1, 1], [], []>} : vector<64x128xbf16>, vector<128x128xbf16>, vector<64x128xf32> -> vector<64x128xf32>
    %c0_20 = arith.constant 0 : index
    %c0_21 = arith.constant 0 : index
    %c0_22 = arith.constant 0 : index
    %21 = vector.load %arg2[%c0_20, %c0_21, %c0_22] : memref<1x64x128xbf16, #tpu.memory_space<vmem>>, vector<1x64x128xbf16>
    %22 = vector.shape_cast %21 : vector<1x64x128xbf16> to vector<64x128xbf16>
    %c0_23 = arith.constant 0 : index
    %c0_24 = arith.constant 0 : index
    %23 = vector.load %arg9[%c0_23, %c0_24] : memref<128x128xbf16, #tpu.memory_space<vmem>>, vector<128x128xbf16>
    %cst_25 = arith.constant dense<0.000000e+00> : vector<64x128xf32>
    %24 = tpu.matmul %22, %23, %cst_25 {dimension_numbers = #tpu.dot_dimension_numbers<[1], [0], [0], [1], [0, 0, 1, 1], [], []>} : vector<64x128xbf16>, vector<128x128xbf16>, vector<64x128xf32> -> vector<64x128xf32>
    %25 = arith.addf %20, %24 : vector<64x128xf32>
    %c0_26 = arith.constant 0 : index
    %c0_27 = arith.constant 0 : index
    %26 = vector.load %arg10[%c0_26, %c0_27] : memref<1x128xf32, #tpu.memory_space<vmem>>, vector<1x128xf32>
    %27 = vector.broadcast %26 : vector<1x128xf32> to vector<64x128xf32>
    %28 = arith.addf %25, %27 : vector<64x128xf32>
    %cst_28 = arith.constant 0.000000e+00 : f32
    %29 = vector.broadcast %cst_28 : f32 to vector<64x128xf32>
    %30 = arith.cmpf oge, %28, %29 : vector<64x128xf32>
    %cst_29 = arith.constant 2.000000e-01 : f32
    %31 = vector.broadcast %cst_29 : f32 to vector<64x128xf32>
    %32 = arith.mulf %31, %28 : vector<64x128xf32>
    %33 = arith.select %30, %28, %32 : vector<64x128xi1>, vector<64x128xf32>
    %34 = arith.truncf %16 : vector<256x128xf32> to vector<256x128xbf16>
    %c0_30 = arith.constant 0 : index
    %c0_31 = arith.constant 0 : index
    %c0_32 = arith.constant 0 : index
    %35 = vector.load %arg11[%c0_30, %c0_31, %c0_32] : memref<1x256x128xbf16, #tpu.memory_space<vmem>>, vector<1x256x128xbf16>
    %36 = vector.shape_cast %35 : vector<1x256x128xbf16> to vector<256x128xbf16>
    %37 = vector.shape_cast %34 : vector<256x128xbf16> to vector<1x256x128xbf16>
    tpu.vector_store %arg11[%c0_30, %c0_31, %c0_32], %37 {strides = array<i32>} : memref<1x256x128xbf16, #tpu.memory_space<vmem>>, vector<1x256x128xbf16>,
    %38 = arith.truncf %33 : vector<64x128xf32> to vector<64x128xbf16>
    %c0_33 = arith.constant 0 : index
    %c0_34 = arith.constant 0 : index
    %c0_35 = arith.constant 0 : index
    %39 = vector.load %arg12[%c0_33, %c0_34, %c0_35] : memref<1x64x128xbf16, #tpu.memory_space<vmem>>, vector<1x64x128xbf16>
    %40 = vector.shape_cast %39 : vector<1x64x128xbf16> to vector<64x128xbf16>
    %41 = vector.shape_cast %38 : vector<64x128xbf16> to vector<1x64x128xbf16>
    tpu.vector_store %arg12[%c0_33, %c0_34, %c0_35], %41 {strides = array<i32>} : memref<1x64x128xbf16, #tpu.memory_space<vmem>>, vector<1x64x128xbf16>,
    %cst_36 = arith.constant dense<0.000000e+00> : vector<128xf32>
    %42 = vector.multi_reduction <add>, %16, %cst_36 [0] : vector<256x128xf32> to vector<128xf32>
    %43 = vector.shape_cast %42 : vector<128xf32> to vector<1x128xf32>
    %cst_37 = arith.constant 2.560000e+02 : f32
    %44 = vector.broadcast %cst_37 : f32 to vector<1x128xf32>
    %45 = arith.divf %43, %44 : vector<1x128xf32>
    %c0_38 = arith.constant 0 : index
    %c0_39 = arith.constant 0 : index
    %c0_40 = arith.constant 0 : index
    %46 = vector.load %arg13[%c0_38, %c0_39, %c0_40] : memref<1x1x128xf32, #tpu.memory_space<vmem>>, vector<1x1x128xf32>
    %47 = vector.shape_cast %46 : vector<1x1x128xf32> to vector<1x128xf32>
    %48 = vector.shape_cast %45 : vector<1x128xf32> to vector<1x1x128xf32>
    tpu.vector_store %arg13[%c0_38, %c0_39, %c0_40], %48 {strides = array<i32>} : memref<1x1x128xf32, #tpu.memory_space<vmem>>, vector<1x1x128xf32>,
    %49 = vector.broadcast %45 : vector<1x128xf32> to vector<256x128xf32>
    %50 = arith.subf %16, %49 : vector<256x128xf32>
    %51 = arith.mulf %50, %50 : vector<256x128xf32>
    %cst_41 = arith.constant dense<0.000000e+00> : vector<128xf32>
    %52 = vector.multi_reduction <add>, %51, %cst_41 [0] : vector<256x128xf32> to vector<128xf32>
    %53 = vector.shape_cast %52 : vector<128xf32> to vector<1x128xf32>
    %cst_42 = arith.constant 2.560000e+02 : f32
    %54 = vector.broadcast %cst_42 : f32 to vector<1x128xf32>
    %55 = arith.divf %53, %54 : vector<1x128xf32>
    %cst_43 = arith.constant 9.99999974E-6 : f32
    %56 = vector.broadcast %cst_43 : f32 to vector<1x128xf32>
    %57 = arith.addf %55, %56 : vector<1x128xf32>
    %58 = math.sqrt %57 : vector<1x128xf32>
    %c0_44 = arith.constant 0 : index
    %c0_45 = arith.constant 0 : index
    %c0_46 = arith.constant 0 : index
    %59 = vector.load %arg14[%c0_44, %c0_45, %c0_46] : memref<1x1x128xf32, #tpu.memory_space<vmem>>, vector<1x1x128xf32>
    %60 = vector.shape_cast %59 : vector<1x1x128xf32> to vector<1x128xf32>
    %61 = vector.shape_cast %58 : vector<1x128xf32> to vector<1x1x128xf32>
    tpu.vector_store %arg14[%c0_44, %c0_45, %c0_46], %61 {strides = array<i32>} : memref<1x1x128xf32, #tpu.memory_space<vmem>>, vector<1x1x128xf32>,
    %cst_47 = arith.constant dense<0.000000e+00> : vector<128xf32>
    %62 = vector.multi_reduction <add>, %33, %cst_47 [0] : vector<64x128xf32> to vector<128xf32>
    %63 = vector.shape_cast %62 : vector<128xf32> to vector<1x128xf32>
    %cst_48 = arith.constant 6.400000e+01 : f32
    %64 = vector.broadcast %cst_48 : f32 to vector<1x128xf32>
    %65 = arith.divf %63, %64 : vector<1x128xf32>
    %c0_49 = arith.constant 0 : index
    %c0_50 = arith.constant 0 : index
    %c0_51 = arith.constant 0 : index
    %66 = vector.load %arg15[%c0_49, %c0_50, %c0_51] : memref<1x1x128xf32, #tpu.memory_space<vmem>>, vector<1x1x128xf32>
    %67 = vector.shape_cast %66 : vector<1x1x128xf32> to vector<1x128xf32>
    %68 = vector.shape_cast %65 : vector<1x128xf32> to vector<1x1x128xf32>
    tpu.vector_store %arg15[%c0_49, %c0_50, %c0_51], %68 {strides = array<i32>} : memref<1x1x128xf32, #tpu.memory_space<vmem>>, vector<1x1x128xf32>,
    %69 = vector.broadcast %65 : vector<1x128xf32> to vector<64x128xf32>
    %70 = arith.subf %33, %69 : vector<64x128xf32>
    %71 = arith.mulf %70, %70 : vector<64x128xf32>
    %cst_52 = arith.constant dense<0.000000e+00> : vector<128xf32>
    %72 = vector.multi_reduction <add>, %71, %cst_52 [0] : vector<64x128xf32> to vector<128xf32>
    %73 = vector.shape_cast %72 : vector<128xf32> to vector<1x128xf32>
    %cst_53 = arith.constant 6.400000e+01 : f32
    %74 = vector.broadcast %cst_53 : f32 to vector<1x128xf32>
    %75 = arith.divf %73, %74 : vector<1x128xf32>
    %cst_54 = arith.constant 9.99999974E-6 : f32
    %76 = vector.broadcast %cst_54 : f32 to vector<1x128xf32>
    %77 = arith.addf %75, %76 : vector<1x128xf32>
    %78 = math.sqrt %77 : vector<1x128xf32>
    %c0_55 = arith.constant 0 : index
    %c0_56 = arith.constant 0 : index
    %c0_57 = arith.constant 0 : index
    %79 = vector.load %arg16[%c0_55, %c0_56, %c0_57] : memref<1x1x128xf32, #tpu.memory_space<vmem>>, vector<1x1x128xf32>
    %80 = vector.shape_cast %79 : vector<1x1x128xf32> to vector<1x128xf32>
    %81 = vector.shape_cast %78 : vector<1x128xf32> to vector<1x1x128xf32>
    tpu.vector_store %arg16[%c0_55, %c0_56, %c0_57], %81 {strides = array<i32>} : memref<1x1x128xf32, #tpu.memory_space<vmem>>, vector<1x1x128xf32>,
    return
  }
  func.func @transform_0(%arg0: i32) -> (i32, i32, i32) {
    %c0_i32 = arith.constant 0 : i32
    %c0_i32_0 = arith.constant 0 : i32
    %c0_i32_1 = arith.constant 0 : i32
    return %arg0, %c0_i32, %c0_i32_0 : i32, i32, i32
  }
  func.func @transform_1(%arg0: i32) -> (i32, i32, i32) {
    %c0_i32 = arith.constant 0 : i32
    %c0_i32_0 = arith.constant 0 : i32
    %c0_i32_1 = arith.constant 0 : i32
    return %arg0, %c0_i32, %c0_i32_0 : i32, i32, i32
  }
  func.func @transform_2(%arg0: i32) -> (i32, i32, i32) {
    %c0_i32 = arith.constant 0 : i32
    %c0_i32_0 = arith.constant 0 : i32
    %c0_i32_1 = arith.constant 0 : i32
    return %arg0, %c0_i32, %c0_i32_0 : i32, i32, i32
  }
  func.func @transform_3(%arg0: i32) -> (i32, i32, i32) {
    %c0_i32 = arith.constant 0 : i32
    %c0_i32_0 = arith.constant 0 : i32
    %c0_i32_1 = arith.constant 0 : i32
    return %arg0, %c0_i32, %c0_i32_0 : i32, i32, i32
  }
  func.func @transform_4(%arg0: i32) -> (i32, i32) {
    %c0_i32 = arith.constant 0 : i32
    %c0_i32_0 = arith.constant 0 : i32
    %c0_i32_1 = arith.constant 0 : i32
    return %c0_i32, %c0_i32_0 : i32, i32
  }
  func.func @transform_5(%arg0: i32) -> (i32, i32) {
    %c0_i32 = arith.constant 0 : i32
    %c0_i32_0 = arith.constant 0 : i32
    %c0_i32_1 = arith.constant 0 : i32
    return %c0_i32, %c0_i32_0 : i32, i32
  }
  func.func @transform_6(%arg0: i32) -> (i32, i32) {
    %c0_i32 = arith.constant 0 : i32
    %c0_i32_0 = arith.constant 0 : i32
    %c0_i32_1 = arith.constant 0 : i32
    return %c0_i32, %c0_i32_0 : i32, i32
  }
  func.func @transform_7(%arg0: i32) -> (i32, i32) {
    %c0_i32 = arith.constant 0 : i32
    %c0_i32_0 = arith.constant 0 : i32
    %c0_i32_1 = arith.constant 0 : i32
    return %c0_i32, %c0_i32_0 : i32, i32
  }
  func.func @transform_8(%arg0: i32) -> (i32, i32) {
    %c0_i32 = arith.constant 0 : i32
    %c0_i32_0 = arith.constant 0 : i32
    %c0_i32_1 = arith.constant 0 : i32
    return %c0_i32, %c0_i32_0 : i32, i32
  }
  func.func @transform_9(%arg0: i32) -> (i32, i32) {
    %c0_i32 = arith.constant 0 : i32
    %c0_i32_0 = arith.constant 0 : i32
    %c0_i32_1 = arith.constant 0 : i32
    return %c0_i32, %c0_i32_0 : i32, i32
  }
  func.func @transform_10(%arg0: i32) -> (i32, i32, i32) {
    %c0_i32 = arith.constant 0 : i32
    %c0_i32_0 = arith.constant 0 : i32
    %c0_i32_1 = arith.constant 0 : i32
    return %arg0, %c0_i32, %c0_i32_0 : i32, i32, i32
  }
  func.func @transform_11(%arg0: i32) -> (i32, i32, i32) {
    %c0_i32 = arith.constant 0 : i32
    %c0_i32_0 = arith.constant 0 : i32
    %c0_i32_1 = arith.constant 0 : i32
    return %arg0, %c0_i32, %c0_i32_0 : i32, i32, i32
  }
  func.func @transform_12(%arg0: i32) -> (i32, i32, i32) {
    %c0_i32 = arith.constant 0 : i32
    %c0_i32_0 = arith.constant 0 : i32
    %c0_i32_1 = arith.constant 0 : i32
    return %arg0, %c0_i32, %c0_i32_0 : i32, i32, i32
  }
  func.func @transform_13(%arg0: i32) -> (i32, i32, i32) {
    %c0_i32 = arith.constant 0 : i32
    %c0_i32_0 = arith.constant 0 : i32
    %c0_i32_1 = arith.constant 0 : i32
    return %arg0, %c0_i32, %c0_i32_0 : i32, i32, i32
  }
  func.func @transform_14(%arg0: i32) -> (i32, i32, i32) {
    %c0_i32 = arith.constant 0 : i32
    %c0_i32_0 = arith.constant 0 : i32
    %c0_i32_1 = arith.constant 0 : i32
    return %arg0, %c0_i32, %c0_i32_0 : i32, i32, i32
  }
  func.func @transform_15(%arg0: i32) -> (i32, i32, i32) {
    %c0_i32 = arith.constant 0 : i32
    %c0_i32_0 = arith.constant 0 : i32
    %c0_i32_1 = arith.constant 0 : i32
    return %arg0, %c0_i32, %c0_i32_0 : i32, i32, i32
  }
}

module attributes {stable_mosaic.version = 11 : i64} {
  func.func @_enc_mix_kernel(%arg0: i32, %arg1: memref<1x256x128xbf16, #tpu.memory_space<vmem>>, %arg2: memref<1x64x128xbf16, #tpu.memory_space<vmem>>, %arg3: memref<1x256x128xbf16, #tpu.memory_space<vmem>>, %arg4: memref<1x64x128xbf16, #tpu.memory_space<vmem>>, %arg5: memref<128x128xbf16, #tpu.memory_space<vmem>>, %arg6: memref<128x128xbf16, #tpu.memory_space<vmem>>, %arg7: memref<1x128xf32, #tpu.memory_space<vmem>>, %arg8: memref<128x128xbf16, #tpu.memory_space<vmem>>, %arg9: memref<128x128xbf16, #tpu.memory_space<vmem>>, %arg10: memref<1x128xf32, #tpu.memory_space<vmem>>, %arg11: memref<1x256x128xbf16, #tpu.memory_space<vmem>>, %arg12: memref<1x64x128xbf16, #tpu.memory_space<vmem>>, %arg13: memref<1x1x128xf32, #tpu.memory_space<vmem>>, %arg14: memref<1x1x128xf32, #tpu.memory_space<vmem>>, %arg15: memref<1x1x128xf32, #tpu.memory_space<vmem>>, %arg16: memref<1x1x128xf32, #tpu.memory_space<vmem>>) attributes {dimension_semantics = [#tpu.dimension_semantics<parallel>], iteration_bounds = array<i64: 2>, scalar_prefetch = 0 : i64, scratch_operands = 0 : i64, tpu.core_type = #tpu.core_type<tc>, window_params = [{transform_indices = @transform_0, window_bounds = array<i64: 1, 256, 128>}, {transform_indices = @transform_1, window_bounds = array<i64: 1, 64, 128>}, {transform_indices = @transform_2, window_bounds = array<i64: 1, 256, 128>}, {transform_indices = @transform_3, window_bounds = array<i64: 1, 64, 128>}, {pipeline_mode = #tpu.pipeline_mode<synchronous>, transform_indices = @transform_4, window_bounds = array<i64: 128, 128>}, {pipeline_mode = #tpu.pipeline_mode<synchronous>, transform_indices = @transform_5, window_bounds = array<i64: 128, 128>}, {pipeline_mode = #tpu.pipeline_mode<synchronous>, transform_indices = @transform_6, window_bounds = array<i64: 1, 128>}, {pipeline_mode = #tpu.pipeline_mode<synchronous>, transform_indices = @transform_7, window_bounds = array<i64: 128, 128>}, {pipeline_mode = #tpu.pipeline_mode<synchronous>, transform_indices = @transform_8, window_bounds = array<i64: 128, 128>}, {pipeline_mode = #tpu.pipeline_mode<synchronous>, transform_indices = @transform_9, window_bounds = array<i64: 1, 128>}, {transform_indices = @transform_10, window_bounds = array<i64: 1, 256, 128>}, {transform_indices = @transform_11, window_bounds = array<i64: 1, 64, 128>}, {transform_indices = @transform_12, window_bounds = array<i64: 1, 1, 128>}, {transform_indices = @transform_13, window_bounds = array<i64: 1, 1, 128>}, {transform_indices = @transform_14, window_bounds = array<i64: 1, 1, 128>}, {transform_indices = @transform_15, window_bounds = array<i64: 1, 1, 128>}]} {
    %c0 = arith.constant 0 : index
    %c0_0 = arith.constant 0 : index
    %c0_1 = arith.constant 0 : index
    %0 = vector.load %arg1[%c0, %c0_0, %c0_1] : memref<1x256x128xbf16, #tpu.memory_space<vmem>>, vector<1x256x128xbf16>
    %1 = vector.shape_cast %0 : vector<1x256x128xbf16> to vector<256x128xbf16>
    %c0_2 = arith.constant 0 : index
    %c0_3 = arith.constant 0 : index
    %2 = vector.load %arg5[%c0_2, %c0_3] : memref<128x128xbf16, #tpu.memory_space<vmem>>, vector<128x128xbf16>
    %cst = arith.constant dense<0.000000e+00> : vector<256x128xf32>
    %3 = tpu.matmul %1, %2, %cst {dimension_numbers = #tpu.dot_dimension_numbers<[1], [0], [0], [1], [0, 0, 1, 1], [], []>} : vector<256x128xbf16>, vector<128x128xbf16>, vector<256x128xf32> -> vector<256x128xf32>
    %c0_4 = arith.constant 0 : index
    %c0_5 = arith.constant 0 : index
    %c0_6 = arith.constant 0 : index
    %4 = vector.load %arg3[%c0_4, %c0_5, %c0_6] : memref<1x256x128xbf16, #tpu.memory_space<vmem>>, vector<1x256x128xbf16>
    %5 = vector.shape_cast %4 : vector<1x256x128xbf16> to vector<256x128xbf16>
    %c0_7 = arith.constant 0 : index
    %c0_8 = arith.constant 0 : index
    %6 = vector.load %arg6[%c0_7, %c0_8] : memref<128x128xbf16, #tpu.memory_space<vmem>>, vector<128x128xbf16>
    %cst_9 = arith.constant dense<0.000000e+00> : vector<256x128xf32>
    %7 = tpu.matmul %5, %6, %cst_9 {dimension_numbers = #tpu.dot_dimension_numbers<[1], [0], [0], [1], [0, 0, 1, 1], [], []>} : vector<256x128xbf16>, vector<128x128xbf16>, vector<256x128xf32> -> vector<256x128xf32>
    %8 = arith.addf %3, %7 : vector<256x128xf32>
    %c0_10 = arith.constant 0 : index
    %c0_11 = arith.constant 0 : index
    %9 = vector.load %arg7[%c0_10, %c0_11] : memref<1x128xf32, #tpu.memory_space<vmem>>, vector<1x128xf32>
    %10 = vector.broadcast %9 : vector<1x128xf32> to vector<256x128xf32>
    %11 = arith.addf %8, %10 : vector<256x128xf32>
    %cst_12 = arith.constant 0.000000e+00 : f32
    %12 = vector.broadcast %cst_12 : f32 to vector<256x128xf32>
    %13 = arith.cmpf oge, %11, %12 : vector<256x128xf32>
    %cst_13 = arith.constant 2.000000e-01 : f32
    %14 = vector.broadcast %cst_13 : f32 to vector<256x128xf32>
    %15 = arith.mulf %14, %11 : vector<256x128xf32>
    %16 = arith.select %13, %11, %15 : vector<256x128xi1>, vector<256x128xf32>
    %c0_14 = arith.constant 0 : index
    %c0_15 = arith.constant 0 : index
    %c0_16 = arith.constant 0 : index
    %17 = vector.load %arg4[%c0_14, %c0_15, %c0_16] : memref<1x64x128xbf16, #tpu.memory_space<vmem>>, vector<1x64x128xbf16>
    %18 = vector.shape_cast %17 : vector<1x64x128xbf16> to vector<64x128xbf16>
    %c0_17 = arith.constant 0 : index
    %c0_18 = arith.constant 0 : index
    %19 = vector.load %arg8[%c0_17, %c0_18] : memref<128x128xbf16, #tpu.memory_space<vmem>>, vector<128x128xbf16>
    %cst_19 = arith.constant dense<0.000000e+00> : vector<64x128xf32>
    %20 = tpu.matmul %18, %19, %cst_19 {dimension_numbers = #tpu.dot_dimension_numbers<[1], [0], [0], [1], [0, 0, 1, 1], [], []>} : vector<64x128xbf16>, vector<128x128xbf16>, vector<64x128xf32> -> vector<64x128xf32>
    %c0_20 = arith.constant 0 : index
    %c0_21 = arith.constant 0 : index
    %c0_22 = arith.constant 0 : index
    %21 = vector.load %arg2[%c0_20, %c0_21, %c0_22] : memref<1x64x128xbf16, #tpu.memory_space<vmem>>, vector<1x64x128xbf16>
    %22 = vector.shape_cast %21 : vector<1x64x128xbf16> to vector<64x128xbf16>
    %c0_23 = arith.constant 0 : index
    %c0_24 = arith.constant 0 : index
    %23 = vector.load %arg9[%c0_23, %c0_24] : memref<128x128xbf16, #tpu.memory_space<vmem>>, vector<128x128xbf16>
    %cst_25 = arith.constant dense<0.000000e+00> : vector<64x128xf32>
    %24 = tpu.matmul %22, %23, %cst_25 {dimension_numbers = #tpu.dot_dimension_numbers<[1], [0], [0], [1], [0, 0, 1, 1], [], []>} : vector<64x128xbf16>, vector<128x128xbf16>, vector<64x128xf32> -> vector<64x128xf32>
    %25 = arith.addf %20, %24 : vector<64x128xf32>
    %c0_26 = arith.constant 0 : index
    %c0_27 = arith.constant 0 : index
    %26 = vector.load %arg10[%c0_26, %c0_27] : memref<1x128xf32, #tpu.memory_space<vmem>>, vector<1x128xf32>
    %27 = vector.broadcast %26 : vector<1x128xf32> to vector<64x128xf32>
    %28 = arith.addf %25, %27 : vector<64x128xf32>
    %cst_28 = arith.constant 0.000000e+00 : f32
    %29 = vector.broadcast %cst_28 : f32 to vector<64x128xf32>
    %30 = arith.cmpf oge, %28, %29 : vector<64x128xf32>
    %cst_29 = arith.constant 2.000000e-01 : f32
    %31 = vector.broadcast %cst_29 : f32 to vector<64x128xf32>
    %32 = arith.mulf %31, %28 : vector<64x128xf32>
    %33 = arith.select %30, %28, %32 : vector<64x128xi1>, vector<64x128xf32>
    %34 = arith.truncf %16 : vector<256x128xf32> to vector<256x128xbf16>
    %c0_30 = arith.constant 0 : index
    %c0_31 = arith.constant 0 : index
    %c0_32 = arith.constant 0 : index
    %35 = vector.load %arg11[%c0_30, %c0_31, %c0_32] : memref<1x256x128xbf16, #tpu.memory_space<vmem>>, vector<1x256x128xbf16>
    %36 = vector.shape_cast %35 : vector<1x256x128xbf16> to vector<256x128xbf16>
    %37 = vector.shape_cast %34 : vector<256x128xbf16> to vector<1x256x128xbf16>
    tpu.vector_store %arg11[%c0_30, %c0_31, %c0_32], %37 {strides = array<i32>} : memref<1x256x128xbf16, #tpu.memory_space<vmem>>, vector<1x256x128xbf16>,
    %38 = arith.truncf %33 : vector<64x128xf32> to vector<64x128xbf16>
    %c0_33 = arith.constant 0 : index
    %c0_34 = arith.constant 0 : index
    %c0_35 = arith.constant 0 : index
    %39 = vector.load %arg12[%c0_33, %c0_34, %c0_35] : memref<1x64x128xbf16, #tpu.memory_space<vmem>>, vector<1x64x128xbf16>
    %40 = vector.shape_cast %39 : vector<1x64x128xbf16> to vector<64x128xbf16>
    %41 = vector.shape_cast %38 : vector<64x128xbf16> to vector<1x64x128xbf16>
    tpu.vector_store %arg12[%c0_33, %c0_34, %c0_35], %41 {strides = array<i32>} : memref<1x64x128xbf16, #tpu.memory_space<vmem>>, vector<1x64x128xbf16>,
    %cst_36 = arith.constant dense<0.000000e+00> : vector<128xf32>
    %42 = vector.multi_reduction <add>, %16, %cst_36 [0] : vector<256x128xf32> to vector<128xf32>
    %43 = vector.shape_cast %42 : vector<128xf32> to vector<1x128xf32>
    %cst_37 = arith.constant 2.560000e+02 : f32
    %44 = vector.broadcast %cst_37 : f32 to vector<1x128xf32>
    %45 = arith.divf %43, %44 : vector<1x128xf32>
    %c0_38 = arith.constant 0 : index
    %c0_39 = arith.constant 0 : index
    %c0_40 = arith.constant 0 : index
    %46 = vector.load %arg13[%c0_38, %c0_39, %c0_40] : memref<1x1x128xf32, #tpu.memory_space<vmem>>, vector<1x1x128xf32>
    %47 = vector.shape_cast %46 : vector<1x1x128xf32> to vector<1x128xf32>
    %48 = vector.shape_cast %45 : vector<1x128xf32> to vector<1x1x128xf32>
    tpu.vector_store %arg13[%c0_38, %c0_39, %c0_40], %48 {strides = array<i32>} : memref<1x1x128xf32, #tpu.memory_space<vmem>>, vector<1x1x128xf32>,
    %49 = vector.broadcast %45 : vector<1x128xf32> to vector<256x128xf32>
    %50 = arith.subf %16, %49 : vector<256x128xf32>
    %51 = arith.mulf %50, %50 : vector<256x128xf32>
    %cst_41 = arith.constant dense<0.000000e+00> : vector<128xf32>
    %52 = vector.multi_reduction <add>, %51, %cst_41 [0] : vector<256x128xf32> to vector<128xf32>
    %53 = vector.shape_cast %52 : vector<128xf32> to vector<1x128xf32>
    %cst_42 = arith.constant 2.560000e+02 : f32
    %54 = vector.broadcast %cst_42 : f32 to vector<1x128xf32>
    %55 = arith.divf %53, %54 : vector<1x128xf32>
    %cst_43 = arith.constant 9.99999974E-6 : f32
    %56 = vector.broadcast %cst_43 : f32 to vector<1x128xf32>
    %57 = arith.addf %55, %56 : vector<1x128xf32>
    %58 = math.sqrt %57 : vector<1x128xf32>
    %c0_44 = arith.constant 0 : index
    %c0_45 = arith.constant 0 : index
    %c0_46 = arith.constant 0 : index
    %59 = vector.load %arg14[%c0_44, %c0_45, %c0_46] : memref<1x1x128xf32, #tpu.memory_space<vmem>>, vector<1x1x128xf32>
    %60 = vector.shape_cast %59 : vector<1x1x128xf32> to vector<1x128xf32>
    %61 = vector.shape_cast %58 : vector<1x128xf32> to vector<1x1x128xf32>
    tpu.vector_store %arg14[%c0_44, %c0_45, %c0_46], %61 {strides = array<i32>} : memref<1x1x128xf32, #tpu.memory_space<vmem>>, vector<1x1x128xf32>,
    %cst_47 = arith.constant dense<0.000000e+00> : vector<128xf32>
    %62 = vector.multi_reduction <add>, %33, %cst_47 [0] : vector<64x128xf32> to vector<128xf32>
    %63 = vector.shape_cast %62 : vector<128xf32> to vector<1x128xf32>
    %cst_48 = arith.constant 6.400000e+01 : f32
    %64 = vector.broadcast %cst_48 : f32 to vector<1x128xf32>
    %65 = arith.divf %63, %64 : vector<1x128xf32>
    %c0_49 = arith.constant 0 : index
    %c0_50 = arith.constant 0 : index
    %c0_51 = arith.constant 0 : index
    %66 = vector.load %arg15[%c0_49, %c0_50, %c0_51] : memref<1x1x128xf32, #tpu.memory_space<vmem>>, vector<1x1x128xf32>
    %67 = vector.shape_cast %66 : vector<1x1x128xf32> to vector<1x128xf32>
    %68 = vector.shape_cast %65 : vector<1x128xf32> to vector<1x1x128xf32>
    tpu.vector_store %arg15[%c0_49, %c0_50, %c0_51], %68 {strides = array<i32>} : memref<1x1x128xf32, #tpu.memory_space<vmem>>, vector<1x1x128xf32>,
    %69 = vector.broadcast %65 : vector<1x128xf32> to vector<64x128xf32>
    %70 = arith.subf %33, %69 : vector<64x128xf32>
    %71 = arith.mulf %70, %70 : vector<64x128xf32>
    %cst_52 = arith.constant dense<0.000000e+00> : vector<128xf32>
    %72 = vector.multi_reduction <add>, %71, %cst_52 [0] : vector<64x128xf32> to vector<128xf32>
    %73 = vector.shape_cast %72 : vector<128xf32> to vector<1x128xf32>
    %cst_53 = arith.constant 6.400000e+01 : f32
    %74 = vector.broadcast %cst_53 : f32 to vector<1x128xf32>
    %75 = arith.divf %73, %74 : vector<1x128xf32>
    %cst_54 = arith.constant 9.99999974E-6 : f32
    %76 = vector.broadcast %cst_54 : f32 to vector<1x128xf32>
    %77 = arith.addf %75, %76 : vector<1x128xf32>
    %78 = math.sqrt %77 : vector<1x128xf32>
    %c0_55 = arith.constant 0 : index
    %c0_56 = arith.constant 0 : index
    %c0_57 = arith.constant 0 : index
    %79 = vector.load %arg16[%c0_55, %c0_56, %c0_57] : memref<1x1x128xf32, #tpu.memory_space<vmem>>, vector<1x1x128xf32>
    %80 = vector.shape_cast %79 : vector<1x1x128xf32> to vector<1x128xf32>
    %81 = vector.shape_cast %78 : vector<1x128xf32> to vector<1x1x128xf32>
    tpu.vector_store %arg16[%c0_55, %c0_56, %c0_57], %81 {strides = array<i32>} : memref<1x1x128xf32, #tpu.memory_space<vmem>>, vector<1x1x128xf32>,
    return
  }
  func.func @transform_0(%arg0: i32) -> (i32, i32, i32) {
    %c0_i32 = arith.constant 0 : i32
    %c0_i32_0 = arith.constant 0 : i32
    %c0_i32_1 = arith.constant 0 : i32
    return %arg0, %c0_i32, %c0_i32_0 : i32, i32, i32
  }
  func.func @transform_1(%arg0: i32) -> (i32, i32, i32) {
    %c0_i32 = arith.constant 0 : i32
    %c0_i32_0 = arith.constant 0 : i32
    %c0_i32_1 = arith.constant 0 : i32
    return %arg0, %c0_i32, %c0_i32_0 : i32, i32, i32
  }
  func.func @transform_2(%arg0: i32) -> (i32, i32, i32) {
    %c0_i32 = arith.constant 0 : i32
    %c0_i32_0 = arith.constant 0 : i32
    %c0_i32_1 = arith.constant 0 : i32
    return %arg0, %c0_i32, %c0_i32_0 : i32, i32, i32
  }
  func.func @transform_3(%arg0: i32) -> (i32, i32, i32) {
    %c0_i32 = arith.constant 0 : i32
    %c0_i32_0 = arith.constant 0 : i32
    %c0_i32_1 = arith.constant 0 : i32
    return %arg0, %c0_i32, %c0_i32_0 : i32, i32, i32
  }
  func.func @transform_4(%arg0: i32) -> (i32, i32) {
    %c0_i32 = arith.constant 0 : i32
    %c0_i32_0 = arith.constant 0 : i32
    %c0_i32_1 = arith.constant 0 : i32
    return %c0_i32, %c0_i32_0 : i32, i32
  }
  func.func @transform_5(%arg0: i32) -> (i32, i32) {
    %c0_i32 = arith.constant 0 : i32
    %c0_i32_0 = arith.constant 0 : i32
    %c0_i32_1 = arith.constant 0 : i32
    return %c0_i32, %c0_i32_0 : i32, i32
  }
  func.func @transform_6(%arg0: i32) -> (i32, i32) {
    %c0_i32 = arith.constant 0 : i32
    %c0_i32_0 = arith.constant 0 : i32
    %c0_i32_1 = arith.constant 0 : i32
    return %c0_i32, %c0_i32_0 : i32, i32
  }
  func.func @transform_7(%arg0: i32) -> (i32, i32) {
    %c0_i32 = arith.constant 0 : i32
    %c0_i32_0 = arith.constant 0 : i32
    %c0_i32_1 = arith.constant 0 : i32
    return %c0_i32, %c0_i32_0 : i32, i32
  }
  func.func @transform_8(%arg0: i32) -> (i32, i32) {
    %c0_i32 = arith.constant 0 : i32
    %c0_i32_0 = arith.constant 0 : i32
    %c0_i32_1 = arith.constant 0 : i32
    return %c0_i32, %c0_i32_0 : i32, i32
  }
  func.func @transform_9(%arg0: i32) -> (i32, i32) {
    %c0_i32 = arith.constant 0 : i32
    %c0_i32_0 = arith.constant 0 : i32
    %c0_i32_1 = arith.constant 0 : i32
    return %c0_i32, %c0_i32_0 : i32, i32
  }
  func.func @transform_10(%arg0: i32) -> (i32, i32, i32) {
    %c0_i32 = arith.constant 0 : i32
    %c0_i32_0 = arith.constant 0 : i32
    %c0_i32_1 = arith.constant 0 : i32
    return %arg0, %c0_i32, %c0_i32_0 : i32, i32, i32
  }
  func.func @transform_11(%arg0: i32) -> (i32, i32, i32) {
    %c0_i32 = arith.constant 0 : i32
    %c0_i32_0 = arith.constant 0 : i32
    %c0_i32_1 = arith.constant 0 : i32
    return %arg0, %c0_i32, %c0_i32_0 : i32, i32, i32
  }
  func.func @transform_12(%arg0: i32) -> (i32, i32, i32) {
    %c0_i32 = arith.constant 0 : i32
    %c0_i32_0 = arith.constant 0 : i32
    %c0_i32_1 = arith.constant 0 : i32
    return %arg0, %c0_i32, %c0_i32_0 : i32, i32, i32
  }
  func.func @transform_13(%arg0: i32) -> (i32, i32, i32) {
    %c0_i32 = arith.constant 0 : i32
    %c0_i32_0 = arith.constant 0 : i32
    %c0_i32_1 = arith.constant 0 : i32
    return %arg0, %c0_i32, %c0_i32_0 : i32, i32, i32
  }
  func.func @transform_14(%arg0: i32) -> (i32, i32, i32) {
    %c0_i32 = arith.constant 0 : i32
    %c0_i32_0 = arith.constant 0 : i32
    %c0_i32_1 = arith.constant 0 : i32
    return %arg0, %c0_i32, %c0_i32_0 : i32, i32, i32
  }
  func.func @transform_15(%arg0: i32) -> (i32, i32, i32) {
    %c0_i32 = arith.constant 0 : i32
    %c0_i32_0 = arith.constant 0 : i32
    %c0_i32_1 = arith.constant 0 : i32
    return %arg0, %c0_i32, %c0_i32_0 : i32, i32, i32
  }
}

module attributes {stable_mosaic.version = 11 : i64} {
  func.func @_gen_kernel(%arg0: i32, %arg1: memref<1x256x128xbf16, #tpu.memory_space<vmem>>, %arg2: memref<1x64x128xbf16, #tpu.memory_space<vmem>>, %arg3: memref<1x256x128xbf16, #tpu.memory_space<vmem>>, %arg4: memref<1x1x128xf32, #tpu.memory_space<vmem>>, %arg5: memref<1x1x128xf32, #tpu.memory_space<vmem>>, %arg6: memref<1x1x128xf32, #tpu.memory_space<vmem>>, %arg7: memref<1x1x128xf32, #tpu.memory_space<vmem>>, %arg8: memref<128x256xbf16, #tpu.memory_space<vmem>>, %arg9: memref<128x128xbf16, #tpu.memory_space<vmem>>, %arg10: memref<1x128xf32, #tpu.memory_space<vmem>>, %arg11: memref<128x128xbf16, #tpu.memory_space<vmem>>, %arg12: memref<1x128xf32, #tpu.memory_space<vmem>>, %arg13: memref<128x128xbf16, #tpu.memory_space<vmem>>, %arg14: memref<128x128xbf16, #tpu.memory_space<vmem>>, %arg15: memref<1x128xf32, #tpu.memory_space<vmem>>, %arg16: memref<64x256xbf16, #tpu.memory_space<vmem>>, %arg17: memref<1x256x128xf32, #tpu.memory_space<vmem>>, %arg18: memref<1x64x128xf32, #tpu.memory_space<vmem>>) attributes {dimension_semantics = [#tpu.dimension_semantics<parallel>], iteration_bounds = array<i64: 2>, scalar_prefetch = 0 : i64, scratch_operands = 0 : i64, tpu.core_type = #tpu.core_type<tc>, window_params = [{transform_indices = @transform_0, window_bounds = array<i64: 1, 256, 128>}, {transform_indices = @transform_1, window_bounds = array<i64: 1, 64, 128>}, {transform_indices = @transform_2, window_bounds = array<i64: 1, 256, 128>}, {transform_indices = @transform_3, window_bounds = array<i64: 1, 1, 128>}, {transform_indices = @transform_4, window_bounds = array<i64: 1, 1, 128>}, {transform_indices = @transform_5, window_bounds = array<i64: 1, 1, 128>}, {transform_indices = @transform_6, window_bounds = array<i64: 1, 1, 128>}, {pipeline_mode = #tpu.pipeline_mode<synchronous>, transform_indices = @transform_7, window_bounds = array<i64: 128, 256>}, {pipeline_mode = #tpu.pipeline_mode<synchronous>, transform_indices = @transform_8, window_bounds = array<i64: 128, 128>}, {pipeline_mode = #tpu.pipeline_mode<synchronous>, transform_indices = @transform_9, window_bounds = array<i64: 1, 128>}, {pipeline_mode = #tpu.pipeline_mode<synchronous>, transform_indices = @transform_10, window_bounds = array<i64: 128, 128>}, {pipeline_mode = #tpu.pipeline_mode<synchronous>, transform_indices = @transform_11, window_bounds = array<i64: 1, 128>}, {pipeline_mode = #tpu.pipeline_mode<synchronous>, transform_indices = @transform_12, window_bounds = array<i64: 128, 128>}, {pipeline_mode = #tpu.pipeline_mode<synchronous>, transform_indices = @transform_13, window_bounds = array<i64: 128, 128>}, {pipeline_mode = #tpu.pipeline_mode<synchronous>, transform_indices = @transform_14, window_bounds = array<i64: 1, 128>}, {pipeline_mode = #tpu.pipeline_mode<synchronous>, transform_indices = @transform_15, window_bounds = array<i64: 64, 256>}, {transform_indices = @transform_16, window_bounds = array<i64: 1, 256, 128>}, {transform_indices = @transform_17, window_bounds = array<i64: 1, 64, 128>}]} {
    %c0 = arith.constant 0 : index
    %c0_0 = arith.constant 0 : index
    %c0_1 = arith.constant 0 : index
    %0 = vector.load %arg1[%c0, %c0_0, %c0_1] : memref<1x256x128xbf16, #tpu.memory_space<vmem>>, vector<1x256x128xbf16>
    %1 = vector.shape_cast %0 : vector<1x256x128xbf16> to vector<256x128xbf16>
    %2 = arith.extf %1 : vector<256x128xbf16> to vector<256x128xf32>
    %c0_2 = arith.constant 0 : index
    %c0_3 = arith.constant 0 : index
    %c0_4 = arith.constant 0 : index
    %3 = vector.load %arg2[%c0_2, %c0_3, %c0_4] : memref<1x64x128xbf16, #tpu.memory_space<vmem>>, vector<1x64x128xbf16>
    %4 = vector.shape_cast %3 : vector<1x64x128xbf16> to vector<64x128xbf16>
    %5 = arith.extf %4 : vector<64x128xbf16> to vector<64x128xf32>
    %c0_5 = arith.constant 0 : index
    %c0_6 = arith.constant 0 : index
    %c0_7 = arith.constant 0 : index
    %6 = vector.load %arg3[%c0_5, %c0_6, %c0_7] : memref<1x256x128xbf16, #tpu.memory_space<vmem>>, vector<1x256x128xbf16>
    %7 = vector.shape_cast %6 : vector<1x256x128xbf16> to vector<256x128xbf16>
    %8 = arith.extf %7 : vector<256x128xbf16> to vector<256x128xf32>
    %cst = arith.constant dense<0.000000e+00> : vector<128xf32>
    %9 = vector.multi_reduction <add>, %2, %cst [0] : vector<256x128xf32> to vector<128xf32>
    %10 = vector.shape_cast %9 : vector<128xf32> to vector<1x128xf32>
    %cst_8 = arith.constant 2.560000e+02 : f32
    %11 = vector.broadcast %cst_8 : f32 to vector<1x128xf32>
    %12 = arith.divf %10, %11 : vector<1x128xf32>
    %13 = vector.broadcast %12 : vector<1x128xf32> to vector<256x128xf32>
    %14 = arith.subf %2, %13 : vector<256x128xf32>
    %15 = arith.mulf %14, %14 : vector<256x128xf32>
    %cst_9 = arith.constant dense<0.000000e+00> : vector<128xf32>
    %16 = vector.multi_reduction <add>, %15, %cst_9 [0] : vector<256x128xf32> to vector<128xf32>
    %17 = vector.shape_cast %16 : vector<128xf32> to vector<1x128xf32>
    %cst_10 = arith.constant 2.560000e+02 : f32
    %18 = vector.broadcast %cst_10 : f32 to vector<1x128xf32>
    %19 = arith.divf %17, %18 : vector<1x128xf32>
    %cst_11 = arith.constant 9.99999974E-6 : f32
    %20 = vector.broadcast %cst_11 : f32 to vector<1x128xf32>
    %21 = arith.addf %19, %20 : vector<1x128xf32>
    %22 = math.rsqrt %21 : vector<1x128xf32>
    %cst_12 = arith.constant dense<0.000000e+00> : vector<128xf32>
    %23 = vector.multi_reduction <add>, %5, %cst_12 [0] : vector<64x128xf32> to vector<128xf32>
    %24 = vector.shape_cast %23 : vector<128xf32> to vector<1x128xf32>
    %cst_13 = arith.constant 6.400000e+01 : f32
    %25 = vector.broadcast %cst_13 : f32 to vector<1x128xf32>
    %26 = arith.divf %24, %25 : vector<1x128xf32>
    %27 = vector.broadcast %26 : vector<1x128xf32> to vector<64x128xf32>
    %28 = arith.subf %5, %27 : vector<64x128xf32>
    %29 = arith.mulf %28, %28 : vector<64x128xf32>
    %cst_14 = arith.constant dense<0.000000e+00> : vector<128xf32>
    %30 = vector.multi_reduction <add>, %29, %cst_14 [0] : vector<64x128xf32> to vector<128xf32>
    %31 = vector.shape_cast %30 : vector<128xf32> to vector<1x128xf32>
    %cst_15 = arith.constant 6.400000e+01 : f32
    %32 = vector.broadcast %cst_15 : f32 to vector<1x128xf32>
    %33 = arith.divf %31, %32 : vector<1x128xf32>
    %cst_16 = arith.constant 9.99999974E-6 : f32
    %34 = vector.broadcast %cst_16 : f32 to vector<1x128xf32>
    %35 = arith.addf %33, %34 : vector<1x128xf32>
    %36 = math.rsqrt %35 : vector<1x128xf32>
    %37 = vector.broadcast %12 : vector<1x128xf32> to vector<256x128xf32>
    %38 = arith.subf %2, %37 : vector<256x128xf32>
    %39 = vector.broadcast %22 : vector<1x128xf32> to vector<256x128xf32>
    %40 = arith.mulf %38, %39 : vector<256x128xf32>
    %c0_17 = arith.constant 0 : index
    %c0_18 = arith.constant 0 : index
    %c0_19 = arith.constant 0 : index
    %41 = vector.load %arg5[%c0_17, %c0_18, %c0_19] : memref<1x1x128xf32, #tpu.memory_space<vmem>>, vector<1x1x128xf32>
    %42 = vector.shape_cast %41 : vector<1x1x128xf32> to vector<1x128xf32>
    %43 = vector.broadcast %42 : vector<1x128xf32> to vector<256x128xf32>
    %44 = arith.mulf %40, %43 : vector<256x128xf32>
    %c0_20 = arith.constant 0 : index
    %c0_21 = arith.constant 0 : index
    %c0_22 = arith.constant 0 : index
    %45 = vector.load %arg4[%c0_20, %c0_21, %c0_22] : memref<1x1x128xf32, #tpu.memory_space<vmem>>, vector<1x1x128xf32>
    %46 = vector.shape_cast %45 : vector<1x1x128xf32> to vector<1x128xf32>
    %47 = vector.broadcast %46 : vector<1x128xf32> to vector<256x128xf32>
    %48 = arith.addf %44, %47 : vector<256x128xf32>
    %cst_23 = arith.constant 0.000000e+00 : f32
    %49 = vector.broadcast %cst_23 : f32 to vector<256x128xf32>
    %50 = arith.cmpf oge, %48, %49 : vector<256x128xf32>
    %cst_24 = arith.constant 2.000000e-01 : f32
    %51 = vector.broadcast %cst_24 : f32 to vector<256x128xf32>
    %52 = arith.mulf %51, %48 : vector<256x128xf32>
    %53 = arith.select %50, %48, %52 : vector<256x128xi1>, vector<256x128xf32>
    %54 = arith.truncf %53 : vector<256x128xf32> to vector<256x128xbf16>
    %55 = vector.broadcast %26 : vector<1x128xf32> to vector<64x128xf32>
    %56 = arith.subf %5, %55 : vector<64x128xf32>
    %57 = vector.broadcast %36 : vector<1x128xf32> to vector<64x128xf32>
    %58 = arith.mulf %56, %57 : vector<64x128xf32>
    %c0_25 = arith.constant 0 : index
    %c0_26 = arith.constant 0 : index
    %c0_27 = arith.constant 0 : index
    %59 = vector.load %arg7[%c0_25, %c0_26, %c0_27] : memref<1x1x128xf32, #tpu.memory_space<vmem>>, vector<1x1x128xf32>
    %60 = vector.shape_cast %59 : vector<1x1x128xf32> to vector<1x128xf32>
    %61 = vector.broadcast %60 : vector<1x128xf32> to vector<64x128xf32>
    %62 = arith.mulf %58, %61 : vector<64x128xf32>
    %c0_28 = arith.constant 0 : index
    %c0_29 = arith.constant 0 : index
    %c0_30 = arith.constant 0 : index
    %63 = vector.load %arg6[%c0_28, %c0_29, %c0_30] : memref<1x1x128xf32, #tpu.memory_space<vmem>>, vector<1x1x128xf32>
    %64 = vector.shape_cast %63 : vector<1x1x128xf32> to vector<1x128xf32>
    %65 = vector.broadcast %64 : vector<1x128xf32> to vector<64x128xf32>
    %66 = arith.addf %62, %65 : vector<64x128xf32>
    %cst_31 = arith.constant 0.000000e+00 : f32
    %67 = vector.broadcast %cst_31 : f32 to vector<64x128xf32>
    %68 = arith.cmpf oge, %66, %67 : vector<64x128xf32>
    %cst_32 = arith.constant 2.000000e-01 : f32
    %69 = vector.broadcast %cst_32 : f32 to vector<64x128xf32>
    %70 = arith.mulf %69, %66 : vector<64x128xf32>
    %71 = arith.select %68, %66, %70 : vector<64x128xi1>, vector<64x128xf32>
    %72 = arith.truncf %71 : vector<64x128xf32> to vector<64x128xbf16>
    %73 = vector.broadcast %26 : vector<1x128xf32> to vector<256x128xf32>
    %74 = arith.subf %8, %73 : vector<256x128xf32>
    %75 = vector.broadcast %36 : vector<1x128xf32> to vector<256x128xf32>
    %76 = arith.mulf %74, %75 : vector<256x128xf32>
    %c0_33 = arith.constant 0 : index
    %c0_34 = arith.constant 0 : index
    %c0_35 = arith.constant 0 : index
    %77 = vector.load %arg7[%c0_33, %c0_34, %c0_35] : memref<1x1x128xf32, #tpu.memory_space<vmem>>, vector<1x1x128xf32>
    %78 = vector.shape_cast %77 : vector<1x1x128xf32> to vector<1x128xf32>
    %79 = vector.broadcast %78 : vector<1x128xf32> to vector<256x128xf32>
    %80 = arith.mulf %76, %79 : vector<256x128xf32>
    %c0_36 = arith.constant 0 : index
    %c0_37 = arith.constant 0 : index
    %c0_38 = arith.constant 0 : index
    %81 = vector.load %arg6[%c0_36, %c0_37, %c0_38] : memref<1x1x128xf32, #tpu.memory_space<vmem>>, vector<1x1x128xf32>
    %82 = vector.shape_cast %81 : vector<1x1x128xf32> to vector<1x128xf32>
    %83 = vector.broadcast %82 : vector<1x128xf32> to vector<256x128xf32>
    %84 = arith.addf %80, %83 : vector<256x128xf32>
    %cst_39 = arith.constant 0.000000e+00 : f32
    %85 = vector.broadcast %cst_39 : f32 to vector<256x128xf32>
    %86 = arith.cmpf oge, %84, %85 : vector<256x128xf32>
    %cst_40 = arith.constant 2.000000e-01 : f32
    %87 = vector.broadcast %cst_40 : f32 to vector<256x128xf32>
    %88 = arith.mulf %87, %84 : vector<256x128xf32>
    %89 = arith.select %86, %84, %88 : vector<256x128xi1>, vector<256x128xf32>
    %90 = arith.truncf %89 : vector<256x128xf32> to vector<256x128xbf16>
    %c0_41 = arith.constant 0 : index
    %c0_42 = arith.constant 0 : index
    %91 = vector.load %arg8[%c0_41, %c0_42] : memref<128x256xbf16, #tpu.memory_space<vmem>>, vector<128x256xbf16>
    %cst_43 = arith.constant dense<0.000000e+00> : vector<256x256xf32>
    %92 = tpu.matmul %54, %91, %cst_43 {dimension_numbers = #tpu.dot_dimension_numbers<[1], [0], [0], [1], [0, 0, 1, 1], [], []>} : vector<256x128xbf16>, vector<128x256xbf16>, vector<256x256xf32> -> vector<256x256xf32>
    %93 = vector.extract_strided_slice %92 {offsets = [0, 0], sizes = [256, 128], strides = [1, 1]} : vector<256x256xf32> to vector<256x128xf32>
    %94 = vector.extract_strided_slice %92 {offsets = [0, 128], sizes = [256, 128], strides = [1, 1]} : vector<256x256xf32> to vector<256x128xf32>
    %c0_44 = arith.constant 0 : index
    %c0_45 = arith.constant 0 : index
    %95 = vector.load %arg9[%c0_44, %c0_45] : memref<128x128xbf16, #tpu.memory_space<vmem>>, vector<128x128xbf16>
    %cst_46 = arith.constant dense<0.000000e+00> : vector<256x128xf32>
    %96 = tpu.matmul %90, %95, %cst_46 {dimension_numbers = #tpu.dot_dimension_numbers<[1], [0], [0], [1], [0, 0, 1, 1], [], []>} : vector<256x128xbf16>, vector<128x128xbf16>, vector<256x128xf32> -> vector<256x128xf32>
    %97 = arith.addf %93, %96 : vector<256x128xf32>
    %c0_47 = arith.constant 0 : index
    %c0_48 = arith.constant 0 : index
    %98 = vector.load %arg10[%c0_47, %c0_48] : memref<1x128xf32, #tpu.memory_space<vmem>>, vector<1x128xf32>
    %99 = vector.broadcast %98 : vector<1x128xf32> to vector<256x128xf32>
    %100 = arith.addf %97, %99 : vector<256x128xf32>
    %cst_49 = arith.constant 0.000000e+00 : f32
    %101 = vector.broadcast %cst_49 : f32 to vector<256x128xf32>
    %102 = arith.cmpf oge, %100, %101 : vector<256x128xf32>
    %cst_50 = arith.constant 2.000000e-01 : f32
    %103 = vector.broadcast %cst_50 : f32 to vector<256x128xf32>
    %104 = arith.mulf %103, %100 : vector<256x128xf32>
    %105 = arith.select %102, %100, %104 : vector<256x128xi1>, vector<256x128xf32>
    %c0_51 = arith.constant 0 : index
    %c0_52 = arith.constant 0 : index
    %106 = vector.load %arg16[%c0_51, %c0_52] : memref<64x256xbf16, #tpu.memory_space<vmem>>, vector<64x256xbf16>
    %107 = arith.truncf %94 : vector<256x128xf32> to vector<256x128xbf16>
    %cst_53 = arith.constant dense<0.000000e+00> : vector<64x128xf32>
    %108 = tpu.matmul %106, %107, %cst_53 {dimension_numbers = #tpu.dot_dimension_numbers<[1], [0], [0], [1], [0, 0, 1, 1], [], []>} : vector<64x256xbf16>, vector<256x128xbf16>, vector<64x128xf32> -> vector<64x128xf32>
    %c0_54 = arith.constant 0 : index
    %c0_55 = arith.constant 0 : index
    %109 = vector.load %arg11[%c0_54, %c0_55] : memref<128x128xbf16, #tpu.memory_space<vmem>>, vector<128x128xbf16>
    %cst_56 = arith.constant dense<0.000000e+00> : vector<64x128xf32>
    %110 = tpu.matmul %72, %109, %cst_56 {dimension_numbers = #tpu.dot_dimension_numbers<[1], [0], [0], [1], [0, 0, 1, 1], [], []>} : vector<64x128xbf16>, vector<128x128xbf16>, vector<64x128xf32> -> vector<64x128xf32>
    %111 = arith.addf %108, %110 : vector<64x128xf32>
    %c0_57 = arith.constant 0 : index
    %c0_58 = arith.constant 0 : index
    %112 = vector.load %arg12[%c0_57, %c0_58] : memref<1x128xf32, #tpu.memory_space<vmem>>, vector<1x128xf32>
    %113 = vector.broadcast %112 : vector<1x128xf32> to vector<64x128xf32>
    %114 = arith.addf %111, %113 : vector<64x128xf32>
    %cst_59 = arith.constant 0.000000e+00 : f32
    %115 = vector.broadcast %cst_59 : f32 to vector<64x128xf32>
    %116 = arith.cmpf oge, %114, %115 : vector<64x128xf32>
    %cst_60 = arith.constant 2.000000e-01 : f32
    %117 = vector.broadcast %cst_60 : f32 to vector<64x128xf32>
    %118 = arith.mulf %117, %114 : vector<64x128xf32>
    %119 = arith.select %116, %114, %118 : vector<64x128xi1>, vector<64x128xf32>
    %120 = arith.truncf %105 : vector<256x128xf32> to vector<256x128xbf16>
    %c0_61 = arith.constant 0 : index
    %c0_62 = arith.constant 0 : index
    %121 = vector.load %arg13[%c0_61, %c0_62] : memref<128x128xbf16, #tpu.memory_space<vmem>>, vector<128x128xbf16>
    %cst_63 = arith.constant dense<0.000000e+00> : vector<256x128xf32>
    %122 = tpu.matmul %120, %121, %cst_63 {dimension_numbers = #tpu.dot_dimension_numbers<[1], [0], [0], [1], [0, 0, 1, 1], [], []>} : vector<256x128xbf16>, vector<128x128xbf16>, vector<256x128xf32> -> vector<256x128xf32>
    %cst_64 = arith.constant 1.000000e+00 : f32
    %123 = vector.broadcast %cst_64 : f32 to vector<256x128xf32>
    %124 = arith.mulf %123, %122 : vector<256x128xf32>
    %c0_65 = arith.constant 0 : index
    %c0_66 = arith.constant 0 : index
    %125 = vector.load %arg15[%c0_65, %c0_66] : memref<1x128xf32, #tpu.memory_space<vmem>>, vector<1x128xf32>
    %126 = vector.broadcast %125 : vector<1x128xf32> to vector<256x128xf32>
    %127 = arith.addf %124, %126 : vector<256x128xf32>
    %c0_67 = arith.constant 0 : index
    %c0_68 = arith.constant 0 : index
    %c0_69 = arith.constant 0 : index
    %128 = vector.load %arg17[%c0_67, %c0_68, %c0_69] : memref<1x256x128xf32, #tpu.memory_space<vmem>>, vector<1x256x128xf32>
    %129 = vector.shape_cast %128 : vector<1x256x128xf32> to vector<256x128xf32>
    %130 = vector.shape_cast %127 : vector<256x128xf32> to vector<1x256x128xf32>
    tpu.vector_store %arg17[%c0_67, %c0_68, %c0_69], %130 {strides = array<i32>} : memref<1x256x128xf32, #tpu.memory_space<vmem>>, vector<1x256x128xf32>,
    %131 = arith.truncf %119 : vector<64x128xf32> to vector<64x128xbf16>
    %c0_70 = arith.constant 0 : index
    %c0_71 = arith.constant 0 : index
    %132 = vector.load %arg14[%c0_70, %c0_71] : memref<128x128xbf16, #tpu.memory_space<vmem>>, vector<128x128xbf16>
    %cst_72 = arith.constant dense<0.000000e+00> : vector<64x128xf32>
    %133 = tpu.matmul %131, %132, %cst_72 {dimension_numbers = #tpu.dot_dimension_numbers<[1], [0], [0], [1], [0, 0, 1, 1], [], []>} : vector<64x128xbf16>, vector<128x128xbf16>, vector<64x128xf32> -> vector<64x128xf32>
    %cst_73 = arith.constant 1.000000e+00 : f32
    %134 = vector.broadcast %cst_73 : f32 to vector<64x128xf32>
    %135 = arith.mulf %134, %133 : vector<64x128xf32>
    %c0_74 = arith.constant 0 : index
    %c0_75 = arith.constant 0 : index
    %c0_76 = arith.constant 0 : index
    %136 = vector.load %arg18[%c0_74, %c0_75, %c0_76] : memref<1x64x128xf32, #tpu.memory_space<vmem>>, vector<1x64x128xf32>
    %137 = vector.shape_cast %136 : vector<1x64x128xf32> to vector<64x128xf32>
    %138 = vector.shape_cast %135 : vector<64x128xf32> to vector<1x64x128xf32>
    tpu.vector_store %arg18[%c0_74, %c0_75, %c0_76], %138 {strides = array<i32>} : memref<1x64x128xf32, #tpu.memory_space<vmem>>, vector<1x64x128xf32>,
    return
  }
  func.func @transform_0(%arg0: i32) -> (i32, i32, i32) {
    %c0_i32 = arith.constant 0 : i32
    %c0_i32_0 = arith.constant 0 : i32
    %c0_i32_1 = arith.constant 0 : i32
    return %arg0, %c0_i32, %c0_i32_0 : i32, i32, i32
  }
  func.func @transform_1(%arg0: i32) -> (i32, i32, i32) {
    %c0_i32 = arith.constant 0 : i32
    %c0_i32_0 = arith.constant 0 : i32
    %c0_i32_1 = arith.constant 0 : i32
    return %arg0, %c0_i32, %c0_i32_0 : i32, i32, i32
  }
  func.func @transform_2(%arg0: i32) -> (i32, i32, i32) {
    %c0_i32 = arith.constant 0 : i32
    %c0_i32_0 = arith.constant 0 : i32
    %c0_i32_1 = arith.constant 0 : i32
    return %arg0, %c0_i32, %c0_i32_0 : i32, i32, i32
  }
  func.func @transform_3(%arg0: i32) -> (i32, i32, i32) {
    %c0_i32 = arith.constant 0 : i32
    %c0_i32_0 = arith.constant 0 : i32
    %c0_i32_1 = arith.constant 0 : i32
    return %arg0, %c0_i32, %c0_i32_0 : i32, i32, i32
  }
  func.func @transform_4(%arg0: i32) -> (i32, i32, i32) {
    %c0_i32 = arith.constant 0 : i32
    %c0_i32_0 = arith.constant 0 : i32
    %c0_i32_1 = arith.constant 0 : i32
    return %arg0, %c0_i32, %c0_i32_0 : i32, i32, i32
  }
  func.func @transform_5(%arg0: i32) -> (i32, i32, i32) {
    %c0_i32 = arith.constant 0 : i32
    %c0_i32_0 = arith.constant 0 : i32
    %c0_i32_1 = arith.constant 0 : i32
    return %arg0, %c0_i32, %c0_i32_0 : i32, i32, i32
  }
  func.func @transform_6(%arg0: i32) -> (i32, i32, i32) {
    %c0_i32 = arith.constant 0 : i32
    %c0_i32_0 = arith.constant 0 : i32
    %c0_i32_1 = arith.constant 0 : i32
    return %arg0, %c0_i32, %c0_i32_0 : i32, i32, i32
  }
  func.func @transform_7(%arg0: i32) -> (i32, i32) {
    %c0_i32 = arith.constant 0 : i32
    %c0_i32_0 = arith.constant 0 : i32
    %c0_i32_1 = arith.constant 0 : i32
    return %c0_i32, %c0_i32_0 : i32, i32
  }
  func.func @transform_8(%arg0: i32) -> (i32, i32) {
    %c0_i32 = arith.constant 0 : i32
    %c0_i32_0 = arith.constant 0 : i32
    %c0_i32_1 = arith.constant 0 : i32
    return %c0_i32, %c0_i32_0 : i32, i32
  }
  func.func @transform_9(%arg0: i32) -> (i32, i32) {
    %c0_i32 = arith.constant 0 : i32
    %c0_i32_0 = arith.constant 0 : i32
    %c0_i32_1 = arith.constant 0 : i32
    return %c0_i32, %c0_i32_0 : i32, i32
  }
  func.func @transform_10(%arg0: i32) -> (i32, i32) {
    %c0_i32 = arith.constant 0 : i32
    %c0_i32_0 = arith.constant 0 : i32
    %c0_i32_1 = arith.constant 0 : i32
    return %c0_i32, %c0_i32_0 : i32, i32
  }
  func.func @transform_11(%arg0: i32) -> (i32, i32) {
    %c0_i32 = arith.constant 0 : i32
    %c0_i32_0 = arith.constant 0 : i32
    %c0_i32_1 = arith.constant 0 : i32
    return %c0_i32, %c0_i32_0 : i32, i32
  }
  func.func @transform_12(%arg0: i32) -> (i32, i32) {
    %c0_i32 = arith.constant 0 : i32
    %c0_i32_0 = arith.constant 0 : i32
    %c0_i32_1 = arith.constant 0 : i32
    return %c0_i32, %c0_i32_0 : i32, i32
  }
  func.func @transform_13(%arg0: i32) -> (i32, i32) {
    %c0_i32 = arith.constant 0 : i32
    %c0_i32_0 = arith.constant 0 : i32
    %c0_i32_1 = arith.constant 0 : i32
    return %c0_i32, %c0_i32_0 : i32, i32
  }
  func.func @transform_14(%arg0: i32) -> (i32, i32) {
    %c0_i32 = arith.constant 0 : i32
    %c0_i32_0 = arith.constant 0 : i32
    %c0_i32_1 = arith.constant 0 : i32
    return %c0_i32, %c0_i32_0 : i32, i32
  }
  func.func @transform_15(%arg0: i32) -> (i32, i32) {
    %c0_i32 = arith.constant 0 : i32
    %c0_i32_0 = arith.constant 0 : i32
    %c0_i32_1 = arith.constant 0 : i32
    return %c0_i32, %c0_i32_0 : i32, i32
  }
  func.func @transform_16(%arg0: i32) -> (i32, i32, i32) {
    %c0_i32 = arith.constant 0 : i32
    %c0_i32_0 = arith.constant 0 : i32
    %c0_i32_1 = arith.constant 0 : i32
    return %arg0, %c0_i32, %c0_i32_0 : i32, i32, i32
  }
  func.func @transform_17(%arg0: i32) -> (i32, i32, i32) {
    %c0_i32 = arith.constant 0 : i32
    %c0_i32_0 = arith.constant 0 : i32
    %c0_i32_1 = arith.constant 0 : i32
    return %arg0, %c0_i32, %c0_i32_0 : i32, i32, i32
  }
}

</mosaic_0001>

<bundles_post_ra>
// kernel: _forward_impl.13
= control target key start
LH: loop header
LB: loop body
LE: loop exit
PB: predicated region body
PF: predicated region fallthrough
CT: control target
= control target key end

     0   :  { %s2595_s12 = smov 0   ;;  %s2913_s0 = inlined_call_operand.vmem [shape: bf16[2048,128], index: 0, kind: input, shape index: {}]   ;;  %s2914_s1 = inlined_call_operand.vmem [shape: bf16[128,128], index: 1, kind: input, shape index: {}]   ;;  %s2915_s2 = inlined_call_operand.vmem [shape: f32[1,128], index: 2, kind: input, shape index: {}]   ;;  %s2916_s3 = inlined_call_operand.vmem [shape: bf16[2048,128], index: 3, kind: output, shape index: {}]  }
   0x1 LB: > { %s1779_s13 = sadd.s32 4294967295, %s2573_s12   ;;  %p1783_p0 = scmp.ge.s32.totalorder %s2573_s12, 1  ;;  %s2573_s12 = sphi %s2595_s12, %s13_s12  }
   0x2   : > { %p138_p1 = scmp.lt.s32.totalorder %s2573_s12, 3 }
   0x4   : > { %p139_p2 = pnand %p1783_p0, %p138_p1 }
   0x5   : > { %s1784_s22 = sshll.u32 (!%p139_p2), %s1779_s13, 7 }
   0x6   : > { %142 = sbr.rel (%p139_p2) target bundleno = 433 (0x1b1), region = 32  ;;  %p163_p3 = scmp.lt.s32.totalorder (!%p139_p2), %s1784_s22, 255 }
   0xb   : > { %v2149_v0 = vld [vmem:[%s2914_s1 + $0x38] sm:$0xff]  ;;  %v2148_v1 = vld [vmem:[%s2914_s1 + $0x30] sm:$0xff]  ;;  %v2147_v2 = vld [vmem:[%s2914_s1 + $0x28] sm:$0xff]  ;;  %s2918_s22 = smov (!%p163_p3, %s1784_s22), 255 }
   0xc   : > { %754 = vmatpush.bf16.msra.mxu0 %v2149_v0  ;;  %2533 = vmatpush.bf16.msra.mxu1 %v2149_v0  ;;  %v2146_v3 = vld [vmem:[%s2914_s1 + $0x20] sm:$0xff]  ;;  %v2145_v4 = vld [vmem:[%s2914_s1 + $0x18] sm:$0xff]  ;;  %v2144_v5 = vld [vmem:[%s2914_s1 + $0x10] sm:$0xff]  ;;  %s1785_s29 = sshll.u32 %s2918_s22, 2 }
   0xd   : > { %2534 = vmatpush.bf16.msra.mxu2 %v2149_v0  ;;  %2535 = vmatpush.bf16.msra.mxu3 %v2149_v0  ;;  %v2143_v6 = vld [vmem:[%s2914_s1 + $0x8] sm:$0xff]  ;;  %v2142_v7 = vld [vmem:[%s2914_s1] sm:$0xff]  ;;  %s2635_s7 = scalar_lea.vmem %s2913_s0, %s1785_s29  ;;  %s2689_s13 = scalar_lea.vmem %s2916_s3, %s1785_s29 }
   0xe   : > { %v2078_v8 = vld [vmem:[%s2635_s7] sm:$0xff]  ;;  %v2079_v12 = vld [vmem:[%s2635_s7 + $0x8] sm:$0xff]  ;;  %v2080_v16 = vld [vmem:[%s2635_s7 + $0x10] sm:$0xff] }
   0xf   : > { %v2094_v9 = vld [vmem:[%s2635_s7 + $0x80] sm:$0xff]  ;;  %v2095_v13 = vld [vmem:[%s2635_s7 + $0x88] sm:$0xff]  ;;  %v2096_v17 = vld [vmem:[%s2635_s7 + $0x90] sm:$0xff] }
  0x10   : > { %755 = vmatpush.bf16.msra.mxu0 %v2148_v1  ;;  %2536 = vmatpush.bf16.msra.mxu1 %v2148_v1  ;;  %v2110_v10 = vld [vmem:[%s2635_s7 + $0x100] sm:$0xff]  ;;  %v2111_v14 = vld [vmem:[%s2635_s7 + $0x108] sm:$0xff]  ;;  %v2112_v18 = vld [vmem:[%s2635_s7 + $0x110] sm:$0xff] }
  0x11   : > { %2537 = vmatpush.bf16.msra.mxu2 %v2148_v1  ;;  %2538 = vmatpush.bf16.msra.mxu3 %v2148_v1  ;;  %v2126_v11 = vld [vmem:[%s2635_s7 + $0x180] sm:$0xff]  ;;  %v2127_v15 = vld [vmem:[%s2635_s7 + $0x188] sm:$0xff]  ;;  %v2128_v19 = vld [vmem:[%s2635_s7 + $0x190] sm:$0xff] }
  0x12   : > { %v2081_v20 = vld [vmem:[%s2635_s7 + $0x18] sm:$0xff]  ;;  %v2082_v24 = vld [vmem:[%s2635_s7 + $0x20] sm:$0xff]  ;;  %v2083_v28 = vld [vmem:[%s2635_s7 + $0x28] sm:$0xff] }
  0x13   : > { %v2097_v21 = vld [vmem:[%s2635_s7 + $0x98] sm:$0xff]  ;;  %v2098_v25 = vld [vmem:[%s2635_s7 + $0xa0] sm:$0xff]  ;;  %v2099_v29 = vld [vmem:[%s2635_s7 + $0xa8] sm:$0xff] }
  0x14   : > { %756 = vmatpush.bf16.msra.mxu0 %v2147_v2  ;;  %2539 = vmatpush.bf16.msra.mxu1 %v2147_v2  ;;  %v2113_v22 = vld [vmem:[%s2635_s7 + $0x118] sm:$0xff]  ;;  %v2114_v26 = vld [vmem:[%s2635_s7 + $0x120] sm:$0xff]  ;;  %v2115_v30 = vld [vmem:[%s2635_s7 + $0x128] sm:$0xff] }
  0x15   : > { %2540 = vmatpush.bf16.msra.mxu2 %v2147_v2  ;;  %2541 = vmatpush.bf16.msra.mxu3 %v2147_v2  ;;  %v2129_v23 = vld [vmem:[%s2635_s7 + $0x198] sm:$0xff]  ;;  %v2130_v27 = vld [vmem:[%s2635_s7 + $0x1a0] sm:$0xff]  ;;  %v2131_v31 = vld [vmem:[%s2635_s7 + $0x1a8] sm:$0xff] }
  0x16   : > { %v2084_v32 = vld [vmem:[%s2635_s7 + $0x30] sm:$0xff]  ;;  %v2085_v36 = vld [vmem:[%s2635_s7 + $0x38] sm:$0xff]  ;;  %v2086_v40 = vld [vmem:[%s2635_s7 + $0x40] sm:$0xff] }
  0x17   : > { %v2100_v33 = vld [vmem:[%s2635_s7 + $0xb0] sm:$0xff]  ;;  %v2101_v37 = vld [vmem:[%s2635_s7 + $0xb8] sm:$0xff]  ;;  %v2102_v41 = vld [vmem:[%s2635_s7 + $0xc0] sm:$0xff] }
  0x18   : > { %757 = vmatpush.bf16.msra.mxu0 %v2146_v3  ;;  %2542 = vmatpush.bf16.msra.mxu1 %v2146_v3  ;;  %v2116_v34 = vld [vmem:[%s2635_s7 + $0x130] sm:$0xff]  ;;  %v2117_v38 = vld [vmem:[%s2635_s7 + $0x138] sm:$0xff]  ;;  %v2118_v44 = vld [vmem:[%s2635_s7 + $0x140] sm:$0xff] }
  0x19   : > { %2543 = vmatpush.bf16.msra.mxu2 %v2146_v3  ;;  %2544 = vmatpush.bf16.msra.mxu3 %v2146_v3  ;;  %v2132_v35 = vld [vmem:[%s2635_s7 + $0x1b0] sm:$0xff]  ;;  %v2133_v39 = vld [vmem:[%s2635_s7 + $0x1b8] sm:$0xff]  ;;  %v2134_v45 = vld [vmem:[%s2635_s7 + $0x1c0] sm:$0xff] }
  0x1a   : > { %v2676_v46 = vld [vmem:[%s2915_s2] ss:$0 sm:$0xff] }
  0x1c   : > { %758 = vmatpush.bf16.msra.mxu0 %v2145_v4  ;;  %2545 = vmatpush.bf16.msra.mxu1 %v2145_v4 }
  0x1d   : > { %2546 = vmatpush.bf16.msra.mxu2 %v2145_v4  ;;  %2547 = vmatpush.bf16.msra.mxu3 %v2145_v4 }
  0x20   : > { %759 = vmatpush.bf16.msra.mxu0 %v2144_v5  ;;  %2548 = vmatpush.bf16.msra.mxu1 %v2144_v5 }
  0x21   : > { %2549 = vmatpush.bf16.msra.mxu2 %v2144_v5  ;;  %2550 = vmatpush.bf16.msra.mxu3 %v2144_v5 }
  0x24   : > { %760 = vmatpush.bf16.msra.mxu0 %v2143_v6  ;;  %2551 = vmatpush.bf16.msra.mxu1 %v2143_v6 }
  0x25   : > { %2552 = vmatpush.bf16.msra.mxu2 %v2143_v6  ;;  %2553 = vmatpush.bf16.msra.mxu3 %v2143_v6  ;;  %v2087_v6 = vld [vmem:[%s2635_s7 + $0x48] sm:$0xff] }
  0x28   : > { %761 = vmatpush.bf16.msra.mxu0 %v2142_v7  ;;  %2554 = vmatpush.bf16.msra.mxu1 %v2142_v7 }
  0x29   : > { %2555 = vmatpush.bf16.msra.mxu2 %v2142_v7  ;;  %2556 = vmatpush.bf16.msra.mxu3 %v2142_v7  ;;  %v2103_v7 = vld [vmem:[%s2635_s7 + $0xc8] sm:$0xff] }
  0x2b   : > { %762 = vmatmul.bf16.vlgmr.msra.gmra.mxu0 %v2078_v8  ;;  %842 = vmatmul.bf16.vlgmr.msra.gmra.mxu1 %v2094_v9 }
  0x2c   : > { %922 = vmatmul.bf16.vlgmr.msra.gmra.mxu2 %v2110_v10  ;;  %1002 = vmatmul.bf16.vlgmr.msra.gmra.mxu3 %v2126_v11 }
  0x3b   : > { %767 = vmatmul.bf16.gmra.mxu0 %v2079_v12  ;;  %847 = vmatmul.bf16.gmra.mxu1 %v2095_v13  ;;  %v2119_v13 = vld [vmem:[%s2635_s7 + $0x148] sm:$0xff] }
  0x3c   : > { %927 = vmatmul.bf16.gmra.mxu2 %v2111_v14  ;;  %1007 = vmatmul.bf16.gmra.mxu3 %v2127_v15  ;;  %v2135_v14 = vld [vmem:[%s2635_s7 + $0x1c8] sm:$0xff] }
  0x4b   : > { %772 = vmatmul.bf16.gmra.mxu0 %v2080_v16  ;;  %852 = vmatmul.bf16.gmra.mxu1 %v2096_v17 }
  0x4c   : > { %932 = vmatmul.bf16.gmra.mxu2 %v2112_v18  ;;  %1012 = vmatmul.bf16.gmra.mxu3 %v2128_v19 }
  0x5b   : > { %777 = vmatmul.bf16.gmra.mxu0 %v2081_v20  ;;  %857 = vmatmul.bf16.gmra.mxu1 %v2097_v21 }
  0x5c   : > { %937 = vmatmul.bf16.gmra.mxu2 %v2113_v22  ;;  %1017 = vmatmul.bf16.gmra.mxu3 %v2129_v23 }
  0x6b   : > { %782 = vmatmul.bf16.gmra.mxu0 %v2082_v24  ;;  %862 = vmatmul.bf16.gmra.mxu1 %v2098_v25 }
  0x6c   : > { %942 = vmatmul.bf16.gmra.mxu2 %v2114_v26  ;;  %1022 = vmatmul.bf16.gmra.mxu3 %v2130_v27 }
  0x7b   : > { %787 = vmatmul.bf16.gmra.mxu0 %v2083_v28  ;;  %867 = vmatmul.bf16.gmra.mxu1 %v2099_v29 }
  0x7c   : > { %947 = vmatmul.bf16.gmra.mxu2 %v2115_v30  ;;  %1027 = vmatmul.bf16.gmra.mxu3 %v2131_v31 }
  0x8b   : > { %792 = vmatmul.bf16.gmra.mxu0 %v2084_v32  ;;  %872 = vmatmul.bf16.gmra.mxu1 %v2100_v33 }
  0x8c   : > { %952 = vmatmul.bf16.gmra.mxu2 %v2116_v34  ;;  %1032 = vmatmul.bf16.gmra.mxu3 %v2132_v35 }
  0x9b   : > { %797 = vmatmul.bf16.gmra.mxu0 %v2085_v36  ;;  %877 = vmatmul.bf16.gmra.mxu1 %v2101_v37 }
  0x9c   : > { %957 = vmatmul.bf16.gmra.mxu2 %v2117_v38  ;;  %1037 = vmatmul.bf16.gmra.mxu3 %v2133_v39 }
  0xa8   : > { %v763_v42 = vpop.f32.mrf.mxu0  ;;  %v843_v43 = vpop.f32.mrf.mxu1 }
  0xa9   : > { %v764_v47 = vadd.f32 %v2676_v46, %v763_v42  ;;  %v844_v48 = vadd.f32 %v2676_v46, %v843_v43 }
  0xab   : > { %802 = vmatmul.bf16.gmra.mxu0 %v2086_v40  ;;  %882 = vmatmul.bf16.gmra.mxu1 %v2102_v41  ;;  %v1211_v53 = vmul.f32 0.2, %v764_v47  ;;  %v1243_v54 = vmul.f32 0.2, %v844_v48  ;;  %vm1083_vm0 = vcmp.ge.f32.partialorder %v764_v47, 0.0  ;;  %vm1115_vm1 = vcmp.ge.f32.partialorder %v844_v48, 0.0 }
  0xac   : > { %962 = vmatmul.bf16.gmra.mxu2 %v2118_v44  ;;  %1042 = vmatmul.bf16.gmra.mxu3 %v2134_v45 }
  0xad   : > { %v1339_v61 = vsel %vm1083_vm0, %v764_v47, %v1211_v53  ;;  %v1371_v62 = vsel %vm1115_vm1, %v844_v48, %v1243_v54  ;;  %v2088_v47 = vld [vmem:[%s2635_s7 + $0x50] sm:$0xff] }
  0xae   : > { %v2104_v48 = vld [vmem:[%s2635_s7 + $0xd0] sm:$0xff] }
  0xaf   : > { %v923_v49 = vpop.f32.mrf.mxu2  ;;  %v1003_v50 = vpop.f32.mrf.mxu3  ;;  %v2120_v54 = vld [vmem:[%s2635_s7 + $0x150] sm:$0xff] }
  0xb0   : > { %v765_v51 = vpop.f32.mrf.mxu0  ;;  %v845_v52 = vpop.f32.mrf.mxu1  ;;  %v924_v57 = vadd.f32 %v2676_v46, %v923_v49  ;;  %v1004_v60 = vadd.f32 %v2676_v46, %v1003_v50 }
  0xb1   : > { %v766_v55 = vadd.f32 %v2676_v46, %v765_v51  ;;  %v846_v56 = vadd.f32 %v2676_v46, %v845_v52 }
  0xb2   : > { %v1275_v3 = vmul.f32 0.2, %v924_v57  ;;  %vm1147_vm4 = vcmp.ge.f32.partialorder %v924_v57, 0.0  ;;  %v1307_v8 = vmul.f32 0.2, %v1004_v60  ;;  %vm1179_vm5 = vcmp.ge.f32.partialorder %v1004_v60, 0.0 }
  0xb3   : > { %vm1084_vm2 = vcmp.ge.f32.partialorder %v766_v55, 0.0  ;;  %v1212_v58 = vmul.f32 0.2, %v766_v55  ;;  %vm1116_vm3 = vcmp.ge.f32.partialorder %v846_v56, 0.0  ;;  %v1244_v59 = vmul.f32 0.2, %v846_v56 }
  0xb4   : > { %v1403_v17 = vsel %vm1147_vm4, %v924_v57, %v1275_v3  ;;  %v1435_v18 = vsel %vm1179_vm5, %v1004_v60, %v1307_v8 }
  0xb5   : > { %v1340_v63 = vsel %vm1084_vm2, %v766_v55, %v1212_v58  ;;  %v1372_v0 = vsel %vm1116_vm3, %v846_v56, %v1244_v59  ;;  %v2136_v55 = vld [vmem:[%s2635_s7 + $0x1d0] sm:$0xff] }
  0xb6   : > { %v2153_v1 = vpack.c.bf16 %v1340_v63, %v1339_v61  ;;  %v2233_v2 = vpack.c.bf16 %v1372_v0, %v1371_v62 }
  0xb7   : > { %v925_v4 = vpop.f32.mrf.mxu2  ;;  %v1005_v5 = vpop.f32.mrf.mxu3 }
  0xb8   : > { %2154 = vst [vmem:[%s2689_s13] sm:$0xff] %v2153_v1   ;;  %v926_v9 = vadd.f32 %v2676_v46, %v925_v4  ;;  %v1006_v10 = vadd.f32 %v2676_v46, %v1005_v5  ;;  %v768_v11 = vpop.f32.mrf.mxu0  ;;  %v848_v12 = vpop.f32.mrf.mxu1 }
  0xb9   : > { %2485 = vst [vmem:[%s2689_s13 + $0x80] sm:$0xff] %v2233_v2   ;;  %v769_v23 = vadd.f32 %v2676_v46, %v768_v11  ;;  %v849_v24 = vadd.f32 %v2676_v46, %v848_v12 }
  0xba   : > { %vm1148_vm6 = vcmp.ge.f32.partialorder %v926_v9, 0.0  ;;  %v1276_v15 = vmul.f32 0.2, %v926_v9  ;;  %vm1180_vm7 = vcmp.ge.f32.partialorder %v1006_v10, 0.0  ;;  %v1308_v16 = vmul.f32 0.2, %v1006_v10 }
  0xbb   : > { %807 = vmatmul.bf16.gmra.mxu0 %v2087_v6  ;;  %887 = vmatmul.bf16.gmra.mxu1 %v2103_v7  ;;  %v1213_v29 = vmul.f32 0.2, %v769_v23  ;;  %v1245_v30 = vmul.f32 0.2, %v849_v24  ;;  %vm1085_vm8 = vcmp.ge.f32.partialorder %v769_v23, 0.0  ;;  %vm1117_vm9 = vcmp.ge.f32.partialorder %v849_v24, 0.0 }
  0xbc   : > { %v1404_v19 = vsel %vm1148_vm6, %v926_v9, %v1276_v15  ;;  %v1436_v20 = vsel %vm1180_vm7, %v1006_v10, %v1308_v16  ;;  %967 = vmatmul.bf16.gmra.mxu2 %v2119_v13  ;;  %1047 = vmatmul.bf16.gmra.mxu3 %v2135_v14 }
  0xbd   : > { %v2313_v21 = vpack.c.bf16 %v1404_v19, %v1403_v17  ;;  %v2393_v22 = vpack.c.bf16 %v1436_v20, %v1435_v18  ;;  %v1341_v37 = vsel %vm1085_vm8, %v769_v23, %v1213_v29  ;;  %v1373_v38 = vsel %vm1117_vm9, %v849_v24, %v1245_v30  ;;  %v2089_v23 = vld [vmem:[%s2635_s7 + $0x58] sm:$0xff] }
  0xbe   : > { %v2105_v24 = vld [vmem:[%s2635_s7 + $0xd8] sm:$0xff] }
  0xbf   : > { %2501 = vst [vmem:[%s2689_s13 + $0x100] sm:$0xff] %v2313_v21   ;;  %v928_v25 = vpop.f32.mrf.mxu2  ;;  %v1008_v26 = vpop.f32.mrf.mxu3  ;;  %v2121_v30 = vld [vmem:[%s2635_s7 + $0x158] sm:$0xff] }
  0xc0   : > { %2517 = vst [vmem:[%s2689_s13 + $0x180] sm:$0xff] %v2393_v22   ;;  %v770_v27 = vpop.f32.mrf.mxu0  ;;  %v850_v28 = vpop.f32.mrf.mxu1  ;;  %v929_v33 = vadd.f32 %v2676_v46, %v928_v25  ;;  %v1009_v36 = vadd.f32 %v2676_v46, %v1008_v26 }
  0xc1   : > { %v771_v31 = vadd.f32 %v2676_v46, %v770_v27  ;;  %v851_v32 = vadd.f32 %v2676_v46, %v850_v28 }
  0xc2   : > { %v1277_v43 = vmul.f32 0.2, %v929_v33  ;;  %vm1149_vm12 = vcmp.ge.f32.partialorder %v929_v33, 0.0  ;;  %v1309_v49 = vmul.f32 0.2, %v1009_v36  ;;  %vm1181_vm13 = vcmp.ge.f32.partialorder %v1009_v36, 0.0 }
  0xc3   : > { %vm1086_vm10 = vcmp.ge.f32.partialorder %v771_v31, 0.0  ;;  %v1214_v34 = vmul.f32 0.2, %v771_v31  ;;  %vm1118_vm11 = vcmp.ge.f32.partialorder %v851_v32, 0.0  ;;  %v1246_v35 = vmul.f32 0.2, %v851_v32 }
  0xc4   : > { %v1405_v58 = vsel %vm1149_vm12, %v929_v33, %v1277_v43  ;;  %v1437_v59 = vsel %vm1181_vm13, %v1009_v36, %v1309_v49 }
  0xc5   : > { %v1342_v39 = vsel %vm1086_vm10, %v771_v31, %v1214_v34  ;;  %v1374_v40 = vsel %vm1118_vm11, %v851_v32, %v1246_v35  ;;  %v2137_v31 = vld [vmem:[%s2635_s7 + $0x1d8] sm:$0xff] }
  0xc6   : > { %v2158_v41 = vpack.c.bf16 %v1342_v39, %v1341_v37  ;;  %v2238_v42 = vpack.c.bf16 %v1374_v40, %v1373_v38 }
  0xc7   : > { %v930_v44 = vpop.f32.mrf.mxu2  ;;  %v1010_v45 = vpop.f32.mrf.mxu3 }
  0xc8   : > { %2470 = vst [vmem:[%s2689_s13 + $0x8] sm:$0xff] %v2158_v41   ;;  %v931_v50 = vadd.f32 %v2676_v46, %v930_v44  ;;  %v1011_v51 = vadd.f32 %v2676_v46, %v1010_v45  ;;  %v773_v52 = vpop.f32.mrf.mxu0  ;;  %v853_v53 = vpop.f32.mrf.mxu1 }
  0xc9   : > { %2486 = vst [vmem:[%s2689_s13 + $0x88] sm:$0xff] %v2238_v42   ;;  %v774_v0 = vadd.f32 %v2676_v46, %v773_v52  ;;  %v854_v1 = vadd.f32 %v2676_v46, %v853_v53 }
  0xca   : > { %vm1150_vm14 = vcmp.ge.f32.partialorder %v931_v50, 0.0  ;;  %v1278_v56 = vmul.f32 0.2, %v931_v50  ;;  %vm1182_vm15 = vcmp.ge.f32.partialorder %v1011_v51, 0.0  ;;  %v1310_v57 = vmul.f32 0.2, %v1011_v51 }
  0xcb   : > { %812 = vmatmul.bf16.gmra.mxu0 %v2088_v47  ;;  %892 = vmatmul.bf16.gmra.mxu1 %v2104_v48  ;;  %v1215_v6 = vmul.f32 0.2, %v774_v0  ;;  %v1247_v7 = vmul.f32 0.2, %v854_v1  ;;  %vm1087_vm0 = vcmp.ge.f32.partialorder %v774_v0, 0.0  ;;  %vm1119_vm1 = vcmp.ge.f32.partialorder %v854_v1, 0.0 }
  0xcc   : > { %v1406_v60 = vsel %vm1150_vm14, %v931_v50, %v1278_v56  ;;  %v1438_v61 = vsel %vm1182_vm15, %v1011_v51, %v1310_v57  ;;  %972 = vmatmul.bf16.gmra.mxu2 %v2120_v54  ;;  %1052 = vmatmul.bf16.gmra.mxu3 %v2136_v55 }
  0xcd   : > { %v2318_v62 = vpack.c.bf16 %v1406_v60, %v1405_v58  ;;  %v2398_v63 = vpack.c.bf16 %v1438_v61, %v1437_v59  ;;  %v1343_v14 = vsel %vm1087_vm0, %v774_v0, %v1215_v6  ;;  %v1375_v15 = vsel %vm1119_vm1, %v854_v1, %v1247_v7  ;;  %v2090_v0 = vld [vmem:[%s2635_s7 + $0x60] sm:$0xff] }
  0xce   : > { %v2106_v1 = vld [vmem:[%s2635_s7 + $0xe0] sm:$0xff] }
  0xcf   : > { %2502 = vst [vmem:[%s2689_s13 + $0x108] sm:$0xff] %v2318_v62   ;;  %v933_v2 = vpop.f32.mrf.mxu2  ;;  %v1013_v3 = vpop.f32.mrf.mxu3  ;;  %v2122_v7 = vld [vmem:[%s2635_s7 + $0x160] sm:$0xff] }
  0xd0   : > { %2518 = vst [vmem:[%s2689_s13 + $0x188] sm:$0xff] %v2398_v63   ;;  %v775_v4 = vpop.f32.mrf.mxu0  ;;  %v855_v5 = vpop.f32.mrf.mxu1  ;;  %v934_v10 = vadd.f32 %v2676_v46, %v933_v2  ;;  %v1014_v13 = vadd.f32 %v2676_v46, %v1013_v3 }
  0xd1   : > { %v776_v8 = vadd.f32 %v2676_v46, %v775_v4  ;;  %v856_v9 = vadd.f32 %v2676_v46, %v855_v5 }
  0xd2   : > { %v1279_v20 = vmul.f32 0.2, %v934_v10  ;;  %vm1151_vm4 = vcmp.ge.f32.partialorder %v934_v10, 0.0  ;;  %v1311_v25 = vmul.f32 0.2, %v1014_v13  ;;  %vm1183_vm5 = vcmp.ge.f32.partialorder %v1014_v13, 0.0 }
  0xd3   : > { %vm1088_vm2 = vcmp.ge.f32.partialorder %v776_v8, 0.0  ;;  %v1216_v11 = vmul.f32 0.2, %v776_v8  ;;  %vm1120_vm3 = vcmp.ge.f32.partialorder %v856_v9, 0.0  ;;  %v1248_v12 = vmul.f32 0.2, %v856_v9 }
  0xd4   : > { %v1407_v34 = vsel %vm1151_vm4, %v934_v10, %v1279_v20  ;;  %v1439_v35 = vsel %vm1183_vm5, %v1014_v13, %v1311_v25 }
  0xd5   : > { %v1344_v16 = vsel %vm1088_vm2, %v776_v8, %v1216_v11  ;;  %v1376_v17 = vsel %vm1120_vm3, %v856_v9, %v1248_v12  ;;  %v2138_v8 = vld [vmem:[%s2635_s7 + $0x1e0] sm:$0xff] }
  0xd6   : > { %v2163_v18 = vpack.c.bf16 %v1344_v16, %v1343_v14  ;;  %v2243_v19 = vpack.c.bf16 %v1376_v17, %v1375_v15 }
  0xd7   : > { %v935_v21 = vpop.f32.mrf.mxu2  ;;  %v1015_v22 = vpop.f32.mrf.mxu3 }
  0xd8   : > { %2471 = vst [vmem:[%s2689_s13 + $0x10] sm:$0xff] %v2163_v18   ;;  %v936_v26 = vadd.f32 %v2676_v46, %v935_v21  ;;  %v1016_v27 = vadd.f32 %v2676_v46, %v1015_v22  ;;  %v778_v28 = vpop.f32.mrf.mxu0  ;;  %v858_v29 = vpop.f32.mrf.mxu1 }
  0xd9   : > { %2487 = vst [vmem:[%s2689_s13 + $0x90] sm:$0xff] %v2243_v19   ;;  %v779_v40 = vadd.f32 %v2676_v46, %v778_v28  ;;  %v859_v41 = vadd.f32 %v2676_v46, %v858_v29 }
  0xda   : > { %vm1152_vm6 = vcmp.ge.f32.partialorder %v936_v26, 0.0  ;;  %v1280_v32 = vmul.f32 0.2, %v936_v26  ;;  %vm1184_vm7 = vcmp.ge.f32.partialorder %v1016_v27, 0.0  ;;  %v1312_v33 = vmul.f32 0.2, %v1016_v27 }
  0xdb   : > { %817 = vmatmul.bf16.gmra.mxu0 %v2089_v23  ;;  %897 = vmatmul.bf16.gmra.mxu1 %v2105_v24  ;;  %v1217_v47 = vmul.f32 0.2, %v779_v40  ;;  %v1249_v48 = vmul.f32 0.2, %v859_v41  ;;  %vm1089_vm8 = vcmp.ge.f32.partialorder %v779_v40, 0.0  ;;  %vm1121_vm9 = vcmp.ge.f32.partialorder %v859_v41, 0.0 }
  0xdc   : > { %v1408_v36 = vsel %vm1152_vm6, %v936_v26, %v1280_v32  ;;  %v1440_v37 = vsel %vm1184_vm7, %v1016_v27, %v1312_v33  ;;  %977 = vmatmul.bf16.gmra.mxu2 %v2121_v30  ;;  %1057 = vmatmul.bf16.gmra.mxu3 %v2137_v31 }
  0xdd   : > { %v2323_v38 = vpack.c.bf16 %v1408_v36, %v1407_v34  ;;  %v2403_v39 = vpack.c.bf16 %v1440_v37, %v1439_v35  ;;  %v1345_v55 = vsel %vm1089_vm8, %v779_v40, %v1217_v47  ;;  %v1377_v56 = vsel %vm1121_vm9, %v859_v41, %v1249_v48  ;;  %v2091_v40 = vld [vmem:[%s2635_s7 + $0x68] sm:$0xff] }
  0xde   : > { %v2107_v41 = vld [vmem:[%s2635_s7 + $0xe8] sm:$0xff] }
  0xdf   : > { %2503 = vst [vmem:[%s2689_s13 + $0x110] sm:$0xff] %v2323_v38   ;;  %v938_v42 = vpop.f32.mrf.mxu2  ;;  %v1018_v43 = vpop.f32.mrf.mxu3  ;;  %v2123_v48 = vld [vmem:[%s2635_s7 + $0x168] sm:$0xff] }
  0xe0   : > { %2519 = vst [vmem:[%s2689_s13 + $0x190] sm:$0xff] %v2403_v39   ;;  %v780_v44 = vpop.f32.mrf.mxu0  ;;  %v860_v45 = vpop.f32.mrf.mxu1  ;;  %v939_v51 = vadd.f32 %v2676_v46, %v938_v42  ;;  %v1019_v54 = vadd.f32 %v2676_v46, %v1018_v43 }
  0xe1   : > { %v781_v49 = vadd.f32 %v2676_v46, %v780_v44  ;;  %v861_v50 = vadd.f32 %v2676_v46, %v860_v45 }
  0xe2   : > { %v1281_v61 = vmul.f32 0.2, %v939_v51  ;;  %vm1153_vm12 = vcmp.ge.f32.partialorder %v939_v51, 0.0  ;;  %v1313_v2 = vmul.f32 0.2, %v1019_v54  ;;  %vm1185_vm13 = vcmp.ge.f32.partialorder %v1019_v54, 0.0 }
  0xe3   : > { %vm1090_vm10 = vcmp.ge.f32.partialorder %v781_v49, 0.0  ;;  %v1218_v52 = vmul.f32 0.2, %v781_v49  ;;  %vm1122_vm11 = vcmp.ge.f32.partialorder %v861_v50, 0.0  ;;  %v1250_v53 = vmul.f32 0.2, %v861_v50 }
  0xe4   : > { %v1409_v11 = vsel %vm1153_vm12, %v939_v51, %v1281_v61  ;;  %v1441_v12 = vsel %vm1185_vm13, %v1019_v54, %v1313_v2 }
  0xe5   : > { %v1346_v57 = vsel %vm1090_vm10, %v781_v49, %v1218_v52  ;;  %v1378_v58 = vsel %vm1122_vm11, %v861_v50, %v1250_v53  ;;  %v2139_v49 = vld [vmem:[%s2635_s7 + $0x1e8] sm:$0xff] }
  0xe6   : > { %v2168_v59 = vpack.c.bf16 %v1346_v57, %v1345_v55  ;;  %v2248_v60 = vpack.c.bf16 %v1378_v58, %v1377_v56 }
  0xe7   : > { %v940_v62 = vpop.f32.mrf.mxu2  ;;  %v1020_v63 = vpop.f32.mrf.mxu3 }
  0xe8   : > { %2472 = vst [vmem:[%s2689_s13 + $0x18] sm:$0xff] %v2168_v59   ;;  %v941_v3 = vadd.f32 %v2676_v46, %v940_v62  ;;  %v1021_v4 = vadd.f32 %v2676_v46, %v1020_v63  ;;  %v783_v5 = vpop.f32.mrf.mxu0  ;;  %v863_v6 = vpop.f32.mrf.mxu1 }
  0xe9   : > { %2488 = vst [vmem:[%s2689_s13 + $0x98] sm:$0xff] %v2248_v60   ;;  %v784_v17 = vadd.f32 %v2676_v46, %v783_v5  ;;  %v864_v18 = vadd.f32 %v2676_v46, %v863_v6 }
  0xea   : > { %vm1154_vm14 = vcmp.ge.f32.partialorder %v941_v3, 0.0  ;;  %v1282_v9 = vmul.f32 0.2, %v941_v3  ;;  %vm1186_vm15 = vcmp.ge.f32.partialorder %v1021_v4, 0.0  ;;  %v1314_v10 = vmul.f32 0.2, %v1021_v4 }
  0xeb   : > { %822 = vmatmul.bf16.gmra.mxu0 %v2090_v0  ;;  %902 = vmatmul.bf16.gmra.mxu1 %v2106_v1  ;;  %v1219_v23 = vmul.f32 0.2, %v784_v17  ;;  %v1251_v24 = vmul.f32 0.2, %v864_v18  ;;  %vm1091_vm0 = vcmp.ge.f32.partialorder %v784_v17, 0.0  ;;  %vm1123_vm1 = vcmp.ge.f32.partialorder %v864_v18, 0.0 }
  0xec   : > { %v1410_v13 = vsel %vm1154_vm14, %v941_v3, %v1282_v9  ;;  %v1442_v14 = vsel %vm1186_vm15, %v1021_v4, %v1314_v10  ;;  %982 = vmatmul.bf16.gmra.mxu2 %v2122_v7  ;;  %1062 = vmatmul.bf16.gmra.mxu3 %v2138_v8 }
  0xed   : > { %v2328_v15 = vpack.c.bf16 %v1410_v13, %v1409_v11  ;;  %v2408_v16 = vpack.c.bf16 %v1442_v14, %v1441_v12  ;;  %v1347_v31 = vsel %vm1091_vm0, %v784_v17, %v1219_v23  ;;  %v1379_v32 = vsel %vm1123_vm1, %v864_v18, %v1251_v24  ;;  %v2092_v17 = vld [vmem:[%s2635_s7 + $0x70] sm:$0xff] }
  0xee   : > { %v2108_v18 = vld [vmem:[%s2635_s7 + $0xf0] sm:$0xff] }
  0xef   : > { %2504 = vst [vmem:[%s2689_s13 + $0x118] sm:$0xff] %v2328_v15   ;;  %v943_v19 = vpop.f32.mrf.mxu2  ;;  %v1023_v20 = vpop.f32.mrf.mxu3  ;;  %v2124_v24 = vld [vmem:[%s2635_s7 + $0x170] sm:$0xff] }
  0xf0   : > { %2520 = vst [vmem:[%s2689_s13 + $0x198] sm:$0xff] %v2408_v16   ;;  %v785_v21 = vpop.f32.mrf.mxu0  ;;  %v865_v22 = vpop.f32.mrf.mxu1  ;;  %v944_v27 = vadd.f32 %v2676_v46, %v943_v19  ;;  %v1024_v30 = vadd.f32 %v2676_v46, %v1023_v20 }
  0xf1   : > { %v786_v25 = vadd.f32 %v2676_v46, %v785_v21  ;;  %v866_v26 = vadd.f32 %v2676_v46, %v865_v22 }
  0xf2   : > { %v1283_v37 = vmul.f32 0.2, %v944_v27  ;;  %vm1155_vm4 = vcmp.ge.f32.partialorder %v944_v27, 0.0  ;;  %v1315_v42 = vmul.f32 0.2, %v1024_v30  ;;  %vm1187_vm5 = vcmp.ge.f32.partialorder %v1024_v30, 0.0 }
  0xf3   : > { %vm1092_vm2 = vcmp.ge.f32.partialorder %v786_v25, 0.0  ;;  %v1220_v28 = vmul.f32 0.2, %v786_v25  ;;  %vm1124_vm3 = vcmp.ge.f32.partialorder %v866_v26, 0.0  ;;  %v1252_v29 = vmul.f32 0.2, %v866_v26 }
  0xf4   : > { %v1411_v52 = vsel %vm1155_vm4, %v944_v27, %v1283_v37  ;;  %v1443_v53 = vsel %vm1187_vm5, %v1024_v30, %v1315_v42 }
  0xf5   : > { %v1348_v33 = vsel %vm1092_vm2, %v786_v25, %v1220_v28  ;;  %v1380_v34 = vsel %vm1124_vm3, %v866_v26, %v1252_v29  ;;  %v2140_v25 = vld [vmem:[%s2635_s7 + $0x1f0] sm:$0xff] }
  0xf6   : > { %v2173_v35 = vpack.c.bf16 %v1348_v33, %v1347_v31  ;;  %v2253_v36 = vpack.c.bf16 %v1380_v34, %v1379_v32 }
  0xf7   : > { %v945_v38 = vpop.f32.mrf.mxu2  ;;  %v1025_v39 = vpop.f32.mrf.mxu3 }
  0xf8   : > { %2473 = vst [vmem:[%s2689_s13 + $0x20] sm:$0xff] %v2173_v35   ;;  %v946_v43 = vadd.f32 %v2676_v46, %v945_v38  ;;  %v1026_v44 = vadd.f32 %v2676_v46, %v1025_v39  ;;  %v788_v45 = vpop.f32.mrf.mxu0  ;;  %v868_v47 = vpop.f32.mrf.mxu1 }
  0xf9   : > { %2489 = vst [vmem:[%s2689_s13 + $0xa0] sm:$0xff] %v2253_v36   ;;  %v789_v58 = vadd.f32 %v2676_v46, %v788_v45  ;;  %v869_v59 = vadd.f32 %v2676_v46, %v868_v47 }
  0xfa   : > { %vm1156_vm6 = vcmp.ge.f32.partialorder %v946_v43, 0.0  ;;  %v1284_v50 = vmul.f32 0.2, %v946_v43  ;;  %vm1188_vm7 = vcmp.ge.f32.partialorder %v1026_v44, 0.0  ;;  %v1316_v51 = vmul.f32 0.2, %v1026_v44 }
  0xfb   : > { %827 = vmatmul.bf16.gmra.mxu0 %v2091_v40  ;;  %907 = vmatmul.bf16.gmra.mxu1 %v2107_v41  ;;  %v1221_v0 = vmul.f32 0.2, %v789_v58  ;;  %v1253_v1 = vmul.f32 0.2, %v869_v59  ;;  %vm1093_vm8 = vcmp.ge.f32.partialorder %v789_v58, 0.0  ;;  %vm1125_vm9 = vcmp.ge.f32.partialorder %v869_v59, 0.0 }
  0xfc   : > { %v1412_v54 = vsel %vm1156_vm6, %v946_v43, %v1284_v50  ;;  %v1444_v55 = vsel %vm1188_vm7, %v1026_v44, %v1316_v51  ;;  %987 = vmatmul.bf16.gmra.mxu2 %v2123_v48  ;;  %1067 = vmatmul.bf16.gmra.mxu3 %v2139_v49 }
  0xfd   : > { %v2333_v56 = vpack.c.bf16 %v1412_v54, %v1411_v52  ;;  %v2413_v57 = vpack.c.bf16 %v1444_v55, %v1443_v53  ;;  %v1349_v8 = vsel %vm1093_vm8, %v789_v58, %v1221_v0  ;;  %v1381_v9 = vsel %vm1125_vm9, %v869_v59, %v1253_v1  ;;  %v2093_v58 = vld [vmem:[%s2635_s7 + $0x78] sm:$0xff] }
  0xfe   : > { %v2109_v59 = vld [vmem:[%s2635_s7 + $0xf8] sm:$0xff] }
  0xff   : > { %2505 = vst [vmem:[%s2689_s13 + $0x120] sm:$0xff] %v2333_v56   ;;  %v948_v60 = vpop.f32.mrf.mxu2  ;;  %v1028_v61 = vpop.f32.mrf.mxu3  ;;  %v2125_v1 = vld [vmem:[%s2635_s7 + $0x178] sm:$0xff] }
 0x100   : > { %2521 = vst [vmem:[%s2689_s13 + $0x1a0] sm:$0xff] %v2413_v57   ;;  %v790_v62 = vpop.f32.mrf.mxu0  ;;  %v870_v63 = vpop.f32.mrf.mxu1  ;;  %v949_v4 = vadd.f32 %v2676_v46, %v948_v60  ;;  %v1029_v7 = vadd.f32 %v2676_v46, %v1028_v61 }
 0x101   : > { %v791_v2 = vadd.f32 %v2676_v46, %v790_v62  ;;  %v871_v3 = vadd.f32 %v2676_v46, %v870_v63 }
 0x102   : > { %v1285_v14 = vmul.f32 0.2, %v949_v4  ;;  %vm1157_vm12 = vcmp.ge.f32.partialorder %v949_v4, 0.0  ;;  %v1317_v19 = vmul.f32 0.2, %v1029_v7  ;;  %vm1189_vm13 = vcmp.ge.f32.partialorder %v1029_v7, 0.0 }
 0x103   : > { %vm1094_vm10 = vcmp.ge.f32.partialorder %v791_v2, 0.0  ;;  %v1222_v5 = vmul.f32 0.2, %v791_v2  ;;  %vm1126_vm11 = vcmp.ge.f32.partialorder %v871_v3, 0.0  ;;  %v1254_v6 = vmul.f32 0.2, %v871_v3 }
 0x104   : > { %v1413_v28 = vsel %vm1157_vm12, %v949_v4, %v1285_v14  ;;  %v1445_v29 = vsel %vm1189_vm13, %v1029_v7, %v1317_v19 }
 0x105   : > { %v1350_v10 = vsel %vm1094_vm10, %v791_v2, %v1222_v5  ;;  %v1382_v11 = vsel %vm1126_vm11, %v871_v3, %v1254_v6  ;;  %v2141_v2 = vld [vmem:[%s2635_s7 + $0x1f8] sm:$0xff] }
 0x106   : > { %v2178_v12 = vpack.c.bf16 %v1350_v10, %v1349_v8  ;;  %v2258_v13 = vpack.c.bf16 %v1382_v11, %v1381_v9 }
 0x107   : > { %v950_v15 = vpop.f32.mrf.mxu2  ;;  %v1030_v16 = vpop.f32.mrf.mxu3 }
 0x108   : > { %2474 = vst [vmem:[%s2689_s13 + $0x28] sm:$0xff] %v2178_v12   ;;  %v951_v20 = vadd.f32 %v2676_v46, %v950_v15  ;;  %v1031_v21 = vadd.f32 %v2676_v46, %v1030_v16  ;;  %v793_v22 = vpop.f32.mrf.mxu0  ;;  %v873_v23 = vpop.f32.mrf.mxu1 }
 0x109   : > { %2490 = vst [vmem:[%s2689_s13 + $0xa8] sm:$0xff] %v2258_v13   ;;  %v794_v34 = vadd.f32 %v2676_v46, %v793_v22  ;;  %v874_v35 = vadd.f32 %v2676_v46, %v873_v23 }
 0x10a   : > { %vm1158_vm14 = vcmp.ge.f32.partialorder %v951_v20, 0.0  ;;  %v1286_v26 = vmul.f32 0.2, %v951_v20  ;;  %vm1190_vm15 = vcmp.ge.f32.partialorder %v1031_v21, 0.0  ;;  %v1318_v27 = vmul.f32 0.2, %v1031_v21 }
 0x10b   : > { %832 = vmatmul.bf16.gmra.mxu0 %v2092_v17  ;;  %912 = vmatmul.bf16.gmra.mxu1 %v2108_v18  ;;  %v1223_v40 = vmul.f32 0.2, %v794_v34  ;;  %v1255_v41 = vmul.f32 0.2, %v874_v35  ;;  %vm1095_vm0 = vcmp.ge.f32.partialorder %v794_v34, 0.0  ;;  %vm1127_vm1 = vcmp.ge.f32.partialorder %v874_v35, 0.0 }
 0x10c   : > { %v1414_v30 = vsel %vm1158_vm14, %v951_v20, %v1286_v26  ;;  %v1446_v31 = vsel %vm1190_vm15, %v1031_v21, %v1318_v27  ;;  %992 = vmatmul.bf16.gmra.mxu2 %v2124_v24  ;;  %1072 = vmatmul.bf16.gmra.mxu3 %v2140_v25 }
 0x10d   : > { %v2338_v32 = vpack.c.bf16 %v1414_v30, %v1413_v28  ;;  %v2418_v33 = vpack.c.bf16 %v1446_v31, %v1445_v29  ;;  %v1351_v49 = vsel %vm1095_vm0, %v794_v34, %v1223_v40  ;;  %v1383_v50 = vsel %vm1127_vm1, %v874_v35, %v1255_v41 }
 0x10f   : > { %2506 = vst [vmem:[%s2689_s13 + $0x128] sm:$0xff] %v2338_v32   ;;  %v953_v36 = vpop.f32.mrf.mxu2  ;;  %v1033_v37 = vpop.f32.mrf.mxu3 }
 0x110   : > { %2522 = vst [vmem:[%s2689_s13 + $0x1a8] sm:$0xff] %v2418_v33   ;;  %v795_v38 = vpop.f32.mrf.mxu0  ;;  %v875_v39 = vpop.f32.mrf.mxu1  ;;  %v954_v44 = vadd.f32 %v2676_v46, %v953_v36  ;;  %v1034_v48 = vadd.f32 %v2676_v46, %v1033_v37 }
 0x111   : > { %v796_v42 = vadd.f32 %v2676_v46, %v795_v38  ;;  %v876_v43 = vadd.f32 %v2676_v46, %v875_v39 }
 0x112   : > { %v1287_v55 = vmul.f32 0.2, %v954_v44  ;;  %vm1159_vm4 = vcmp.ge.f32.partialorder %v954_v44, 0.0  ;;  %v1319_v60 = vmul.f32 0.2, %v1034_v48  ;;  %vm1191_vm5 = vcmp.ge.f32.partialorder %v1034_v48, 0.0 }
 0x113   : > { %vm1096_vm2 = vcmp.ge.f32.partialorder %v796_v42, 0.0  ;;  %v1224_v45 = vmul.f32 0.2, %v796_v42  ;;  %vm1128_vm3 = vcmp.ge.f32.partialorder %v876_v43, 0.0  ;;  %v1256_v47 = vmul.f32 0.2, %v876_v43 }
 0x114   : > { %v1415_v5 = vsel %vm1159_vm4, %v954_v44, %v1287_v55  ;;  %v1447_v6 = vsel %vm1191_vm5, %v1034_v48, %v1319_v60 }
 0x115   : > { %v1352_v51 = vsel %vm1096_vm2, %v796_v42, %v1224_v45  ;;  %v1384_v52 = vsel %vm1128_vm3, %v876_v43, %v1256_v47 }
 0x116   : > { %v2183_v53 = vpack.c.bf16 %v1352_v51, %v1351_v49  ;;  %v2263_v54 = vpack.c.bf16 %v1384_v52, %v1383_v50 }
 0x117   : > { %v955_v56 = vpop.f32.mrf.mxu2  ;;  %v1035_v57 = vpop.f32.mrf.mxu3 }
 0x118   : > { %2475 = vst [vmem:[%s2689_s13 + $0x30] sm:$0xff] %v2183_v53   ;;  %v956_v61 = vadd.f32 %v2676_v46, %v955_v56  ;;  %v1036_v62 = vadd.f32 %v2676_v46, %v1035_v57  ;;  %v798_v63 = vpop.f32.mrf.mxu0  ;;  %v878_v0 = vpop.f32.mrf.mxu1 }
 0x119   : > { %2491 = vst [vmem:[%s2689_s13 + $0xb0] sm:$0xff] %v2263_v54   ;;  %v799_v11 = vadd.f32 %v2676_v46, %v798_v63  ;;  %v879_v12 = vadd.f32 %v2676_v46, %v878_v0 }
 0x11a   : > { %vm1160_vm6 = vcmp.ge.f32.partialorder %v956_v61, 0.0  ;;  %v1288_v3 = vmul.f32 0.2, %v956_v61  ;;  %vm1192_vm7 = vcmp.ge.f32.partialorder %v1036_v62, 0.0  ;;  %v1320_v4 = vmul.f32 0.2, %v1036_v62 }
 0x11b   : > { %837 = vmatmul.bf16.gmra.mxu0 %v2093_v58  ;;  %917 = vmatmul.bf16.gmra.mxu1 %v2109_v59  ;;  %v1225_v17 = vmul.f32 0.2, %v799_v11  ;;  %v1257_v18 = vmul.f32 0.2, %v879_v12  ;;  %vm1097_vm8 = vcmp.ge.f32.partialorder %v799_v11, 0.0  ;;  %vm1129_vm9 = vcmp.ge.f32.partialorder %v879_v12, 0.0 }
 0x11c   : > { %v1416_v7 = vsel %vm1160_vm6, %v956_v61, %v1288_v3  ;;  %v1448_v8 = vsel %vm1192_vm7, %v1036_v62, %v1320_v4  ;;  %997 = vmatmul.bf16.gmra.mxu2 %v2125_v1  ;;  %1077 = vmatmul.bf16.gmra.mxu3 %v2141_v2 }
 0x11d   : > { %v2343_v9 = vpack.c.bf16 %v1416_v7, %v1415_v5  ;;  %v2423_v10 = vpack.c.bf16 %v1448_v8, %v1447_v6  ;;  %v1353_v25 = vsel %vm1097_vm8, %v799_v11, %v1225_v17  ;;  %v1385_v26 = vsel %vm1129_vm9, %v879_v12, %v1257_v18 }
 0x11f   : > { %2507 = vst [vmem:[%s2689_s13 + $0x130] sm:$0xff] %v2343_v9   ;;  %v958_v13 = vpop.f32.mrf.mxu2  ;;  %v1038_v14 = vpop.f32.mrf.mxu3 }
 0x120   : > { %2523 = vst [vmem:[%s2689_s13 + $0x1b0] sm:$0xff] %v2423_v10   ;;  %v800_v15 = vpop.f32.mrf.mxu0  ;;  %v880_v16 = vpop.f32.mrf.mxu1  ;;  %v959_v23 = vadd.f32 %v2676_v46, %v958_v13  ;;  %v1039_v24 = vadd.f32 %v2676_v46, %v1038_v14 }
 0x121   : > { %v801_v19 = vadd.f32 %v2676_v46, %v800_v15  ;;  %v881_v20 = vadd.f32 %v2676_v46, %v880_v16 }
 0x122   : > { %v1289_v33 = vmul.f32 0.2, %v959_v23  ;;  %v1321_v34 = vmul.f32 0.2, %v1039_v24  ;;  %vm1161_vm12 = vcmp.ge.f32.partialorder %v959_v23, 0.0  ;;  %vm1193_vm13 = vcmp.ge.f32.partialorder %v1039_v24, 0.0 }
 0x123   : > { %vm1098_vm10 = vcmp.ge.f32.partialorder %v801_v19, 0.0  ;;  %v1226_v21 = vmul.f32 0.2, %v801_v19  ;;  %vm1130_vm11 = vcmp.ge.f32.partialorder %v881_v20, 0.0  ;;  %v1258_v22 = vmul.f32 0.2, %v881_v20 }
 0x124   : > { %v1417_v41 = vsel %vm1161_vm12, %v959_v23, %v1289_v33  ;;  %v1449_v42 = vsel %vm1193_vm13, %v1039_v24, %v1321_v34 }
 0x125   : > { %v1354_v27 = vsel %vm1098_vm10, %v801_v19, %v1226_v21  ;;  %v1386_v28 = vsel %vm1130_vm11, %v881_v20, %v1258_v22 }
 0x126   : > { %v2188_v29 = vpack.c.bf16 %v1354_v27, %v1353_v25  ;;  %v2268_v30 = vpack.c.bf16 %v1386_v28, %v1385_v26 }
 0x127   : > { %v960_v31 = vpop.f32.mrf.mxu2  ;;  %v1040_v32 = vpop.f32.mrf.mxu3 }
 0x128   : > { %2476 = vst [vmem:[%s2689_s13 + $0x38] sm:$0xff] %v2188_v29   ;;  %v961_v35 = vadd.f32 %v2676_v46, %v960_v31  ;;  %v1041_v36 = vadd.f32 %v2676_v46, %v1040_v32  ;;  %v803_v37 = vpop.f32.mrf.mxu0  ;;  %v883_v38 = vpop.f32.mrf.mxu1 }
 0x129   : > { %2492 = vst [vmem:[%s2689_s13 + $0xb8] sm:$0xff] %v2268_v30   ;;  %v804_v48 = vadd.f32 %v2676_v46, %v803_v37  ;;  %v884_v49 = vadd.f32 %v2676_v46, %v883_v38 }
 0x12a   : > { %vm1162_vm14 = vcmp.ge.f32.partialorder %v961_v35, 0.0  ;;  %v1290_v39 = vmul.f32 0.2, %v961_v35  ;;  %vm1194_vm15 = vcmp.ge.f32.partialorder %v1041_v36, 0.0  ;;  %v1322_v40 = vmul.f32 0.2, %v1041_v36 }
 0x12b   : > { %v1227_v54 = vmul.f32 0.2, %v804_v48  ;;  %v1259_v55 = vmul.f32 0.2, %v884_v49  ;;  %vm1099_vm0 = vcmp.ge.f32.partialorder %v804_v48, 0.0  ;;  %vm1131_vm1 = vcmp.ge.f32.partialorder %v884_v49, 0.0 }
 0x12c   : > { %v1418_v43 = vsel %vm1162_vm14, %v961_v35, %v1290_v39  ;;  %v1450_v44 = vsel %vm1194_vm15, %v1041_v36, %v1322_v40 }
 0x12d   : > { %v2348_v45 = vpack.c.bf16 %v1418_v43, %v1417_v41  ;;  %v2428_v47 = vpack.c.bf16 %v1450_v44, %v1449_v42  ;;  %v1355_v62 = vsel %vm1099_vm0, %v804_v48, %v1227_v54  ;;  %v1387_v63 = vsel %vm1131_vm1, %v884_v49, %v1259_v55  ;;  %v2831_v44 = vld [vmem:[%s2915_s2] ss:$0 sm:$0xff] }
 0x12f   : > { %2508 = vst [vmem:[%s2689_s13 + $0x138] sm:$0xff] %v2348_v45   ;;  %v963_v50 = vpop.f32.mrf.mxu2  ;;  %v1043_v51 = vpop.f32.mrf.mxu3 }
 0x130   : > { %2524 = vst [vmem:[%s2689_s13 + $0x1b8] sm:$0xff] %v2428_v47   ;;  %v805_v52 = vpop.f32.mrf.mxu0  ;;  %v885_v53 = vpop.f32.mrf.mxu1  ;;  %v964_v60 = vadd.f32 %v2676_v46, %v963_v50  ;;  %v1044_v61 = vadd.f32 %v2676_v46, %v1043_v51 }
 0x131   : > { %v806_v56 = vadd.f32 %v2676_v46, %v805_v52  ;;  %v886_v57 = vadd.f32 %v2676_v46, %v885_v53 }
 0x132   : > { %v1291_v6 = vmul.f32 0.2, %v964_v60  ;;  %v1323_v7 = vmul.f32 0.2, %v1044_v61  ;;  %vm1163_vm4 = vcmp.ge.f32.partialorder %v964_v60, 0.0  ;;  %vm1195_vm5 = vcmp.ge.f32.partialorder %v1044_v61, 0.0 }
 0x133   : > { %vm1100_vm2 = vcmp.ge.f32.partialorder %v806_v56, 0.0  ;;  %v1228_v58 = vmul.f32 0.2, %v806_v56  ;;  %vm1132_vm3 = vcmp.ge.f32.partialorder %v886_v57, 0.0  ;;  %v1260_v59 = vmul.f32 0.2, %v886_v57 }
 0x134   : > { %v1419_v14 = vsel %vm1163_vm4, %v964_v60, %v1291_v6  ;;  %v1451_v15 = vsel %vm1195_vm5, %v1044_v61, %v1323_v7 }
 0x135   : > { %v1356_v0 = vsel %vm1100_vm2, %v806_v56, %v1228_v58  ;;  %v1388_v1 = vsel %vm1132_vm3, %v886_v57, %v1260_v59 }
 0x136   : > { %v2193_v2 = vpack.c.bf16 %v1356_v0, %v1355_v62  ;;  %v2273_v3 = vpack.c.bf16 %v1388_v1, %v1387_v63 }
 0x137   : > { %v965_v4 = vpop.f32.mrf.mxu2  ;;  %v1045_v5 = vpop.f32.mrf.mxu3 }
 0x138   : > { %2477 = vst [vmem:[%s2689_s13 + $0x40] sm:$0xff] %v2193_v2   ;;  %v966_v8 = vadd.f32 %v2676_v46, %v965_v4  ;;  %v1046_v9 = vadd.f32 %v2676_v46, %v1045_v5  ;;  %v808_v10 = vpop.f32.mrf.mxu0  ;;  %v888_v11 = vpop.f32.mrf.mxu1 }
 0x139   : > { %2493 = vst [vmem:[%s2689_s13 + $0xc0] sm:$0xff] %v2273_v3   ;;  %v809_v20 = vadd.f32 %v2676_v46, %v808_v10  ;;  %v889_v21 = vadd.f32 %v2676_v46, %v888_v11 }
 0x13a   : > { %vm1164_vm6 = vcmp.ge.f32.partialorder %v966_v8, 0.0  ;;  %v1292_v12 = vmul.f32 0.2, %v966_v8  ;;  %vm1196_vm7 = vcmp.ge.f32.partialorder %v1046_v9, 0.0  ;;  %v1324_v13 = vmul.f32 0.2, %v1046_v9 }
 0x13b   : > { %v1229_v26 = vmul.f32 0.2, %v809_v20  ;;  %v1261_v27 = vmul.f32 0.2, %v889_v21  ;;  %vm1101_vm8 = vcmp.ge.f32.partialorder %v809_v20, 0.0  ;;  %vm1133_vm9 = vcmp.ge.f32.partialorder %v889_v21, 0.0 }
 0x13c   : > { %v1420_v16 = vsel %vm1164_vm6, %v966_v8, %v1292_v12  ;;  %v1452_v17 = vsel %vm1196_vm7, %v1046_v9, %v1324_v13 }
 0x13d   : > { %v2353_v18 = vpack.c.bf16 %v1420_v16, %v1419_v14  ;;  %v2433_v19 = vpack.c.bf16 %v1452_v17, %v1451_v15  ;;  %v1357_v34 = vsel %vm1101_vm8, %v809_v20, %v1229_v26  ;;  %v1389_v35 = vsel %vm1133_vm9, %v889_v21, %v1261_v27 }
 0x13f   : > { %2509 = vst [vmem:[%s2689_s13 + $0x140] sm:$0xff] %v2353_v18   ;;  %v968_v22 = vpop.f32.mrf.mxu2  ;;  %v1048_v23 = vpop.f32.mrf.mxu3 }
 0x140   : > { %2525 = vst [vmem:[%s2689_s13 + $0x1c0] sm:$0xff] %v2433_v19   ;;  %v810_v24 = vpop.f32.mrf.mxu0  ;;  %v890_v25 = vpop.f32.mrf.mxu1  ;;  %v969_v32 = vadd.f32 %v2676_v46, %v968_v22  ;;  %v1049_v33 = vadd.f32 %v2676_v46, %v1048_v23 }
 0x141   : > { %v811_v28 = vadd.f32 %v2676_v46, %v810_v24  ;;  %v891_v29 = vadd.f32 %v2676_v46, %v890_v25 }
 0x142   : > { %v1293_v42 = vmul.f32 0.2, %v969_v32  ;;  %v1325_v43 = vmul.f32 0.2, %v1049_v33  ;;  %vm1165_vm12 = vcmp.ge.f32.partialorder %v969_v32, 0.0  ;;  %vm1197_vm13 = vcmp.ge.f32.partialorder %v1049_v33, 0.0 }
 0x143   : > { %vm1102_vm10 = vcmp.ge.f32.partialorder %v811_v28, 0.0  ;;  %v1230_v30 = vmul.f32 0.2, %v811_v28  ;;  %vm1134_vm11 = vcmp.ge.f32.partialorder %v891_v29, 0.0  ;;  %v1262_v31 = vmul.f32 0.2, %v891_v29 }
 0x144   : > { %v1421_v51 = vsel %vm1165_vm12, %v969_v32, %v1293_v42  ;;  %v1453_v52 = vsel %vm1197_vm13, %v1049_v33, %v1325_v43 }
 0x145   : > { %v1358_v36 = vsel %vm1102_vm10, %v811_v28, %v1230_v30  ;;  %v1390_v37 = vsel %vm1134_vm11, %v891_v29, %v1262_v31 }
 0x146   : > { %v2198_v38 = vpack.c.bf16 %v1358_v36, %v1357_v34  ;;  %v2278_v39 = vpack.c.bf16 %v1390_v37, %v1389_v35 }
 0x147   : > { %v970_v40 = vpop.f32.mrf.mxu2  ;;  %v1050_v41 = vpop.f32.mrf.mxu3 }
 0x148   : > { %2478 = vst [vmem:[%s2689_s13 + $0x48] sm:$0xff] %v2198_v38   ;;  %v971_v45 = vadd.f32 %v2831_v44, %v970_v40  ;;  %v1051_v46 = vadd.f32 %v2831_v44, %v1050_v41  ;;  %v813_v47 = vpop.f32.mrf.mxu0  ;;  %v893_v48 = vpop.f32.mrf.mxu1 }
 0x149   : > { %2494 = vst [vmem:[%s2689_s13 + $0xc8] sm:$0xff] %v2278_v39   ;;  %v814_v57 = vadd.f32 %v2831_v44, %v813_v47  ;;  %v894_v58 = vadd.f32 %v2831_v44, %v893_v48 }
 0x14a   : > { %vm1166_vm14 = vcmp.ge.f32.partialorder %v971_v45, 0.0  ;;  %v1294_v49 = vmul.f32 0.2, %v971_v45  ;;  %vm1198_vm15 = vcmp.ge.f32.partialorder %v1051_v46, 0.0  ;;  %v1326_v50 = vmul.f32 0.2, %v1051_v46 }
 0x14b   : > { %v1231_v63 = vmul.f32 0.2, %v814_v57  ;;  %v1263_v0 = vmul.f32 0.2, %v894_v58  ;;  %vm1103_vm0 = vcmp.ge.f32.partialorder %v814_v57, 0.0  ;;  %vm1135_vm1 = vcmp.ge.f32.partialorder %v894_v58, 0.0 }
 0x14c   : > { %v1422_v53 = vsel %vm1166_vm14, %v971_v45, %v1294_v49  ;;  %v1454_v54 = vsel %vm1198_vm15, %v1051_v46, %v1326_v50 }
 0x14d   : > { %v2358_v55 = vpack.c.bf16 %v1422_v53, %v1421_v51  ;;  %v2438_v56 = vpack.c.bf16 %v1454_v54, %v1453_v52  ;;  %v1359_v7 = vsel %vm1103_vm0, %v814_v57, %v1231_v63  ;;  %v1391_v8 = vsel %vm1135_vm1, %v894_v58, %v1263_v0 }
 0x14f   : > { %2510 = vst [vmem:[%s2689_s13 + $0x148] sm:$0xff] %v2358_v55   ;;  %v973_v59 = vpop.f32.mrf.mxu2  ;;  %v1053_v60 = vpop.f32.mrf.mxu3 }
 0x150   : > { %2526 = vst [vmem:[%s2689_s13 + $0x1c8] sm:$0xff] %v2438_v56   ;;  %v815_v61 = vpop.f32.mrf.mxu0  ;;  %v895_v62 = vpop.f32.mrf.mxu1  ;;  %v974_v5 = vadd.f32 %v2831_v44, %v973_v59  ;;  %v1054_v6 = vadd.f32 %v2831_v44, %v1053_v60 }
 0x151   : > { %v816_v1 = vadd.f32 %v2831_v44, %v815_v61  ;;  %v896_v2 = vadd.f32 %v2831_v44, %v895_v62 }
 0x152   : > { %v1295_v15 = vmul.f32 0.2, %v974_v5  ;;  %v1327_v16 = vmul.f32 0.2, %v1054_v6  ;;  %vm1167_vm4 = vcmp.ge.f32.partialorder %v974_v5, 0.0  ;;  %vm1199_vm5 = vcmp.ge.f32.partialorder %v1054_v6, 0.0 }
 0x153   : > { %vm1104_vm2 = vcmp.ge.f32.partialorder %v816_v1, 0.0  ;;  %v1232_v3 = vmul.f32 0.2, %v816_v1  ;;  %vm1136_vm3 = vcmp.ge.f32.partialorder %v896_v2, 0.0  ;;  %v1264_v4 = vmul.f32 0.2, %v896_v2 }
 0x154   : > { %v1423_v23 = vsel %vm1167_vm4, %v974_v5, %v1295_v15  ;;  %v1455_v24 = vsel %vm1199_vm5, %v1054_v6, %v1327_v16 }
 0x155   : > { %v1360_v9 = vsel %vm1104_vm2, %v816_v1, %v1232_v3  ;;  %v1392_v10 = vsel %vm1136_vm3, %v896_v2, %v1264_v4 }
 0x156   : > { %v2203_v11 = vpack.c.bf16 %v1360_v9, %v1359_v7  ;;  %v2283_v12 = vpack.c.bf16 %v1392_v10, %v1391_v8 }
 0x157   : > { %v975_v13 = vpop.f32.mrf.mxu2  ;;  %v1055_v14 = vpop.f32.mrf.mxu3 }
 0x158   : > { %2479 = vst [vmem:[%s2689_s13 + $0x50] sm:$0xff] %v2203_v11   ;;  %v976_v17 = vadd.f32 %v2831_v44, %v975_v13  ;;  %v1056_v18 = vadd.f32 %v2831_v44, %v1055_v14  ;;  %v818_v19 = vpop.f32.mrf.mxu0  ;;  %v898_v20 = vpop.f32.mrf.mxu1 }
 0x159   : > { %2495 = vst [vmem:[%s2689_s13 + $0xd0] sm:$0xff] %v2283_v12   ;;  %v819_v29 = vadd.f32 %v2831_v44, %v818_v19  ;;  %v899_v30 = vadd.f32 %v2831_v44, %v898_v20 }
 0x15a   : > { %vm1168_vm6 = vcmp.ge.f32.partialorder %v976_v17, 0.0  ;;  %v1296_v21 = vmul.f32 0.2, %v976_v17  ;;  %vm1200_vm7 = vcmp.ge.f32.partialorder %v1056_v18, 0.0  ;;  %v1328_v22 = vmul.f32 0.2, %v1056_v18 }
 0x15b   : > { %v1233_v35 = vmul.f32 0.2, %v819_v29  ;;  %v1265_v36 = vmul.f32 0.2, %v899_v30  ;;  %vm1105_vm8 = vcmp.ge.f32.partialorder %v819_v29, 0.0  ;;  %vm1137_vm9 = vcmp.ge.f32.partialorder %v899_v30, 0.0 }
 0x15c   : > { %v1424_v25 = vsel %vm1168_vm6, %v976_v17, %v1296_v21  ;;  %v1456_v26 = vsel %vm1200_vm7, %v1056_v18, %v1328_v22 }
 0x15d   : > { %v2363_v27 = vpack.c.bf16 %v1424_v25, %v1423_v23  ;;  %v2443_v28 = vpack.c.bf16 %v1456_v26, %v1455_v24  ;;  %v1361_v43 = vsel %vm1105_vm8, %v819_v29, %v1233_v35  ;;  %v1393_v45 = vsel %vm1137_vm9, %v899_v30, %v1265_v36 }
 0x15f   : > { %2511 = vst [vmem:[%s2689_s13 + $0x150] sm:$0xff] %v2363_v27   ;;  %v978_v31 = vpop.f32.mrf.mxu2  ;;  %v1058_v32 = vpop.f32.mrf.mxu3 }
 0x160   : > { %2527 = vst [vmem:[%s2689_s13 + $0x1d0] sm:$0xff] %v2443_v28   ;;  %v820_v33 = vpop.f32.mrf.mxu0  ;;  %v900_v34 = vpop.f32.mrf.mxu1  ;;  %v979_v41 = vadd.f32 %v2831_v44, %v978_v31  ;;  %v1059_v42 = vadd.f32 %v2831_v44, %v1058_v32 }
 0x161   : > { %v821_v37 = vadd.f32 %v2831_v44, %v820_v33  ;;  %v901_v38 = vadd.f32 %v2831_v44, %v900_v34 }
 0x162   : > { %v1297_v52 = vmul.f32 0.2, %v979_v41  ;;  %v1329_v53 = vmul.f32 0.2, %v1059_v42  ;;  %vm1169_vm12 = vcmp.ge.f32.partialorder %v979_v41, 0.0  ;;  %vm1201_vm13 = vcmp.ge.f32.partialorder %v1059_v42, 0.0 }
 0x163   : > { %vm1106_vm10 = vcmp.ge.f32.partialorder %v821_v37, 0.0  ;;  %v1234_v39 = vmul.f32 0.2, %v821_v37  ;;  %vm1138_vm11 = vcmp.ge.f32.partialorder %v901_v38, 0.0  ;;  %v1266_v40 = vmul.f32 0.2, %v901_v38 }
 0x164   : > { %v1425_v60 = vsel %vm1169_vm12, %v979_v41, %v1297_v52  ;;  %v1457_v61 = vsel %vm1201_vm13, %v1059_v42, %v1329_v53 }
 0x165   : > { %v1362_v46 = vsel %vm1106_vm10, %v821_v37, %v1234_v39  ;;  %v1394_v47 = vsel %vm1138_vm11, %v901_v38, %v1266_v40 }
 0x166   : > { %v2208_v48 = vpack.c.bf16 %v1362_v46, %v1361_v43  ;;  %v2288_v49 = vpack.c.bf16 %v1394_v47, %v1393_v45 }
 0x167   : > { %v980_v50 = vpop.f32.mrf.mxu2  ;;  %v1060_v51 = vpop.f32.mrf.mxu3 }
 0x168   : > { %2480 = vst [vmem:[%s2689_s13 + $0x58] sm:$0xff] %v2208_v48   ;;  %v981_v54 = vadd.f32 %v2831_v44, %v980_v50  ;;  %v1061_v55 = vadd.f32 %v2831_v44, %v1060_v51  ;;  %v823_v56 = vpop.f32.mrf.mxu0  ;;  %v903_v57 = vpop.f32.mrf.mxu1 }
 0x169   : > { %2496 = vst [vmem:[%s2689_s13 + $0xd8] sm:$0xff] %v2288_v49   ;;  %v824_v2 = vadd.f32 %v2831_v44, %v823_v56  ;;  %v904_v3 = vadd.f32 %v2831_v44, %v903_v57 }
 0x16a   : > { %vm1170_vm14 = vcmp.ge.f32.partialorder %v981_v54, 0.0  ;;  %v1298_v58 = vmul.f32 0.2, %v981_v54  ;;  %vm1202_vm15 = vcmp.ge.f32.partialorder %v1061_v55, 0.0  ;;  %v1330_v59 = vmul.f32 0.2, %v1061_v55 }
 0x16b   : > { %v1235_v8 = vmul.f32 0.2, %v824_v2  ;;  %v1267_v9 = vmul.f32 0.2, %v904_v3  ;;  %vm1107_vm0 = vcmp.ge.f32.partialorder %v824_v2, 0.0  ;;  %vm1139_vm1 = vcmp.ge.f32.partialorder %v904_v3, 0.0 }
 0x16c   : > { %v1426_v62 = vsel %vm1170_vm14, %v981_v54, %v1298_v58  ;;  %v1458_v63 = vsel %vm1202_vm15, %v1061_v55, %v1330_v59 }
 0x16d   : > { %v2368_v0 = vpack.c.bf16 %v1426_v62, %v1425_v60  ;;  %v2448_v1 = vpack.c.bf16 %v1458_v63, %v1457_v61  ;;  %v1363_v16 = vsel %vm1107_vm0, %v824_v2, %v1235_v8  ;;  %v1395_v17 = vsel %vm1139_vm1, %v904_v3, %v1267_v9 }
 0x16f   : > { %2512 = vst [vmem:[%s2689_s13 + $0x158] sm:$0xff] %v2368_v0   ;;  %v983_v4 = vpop.f32.mrf.mxu2  ;;  %v1063_v5 = vpop.f32.mrf.mxu3 }
 0x170   : > { %2528 = vst [vmem:[%s2689_s13 + $0x1d8] sm:$0xff] %v2448_v1   ;;  %v825_v6 = vpop.f32.mrf.mxu0  ;;  %v905_v7 = vpop.f32.mrf.mxu1  ;;  %v984_v14 = vadd.f32 %v2831_v44, %v983_v4  ;;  %v1064_v15 = vadd.f32 %v2831_v44, %v1063_v5 }
 0x171   : > { %v826_v10 = vadd.f32 %v2831_v44, %v825_v6  ;;  %v906_v11 = vadd.f32 %v2831_v44, %v905_v7 }
 0x172   : > { %v1299_v24 = vmul.f32 0.2, %v984_v14  ;;  %v1331_v25 = vmul.f32 0.2, %v1064_v15  ;;  %vm1171_vm4 = vcmp.ge.f32.partialorder %v984_v14, 0.0  ;;  %vm1203_vm5 = vcmp.ge.f32.partialorder %v1064_v15, 0.0 }
 0x173   : > { %vm1108_vm2 = vcmp.ge.f32.partialorder %v826_v10, 0.0  ;;  %v1236_v12 = vmul.f32 0.2, %v826_v10  ;;  %vm1140_vm3 = vcmp.ge.f32.partialorder %v906_v11, 0.0  ;;  %v1268_v13 = vmul.f32 0.2, %v906_v11 }
 0x174   : > { %v1427_v32 = vsel %vm1171_vm4, %v984_v14, %v1299_v24  ;;  %v1459_v33 = vsel %vm1203_vm5, %v1064_v15, %v1331_v25 }
 0x175   : > { %v1364_v18 = vsel %vm1108_vm2, %v826_v10, %v1236_v12  ;;  %v1396_v19 = vsel %vm1140_vm3, %v906_v11, %v1268_v13 }
 0x176   : > { %v2213_v20 = vpack.c.bf16 %v1364_v18, %v1363_v16  ;;  %v2293_v21 = vpack.c.bf16 %v1396_v19, %v1395_v17 }
 0x177   : > { %v985_v22 = vpop.f32.mrf.mxu2  ;;  %v1065_v23 = vpop.f32.mrf.mxu3 }
 0x178   : > { %2481 = vst [vmem:[%s2689_s13 + $0x60] sm:$0xff] %v2213_v20   ;;  %v986_v26 = vadd.f32 %v2831_v44, %v985_v22  ;;  %v1066_v27 = vadd.f32 %v2831_v44, %v1065_v23  ;;  %v828_v28 = vpop.f32.mrf.mxu0  ;;  %v908_v29 = vpop.f32.mrf.mxu1 }
 0x179   : > { %2497 = vst [vmem:[%s2689_s13 + $0xe0] sm:$0xff] %v2293_v21   ;;  %v829_v38 = vadd.f32 %v2831_v44, %v828_v28  ;;  %v909_v39 = vadd.f32 %v2831_v44, %v908_v29 }
 0x17a   : > { %vm1172_vm6 = vcmp.ge.f32.partialorder %v986_v26, 0.0  ;;  %v1300_v30 = vmul.f32 0.2, %v986_v26  ;;  %vm1204_vm7 = vcmp.ge.f32.partialorder %v1066_v27, 0.0  ;;  %v1332_v31 = vmul.f32 0.2, %v1066_v27 }
 0x17b   : > { %v1237_v45 = vmul.f32 0.2, %v829_v38  ;;  %v1269_v46 = vmul.f32 0.2, %v909_v39  ;;  %vm1109_vm8 = vcmp.ge.f32.partialorder %v829_v38, 0.0  ;;  %vm1141_vm9 = vcmp.ge.f32.partialorder %v909_v39, 0.0 }
 0x17c   : > { %v1428_v34 = vsel %vm1172_vm6, %v986_v26, %v1300_v30  ;;  %v1460_v35 = vsel %vm1204_vm7, %v1066_v27, %v1332_v31 }
 0x17d   : > { %v2373_v36 = vpack.c.bf16 %v1428_v34, %v1427_v32  ;;  %v2453_v37 = vpack.c.bf16 %v1460_v35, %v1459_v33  ;;  %v1365_v53 = vsel %vm1109_vm8, %v829_v38, %v1237_v45  ;;  %v1397_v54 = vsel %vm1141_vm9, %v909_v39, %v1269_v46 }
 0x17f   : > { %2513 = vst [vmem:[%s2689_s13 + $0x160] sm:$0xff] %v2373_v36   ;;  %v988_v40 = vpop.f32.mrf.mxu2  ;;  %v1068_v41 = vpop.f32.mrf.mxu3 }
 0x180   : > { %2529 = vst [vmem:[%s2689_s13 + $0x1e0] sm:$0xff] %v2453_v37   ;;  %v830_v42 = vpop.f32.mrf.mxu0  ;;  %v910_v43 = vpop.f32.mrf.mxu1  ;;  %v989_v51 = vadd.f32 %v2831_v44, %v988_v40  ;;  %v1069_v52 = vadd.f32 %v2831_v44, %v1068_v41 }
 0x181   : > { %v831_v47 = vadd.f32 %v2831_v44, %v830_v42  ;;  %v911_v48 = vadd.f32 %v2831_v44, %v910_v43 }
 0x182   : > { %v1301_v61 = vmul.f32 0.2, %v989_v51  ;;  %v1333_v62 = vmul.f32 0.2, %v1069_v52  ;;  %vm1173_vm12 = vcmp.ge.f32.partialorder %v989_v51, 0.0  ;;  %vm1205_vm13 = vcmp.ge.f32.partialorder %v1069_v52, 0.0 }
 0x183   : > { %vm1110_vm10 = vcmp.ge.f32.partialorder %v831_v47, 0.0  ;;  %v1238_v49 = vmul.f32 0.2, %v831_v47  ;;  %vm1142_vm11 = vcmp.ge.f32.partialorder %v911_v48, 0.0  ;;  %v1270_v50 = vmul.f32 0.2, %v911_v48 }
 0x184   : > { %v1429_v5 = vsel %vm1173_vm12, %v989_v51, %v1301_v61  ;;  %v1461_v6 = vsel %vm1205_vm13, %v1069_v52, %v1333_v62 }
 0x185   : > { %v1366_v55 = vsel %vm1110_vm10, %v831_v47, %v1238_v49  ;;  %v1398_v56 = vsel %vm1142_vm11, %v911_v48, %v1270_v50 }
 0x186   : > { %v2218_v57 = vpack.c.bf16 %v1366_v55, %v1365_v53  ;;  %v2298_v58 = vpack.c.bf16 %v1398_v56, %v1397_v54 }
 0x187   : > { %v990_v59 = vpop.f32.mrf.mxu2  ;;  %v1070_v60 = vpop.f32.mrf.mxu3 }
 0x188   : > { %2482 = vst [vmem:[%s2689_s13 + $0x68] sm:$0xff] %v2218_v57   ;;  %v991_v63 = vadd.f32 %v2831_v44, %v990_v59  ;;  %v1071_v0 = vadd.f32 %v2831_v44, %v1070_v60  ;;  %v833_v1 = vpop.f32.mrf.mxu0  ;;  %v913_v2 = vpop.f32.mrf.mxu1 }
 0x189   : > { %2498 = vst [vmem:[%s2689_s13 + $0xe8] sm:$0xff] %v2298_v58   ;;  %v834_v11 = vadd.f32 %v2831_v44, %v833_v1  ;;  %v914_v12 = vadd.f32 %v2831_v44, %v913_v2 }
 0x18a   : > { %vm1174_vm14 = vcmp.ge.f32.partialorder %v991_v63, 0.0  ;;  %v1302_v3 = vmul.f32 0.2, %v991_v63  ;;  %vm1206_vm15 = vcmp.ge.f32.partialorder %v1071_v0, 0.0  ;;  %v1334_v4 = vmul.f32 0.2, %v1071_v0 }
 0x18b   : > { %v1239_v17 = vmul.f32 0.2, %v834_v11  ;;  %v1271_v18 = vmul.f32 0.2, %v914_v12  ;;  %vm1111_vm0 = vcmp.ge.f32.partialorder %v834_v11, 0.0  ;;  %vm1143_vm1 = vcmp.ge.f32.partialorder %v914_v12, 0.0 }
 0x18c   : > { %v1430_v7 = vsel %vm1174_vm14, %v991_v63, %v1302_v3  ;;  %v1462_v8 = vsel %vm1206_vm15, %v1071_v0, %v1334_v4 }
 0x18d   : > { %v2378_v9 = vpack.c.bf16 %v1430_v7, %v1429_v5  ;;  %v2458_v10 = vpack.c.bf16 %v1462_v8, %v1461_v6  ;;  %v1367_v25 = vsel %vm1111_vm0, %v834_v11, %v1239_v17  ;;  %v1399_v26 = vsel %vm1143_vm1, %v914_v12, %v1271_v18 }
 0x18f   : > { %2514 = vst [vmem:[%s2689_s13 + $0x168] sm:$0xff] %v2378_v9   ;;  %v993_v13 = vpop.f32.mrf.mxu2  ;;  %v1073_v14 = vpop.f32.mrf.mxu3 }
 0x190   : > { %2530 = vst [vmem:[%s2689_s13 + $0x1e8] sm:$0xff] %v2458_v10   ;;  %v835_v15 = vpop.f32.mrf.mxu0  ;;  %v915_v16 = vpop.f32.mrf.mxu1  ;;  %v994_v23 = vadd.f32 %v2831_v44, %v993_v13  ;;  %v1074_v24 = vadd.f32 %v2831_v44, %v1073_v14 }
 0x191   : > { %v836_v19 = vadd.f32 %v2831_v44, %v835_v15  ;;  %v916_v20 = vadd.f32 %v2831_v44, %v915_v16 }
 0x192   : > { %v1303_v33 = vmul.f32 0.2, %v994_v23  ;;  %v1335_v34 = vmul.f32 0.2, %v1074_v24  ;;  %vm1175_vm4 = vcmp.ge.f32.partialorder %v994_v23, 0.0  ;;  %vm1207_vm5 = vcmp.ge.f32.partialorder %v1074_v24, 0.0 }
 0x193   : > { %vm1112_vm2 = vcmp.ge.f32.partialorder %v836_v19, 0.0  ;;  %v1240_v21 = vmul.f32 0.2, %v836_v19  ;;  %vm1144_vm3 = vcmp.ge.f32.partialorder %v916_v20, 0.0  ;;  %v1272_v22 = vmul.f32 0.2, %v916_v20 }
 0x194   : > { %v1431_v41 = vsel %vm1175_vm4, %v994_v23, %v1303_v33  ;;  %v1463_v42 = vsel %vm1207_vm5, %v1074_v24, %v1335_v34 }
 0x195   : > { %v1368_v27 = vsel %vm1112_vm2, %v836_v19, %v1240_v21  ;;  %v1400_v28 = vsel %vm1144_vm3, %v916_v20, %v1272_v22 }
 0x196   : > { %v2223_v29 = vpack.c.bf16 %v1368_v27, %v1367_v25  ;;  %v2303_v30 = vpack.c.bf16 %v1400_v28, %v1399_v26 }
 0x197   : > { %v995_v31 = vpop.f32.mrf.mxu2  ;;  %v1075_v32 = vpop.f32.mrf.mxu3 }
 0x198   : > { %2483 = vst [vmem:[%s2689_s13 + $0x70] sm:$0xff] %v2223_v29   ;;  %v996_v35 = vadd.f32 %v2831_v44, %v995_v31  ;;  %v1076_v36 = vadd.f32 %v2831_v44, %v1075_v32  ;;  %v838_v37 = vpop.f32.mrf.mxu0  ;;  %v918_v38 = vpop.f32.mrf.mxu1 }
 0x199   : > { %2499 = vst [vmem:[%s2689_s13 + $0xf0] sm:$0xff] %v2303_v30   ;;  %v839_v48 = vadd.f32 %v2831_v44, %v838_v37  ;;  %v919_v49 = vadd.f32 %v2831_v44, %v918_v38 }
 0x19a   : > { %vm1176_vm6 = vcmp.ge.f32.partialorder %v996_v35, 0.0  ;;  %v1304_v39 = vmul.f32 0.2, %v996_v35  ;;  %vm1208_vm7 = vcmp.ge.f32.partialorder %v1076_v36, 0.0  ;;  %v1336_v40 = vmul.f32 0.2, %v1076_v36 }
 0x19b   : > { %v1241_v54 = vmul.f32 0.2, %v839_v48  ;;  %v1273_v55 = vmul.f32 0.2, %v919_v49  ;;  %vm1113_vm8 = vcmp.ge.f32.partialorder %v839_v48, 0.0  ;;  %vm1145_vm9 = vcmp.ge.f32.partialorder %v919_v49, 0.0 }
 0x19c   : > { %v1432_v43 = vsel %vm1176_vm6, %v996_v35, %v1304_v39  ;;  %v1464_v45 = vsel %vm1208_vm7, %v1076_v36, %v1336_v40 }
 0x19d   : > { %v2383_v46 = vpack.c.bf16 %v1432_v43, %v1431_v41  ;;  %v2463_v47 = vpack.c.bf16 %v1464_v45, %v1463_v42  ;;  %v1369_v62 = vsel %vm1113_vm8, %v839_v48, %v1241_v54  ;;  %v1401_v63 = vsel %vm1145_vm9, %v919_v49, %v1273_v55 }
 0x19f   : > { %2515 = vst [vmem:[%s2689_s13 + $0x170] sm:$0xff] %v2383_v46   ;;  %v998_v50 = vpop.f32.mrf.mxu2  ;;  %v1078_v51 = vpop.f32.mrf.mxu3 }
 0x1a0   : > { %2531 = vst [vmem:[%s2689_s13 + $0x1f0] sm:$0xff] %v2463_v47   ;;  %v840_v52 = vpop.f32.mrf.mxu0  ;;  %v920_v53 = vpop.f32.mrf.mxu1  ;;  %v999_v60 = vadd.f32 %v2831_v44, %v998_v50  ;;  %v1079_v61 = vadd.f32 %v2831_v44, %v1078_v51 }
 0x1a1   : > { %v841_v56 = vadd.f32 %v2831_v44, %v840_v52  ;;  %v921_v57 = vadd.f32 %v2831_v44, %v920_v53 }
 0x1a2   : > { %v1305_v6 = vmul.f32 0.2, %v999_v60  ;;  %v1337_v7 = vmul.f32 0.2, %v1079_v61  ;;  %vm1177_vm12 = vcmp.ge.f32.partialorder %v999_v60, 0.0  ;;  %vm1209_vm13 = vcmp.ge.f32.partialorder %v1079_v61, 0.0 }
 0x1a3   : > { %vm1114_vm10 = vcmp.ge.f32.partialorder %v841_v56, 0.0  ;;  %v1242_v58 = vmul.f32 0.2, %v841_v56  ;;  %vm1146_vm11 = vcmp.ge.f32.partialorder %v921_v57, 0.0  ;;  %v1274_v59 = vmul.f32 0.2, %v921_v57 }
 0x1a4   : > { %v1433_v12 = vsel %vm1177_vm12, %v999_v60, %v1305_v6  ;;  %v1465_v13 = vsel %vm1209_vm13, %v1079_v61, %v1337_v7 }
 0x1a5   : > { %v1370_v0 = vsel %vm1114_vm10, %v841_v56, %v1242_v58  ;;  %v1402_v1 = vsel %vm1146_vm11, %v921_v57, %v1274_v59 }
 0x1a6   : > { %v2228_v2 = vpack.c.bf16 %v1370_v0, %v1369_v62  ;;  %v2308_v3 = vpack.c.bf16 %v1402_v1, %v1401_v63 }
 0x1a7   : > { %v1000_v4 = vpop.f32.mrf.mxu2  ;;  %v1080_v5 = vpop.f32.mrf.mxu3 }
 0x1a8   : > { %2484 = vst [vmem:[%s2689_s13 + $0x78] sm:$0xff] %v2228_v2   ;;  %v1001_v8 = vadd.f32 %v2831_v44, %v1000_v4  ;;  %v1081_v9 = vadd.f32 %v2831_v44, %v1080_v5 }
 0x1a9   : > { %2500 = vst [vmem:[%s2689_s13 + $0xf8] sm:$0xff] %v2308_v3  }
 0x1aa   : > { %vm1178_vm14 = vcmp.ge.f32.partialorder %v1001_v8, 0.0  ;;  %v1306_v10 = vmul.f32 0.2, %v1001_v8  ;;  %vm1210_vm15 = vcmp.ge.f32.partialorder %v1081_v9, 0.0  ;;  %v1338_v11 = vmul.f32 0.2, %v1081_v9 }
 0x1ac   : > { %v1434_v14 = vsel %vm1178_vm14, %v1001_v8, %v1306_v10  ;;  %v1466_v15 = vsel %vm1210_vm15, %v1081_v9, %v1338_v11 }
 0x1ad   : > { %v2388_v16 = vpack.c.bf16 %v1434_v14, %v1433_v12  ;;  %v2468_v17 = vpack.c.bf16 %v1466_v15, %v1465_v13 }
 0x1af   : > { %2516 = vst [vmem:[%s2689_s13 + $0x178] sm:$0xff] %v2388_v16  }
 0x1b0   : > { %2532 = vst [vmem:[%s2689_s13 + $0x1f8] sm:$0xff] %v2468_v17  }
 0x1b1 PF: > { %s13_s12 = sadd.s32 1, %s2573_s12  }
 0x1b2   : > { %p10_p4 = scmp.ge.s32.totalorder %s13_s12, 4  }
 0x1b4   :  { %12 = sbr.rel (!%p10_p4) target bundleno = 1 (0x1), region = 62 }

// kernel: _forward_impl.15
= control target key start
LH: loop header
LB: loop body
LE: loop exit
PB: predicated region body
PF: predicated region fallthrough
CT: control target
= control target key end

     0   :  { %s857_s1 = inlined_call_operand.vmem [shape: bf16[256,128], index: 1, kind: input, shape index: {}]   ;;  %s858_s2 = inlined_call_operand.vmem [shape: f32[1,128], index: 2, kind: input, shape index: {}]   ;;  %s859_s0 = inlined_call_operand.vmem [shape: bf16[128,256], index: 0, kind: input, shape index: {}]   ;;  %s860_s3 = inlined_call_operand.vmem [shape: bf16[128,128], index: 3, kind: output, shape index: {}]  }
   0x1   :  { %v575_v0 = vld [vmem:[%s857_s1 + $0x38] sm:$0xff]  ;;  %v574_v2 = vld [vmem:[%s857_s1 + $0x30] sm:$0xff]  ;;  %v573_v4 = vld [vmem:[%s857_s1 + $0x28] sm:$0xff] }
   0x2   :  { %v583_v1 = vld [vmem:[%s857_s1 + $0x78] sm:$0xff]  ;;  %242 = vmatpush.bf16.msra.mxu0 %v575_v0  ;;  %631 = vmatpush.bf16.msra.mxu2 %v575_v0  ;;  %v582_v3 = vld [vmem:[%s857_s1 + $0x70] sm:$0xff]  ;;  %v581_v5 = vld [vmem:[%s857_s1 + $0x68] sm:$0xff] }
   0x3   :  { %291 = vmatpush.bf16.msra.mxu1 %v583_v1  ;;  %639 = vmatpush.bf16.msra.mxu3 %v583_v1  ;;  %v572_v6 = vld [vmem:[%s857_s1 + $0x20] sm:$0xff]  ;;  %v571_v8 = vld [vmem:[%s857_s1 + $0x18] sm:$0xff]  ;;  %v570_v10 = vld [vmem:[%s857_s1 + $0x10] sm:$0xff] }
   0x4   :  { %v580_v7 = vld [vmem:[%s857_s1 + $0x60] sm:$0xff]  ;;  %v579_v9 = vld [vmem:[%s857_s1 + $0x58] sm:$0xff]  ;;  %v578_v11 = vld [vmem:[%s857_s1 + $0x50] sm:$0xff] }
   0x5   :  { %v569_v12 = vld [vmem:[%s857_s1 + $0x8] sm:$0xff]  ;;  %v568_v14 = vld [vmem:[%s857_s1] sm:$0xff]  ;;  %v434_v28 = vld [vmem:[%s859_s0 + $0x10] sm:$0xf] }
   0x6   :  { %243 = vmatpush.bf16.msra.mxu0 %v574_v2  ;;  %632 = vmatpush.bf16.msra.mxu2 %v574_v2  ;;  %v577_v13 = vld [vmem:[%s857_s1 + $0x48] sm:$0xff]  ;;  %v576_v15 = vld [vmem:[%s857_s1 + $0x40] sm:$0xff]  ;;  %v555_v29 = vld [vmem:[%s859_s0 + $0x14] sm:$0xf0] }
   0x7   :  { %292 = vmatpush.bf16.msra.mxu1 %v582_v3  ;;  %640 = vmatpush.bf16.msra.mxu3 %v582_v3  ;;  %v426_v16 = vld [vmem:[%s859_s0] sm:$0xf]  ;;  %v553_v17 = vld [vmem:[%s859_s0 + $0x4] sm:$0xf0]  ;;  %v552_v20 = vld [vmem:[%s859_s0 + $0x4] sm:$0xf]  ;;  %v435_v36 = vor.u32 %v555_v29, %v434_v28 }
   0x8   :  { %v458_v18 = vld [vmem:[%s859_s0 + $0x40] sm:$0xf]  ;;  %v561_v19 = vld [vmem:[%s859_s0 + $0x44] sm:$0xf0]  ;;  %v428_v21 = vld [vmem:[%s859_s0 + $0x8] sm:$0xf0]  ;;  %v427_v24 = vor.u32 %v553_v17, %v426_v16 }
   0x9   :  { %v560_v22 = vld [vmem:[%s859_s0 + $0x44] sm:$0xf]  ;;  %v460_v23 = vld [vmem:[%s859_s0 + $0x48] sm:$0xf0]  ;;  %v459_v25 = vor.u32 %v561_v19, %v458_v18  ;;  %v431_v26 = vor.u32 %v552_v20, %v428_v21  ;;  %v466_v30 = vld [vmem:[%s859_s0 + $0x50] sm:$0xf] }
   0xa   :  { %244 = vmatpush.bf16.msra.mxu0 %v573_v4  ;;  %633 = vmatpush.bf16.msra.mxu2 %v573_v4  ;;  %v463_v27 = vor.u32 %v560_v22, %v460_v23  ;;  %v563_v31 = vld [vmem:[%s859_s0 + $0x54] sm:$0xf0]  ;;  %v554_v32 = vld [vmem:[%s859_s0 + $0x14] sm:$0xf]  ;;  %v436_v33 = vld [vmem:[%s859_s0 + $0x18] sm:$0xf0] }
   0xb   :  { %293 = vmatpush.bf16.msra.mxu1 %v581_v5  ;;  %641 = vmatpush.bf16.msra.mxu3 %v581_v5  ;;  %v562_v34 = vld [vmem:[%s859_s0 + $0x54] sm:$0xf]  ;;  %v468_v35 = vld [vmem:[%s859_s0 + $0x58] sm:$0xf0]  ;;  %v467_v37 = vor.u32 %v563_v31, %v466_v30  ;;  %v439_v38 = vor.u32 %v554_v32, %v436_v33  ;;  %v442_v40 = vld [vmem:[%s859_s0 + $0x20] sm:$0xf] }
   0xc   :  { %v471_v39 = vor.u32 %v562_v34, %v468_v35  ;;  %v557_v41 = vld [vmem:[%s859_s0 + $0x24] sm:$0xf0]  ;;  %v474_v42 = vld [vmem:[%s859_s0 + $0x60] sm:$0xf]  ;;  %v556_v44 = vld [vmem:[%s859_s0 + $0x24] sm:$0xf] }
   0xd   :  { %v565_v43 = vld [vmem:[%s859_s0 + $0x64] sm:$0xf0]  ;;  %v444_v45 = vld [vmem:[%s859_s0 + $0x28] sm:$0xf0]  ;;  %v564_v46 = vld [vmem:[%s859_s0 + $0x64] sm:$0xf]  ;;  %v443_v48 = vor.u32 %v557_v41, %v442_v40 }
   0xe   :  { %245 = vmatpush.bf16.msra.mxu0 %v572_v6  ;;  %634 = vmatpush.bf16.msra.mxu2 %v572_v6  ;;  %v476_v47 = vld [vmem:[%s859_s0 + $0x68] sm:$0xf0]  ;;  %v475_v49 = vor.u32 %v565_v43, %v474_v42  ;;  %v447_v50 = vor.u32 %v556_v44, %v444_v45  ;;  %v450_v52 = vld [vmem:[%s859_s0 + $0x30] sm:$0xf]  ;;  %v559_v53 = vld [vmem:[%s859_s0 + $0x34] sm:$0xf0] }
   0xf   :  { %294 = vmatpush.bf16.msra.mxu1 %v580_v7  ;;  %642 = vmatpush.bf16.msra.mxu3 %v580_v7  ;;  %v479_v51 = vor.u32 %v564_v46, %v476_v47  ;;  %v482_v54 = vld [vmem:[%s859_s0 + $0x70] sm:$0xf]  ;;  %v567_v55 = vld [vmem:[%s859_s0 + $0x74] sm:$0xf0]  ;;  %v558_v56 = vld [vmem:[%s859_s0 + $0x34] sm:$0xf]  ;;  %v451_v60 = vor.u32 %v559_v53, %v450_v52 }
  0x10   :  { %v452_v57 = vld [vmem:[%s859_s0 + $0x38] sm:$0xf0]  ;;  %v566_v58 = vld [vmem:[%s859_s0 + $0x74] sm:$0xf]  ;;  %v483_v61 = vor.u32 %v567_v55, %v482_v54  ;;  %v815_v0 = vld [vmem:[%s858_s2] ss:$0 sm:$0xff] }
  0x11   :  { %v484_v59 = vld [vmem:[%s859_s0 + $0x78] sm:$0xf0]  ;;  %v455_v62 = vor.u32 %v558_v56, %v452_v57 }
  0x12   :  { %246 = vmatpush.bf16.msra.mxu0 %v571_v8  ;;  %635 = vmatpush.bf16.msra.mxu2 %v571_v8  ;;  %v487_v63 = vor.u32 %v566_v58, %v484_v59 }
  0x13   :  { %295 = vmatpush.bf16.msra.mxu1 %v579_v9  ;;  %643 = vmatpush.bf16.msra.mxu3 %v579_v9 }
  0x16   :  { %247 = vmatpush.bf16.msra.mxu0 %v570_v10  ;;  %636 = vmatpush.bf16.msra.mxu2 %v570_v10 }
  0x17   :  { %296 = vmatpush.bf16.msra.mxu1 %v578_v11  ;;  %644 = vmatpush.bf16.msra.mxu3 %v578_v11 }
  0x1a   :  { %248 = vmatpush.bf16.msra.mxu0 %v569_v12  ;;  %637 = vmatpush.bf16.msra.mxu2 %v569_v12 }
  0x1b   :  { %297 = vmatpush.bf16.msra.mxu1 %v577_v13  ;;  %645 = vmatpush.bf16.msra.mxu3 %v577_v13 }
  0x1e   :  { %249 = vmatpush.bf16.msra.mxu0 %v568_v14  ;;  %638 = vmatpush.bf16.msra.mxu2 %v568_v14 }
  0x1f   :  { %298 = vmatpush.bf16.msra.mxu1 %v576_v15  ;;  %646 = vmatpush.bf16.msra.mxu3 %v576_v15 }
  0x21   :  { %250 = vmatmul.bf16.vlgmr.msra.gmra.mxu0 %v427_v24  ;;  %270 = vmatmul.bf16.vlgmr.msra.gmra.mxu2 %v459_v25 }
  0x22   :  { %299 = vmatmul.bf16.vlgmr.msra.gmra.mxu1 %v431_v26  ;;  %319 = vmatmul.bf16.vlgmr.msra.gmra.mxu3 %v463_v27 }
  0x31   :  { %255 = vmatmul.bf16.gmra.mxu0 %v435_v36  ;;  %275 = vmatmul.bf16.gmra.mxu2 %v467_v37 }
  0x32   :  { %304 = vmatmul.bf16.gmra.mxu1 %v439_v38  ;;  %324 = vmatmul.bf16.gmra.mxu3 %v471_v39 }
  0x41   :  { %260 = vmatmul.bf16.gmra.mxu0 %v443_v48  ;;  %280 = vmatmul.bf16.gmra.mxu2 %v475_v49 }
  0x42   :  { %309 = vmatmul.bf16.gmra.mxu1 %v447_v50  ;;  %329 = vmatmul.bf16.gmra.mxu3 %v479_v51 }
  0x51   :  { %265 = vmatmul.bf16.gmra.mxu0 %v451_v60  ;;  %285 = vmatmul.bf16.gmra.mxu2 %v483_v61 }
  0x52   :  { %314 = vmatmul.bf16.gmra.mxu1 %v455_v62  ;;  %334 = vmatmul.bf16.gmra.mxu3 %v487_v63 }
  0x9e   :  { %v251_v1 = vpop.f32.mrf.mxu0 }
  0x9f   :  { %v300_v2 = vpop.f32.mrf.mxu1  ;;  %v252_v3 = vadd.f32 %v815_v0, %v251_v1 }
  0xa1   :  { %v301_v5 = vadd.f32 %v300_v2, %v252_v3 }
  0xa3   :  { %v356_v11 = vmul.f32 0.2, %v301_v5  ;;  %vm340_vm0 = vcmp.ge.f32.partialorder %v301_v5, 0.0 }
  0xa4   :  { %v271_v4 = vpop.f32.mrf.mxu2 }
  0xa5   :  { %v320_v6 = vpop.f32.mrf.mxu3  ;;  %v272_v8 = vadd.f32 %v815_v0, %v271_v4  ;;  %v372_v16 = vsel %vm340_vm0, %v301_v5, %v356_v11 }
  0xa6   :  { %v253_v7 = vpop.f32.mrf.mxu0 }
  0xa7   :  { %v254_v9 = vadd.f32 %v815_v0, %v253_v7  ;;  %v302_v10 = vpop.f32.mrf.mxu1  ;;  %v321_v13 = vadd.f32 %v320_v6, %v272_v8 }
  0xa9   :  { %v303_v12 = vadd.f32 %v302_v10, %v254_v9  ;;  %v364_v22 = vmul.f32 0.2, %v321_v13  ;;  %vm348_vm2 = vcmp.ge.f32.partialorder %v321_v13, 0.0 }
  0xab   :  { %vm341_vm1 = vcmp.ge.f32.partialorder %v303_v12, 0.0  ;;  %v357_v14 = vmul.f32 0.2, %v303_v12  ;;  %v380_v27 = vsel %vm348_vm2, %v321_v13, %v364_v22 }
  0xac   :  { %v273_v15 = vpop.f32.mrf.mxu2 }
  0xad   :  { %v373_v17 = vsel %vm341_vm1, %v303_v12, %v357_v14  ;;  %v274_v18 = vadd.f32 %v815_v0, %v273_v15  ;;  %v322_v19 = vpop.f32.mrf.mxu3 }
  0xae   :  { %v587_v20 = vpack.c.bf16 %v373_v17, %v372_v16  ;;  %v256_v21 = vpop.f32.mrf.mxu0 }
  0xaf   :  { %v323_v23 = vadd.f32 %v322_v19, %v274_v18  ;;  %v305_v24 = vpop.f32.mrf.mxu1  ;;  %v257_v26 = vadd.f32 %v815_v0, %v256_v21 }
  0xb0   :  { %588 = vst [vmem:[%s860_s3] sm:$0xff] %v587_v20  }
  0xb1   :  { %vm349_vm3 = vcmp.ge.f32.partialorder %v323_v23, 0.0  ;;  %v365_v25 = vmul.f32 0.2, %v323_v23  ;;  %v306_v31 = vadd.f32 %v305_v24, %v257_v26 }
  0xb3   :  { %v381_v28 = vsel %vm349_vm3, %v323_v23, %v365_v25  ;;  %v358_v37 = vmul.f32 0.2, %v306_v31  ;;  %vm342_vm4 = vcmp.ge.f32.partialorder %v306_v31, 0.0 }
  0xb4   :  { %v607_v29 = vpack.c.bf16 %v381_v28, %v380_v27  ;;  %v276_v30 = vpop.f32.mrf.mxu2 }
  0xb5   :  { %v325_v32 = vpop.f32.mrf.mxu3  ;;  %v277_v34 = vadd.f32 %v815_v0, %v276_v30  ;;  %v374_v42 = vsel %vm342_vm4, %v306_v31, %v358_v37 }
  0xb6   :  { %627 = vst [vmem:[%s860_s3 + $0x20] sm:$0xff] %v607_v29   ;;  %v258_v33 = vpop.f32.mrf.mxu0 }
  0xb7   :  { %v259_v35 = vadd.f32 %v815_v0, %v258_v33  ;;  %v307_v36 = vpop.f32.mrf.mxu1  ;;  %v326_v39 = vadd.f32 %v325_v32, %v277_v34 }
  0xb9   :  { %v308_v38 = vadd.f32 %v307_v36, %v259_v35  ;;  %v366_v48 = vmul.f32 0.2, %v326_v39  ;;  %vm350_vm6 = vcmp.ge.f32.partialorder %v326_v39, 0.0 }
  0xbb   :  { %vm343_vm5 = vcmp.ge.f32.partialorder %v308_v38, 0.0  ;;  %v359_v40 = vmul.f32 0.2, %v308_v38  ;;  %v382_v53 = vsel %vm350_vm6, %v326_v39, %v366_v48 }
  0xbc   :  { %v278_v41 = vpop.f32.mrf.mxu2 }
  0xbd   :  { %v375_v43 = vsel %vm343_vm5, %v308_v38, %v359_v40  ;;  %v279_v44 = vadd.f32 %v815_v0, %v278_v41  ;;  %v327_v45 = vpop.f32.mrf.mxu3 }
  0xbe   :  { %v592_v46 = vpack.c.bf16 %v375_v43, %v374_v42  ;;  %v261_v47 = vpop.f32.mrf.mxu0 }
  0xbf   :  { %v328_v49 = vadd.f32 %v327_v45, %v279_v44  ;;  %v310_v50 = vpop.f32.mrf.mxu1  ;;  %v262_v52 = vadd.f32 %v815_v0, %v261_v47 }
  0xc0   :  { %624 = vst [vmem:[%s860_s3 + $0x8] sm:$0xff] %v592_v46  }
  0xc1   :  { %vm351_vm7 = vcmp.ge.f32.partialorder %v328_v49, 0.0  ;;  %v367_v51 = vmul.f32 0.2, %v328_v49  ;;  %v311_v57 = vadd.f32 %v310_v50, %v262_v52 }
  0xc3   :  { %v383_v54 = vsel %vm351_vm7, %v328_v49, %v367_v51  ;;  %v360_v63 = vmul.f32 0.2, %v311_v57  ;;  %vm344_vm8 = vcmp.ge.f32.partialorder %v311_v57, 0.0 }
  0xc4   :  { %v612_v55 = vpack.c.bf16 %v383_v54, %v382_v53  ;;  %v281_v56 = vpop.f32.mrf.mxu2 }
  0xc5   :  { %v330_v58 = vpop.f32.mrf.mxu3  ;;  %v282_v60 = vadd.f32 %v815_v0, %v281_v56  ;;  %v376_v5 = vsel %vm344_vm8, %v311_v57, %v360_v63 }
  0xc6   :  { %628 = vst [vmem:[%s860_s3 + $0x28] sm:$0xff] %v612_v55   ;;  %v263_v59 = vpop.f32.mrf.mxu0 }
  0xc7   :  { %v264_v61 = vadd.f32 %v815_v0, %v263_v59  ;;  %v312_v62 = vpop.f32.mrf.mxu1  ;;  %v331_v2 = vadd.f32 %v330_v58, %v282_v60 }
  0xc9   :  { %v313_v1 = vadd.f32 %v312_v62, %v264_v61  ;;  %v368_v11 = vmul.f32 0.2, %v331_v2  ;;  %vm352_vm10 = vcmp.ge.f32.partialorder %v331_v2, 0.0 }
  0xcb   :  { %vm345_vm9 = vcmp.ge.f32.partialorder %v313_v1, 0.0  ;;  %v361_v3 = vmul.f32 0.2, %v313_v1  ;;  %v384_v16 = vsel %vm352_vm10, %v331_v2, %v368_v11 }
  0xcc   :  { %v283_v4 = vpop.f32.mrf.mxu2 }
  0xcd   :  { %v377_v6 = vsel %vm345_vm9, %v313_v1, %v361_v3  ;;  %v284_v7 = vadd.f32 %v815_v0, %v283_v4  ;;  %v332_v8 = vpop.f32.mrf.mxu3 }
  0xce   :  { %v597_v9 = vpack.c.bf16 %v377_v6, %v376_v5  ;;  %v266_v10 = vpop.f32.mrf.mxu0 }
  0xcf   :  { %v333_v12 = vadd.f32 %v332_v8, %v284_v7  ;;  %v315_v13 = vpop.f32.mrf.mxu1  ;;  %v267_v15 = vadd.f32 %v815_v0, %v266_v10 }
  0xd0   :  { %625 = vst [vmem:[%s860_s3 + $0x10] sm:$0xff] %v597_v9  }
  0xd1   :  { %vm353_vm11 = vcmp.ge.f32.partialorder %v333_v12, 0.0  ;;  %v369_v14 = vmul.f32 0.2, %v333_v12  ;;  %v316_v20 = vadd.f32 %v315_v13, %v267_v15 }
  0xd3   :  { %v385_v17 = vsel %vm353_vm11, %v333_v12, %v369_v14  ;;  %v362_v26 = vmul.f32 0.2, %v316_v20  ;;  %vm346_vm12 = vcmp.ge.f32.partialorder %v316_v20, 0.0 }
  0xd4   :  { %v617_v18 = vpack.c.bf16 %v385_v17, %v384_v16  ;;  %v286_v19 = vpop.f32.mrf.mxu2 }
  0xd5   :  { %v335_v21 = vpop.f32.mrf.mxu3  ;;  %v287_v23 = vadd.f32 %v815_v0, %v286_v19  ;;  %v378_v31 = vsel %vm346_vm12, %v316_v20, %v362_v26 }
  0xd6   :  { %629 = vst [vmem:[%s860_s3 + $0x30] sm:$0xff] %v617_v18   ;;  %v268_v22 = vpop.f32.mrf.mxu0 }
  0xd7   :  { %v269_v24 = vadd.f32 %v815_v0, %v268_v22  ;;  %v317_v25 = vpop.f32.mrf.mxu1  ;;  %v336_v28 = vadd.f32 %v335_v21, %v287_v23 }
  0xd9   :  { %v318_v27 = vadd.f32 %v317_v25, %v269_v24  ;;  %v370_v36 = vmul.f32 0.2, %v336_v28  ;;  %vm354_vm14 = vcmp.ge.f32.partialorder %v336_v28, 0.0 }
  0xdb   :  { %vm347_vm13 = vcmp.ge.f32.partialorder %v318_v27, 0.0  ;;  %v363_v29 = vmul.f32 0.2, %v318_v27  ;;  %v386_v39 = vsel %vm354_vm14, %v336_v28, %v370_v36 }
  0xdc   :  { %v288_v30 = vpop.f32.mrf.mxu2 }
  0xdd   :  { %v379_v32 = vsel %vm347_vm13, %v318_v27, %v363_v29  ;;  %v289_v33 = vadd.f32 %v815_v0, %v288_v30  ;;  %v337_v35 = vpop.f32.mrf.mxu3 }
  0xde   :  { %v602_v34 = vpack.c.bf16 %v379_v32, %v378_v31 }
  0xdf   :  { %v338_v37 = vadd.f32 %v337_v35, %v289_v33 }
  0xe0   :  { %626 = vst [vmem:[%s860_s3 + $0x18] sm:$0xff] %v602_v34  }
  0xe1   :  { %vm355_vm15 = vcmp.ge.f32.partialorder %v338_v37, 0.0  ;;  %v371_v38 = vmul.f32 0.2, %v338_v37 }
  0xe3   :  { %v387_v40 = vsel %vm355_vm15, %v338_v37, %v371_v38 }
  0xe4   :  { %v622_v41 = vpack.c.bf16 %v387_v40, %v386_v39 }
  0xe6   :  { %630 = vst [vmem:[%s860_s3 + $0x38] sm:$0xff] %v622_v41  }

// kernel: _forward_impl.14
= control target key start
LH: loop header
LB: loop body
LE: loop exit
PB: predicated region body
PF: predicated region fallthrough
CT: control target
= control target key end

     0   :  { %s2423_s1 = inlined_call_operand.vmem [shape: bf16[256,128], index: 1, kind: input, shape index: {}]   ;;  %s2424_s2 = inlined_call_operand.vmem [shape: f32[1,128], index: 2, kind: input, shape index: {}]   ;;  %s2425_s0 = inlined_call_operand.vmem [shape: bf16[512,256], index: 0, kind: input, shape index: {}]   ;;  %s2426_s3 = inlined_call_operand.vmem [shape: bf16[512,128], index: 3, kind: output, shape index: {}]  }
   0x1   :  { %v1583_v0 = vld [vmem:[%s2423_s1 + $0x38] sm:$0xff]  ;;  %v1582_v2 = vld [vmem:[%s2423_s1 + $0x30] sm:$0xff]  ;;  %v1581_v4 = vld [vmem:[%s2423_s1 + $0x28] sm:$0xff] }
   0x2   :  { %v1591_v1 = vld [vmem:[%s2423_s1 + $0x78] sm:$0xff]  ;;  %530 = vmatpush.bf16.msra.mxu0 %v1583_v0  ;;  %1783 = vmatpush.bf16.msra.mxu2 %v1583_v0  ;;  %v1590_v3 = vld [vmem:[%s2423_s1 + $0x70] sm:$0xff]  ;;  %v1589_v5 = vld [vmem:[%s2423_s1 + $0x68] sm:$0xff] }
   0x3   :  { %699 = vmatpush.bf16.msra.mxu1 %v1591_v1  ;;  %1791 = vmatpush.bf16.msra.mxu3 %v1591_v1  ;;  %v1580_v6 = vld [vmem:[%s2423_s1 + $0x20] sm:$0xff]  ;;  %v1579_v8 = vld [vmem:[%s2423_s1 + $0x18] sm:$0xff]  ;;  %v1578_v10 = vld [vmem:[%s2423_s1 + $0x10] sm:$0xff] }
   0x4   :  { %v1588_v7 = vld [vmem:[%s2423_s1 + $0x60] sm:$0xff]  ;;  %v1587_v9 = vld [vmem:[%s2423_s1 + $0x58] sm:$0xff]  ;;  %v1586_v11 = vld [vmem:[%s2423_s1 + $0x50] sm:$0xff] }
   0x5   :  { %v1577_v12 = vld [vmem:[%s2423_s1 + $0x8] sm:$0xff]  ;;  %v1576_v14 = vld [vmem:[%s2423_s1] sm:$0xff]  ;;  %v1202_v28 = vld [vmem:[%s2425_s0 + $0x10] sm:$0xf] }
   0x6   :  { %531 = vmatpush.bf16.msra.mxu0 %v1582_v2  ;;  %1784 = vmatpush.bf16.msra.mxu2 %v1582_v2  ;;  %v1585_v13 = vld [vmem:[%s2423_s1 + $0x48] sm:$0xff]  ;;  %v1584_v15 = vld [vmem:[%s2423_s1 + $0x40] sm:$0xff]  ;;  %v1515_v29 = vld [vmem:[%s2425_s0 + $0x14] sm:$0xf0] }
   0x7   :  { %700 = vmatpush.bf16.msra.mxu1 %v1590_v3  ;;  %1792 = vmatpush.bf16.msra.mxu3 %v1590_v3  ;;  %v1194_v16 = vld [vmem:[%s2425_s0] sm:$0xf]  ;;  %v1513_v17 = vld [vmem:[%s2425_s0 + $0x4] sm:$0xf0]  ;;  %v1512_v20 = vld [vmem:[%s2425_s0 + $0x4] sm:$0xf]  ;;  %v1203_v36 = vor.u32 %v1515_v29, %v1202_v28 }
   0x8   :  { %v1322_v18 = vld [vmem:[%s2425_s0 + $0x100] sm:$0xf]  ;;  %v1545_v19 = vld [vmem:[%s2425_s0 + $0x104] sm:$0xf0]  ;;  %v1196_v21 = vld [vmem:[%s2425_s0 + $0x8] sm:$0xf0]  ;;  %v1195_v24 = vor.u32 %v1513_v17, %v1194_v16 }
   0x9   :  { %v1544_v22 = vld [vmem:[%s2425_s0 + $0x104] sm:$0xf]  ;;  %v1324_v23 = vld [vmem:[%s2425_s0 + $0x108] sm:$0xf0]  ;;  %v1323_v25 = vor.u32 %v1545_v19, %v1322_v18  ;;  %v1199_v26 = vor.u32 %v1512_v20, %v1196_v21  ;;  %v1330_v30 = vld [vmem:[%s2425_s0 + $0x110] sm:$0xf] }
   0xa   :  { %532 = vmatpush.bf16.msra.mxu0 %v1581_v4  ;;  %1785 = vmatpush.bf16.msra.mxu2 %v1581_v4  ;;  %v1327_v27 = vor.u32 %v1544_v22, %v1324_v23  ;;  %v1547_v31 = vld [vmem:[%s2425_s0 + $0x114] sm:$0xf0]  ;;  %v1514_v32 = vld [vmem:[%s2425_s0 + $0x14] sm:$0xf]  ;;  %v1204_v33 = vld [vmem:[%s2425_s0 + $0x18] sm:$0xf0] }
   0xb   :  { %701 = vmatpush.bf16.msra.mxu1 %v1589_v5  ;;  %1793 = vmatpush.bf16.msra.mxu3 %v1589_v5  ;;  %v1546_v34 = vld [vmem:[%s2425_s0 + $0x114] sm:$0xf]  ;;  %v1332_v35 = vld [vmem:[%s2425_s0 + $0x118] sm:$0xf0]  ;;  %v1331_v37 = vor.u32 %v1547_v31, %v1330_v30  ;;  %v1207_v38 = vor.u32 %v1514_v32, %v1204_v33  ;;  %v1210_v40 = vld [vmem:[%s2425_s0 + $0x20] sm:$0xf] }
   0xc   :  { %v1335_v39 = vor.u32 %v1546_v34, %v1332_v35  ;;  %v1517_v41 = vld [vmem:[%s2425_s0 + $0x24] sm:$0xf0]  ;;  %v1338_v42 = vld [vmem:[%s2425_s0 + $0x120] sm:$0xf]  ;;  %v1516_v44 = vld [vmem:[%s2425_s0 + $0x24] sm:$0xf] }
   0xd   :  { %v1549_v43 = vld [vmem:[%s2425_s0 + $0x124] sm:$0xf0]  ;;  %v1212_v45 = vld [vmem:[%s2425_s0 + $0x28] sm:$0xf0]  ;;  %v1548_v46 = vld [vmem:[%s2425_s0 + $0x124] sm:$0xf]  ;;  %v1211_v48 = vor.u32 %v1517_v41, %v1210_v40 }
   0xe   :  { %533 = vmatpush.bf16.msra.mxu0 %v1580_v6  ;;  %1786 = vmatpush.bf16.msra.mxu2 %v1580_v6  ;;  %v1340_v47 = vld [vmem:[%s2425_s0 + $0x128] sm:$0xf0]  ;;  %v1339_v49 = vor.u32 %v1549_v43, %v1338_v42  ;;  %v1215_v50 = vor.u32 %v1516_v44, %v1212_v45  ;;  %v1218_v52 = vld [vmem:[%s2425_s0 + $0x30] sm:$0xf]  ;;  %v1519_v53 = vld [vmem:[%s2425_s0 + $0x34] sm:$0xf0] }
   0xf   :  { %702 = vmatpush.bf16.msra.mxu1 %v1588_v7  ;;  %1794 = vmatpush.bf16.msra.mxu3 %v1588_v7  ;;  %v1343_v51 = vor.u32 %v1548_v46, %v1340_v47  ;;  %v1346_v54 = vld [vmem:[%s2425_s0 + $0x130] sm:$0xf]  ;;  %v1551_v55 = vld [vmem:[%s2425_s0 + $0x134] sm:$0xf0]  ;;  %v1518_v56 = vld [vmem:[%s2425_s0 + $0x34] sm:$0xf]  ;;  %v1219_v60 = vor.u32 %v1519_v53, %v1218_v52 }
  0x10   :  { %v1220_v57 = vld [vmem:[%s2425_s0 + $0x38] sm:$0xf0]  ;;  %v1550_v58 = vld [vmem:[%s2425_s0 + $0x134] sm:$0xf]  ;;  %v1347_v61 = vor.u32 %v1551_v55, %v1346_v54  ;;  %v1226_v0 = vld [vmem:[%s2425_s0 + $0x40] sm:$0xf] }
  0x11   :  { %v1348_v59 = vld [vmem:[%s2425_s0 + $0x138] sm:$0xf0]  ;;  %v1223_v62 = vor.u32 %v1518_v56, %v1220_v57  ;;  %v1521_v1 = vld [vmem:[%s2425_s0 + $0x44] sm:$0xf0]  ;;  %v1354_v2 = vld [vmem:[%s2425_s0 + $0x140] sm:$0xf] }
  0x12   :  { %534 = vmatpush.bf16.msra.mxu0 %v1579_v8  ;;  %1787 = vmatpush.bf16.msra.mxu2 %v1579_v8  ;;  %v1351_v63 = vor.u32 %v1550_v58, %v1348_v59  ;;  %v1553_v3 = vld [vmem:[%s2425_s0 + $0x144] sm:$0xf0]  ;;  %v1520_v4 = vld [vmem:[%s2425_s0 + $0x44] sm:$0xf]  ;;  %v1228_v5 = vld [vmem:[%s2425_s0 + $0x48] sm:$0xf0]  ;;  %v1227_v8 = vor.u32 %v1521_v1, %v1226_v0 }
  0x13   :  { %703 = vmatpush.bf16.msra.mxu1 %v1587_v9  ;;  %1795 = vmatpush.bf16.msra.mxu3 %v1587_v9  ;;  %v1552_v6 = vld [vmem:[%s2425_s0 + $0x144] sm:$0xf]  ;;  %v1356_v7 = vld [vmem:[%s2425_s0 + $0x148] sm:$0xf0]  ;;  %v1355_v9 = vor.u32 %v1553_v3, %v1354_v2  ;;  %v1522_v16 = vld [vmem:[%s2425_s0 + $0x54] sm:$0xf] }
  0x14   :  { %v1236_v17 = vld [vmem:[%s2425_s0 + $0x58] sm:$0xf0]  ;;  %v1554_v18 = vld [vmem:[%s2425_s0 + $0x154] sm:$0xf]  ;;  %v1524_v28 = vld [vmem:[%s2425_s0 + $0x64] sm:$0xf] }
  0x15   :  { %v1364_v19 = vld [vmem:[%s2425_s0 + $0x158] sm:$0xf0]  ;;  %v1239_v22 = vor.u32 %v1522_v16, %v1236_v17  ;;  %v1244_v29 = vld [vmem:[%s2425_s0 + $0x68] sm:$0xf0]  ;;  %v1556_v30 = vld [vmem:[%s2425_s0 + $0x164] sm:$0xf] }
  0x16   :  { %535 = vmatpush.bf16.msra.mxu0 %v1578_v10  ;;  %1788 = vmatpush.bf16.msra.mxu2 %v1578_v10  ;;  %v1231_v10 = vor.u32 %v1520_v4, %v1228_v5  ;;  %v1367_v23 = vor.u32 %v1554_v18, %v1364_v19  ;;  %v1372_v31 = vld [vmem:[%s2425_s0 + $0x168] sm:$0xf0]  ;;  %v1247_v34 = vor.u32 %v1524_v28, %v1244_v29  ;;  %v1526_v40 = vld [vmem:[%s2425_s0 + $0x74] sm:$0xf]  ;;  %v1252_v41 = vld [vmem:[%s2425_s0 + $0x78] sm:$0xf0] }
  0x17   :  { %704 = vmatpush.bf16.msra.mxu1 %v1586_v11  ;;  %1796 = vmatpush.bf16.msra.mxu3 %v1586_v11  ;;  %v1359_v11 = vor.u32 %v1552_v6, %v1356_v7  ;;  %v1375_v35 = vor.u32 %v1556_v30, %v1372_v31  ;;  %v1558_v42 = vld [vmem:[%s2425_s0 + $0x174] sm:$0xf]  ;;  %v1380_v43 = vld [vmem:[%s2425_s0 + $0x178] sm:$0xf0]  ;;  %v1255_v46 = vor.u32 %v1526_v40, %v1252_v41  ;;  %v1528_v52 = vld [vmem:[%s2425_s0 + $0x84] sm:$0xf] }
  0x18   :  { %v1383_v47 = vor.u32 %v1558_v42, %v1380_v43  ;;  %v1260_v53 = vld [vmem:[%s2425_s0 + $0x88] sm:$0xf0]  ;;  %v1560_v54 = vld [vmem:[%s2425_s0 + $0x184] sm:$0xf]  ;;  %v2088_v56 = vld [vmem:[%s2424_s2] ss:$0 sm:$0xff] }
  0x19   :  { %v1388_v55 = vld [vmem:[%s2425_s0 + $0x188] sm:$0xf0]  ;;  %v1266_v7 = vld [vmem:[%s2425_s0 + $0x90] sm:$0xf]  ;;  %v1396_v18 = vld [vmem:[%s2425_s0 + $0x198] sm:$0xf0] }
  0x1a   :  { %536 = vmatpush.bf16.msra.mxu0 %v1577_v12  ;;  %1789 = vmatpush.bf16.msra.mxu2 %v1577_v12  ;;  %v1234_v12 = vld [vmem:[%s2425_s0 + $0x50] sm:$0xf] }
  0x1b   :  { %705 = vmatpush.bf16.msra.mxu1 %v1585_v13  ;;  %1797 = vmatpush.bf16.msra.mxu3 %v1585_v13  ;;  %v1523_v13 = vld [vmem:[%s2425_s0 + $0x54] sm:$0xf0] }
  0x1c   :  { %v1235_v20 = vor.u32 %v1523_v13, %v1234_v12  ;;  %v1563_v12 = vld [vmem:[%s2425_s0 + $0x194] sm:$0xf0]  ;;  %v1530_v13 = vld [vmem:[%s2425_s0 + $0x94] sm:$0xf] }
  0x1e   :  { %537 = vmatpush.bf16.msra.mxu0 %v1576_v14  ;;  %1790 = vmatpush.bf16.msra.mxu2 %v1576_v14  ;;  %v1362_v14 = vld [vmem:[%s2425_s0 + $0x150] sm:$0xf] }
  0x1f   :  { %706 = vmatpush.bf16.msra.mxu1 %v1584_v15  ;;  %1798 = vmatpush.bf16.msra.mxu3 %v1584_v15  ;;  %v1555_v15 = vld [vmem:[%s2425_s0 + $0x154] sm:$0xf0] }
  0x20   :  { %v1363_v21 = vor.u32 %v1555_v15, %v1362_v14  ;;  %v1268_v14 = vld [vmem:[%s2425_s0 + $0x98] sm:$0xf0]  ;;  %v1562_v15 = vld [vmem:[%s2425_s0 + $0x194] sm:$0xf] }
  0x21   :  { %538 = vmatmul.bf16.vlgmr.msra.gmra.mxu0 %v1195_v24  ;;  %618 = vmatmul.bf16.vlgmr.msra.gmra.mxu2 %v1323_v25  ;;  %v1242_v24 = vld [vmem:[%s2425_s0 + $0x60] sm:$0xf]  ;;  %v1525_v25 = vld [vmem:[%s2425_s0 + $0x64] sm:$0xf0]  ;;  %v1271_v28 = vor.u32 %v1530_v13, %v1268_v14  ;;  %v1399_v29 = vor.u32 %v1562_v15, %v1396_v18 }
  0x22   :  { %707 = vmatmul.bf16.vlgmr.msra.gmra.mxu1 %v1199_v26  ;;  %787 = vmatmul.bf16.vlgmr.msra.gmra.mxu3 %v1327_v27  ;;  %v1370_v26 = vld [vmem:[%s2425_s0 + $0x160] sm:$0xf]  ;;  %v1557_v27 = vld [vmem:[%s2425_s0 + $0x164] sm:$0xf0]  ;;  %v1243_v32 = vor.u32 %v1525_v25, %v1242_v24 }
  0x23   :  { %v1371_v33 = vor.u32 %v1557_v27, %v1370_v26 }
  0x31   :  { %543 = vmatmul.bf16.gmra.mxu0 %v1203_v36  ;;  %623 = vmatmul.bf16.gmra.mxu2 %v1331_v37  ;;  %v1250_v36 = vld [vmem:[%s2425_s0 + $0x70] sm:$0xf]  ;;  %v1527_v37 = vld [vmem:[%s2425_s0 + $0x74] sm:$0xf0] }
  0x32   :  { %712 = vmatmul.bf16.gmra.mxu1 %v1207_v38  ;;  %792 = vmatmul.bf16.gmra.mxu3 %v1335_v39  ;;  %v1378_v38 = vld [vmem:[%s2425_s0 + $0x170] sm:$0xf]  ;;  %v1559_v39 = vld [vmem:[%s2425_s0 + $0x174] sm:$0xf0]  ;;  %v1251_v44 = vor.u32 %v1527_v37, %v1250_v36 }
  0x33   :  { %v1379_v45 = vor.u32 %v1559_v39, %v1378_v38 }
  0x41   :  { %548 = vmatmul.bf16.gmra.mxu0 %v1211_v48  ;;  %628 = vmatmul.bf16.gmra.mxu2 %v1339_v49  ;;  %v1258_v48 = vld [vmem:[%s2425_s0 + $0x80] sm:$0xf]  ;;  %v1529_v49 = vld [vmem:[%s2425_s0 + $0x84] sm:$0xf0] }
  0x42   :  { %717 = vmatmul.bf16.gmra.mxu1 %v1215_v50  ;;  %797 = vmatmul.bf16.gmra.mxu3 %v1343_v51  ;;  %v1386_v50 = vld [vmem:[%s2425_s0 + $0x180] sm:$0xf]  ;;  %v1561_v51 = vld [vmem:[%s2425_s0 + $0x184] sm:$0xf0]  ;;  %v1259_v57 = vor.u32 %v1529_v49, %v1258_v48 }
  0x43   :  { %v1387_v58 = vor.u32 %v1561_v51, %v1386_v50  ;;  %v1565_v50 = vld [vmem:[%s2425_s0 + $0x1a4] sm:$0xf0]  ;;  %v1532_v51 = vld [vmem:[%s2425_s0 + $0xa4] sm:$0xf] }
  0x51   :  { %553 = vmatmul.bf16.gmra.mxu0 %v1219_v60  ;;  %633 = vmatmul.bf16.gmra.mxu2 %v1347_v61  ;;  %v1263_v60 = vor.u32 %v1528_v52, %v1260_v53  ;;  %v1391_v61 = vor.u32 %v1560_v54, %v1388_v55  ;;  %v1276_v52 = vld [vmem:[%s2425_s0 + $0xa8] sm:$0xf0]  ;;  %v1564_v53 = vld [vmem:[%s2425_s0 + $0x1a4] sm:$0xf] }
  0x52   :  { %722 = vmatmul.bf16.gmra.mxu1 %v1223_v62  ;;  %802 = vmatmul.bf16.gmra.mxu3 %v1351_v63 }
  0x61   :  { %558 = vmatmul.bf16.gmra.mxu0 %v1227_v8  ;;  %638 = vmatmul.bf16.gmra.mxu2 %v1355_v9  ;;  %v1531_v8 = vld [vmem:[%s2425_s0 + $0x94] sm:$0xf0]  ;;  %v1394_v9 = vld [vmem:[%s2425_s0 + $0x190] sm:$0xf] }
  0x62   :  { %727 = vmatmul.bf16.gmra.mxu1 %v1231_v10  ;;  %807 = vmatmul.bf16.gmra.mxu3 %v1359_v11  ;;  %v1395_v25 = vor.u32 %v1563_v12, %v1394_v9 }
  0x71   :  { %563 = vmatmul.bf16.gmra.mxu0 %v1235_v20  ;;  %643 = vmatmul.bf16.gmra.mxu2 %v1363_v21  ;;  %v1267_v20 = vor.u32 %v1531_v8, %v1266_v7 }
  0x72   :  { %732 = vmatmul.bf16.gmra.mxu1 %v1239_v22  ;;  %812 = vmatmul.bf16.gmra.mxu3 %v1367_v23 }
  0x81   :  { %568 = vmatmul.bf16.gmra.mxu0 %v1243_v32  ;;  %648 = vmatmul.bf16.gmra.mxu2 %v1371_v33 }
  0x82   :  { %737 = vmatmul.bf16.gmra.mxu1 %v1247_v34  ;;  %817 = vmatmul.bf16.gmra.mxu3 %v1375_v35 }
  0x91   :  { %573 = vmatmul.bf16.gmra.mxu0 %v1251_v44  ;;  %653 = vmatmul.bf16.gmra.mxu2 %v1379_v45  ;;  %v1274_v45 = vld [vmem:[%s2425_s0 + $0xa0] sm:$0xf] }
  0x92   :  { %742 = vmatmul.bf16.gmra.mxu1 %v1255_v46  ;;  %822 = vmatmul.bf16.gmra.mxu3 %v1383_v47  ;;  %v1533_v46 = vld [vmem:[%s2425_s0 + $0xa4] sm:$0xf0]  ;;  %v1402_v47 = vld [vmem:[%s2425_s0 + $0x1a0] sm:$0xf] }
  0x9e   :  { %v539_v59 = vpop.f32.mrf.mxu0 }
  0x9f   :  { %v708_v62 = vpop.f32.mrf.mxu1  ;;  %v540_v63 = vadd.f32 %v2088_v56, %v539_v59  ;;  %v1275_v59 = vor.u32 %v1533_v46, %v1274_v45 }
  0xa1   :  { %578 = vmatmul.bf16.gmra.mxu0 %v1259_v57  ;;  %658 = vmatmul.bf16.gmra.mxu2 %v1387_v58  ;;  %v709_v1 = vadd.f32 %v708_v62, %v540_v63  ;;  %v1404_v57 = vld [vmem:[%s2425_s0 + $0x1a8] sm:$0xf0] }
  0xa2   :  { %747 = vmatmul.bf16.gmra.mxu1 %v1263_v60  ;;  %827 = vmatmul.bf16.gmra.mxu3 %v1391_v61 }
  0xa3   :  { %v932_v10 = vmul.f32 0.2, %v709_v1  ;;  %vm868_vm0 = vcmp.ge.f32.partialorder %v709_v1, 0.0 }
  0xa4   :  { %v619_v0 = vpop.f32.mrf.mxu2 }
  0xa5   :  { %v788_v2 = vpop.f32.mrf.mxu3  ;;  %v620_v4 = vadd.f32 %v2088_v56, %v619_v0  ;;  %v996_v21 = vsel %vm868_vm0, %v709_v1, %v932_v10  ;;  %v1403_v0 = vor.u32 %v1565_v50, %v1402_v47 }
  0xa6   :  { %v541_v3 = vpop.f32.mrf.mxu0 }
  0xa7   :  { %v542_v5 = vadd.f32 %v2088_v56, %v541_v3  ;;  %v710_v6 = vpop.f32.mrf.mxu1  ;;  %v789_v16 = vadd.f32 %v788_v2, %v620_v4  ;;  %v1279_v3 = vor.u32 %v1532_v51, %v1276_v52  ;;  %v1407_v4 = vor.u32 %v1564_v53, %v1404_v57 }
  0xa9   :  { %v711_v11 = vadd.f32 %v710_v6, %v542_v5  ;;  %v964_v30 = vmul.f32 0.2, %v789_v16  ;;  %vm900_vm2 = vcmp.ge.f32.partialorder %v789_v16, 0.0 }
  0xab   :  { %vm869_vm1 = vcmp.ge.f32.partialorder %v711_v11, 0.0  ;;  %v933_v17 = vmul.f32 0.2, %v711_v11  ;;  %v1028_v35 = vsel %vm900_vm2, %v789_v16, %v964_v30 }
  0xac   :  { %v621_v19 = vpop.f32.mrf.mxu2 }
  0xad   :  { %v997_v22 = vsel %vm869_vm1, %v711_v11, %v933_v17  ;;  %v622_v23 = vadd.f32 %v2088_v56, %v621_v19  ;;  %v790_v24 = vpop.f32.mrf.mxu3 }
  0xae   :  { %v1595_v26 = vpack.c.bf16 %v997_v22, %v996_v21  ;;  %v544_v27 = vpop.f32.mrf.mxu0  ;;  %v1535_v21 = vld [vmem:[%s2425_s0 + $0xb4] sm:$0xf0]  ;;  %v1410_v22 = vld [vmem:[%s2425_s0 + $0x1b0] sm:$0xf] }
  0xaf   :  { %v791_v31 = vadd.f32 %v790_v24, %v622_v23  ;;  %v713_v32 = vpop.f32.mrf.mxu1  ;;  %v545_v34 = vadd.f32 %v2088_v56, %v544_v27  ;;  %v1284_v27 = vld [vmem:[%s2425_s0 + $0xb8] sm:$0xf0] }
  0xb0   :  { %1596 = vst [vmem:[%s2426_s3] sm:$0xff] %v1595_v26   ;;  %v1534_v26 = vld [vmem:[%s2425_s0 + $0xb4] sm:$0xf] }
  0xb1   :  { %vm901_vm3 = vcmp.ge.f32.partialorder %v791_v31, 0.0  ;;  %v965_v33 = vmul.f32 0.2, %v791_v31  ;;  %583 = vmatmul.bf16.gmra.mxu0 %v1267_v20  ;;  %663 = vmatmul.bf16.gmra.mxu2 %v1395_v25  ;;  %v714_v39 = vadd.f32 %v713_v32, %v545_v34  ;;  %v1282_v20 = vld [vmem:[%s2425_s0 + $0xb0] sm:$0xf] }
  0xb2   :  { %752 = vmatmul.bf16.gmra.mxu1 %v1271_v28  ;;  %832 = vmatmul.bf16.gmra.mxu3 %v1399_v29  ;;  %v1567_v25 = vld [vmem:[%s2425_s0 + $0x1b4] sm:$0xf0]  ;;  %v1566_v28 = vld [vmem:[%s2425_s0 + $0x1b4] sm:$0xf] }
  0xb3   :  { %v1029_v36 = vsel %vm901_vm3, %v791_v31, %v965_v33  ;;  %v934_v48 = vmul.f32 0.2, %v714_v39  ;;  %vm870_vm4 = vcmp.ge.f32.partialorder %v714_v39, 0.0  ;;  %v1412_v31 = vld [vmem:[%s2425_s0 + $0x1b8] sm:$0xf0]  ;;  %v1283_v33 = vor.u32 %v1535_v21, %v1282_v20 }
  0xb4   :  { %v1675_v37 = vpack.c.bf16 %v1029_v36, %v1028_v35  ;;  %v624_v38 = vpop.f32.mrf.mxu2 }
  0xb5   :  { %v793_v40 = vpop.f32.mrf.mxu3  ;;  %v625_v42 = vadd.f32 %v2088_v56, %v624_v38  ;;  %v998_v60 = vsel %vm870_vm4, %v714_v39, %v934_v48  ;;  %v1411_v38 = vor.u32 %v1567_v25, %v1410_v22 }
  0xb6   :  { %1767 = vst [vmem:[%s2426_s3 + $0x80] sm:$0xff] %v1675_v37   ;;  %v546_v41 = vpop.f32.mrf.mxu0 }
  0xb7   :  { %v547_v43 = vadd.f32 %v2088_v56, %v546_v41  ;;  %v715_v44 = vpop.f32.mrf.mxu1  ;;  %v794_v54 = vadd.f32 %v793_v40, %v625_v42  ;;  %v1287_v41 = vor.u32 %v1534_v26, %v1284_v27  ;;  %v1415_v42 = vor.u32 %v1566_v28, %v1412_v31 }
  0xb9   :  { %v716_v49 = vadd.f32 %v715_v44, %v547_v43  ;;  %v966_v5 = vmul.f32 0.2, %v794_v54  ;;  %vm902_vm6 = vcmp.ge.f32.partialorder %v794_v54, 0.0 }
  0xbb   :  { %vm871_vm5 = vcmp.ge.f32.partialorder %v716_v49, 0.0  ;;  %v935_v55 = vmul.f32 0.2, %v716_v49  ;;  %v1030_v10 = vsel %vm902_vm6, %v794_v54, %v966_v5 }
  0xbc   :  { %v626_v58 = vpop.f32.mrf.mxu2 }
  0xbd   :  { %v999_v61 = vsel %vm871_vm5, %v716_v49, %v935_v55  ;;  %v627_v62 = vadd.f32 %v2088_v56, %v626_v58  ;;  %v795_v63 = vpop.f32.mrf.mxu3 }
  0xbe   :  { %v1600_v1 = vpack.c.bf16 %v999_v61, %v998_v60  ;;  %v549_v2 = vpop.f32.mrf.mxu0  ;;  %v1537_v60 = vld [vmem:[%s2425_s0 + $0xc4] sm:$0xf0]  ;;  %v1418_v61 = vld [vmem:[%s2425_s0 + $0x1c0] sm:$0xf] }
  0xbf   :  { %v796_v6 = vadd.f32 %v795_v63, %v627_v62  ;;  %v718_v7 = vpop.f32.mrf.mxu1  ;;  %v550_v9 = vadd.f32 %v2088_v56, %v549_v2  ;;  %v1292_v2 = vld [vmem:[%s2425_s0 + $0xc8] sm:$0xf0] }
  0xc0   :  { %1752 = vst [vmem:[%s2426_s3 + $0x8] sm:$0xff] %v1600_v1   ;;  %v1536_v1 = vld [vmem:[%s2425_s0 + $0xc4] sm:$0xf] }
  0xc1   :  { %vm903_vm7 = vcmp.ge.f32.partialorder %v796_v6, 0.0  ;;  %v967_v8 = vmul.f32 0.2, %v796_v6  ;;  %588 = vmatmul.bf16.gmra.mxu0 %v1275_v59  ;;  %668 = vmatmul.bf16.gmra.mxu2 %v1403_v0  ;;  %v719_v14 = vadd.f32 %v718_v7, %v550_v9  ;;  %v1290_v59 = vld [vmem:[%s2425_s0 + $0xc0] sm:$0xf] }
  0xc2   :  { %757 = vmatmul.bf16.gmra.mxu1 %v1279_v3  ;;  %837 = vmatmul.bf16.gmra.mxu3 %v1407_v4  ;;  %v1569_v0 = vld [vmem:[%s2425_s0 + $0x1c4] sm:$0xf0]  ;;  %v1568_v3 = vld [vmem:[%s2425_s0 + $0x1c4] sm:$0xf] }
  0xc3   :  { %v1031_v11 = vsel %vm903_vm7, %v796_v6, %v967_v8  ;;  %v936_v23 = vmul.f32 0.2, %v719_v14  ;;  %vm872_vm8 = vcmp.ge.f32.partialorder %v719_v14, 0.0  ;;  %v1420_v6 = vld [vmem:[%s2425_s0 + $0x1c8] sm:$0xf0]  ;;  %v1291_v8 = vor.u32 %v1537_v60, %v1290_v59 }
  0xc4   :  { %v1680_v12 = vpack.c.bf16 %v1031_v11, %v1030_v10  ;;  %v629_v13 = vpop.f32.mrf.mxu2 }
  0xc5   :  { %v798_v15 = vpop.f32.mrf.mxu3  ;;  %v630_v17 = vadd.f32 %v2088_v56, %v629_v13  ;;  %v1000_v34 = vsel %vm872_vm8, %v719_v14, %v936_v23  ;;  %v1419_v13 = vor.u32 %v1569_v0, %v1418_v61 }
  0xc6   :  { %1768 = vst [vmem:[%s2426_s3 + $0x88] sm:$0xff] %v1680_v12   ;;  %v551_v16 = vpop.f32.mrf.mxu0 }
  0xc7   :  { %v552_v18 = vadd.f32 %v2088_v56, %v551_v16  ;;  %v720_v19 = vpop.f32.mrf.mxu1  ;;  %v799_v29 = vadd.f32 %v798_v15, %v630_v17  ;;  %v1295_v16 = vor.u32 %v1536_v1, %v1292_v2  ;;  %v1423_v17 = vor.u32 %v1568_v3, %v1420_v6 }
  0xc9   :  { %v721_v24 = vadd.f32 %v720_v19, %v552_v18  ;;  %v968_v43 = vmul.f32 0.2, %v799_v29  ;;  %vm904_vm10 = vcmp.ge.f32.partialorder %v799_v29, 0.0 }
  0xcb   :  { %vm873_vm9 = vcmp.ge.f32.partialorder %v721_v24, 0.0  ;;  %v937_v30 = vmul.f32 0.2, %v721_v24  ;;  %v1032_v48 = vsel %vm904_vm10, %v799_v29, %v968_v43 }
  0xcc   :  { %v631_v32 = vpop.f32.mrf.mxu2 }
  0xcd   :  { %v1001_v35 = vsel %vm873_vm9, %v721_v24, %v937_v30  ;;  %v632_v36 = vadd.f32 %v2088_v56, %v631_v32  ;;  %v800_v37 = vpop.f32.mrf.mxu3 }
  0xce   :  { %v1605_v39 = vpack.c.bf16 %v1001_v35, %v1000_v34  ;;  %v554_v40 = vpop.f32.mrf.mxu0  ;;  %v1539_v34 = vld [vmem:[%s2425_s0 + $0xd4] sm:$0xf0]  ;;  %v1426_v35 = vld [vmem:[%s2425_s0 + $0x1d0] sm:$0xf] }
  0xcf   :  { %v801_v44 = vadd.f32 %v800_v37, %v632_v36  ;;  %v723_v45 = vpop.f32.mrf.mxu1  ;;  %v555_v47 = vadd.f32 %v2088_v56, %v554_v40  ;;  %v1300_v40 = vld [vmem:[%s2425_s0 + $0xd8] sm:$0xf0] }
  0xd0   :  { %1753 = vst [vmem:[%s2426_s3 + $0x10] sm:$0xff] %v1605_v39   ;;  %v1538_v39 = vld [vmem:[%s2425_s0 + $0xd4] sm:$0xf] }
  0xd1   :  { %vm905_vm11 = vcmp.ge.f32.partialorder %v801_v44, 0.0  ;;  %v969_v46 = vmul.f32 0.2, %v801_v44  ;;  %593 = vmatmul.bf16.gmra.mxu0 %v1283_v33  ;;  %673 = vmatmul.bf16.gmra.mxu2 %v1411_v38  ;;  %v724_v52 = vadd.f32 %v723_v45, %v555_v47  ;;  %v1298_v33 = vld [vmem:[%s2425_s0 + $0xd0] sm:$0xf] }
  0xd2   :  { %762 = vmatmul.bf16.gmra.mxu1 %v1287_v41  ;;  %842 = vmatmul.bf16.gmra.mxu3 %v1415_v42  ;;  %v1571_v38 = vld [vmem:[%s2425_s0 + $0x1d4] sm:$0xf0]  ;;  %v1570_v41 = vld [vmem:[%s2425_s0 + $0x1d4] sm:$0xf] }
  0xd3   :  { %v1033_v49 = vsel %vm905_vm11, %v801_v44, %v969_v46  ;;  %v938_v62 = vmul.f32 0.2, %v724_v52  ;;  %vm874_vm12 = vcmp.ge.f32.partialorder %v724_v52, 0.0  ;;  %v1428_v44 = vld [vmem:[%s2425_s0 + $0x1d8] sm:$0xf0]  ;;  %v1299_v46 = vor.u32 %v1539_v34, %v1298_v33 }
  0xd4   :  { %v1685_v50 = vpack.c.bf16 %v1033_v49, %v1032_v48  ;;  %v634_v51 = vpop.f32.mrf.mxu2 }
  0xd5   :  { %v803_v53 = vpop.f32.mrf.mxu3  ;;  %v635_v55 = vadd.f32 %v2088_v56, %v634_v51  ;;  %v1002_v9 = vsel %vm874_vm12, %v724_v52, %v938_v62  ;;  %v1427_v51 = vor.u32 %v1571_v38, %v1426_v35 }
  0xd6   :  { %1769 = vst [vmem:[%s2426_s3 + $0x90] sm:$0xff] %v1685_v50   ;;  %v556_v54 = vpop.f32.mrf.mxu0 }
  0xd7   :  { %v557_v57 = vadd.f32 %v2088_v56, %v556_v54  ;;  %v725_v58 = vpop.f32.mrf.mxu1  ;;  %v804_v4 = vadd.f32 %v803_v53, %v635_v55  ;;  %v1303_v54 = vor.u32 %v1538_v39, %v1300_v40  ;;  %v1431_v55 = vor.u32 %v1570_v41, %v1428_v44 }
  0xd9   :  { %v726_v63 = vadd.f32 %v725_v58, %v557_v57  ;;  %v970_v18 = vmul.f32 0.2, %v804_v4  ;;  %vm906_vm14 = vcmp.ge.f32.partialorder %v804_v4, 0.0 }
  0xdb   :  { %vm875_vm13 = vcmp.ge.f32.partialorder %v726_v63, 0.0  ;;  %v939_v5 = vmul.f32 0.2, %v726_v63  ;;  %v1034_v23 = vsel %vm906_vm14, %v804_v4, %v970_v18 }
  0xdc   :  { %v636_v7 = vpop.f32.mrf.mxu2 }
  0xdd   :  { %v1003_v10 = vsel %vm875_vm13, %v726_v63, %v939_v5  ;;  %v637_v11 = vadd.f32 %v2088_v56, %v636_v7  ;;  %v805_v12 = vpop.f32.mrf.mxu3 }
  0xde   :  { %v1610_v14 = vpack.c.bf16 %v1003_v10, %v1002_v9  ;;  %v559_v15 = vpop.f32.mrf.mxu0  ;;  %v1541_v9 = vld [vmem:[%s2425_s0 + $0xe4] sm:$0xf0]  ;;  %v1434_v10 = vld [vmem:[%s2425_s0 + $0x1e0] sm:$0xf] }
  0xdf   :  { %v806_v19 = vadd.f32 %v805_v12, %v637_v11  ;;  %v728_v20 = vpop.f32.mrf.mxu1  ;;  %v560_v22 = vadd.f32 %v2088_v56, %v559_v15  ;;  %v1308_v15 = vld [vmem:[%s2425_s0 + $0xe8] sm:$0xf0] }
  0xe0   :  { %1754 = vst [vmem:[%s2426_s3 + $0x18] sm:$0xff] %v1610_v14   ;;  %v1540_v14 = vld [vmem:[%s2425_s0 + $0xe4] sm:$0xf] }
  0xe1   :  { %vm907_vm15 = vcmp.ge.f32.partialorder %v806_v19, 0.0  ;;  %v971_v21 = vmul.f32 0.2, %v806_v19  ;;  %598 = vmatmul.bf16.gmra.mxu0 %v1291_v8  ;;  %678 = vmatmul.bf16.gmra.mxu2 %v1419_v13  ;;  %v729_v27 = vadd.f32 %v728_v20, %v560_v22  ;;  %v1306_v8 = vld [vmem:[%s2425_s0 + $0xe0] sm:$0xf] }
  0xe2   :  { %767 = vmatmul.bf16.gmra.mxu1 %v1295_v16  ;;  %847 = vmatmul.bf16.gmra.mxu3 %v1423_v17  ;;  %v1573_v13 = vld [vmem:[%s2425_s0 + $0x1e4] sm:$0xf0]  ;;  %v1572_v16 = vld [vmem:[%s2425_s0 + $0x1e4] sm:$0xf] }
  0xe3   :  { %v1035_v24 = vsel %vm907_vm15, %v806_v19, %v971_v21  ;;  %v940_v36 = vmul.f32 0.2, %v729_v27  ;;  %vm876_vm0 = vcmp.ge.f32.partialorder %v729_v27, 0.0  ;;  %v1436_v19 = vld [vmem:[%s2425_s0 + $0x1e8] sm:$0xf0]  ;;  %v1307_v21 = vor.u32 %v1541_v9, %v1306_v8 }
  0xe4   :  { %v1690_v25 = vpack.c.bf16 %v1035_v24, %v1034_v23  ;;  %v639_v26 = vpop.f32.mrf.mxu2 }
  0xe5   :  { %v808_v28 = vpop.f32.mrf.mxu3  ;;  %v640_v30 = vadd.f32 %v2088_v56, %v639_v26  ;;  %v1004_v47 = vsel %vm876_vm0, %v729_v27, %v940_v36  ;;  %v1435_v26 = vor.u32 %v1573_v13, %v1434_v10 }
  0xe6   :  { %1770 = vst [vmem:[%s2426_s3 + $0x98] sm:$0xff] %v1690_v25   ;;  %v561_v29 = vpop.f32.mrf.mxu0 }
  0xe7   :  { %v562_v31 = vadd.f32 %v2088_v56, %v561_v29  ;;  %v730_v32 = vpop.f32.mrf.mxu1  ;;  %v809_v42 = vadd.f32 %v808_v28, %v640_v30  ;;  %v1311_v29 = vor.u32 %v1540_v14, %v1308_v15  ;;  %v1439_v30 = vor.u32 %v1572_v16, %v1436_v19 }
  0xe9   :  { %v731_v37 = vadd.f32 %v730_v32, %v562_v31  ;;  %v972_v57 = vmul.f32 0.2, %v809_v42  ;;  %vm908_vm2 = vcmp.ge.f32.partialorder %v809_v42, 0.0 }
  0xeb   :  { %vm877_vm1 = vcmp.ge.f32.partialorder %v731_v37, 0.0  ;;  %v941_v43 = vmul.f32 0.2, %v731_v37  ;;  %v1036_v62 = vsel %vm908_vm2, %v809_v42, %v972_v57 }
  0xec   :  { %v641_v45 = vpop.f32.mrf.mxu2 }
  0xed   :  { %v1005_v48 = vsel %vm877_vm1, %v731_v37, %v941_v43  ;;  %v642_v49 = vadd.f32 %v2088_v56, %v641_v45  ;;  %v810_v50 = vpop.f32.mrf.mxu3 }
  0xee   :  { %v1615_v52 = vpack.c.bf16 %v1005_v48, %v1004_v47  ;;  %v564_v53 = vpop.f32.mrf.mxu0  ;;  %v1543_v47 = vld [vmem:[%s2425_s0 + $0xf4] sm:$0xf0]  ;;  %v1442_v48 = vld [vmem:[%s2425_s0 + $0x1f0] sm:$0xf] }
  0xef   :  { %v811_v58 = vadd.f32 %v810_v50, %v642_v49  ;;  %v733_v59 = vpop.f32.mrf.mxu1  ;;  %v565_v61 = vadd.f32 %v2088_v56, %v564_v53  ;;  %v1316_v53 = vld [vmem:[%s2425_s0 + $0xf8] sm:$0xf0] }
  0xf0   :  { %1755 = vst [vmem:[%s2426_s3 + $0x20] sm:$0xff] %v1615_v52   ;;  %v1542_v52 = vld [vmem:[%s2425_s0 + $0xf4] sm:$0xf] }
  0xf1   :  { %vm909_vm3 = vcmp.ge.f32.partialorder %v811_v58, 0.0  ;;  %v973_v60 = vmul.f32 0.2, %v811_v58  ;;  %603 = vmatmul.bf16.gmra.mxu0 %v1299_v46  ;;  %683 = vmatmul.bf16.gmra.mxu2 %v1427_v51  ;;  %v734_v2 = vadd.f32 %v733_v59, %v565_v61  ;;  %v1314_v46 = vld [vmem:[%s2425_s0 + $0xf0] sm:$0xf] }
  0xf2   :  { %772 = vmatmul.bf16.gmra.mxu1 %v1303_v54  ;;  %852 = vmatmul.bf16.gmra.mxu3 %v1431_v55  ;;  %v1575_v51 = vld [vmem:[%s2425_s0 + $0x1f4] sm:$0xf0]  ;;  %v1574_v54 = vld [vmem:[%s2425_s0 + $0x1f4] sm:$0xf] }
  0xf3   :  { %v1037_v63 = vsel %vm909_vm3, %v811_v58, %v973_v60  ;;  %v942_v11 = vmul.f32 0.2, %v734_v2  ;;  %vm878_vm4 = vcmp.ge.f32.partialorder %v734_v2, 0.0  ;;  %v1444_v58 = vld [vmem:[%s2425_s0 + $0x1f8] sm:$0xf0]  ;;  %v1315_v60 = vor.u32 %v1543_v47, %v1314_v46 }
  0xf4   :  { %v1695_v0 = vpack.c.bf16 %v1037_v63, %v1036_v62  ;;  %v644_v1 = vpop.f32.mrf.mxu2 }
  0xf5   :  { %v813_v3 = vpop.f32.mrf.mxu3  ;;  %v645_v5 = vadd.f32 %v2088_v56, %v644_v1  ;;  %v1006_v22 = vsel %vm878_vm4, %v734_v2, %v942_v11  ;;  %v1443_v1 = vor.u32 %v1575_v51, %v1442_v48 }
  0xf6   :  { %1771 = vst [vmem:[%s2426_s3 + $0xa0] sm:$0xff] %v1695_v0   ;;  %v566_v4 = vpop.f32.mrf.mxu0 }
  0xf7   :  { %v567_v6 = vadd.f32 %v2088_v56, %v566_v4  ;;  %v735_v7 = vpop.f32.mrf.mxu1  ;;  %v814_v17 = vadd.f32 %v813_v3, %v645_v5  ;;  %v1319_v4 = vor.u32 %v1542_v52, %v1316_v53  ;;  %v1447_v5 = vor.u32 %v1574_v54, %v1444_v58 }
  0xf9   :  { %v736_v12 = vadd.f32 %v735_v7, %v567_v6  ;;  %v974_v31 = vmul.f32 0.2, %v814_v17  ;;  %vm910_vm6 = vcmp.ge.f32.partialorder %v814_v17, 0.0 }
  0xfb   :  { %vm879_vm5 = vcmp.ge.f32.partialorder %v736_v12, 0.0  ;;  %v943_v18 = vmul.f32 0.2, %v736_v12  ;;  %v1038_v36 = vsel %vm910_vm6, %v814_v17, %v974_v31 }
  0xfc   :  { %v646_v20 = vpop.f32.mrf.mxu2 }
  0xfd   :  { %v1007_v23 = vsel %vm879_vm5, %v736_v12, %v943_v18  ;;  %v647_v24 = vadd.f32 %v2088_v56, %v646_v20  ;;  %v815_v25 = vpop.f32.mrf.mxu3 }
  0xfe   :  { %v1620_v27 = vpack.c.bf16 %v1007_v23, %v1006_v22  ;;  %v569_v28 = vpop.f32.mrf.mxu0 }
  0xff   :  { %v816_v32 = vadd.f32 %v815_v25, %v647_v24  ;;  %v738_v33 = vpop.f32.mrf.mxu1  ;;  %v570_v35 = vadd.f32 %v2088_v56, %v569_v28 }
 0x100   :  { %1756 = vst [vmem:[%s2426_s3 + $0x28] sm:$0xff] %v1620_v27  }
 0x101   :  { %vm911_vm7 = vcmp.ge.f32.partialorder %v816_v32, 0.0  ;;  %v975_v34 = vmul.f32 0.2, %v816_v32  ;;  %608 = vmatmul.bf16.gmra.mxu0 %v1307_v21  ;;  %688 = vmatmul.bf16.gmra.mxu2 %v1435_v26  ;;  %v739_v40 = vadd.f32 %v738_v33, %v570_v35 }
 0x102   :  { %777 = vmatmul.bf16.gmra.mxu1 %v1311_v29  ;;  %857 = vmatmul.bf16.gmra.mxu3 %v1439_v30 }
 0x103   :  { %v1039_v37 = vsel %vm911_vm7, %v816_v32, %v975_v34  ;;  %v944_v49 = vmul.f32 0.2, %v739_v40  ;;  %vm880_vm8 = vcmp.ge.f32.partialorder %v739_v40, 0.0 }
 0x104   :  { %v1700_v38 = vpack.c.bf16 %v1039_v37, %v1038_v36  ;;  %v649_v39 = vpop.f32.mrf.mxu2 }
 0x105   :  { %v818_v41 = vpop.f32.mrf.mxu3  ;;  %v650_v43 = vadd.f32 %v2088_v56, %v649_v39  ;;  %v1008_v61 = vsel %vm880_vm8, %v739_v40, %v944_v49 }
 0x106   :  { %1772 = vst [vmem:[%s2426_s3 + $0xa8] sm:$0xff] %v1700_v38   ;;  %v571_v42 = vpop.f32.mrf.mxu0 }
 0x107   :  { %v572_v44 = vadd.f32 %v2088_v56, %v571_v42  ;;  %v740_v45 = vpop.f32.mrf.mxu1  ;;  %v819_v55 = vadd.f32 %v818_v41, %v650_v43 }
 0x109   :  { %v741_v50 = vadd.f32 %v740_v45, %v572_v44  ;;  %v976_v6 = vmul.f32 0.2, %v819_v55  ;;  %vm912_vm10 = vcmp.ge.f32.partialorder %v819_v55, 0.0 }
 0x10b   :  { %vm881_vm9 = vcmp.ge.f32.partialorder %v741_v50, 0.0  ;;  %v945_v57 = vmul.f32 0.2, %v741_v50  ;;  %v1040_v11 = vsel %vm912_vm10, %v819_v55, %v976_v6 }
 0x10c   :  { %v651_v59 = vpop.f32.mrf.mxu2 }
 0x10d   :  { %v1009_v62 = vsel %vm881_vm9, %v741_v50, %v945_v57  ;;  %v652_v63 = vadd.f32 %v2088_v56, %v651_v59  ;;  %v820_v0 = vpop.f32.mrf.mxu3 }
 0x10e   :  { %v1625_v2 = vpack.c.bf16 %v1009_v62, %v1008_v61  ;;  %v574_v3 = vpop.f32.mrf.mxu0 }
 0x10f   :  { %v821_v7 = vadd.f32 %v820_v0, %v652_v63  ;;  %v743_v8 = vpop.f32.mrf.mxu1  ;;  %v575_v10 = vadd.f32 %v2088_v56, %v574_v3 }
 0x110   :  { %1757 = vst [vmem:[%s2426_s3 + $0x30] sm:$0xff] %v1625_v2  }
 0x111   :  { %vm913_vm11 = vcmp.ge.f32.partialorder %v821_v7, 0.0  ;;  %v977_v9 = vmul.f32 0.2, %v821_v7  ;;  %613 = vmatmul.bf16.gmra.mxu0 %v1315_v60  ;;  %693 = vmatmul.bf16.gmra.mxu2 %v1443_v1  ;;  %v744_v15 = vadd.f32 %v743_v8, %v575_v10 }
 0x112   :  { %782 = vmatmul.bf16.gmra.mxu1 %v1319_v4  ;;  %862 = vmatmul.bf16.gmra.mxu3 %v1447_v5 }
 0x113   :  { %v1041_v12 = vsel %vm913_vm11, %v821_v7, %v977_v9  ;;  %v946_v21 = vmul.f32 0.2, %v744_v15  ;;  %vm882_vm12 = vcmp.ge.f32.partialorder %v744_v15, 0.0 }
 0x114   :  { %v1705_v13 = vpack.c.bf16 %v1041_v12, %v1040_v11  ;;  %v654_v14 = vpop.f32.mrf.mxu2 }
 0x115   :  { %v823_v16 = vpop.f32.mrf.mxu3  ;;  %v655_v18 = vadd.f32 %v2088_v56, %v654_v14  ;;  %v1010_v26 = vsel %vm882_vm12, %v744_v15, %v946_v21 }
 0x116   :  { %1773 = vst [vmem:[%s2426_s3 + $0xb0] sm:$0xff] %v1705_v13   ;;  %v576_v17 = vpop.f32.mrf.mxu0 }
 0x117   :  { %v577_v19 = vadd.f32 %v2088_v56, %v576_v17  ;;  %v745_v20 = vpop.f32.mrf.mxu1  ;;  %v824_v23 = vadd.f32 %v823_v16, %v655_v18 }
 0x119   :  { %v746_v22 = vadd.f32 %v745_v20, %v577_v19  ;;  %v978_v32 = vmul.f32 0.2, %v824_v23  ;;  %vm914_vm14 = vcmp.ge.f32.partialorder %v824_v23, 0.0 }
 0x11b   :  { %vm883_vm13 = vcmp.ge.f32.partialorder %v746_v22, 0.0  ;;  %v947_v24 = vmul.f32 0.2, %v746_v22  ;;  %v1042_v37 = vsel %vm914_vm14, %v824_v23, %v978_v32 }
 0x11c   :  { %v656_v25 = vpop.f32.mrf.mxu2 }
 0x11d   :  { %v1011_v27 = vsel %vm883_vm13, %v746_v22, %v947_v24  ;;  %v657_v28 = vadd.f32 %v2088_v56, %v656_v25  ;;  %v825_v29 = vpop.f32.mrf.mxu3 }
 0x11e   :  { %v1630_v30 = vpack.c.bf16 %v1011_v27, %v1010_v26  ;;  %v579_v31 = vpop.f32.mrf.mxu0 }
 0x11f   :  { %v826_v33 = vadd.f32 %v825_v29, %v657_v28  ;;  %v748_v34 = vpop.f32.mrf.mxu1  ;;  %v580_v36 = vadd.f32 %v2088_v56, %v579_v31 }
 0x120   :  { %1758 = vst [vmem:[%s2426_s3 + $0x38] sm:$0xff] %v1630_v30  }
 0x121   :  { %vm915_vm15 = vcmp.ge.f32.partialorder %v826_v33, 0.0  ;;  %v979_v35 = vmul.f32 0.2, %v826_v33  ;;  %v749_v41 = vadd.f32 %v748_v34, %v580_v36 }
 0x123   :  { %v1043_v38 = vsel %vm915_vm15, %v826_v33, %v979_v35  ;;  %v948_v47 = vmul.f32 0.2, %v749_v41  ;;  %vm884_vm0 = vcmp.ge.f32.partialorder %v749_v41, 0.0 }
 0x124   :  { %v1710_v39 = vpack.c.bf16 %v1043_v38, %v1042_v37  ;;  %v659_v40 = vpop.f32.mrf.mxu2 }
 0x125   :  { %v828_v42 = vpop.f32.mrf.mxu3  ;;  %v660_v44 = vadd.f32 %v2088_v56, %v659_v40  ;;  %v1012_v52 = vsel %vm884_vm0, %v749_v41, %v948_v47 }
 0x126   :  { %1774 = vst [vmem:[%s2426_s3 + $0xb8] sm:$0xff] %v1710_v39   ;;  %v581_v43 = vpop.f32.mrf.mxu0 }
 0x127   :  { %v582_v45 = vadd.f32 %v2088_v56, %v581_v43  ;;  %v750_v46 = vpop.f32.mrf.mxu1  ;;  %v829_v49 = vadd.f32 %v828_v42, %v660_v44 }
 0x129   :  { %v751_v48 = vadd.f32 %v750_v46, %v582_v45  ;;  %v980_v59 = vmul.f32 0.2, %v829_v49  ;;  %vm916_vm2 = vcmp.ge.f32.partialorder %v829_v49, 0.0 }
 0x12b   :  { %vm885_vm1 = vcmp.ge.f32.partialorder %v751_v48, 0.0  ;;  %v949_v50 = vmul.f32 0.2, %v751_v48  ;;  %v1044_v0 = vsel %vm916_vm2, %v829_v49, %v980_v59 }
 0x12c   :  { %v661_v51 = vpop.f32.mrf.mxu2 }
 0x12d   :  { %v1013_v53 = vsel %vm885_vm1, %v751_v48, %v949_v50  ;;  %v662_v54 = vadd.f32 %v2088_v56, %v661_v51  ;;  %v830_v55 = vpop.f32.mrf.mxu3 }
 0x12e   :  { %v1635_v57 = vpack.c.bf16 %v1013_v53, %v1012_v52  ;;  %v584_v58 = vpop.f32.mrf.mxu0 }
 0x12f   :  { %v831_v60 = vadd.f32 %v830_v55, %v662_v54  ;;  %v753_v61 = vpop.f32.mrf.mxu1  ;;  %v585_v63 = vadd.f32 %v2088_v56, %v584_v58 }
 0x130   :  { %1759 = vst [vmem:[%s2426_s3 + $0x40] sm:$0xff] %v1635_v57  }
 0x131   :  { %vm917_vm3 = vcmp.ge.f32.partialorder %v831_v60, 0.0  ;;  %v981_v62 = vmul.f32 0.2, %v831_v60  ;;  %v754_v4 = vadd.f32 %v753_v61, %v585_v63 }
 0x133   :  { %v1045_v1 = vsel %vm917_vm3, %v831_v60, %v981_v62  ;;  %v950_v10 = vmul.f32 0.2, %v754_v4  ;;  %vm886_vm4 = vcmp.ge.f32.partialorder %v754_v4, 0.0 }
 0x134   :  { %v1715_v2 = vpack.c.bf16 %v1045_v1, %v1044_v0  ;;  %v664_v3 = vpop.f32.mrf.mxu2 }
 0x135   :  { %v833_v5 = vpop.f32.mrf.mxu3  ;;  %v665_v7 = vadd.f32 %v2088_v56, %v664_v3  ;;  %v1014_v15 = vsel %vm886_vm4, %v754_v4, %v950_v10 }
 0x136   :  { %1775 = vst [vmem:[%s2426_s3 + $0xc0] sm:$0xff] %v1715_v2   ;;  %v586_v6 = vpop.f32.mrf.mxu0 }
 0x137   :  { %v587_v8 = vadd.f32 %v2088_v56, %v586_v6  ;;  %v755_v9 = vpop.f32.mrf.mxu1  ;;  %v834_v12 = vadd.f32 %v833_v5, %v665_v7 }
 0x139   :  { %v756_v11 = vadd.f32 %v755_v9, %v587_v8  ;;  %v982_v21 = vmul.f32 0.2, %v834_v12  ;;  %vm918_vm6 = vcmp.ge.f32.partialorder %v834_v12, 0.0 }
 0x13b   :  { %vm887_vm5 = vcmp.ge.f32.partialorder %v756_v11, 0.0  ;;  %v951_v13 = vmul.f32 0.2, %v756_v11  ;;  %v1046_v26 = vsel %vm918_vm6, %v834_v12, %v982_v21 }
 0x13c   :  { %v666_v14 = vpop.f32.mrf.mxu2 }
 0x13d   :  { %v1015_v16 = vsel %vm887_vm5, %v756_v11, %v951_v13  ;;  %v667_v17 = vadd.f32 %v2088_v56, %v666_v14  ;;  %v835_v18 = vpop.f32.mrf.mxu3 }
 0x13e   :  { %v1640_v19 = vpack.c.bf16 %v1015_v16, %v1014_v15  ;;  %v589_v20 = vpop.f32.mrf.mxu0 }
 0x13f   :  { %v836_v22 = vadd.f32 %v835_v18, %v667_v17  ;;  %v758_v23 = vpop.f32.mrf.mxu1  ;;  %v590_v25 = vadd.f32 %v2088_v56, %v589_v20 }
 0x140   :  { %1760 = vst [vmem:[%s2426_s3 + $0x48] sm:$0xff] %v1640_v19  }
 0x141   :  { %vm919_vm7 = vcmp.ge.f32.partialorder %v836_v22, 0.0  ;;  %v983_v24 = vmul.f32 0.2, %v836_v22  ;;  %v759_v30 = vadd.f32 %v758_v23, %v590_v25 }
 0x143   :  { %v1047_v27 = vsel %vm919_vm7, %v836_v22, %v983_v24  ;;  %v952_v36 = vmul.f32 0.2, %v759_v30  ;;  %vm888_vm8 = vcmp.ge.f32.partialorder %v759_v30, 0.0  ;;  %v2382_v22 = vld [vmem:[%s2424_s2] ss:$0 sm:$0xff] }
 0x144   :  { %v1720_v28 = vpack.c.bf16 %v1047_v27, %v1046_v26  ;;  %v669_v29 = vpop.f32.mrf.mxu2 }
 0x145   :  { %v838_v31 = vpop.f32.mrf.mxu3  ;;  %v670_v33 = vadd.f32 %v2088_v56, %v669_v29  ;;  %v1016_v41 = vsel %vm888_vm8, %v759_v30, %v952_v36 }
 0x146   :  { %1776 = vst [vmem:[%s2426_s3 + $0xc8] sm:$0xff] %v1720_v28   ;;  %v591_v32 = vpop.f32.mrf.mxu0 }
 0x147   :  { %v592_v34 = vadd.f32 %v2088_v56, %v591_v32  ;;  %v760_v35 = vpop.f32.mrf.mxu1  ;;  %v839_v38 = vadd.f32 %v838_v31, %v670_v33 }
 0x149   :  { %v761_v37 = vadd.f32 %v760_v35, %v592_v34  ;;  %v984_v47 = vmul.f32 0.2, %v839_v38  ;;  %vm920_vm10 = vcmp.ge.f32.partialorder %v839_v38, 0.0 }
 0x14b   :  { %vm889_vm9 = vcmp.ge.f32.partialorder %v761_v37, 0.0  ;;  %v953_v39 = vmul.f32 0.2, %v761_v37  ;;  %v1048_v52 = vsel %vm920_vm10, %v839_v38, %v984_v47 }
 0x14c   :  { %v671_v40 = vpop.f32.mrf.mxu2 }
 0x14d   :  { %v1017_v42 = vsel %vm889_vm9, %v761_v37, %v953_v39  ;;  %v672_v43 = vadd.f32 %v2088_v56, %v671_v40  ;;  %v840_v44 = vpop.f32.mrf.mxu3 }
 0x14e   :  { %v1645_v45 = vpack.c.bf16 %v1017_v42, %v1016_v41  ;;  %v594_v46 = vpop.f32.mrf.mxu0 }
 0x14f   :  { %v841_v48 = vadd.f32 %v840_v44, %v672_v43  ;;  %v763_v49 = vpop.f32.mrf.mxu1  ;;  %v595_v51 = vadd.f32 %v2088_v56, %v594_v46 }
 0x150   :  { %1761 = vst [vmem:[%s2426_s3 + $0x50] sm:$0xff] %v1645_v45  }
 0x151   :  { %vm921_vm11 = vcmp.ge.f32.partialorder %v841_v48, 0.0  ;;  %v985_v50 = vmul.f32 0.2, %v841_v48  ;;  %v764_v57 = vadd.f32 %v763_v49, %v595_v51 }
 0x153   :  { %v1049_v53 = vsel %vm921_vm11, %v841_v48, %v985_v50  ;;  %v954_v63 = vmul.f32 0.2, %v764_v57  ;;  %vm890_vm12 = vcmp.ge.f32.partialorder %v764_v57, 0.0 }
 0x154   :  { %v1725_v54 = vpack.c.bf16 %v1049_v53, %v1048_v52  ;;  %v674_v55 = vpop.f32.mrf.mxu2 }
 0x155   :  { %v843_v58 = vpop.f32.mrf.mxu3  ;;  %v675_v60 = vadd.f32 %v2088_v56, %v674_v55  ;;  %v1018_v4 = vsel %vm890_vm12, %v764_v57, %v954_v63 }
 0x156   :  { %1777 = vst [vmem:[%s2426_s3 + $0xd0] sm:$0xff] %v1725_v54   ;;  %v596_v59 = vpop.f32.mrf.mxu0 }
 0x157   :  { %v597_v61 = vadd.f32 %v2088_v56, %v596_v59  ;;  %v765_v62 = vpop.f32.mrf.mxu1  ;;  %v844_v1 = vadd.f32 %v843_v58, %v675_v60 }
 0x159   :  { %v766_v0 = vadd.f32 %v765_v62, %v597_v61  ;;  %v986_v10 = vmul.f32 0.2, %v844_v1  ;;  %vm922_vm14 = vcmp.ge.f32.partialorder %v844_v1, 0.0 }
 0x15b   :  { %vm891_vm13 = vcmp.ge.f32.partialorder %v766_v0, 0.0  ;;  %v955_v2 = vmul.f32 0.2, %v766_v0  ;;  %v1050_v15 = vsel %vm922_vm14, %v844_v1, %v986_v10 }
 0x15c   :  { %v676_v3 = vpop.f32.mrf.mxu2 }
 0x15d   :  { %v1019_v5 = vsel %vm891_vm13, %v766_v0, %v955_v2  ;;  %v677_v6 = vadd.f32 %v2088_v56, %v676_v3  ;;  %v845_v7 = vpop.f32.mrf.mxu3 }
 0x15e   :  { %v1650_v8 = vpack.c.bf16 %v1019_v5, %v1018_v4  ;;  %v599_v9 = vpop.f32.mrf.mxu0 }
 0x15f   :  { %v846_v11 = vadd.f32 %v845_v7, %v677_v6  ;;  %v768_v12 = vpop.f32.mrf.mxu1  ;;  %v600_v14 = vadd.f32 %v2088_v56, %v599_v9 }
 0x160   :  { %1762 = vst [vmem:[%s2426_s3 + $0x58] sm:$0xff] %v1650_v8  }
 0x161   :  { %vm923_vm15 = vcmp.ge.f32.partialorder %v846_v11, 0.0  ;;  %v987_v13 = vmul.f32 0.2, %v846_v11  ;;  %v769_v19 = vadd.f32 %v768_v12, %v600_v14 }
 0x163   :  { %v1051_v16 = vsel %vm923_vm15, %v846_v11, %v987_v13  ;;  %v956_v25 = vmul.f32 0.2, %v769_v19  ;;  %vm892_vm0 = vcmp.ge.f32.partialorder %v769_v19, 0.0 }
 0x164   :  { %v1730_v17 = vpack.c.bf16 %v1051_v16, %v1050_v15  ;;  %v679_v18 = vpop.f32.mrf.mxu2 }
 0x165   :  { %v848_v20 = vpop.f32.mrf.mxu3  ;;  %v680_v23 = vadd.f32 %v2382_v22, %v679_v18  ;;  %v1020_v30 = vsel %vm892_vm0, %v769_v19, %v956_v25 }
 0x166   :  { %1778 = vst [vmem:[%s2426_s3 + $0xd8] sm:$0xff] %v1730_v17   ;;  %v601_v21 = vpop.f32.mrf.mxu0 }
 0x167   :  { %v602_v56 = vadd.f32 %v2382_v22, %v601_v21  ;;  %v770_v24 = vpop.f32.mrf.mxu1  ;;  %v849_v27 = vadd.f32 %v848_v20, %v680_v23 }
 0x169   :  { %v771_v26 = vadd.f32 %v770_v24, %v602_v56  ;;  %v988_v36 = vmul.f32 0.2, %v849_v27  ;;  %vm924_vm2 = vcmp.ge.f32.partialorder %v849_v27, 0.0 }
 0x16b   :  { %vm893_vm1 = vcmp.ge.f32.partialorder %v771_v26, 0.0  ;;  %v957_v28 = vmul.f32 0.2, %v771_v26  ;;  %v1052_v41 = vsel %vm924_vm2, %v849_v27, %v988_v36 }
 0x16c   :  { %v681_v29 = vpop.f32.mrf.mxu2 }
 0x16d   :  { %v1021_v31 = vsel %vm893_vm1, %v771_v26, %v957_v28  ;;  %v682_v32 = vadd.f32 %v2382_v22, %v681_v29  ;;  %v850_v33 = vpop.f32.mrf.mxu3 }
 0x16e   :  { %v1655_v34 = vpack.c.bf16 %v1021_v31, %v1020_v30  ;;  %v604_v35 = vpop.f32.mrf.mxu0 }
 0x16f   :  { %v851_v37 = vadd.f32 %v850_v33, %v682_v32  ;;  %v773_v38 = vpop.f32.mrf.mxu1  ;;  %v605_v40 = vadd.f32 %v2382_v22, %v604_v35 }
 0x170   :  { %1763 = vst [vmem:[%s2426_s3 + $0x60] sm:$0xff] %v1655_v34  }
 0x171   :  { %vm925_vm3 = vcmp.ge.f32.partialorder %v851_v37, 0.0  ;;  %v989_v39 = vmul.f32 0.2, %v851_v37  ;;  %v774_v45 = vadd.f32 %v773_v38, %v605_v40 }
 0x173   :  { %v1053_v42 = vsel %vm925_vm3, %v851_v37, %v989_v39  ;;  %v958_v51 = vmul.f32 0.2, %v774_v45  ;;  %vm894_vm4 = vcmp.ge.f32.partialorder %v774_v45, 0.0 }
 0x174   :  { %v1735_v43 = vpack.c.bf16 %v1053_v42, %v1052_v41  ;;  %v684_v44 = vpop.f32.mrf.mxu2 }
 0x175   :  { %v853_v46 = vpop.f32.mrf.mxu3  ;;  %v685_v48 = vadd.f32 %v2382_v22, %v684_v44  ;;  %v1022_v57 = vsel %vm894_vm4, %v774_v45, %v958_v51 }
 0x176   :  { %1779 = vst [vmem:[%s2426_s3 + $0xe0] sm:$0xff] %v1735_v43   ;;  %v606_v47 = vpop.f32.mrf.mxu0 }
 0x177   :  { %v607_v49 = vadd.f32 %v2382_v22, %v606_v47  ;;  %v775_v50 = vpop.f32.mrf.mxu1  ;;  %v854_v53 = vadd.f32 %v853_v46, %v685_v48 }
 0x179   :  { %v776_v52 = vadd.f32 %v775_v50, %v607_v49  ;;  %v990_v63 = vmul.f32 0.2, %v854_v53  ;;  %vm926_vm6 = vcmp.ge.f32.partialorder %v854_v53, 0.0 }
 0x17b   :  { %vm895_vm5 = vcmp.ge.f32.partialorder %v776_v52, 0.0  ;;  %v959_v54 = vmul.f32 0.2, %v776_v52  ;;  %v1054_v4 = vsel %vm926_vm6, %v854_v53, %v990_v63 }
 0x17c   :  { %v686_v55 = vpop.f32.mrf.mxu2 }
 0x17d   :  { %v1023_v58 = vsel %vm895_vm5, %v776_v52, %v959_v54  ;;  %v687_v59 = vadd.f32 %v2382_v22, %v686_v55  ;;  %v855_v60 = vpop.f32.mrf.mxu3 }
 0x17e   :  { %v1660_v61 = vpack.c.bf16 %v1023_v58, %v1022_v57  ;;  %v609_v62 = vpop.f32.mrf.mxu0 }
 0x17f   :  { %v856_v0 = vadd.f32 %v855_v60, %v687_v59  ;;  %v778_v1 = vpop.f32.mrf.mxu1  ;;  %v610_v3 = vadd.f32 %v2382_v22, %v609_v62 }
 0x180   :  { %1764 = vst [vmem:[%s2426_s3 + $0x68] sm:$0xff] %v1660_v61  }
 0x181   :  { %vm927_vm7 = vcmp.ge.f32.partialorder %v856_v0, 0.0  ;;  %v991_v2 = vmul.f32 0.2, %v856_v0  ;;  %v779_v8 = vadd.f32 %v778_v1, %v610_v3 }
 0x183   :  { %v1055_v5 = vsel %vm927_vm7, %v856_v0, %v991_v2  ;;  %v960_v14 = vmul.f32 0.2, %v779_v8  ;;  %vm896_vm8 = vcmp.ge.f32.partialorder %v779_v8, 0.0 }
 0x184   :  { %v1740_v6 = vpack.c.bf16 %v1055_v5, %v1054_v4  ;;  %v689_v7 = vpop.f32.mrf.mxu2 }
 0x185   :  { %v858_v9 = vpop.f32.mrf.mxu3  ;;  %v690_v11 = vadd.f32 %v2382_v22, %v689_v7  ;;  %v1024_v19 = vsel %vm896_vm8, %v779_v8, %v960_v14 }
 0x186   :  { %1780 = vst [vmem:[%s2426_s3 + $0xe8] sm:$0xff] %v1740_v6   ;;  %v611_v10 = vpop.f32.mrf.mxu0 }
 0x187   :  { %v612_v12 = vadd.f32 %v2382_v22, %v611_v10  ;;  %v780_v13 = vpop.f32.mrf.mxu1  ;;  %v859_v16 = vadd.f32 %v858_v9, %v690_v11 }
 0x189   :  { %v781_v15 = vadd.f32 %v780_v13, %v612_v12  ;;  %v992_v25 = vmul.f32 0.2, %v859_v16  ;;  %vm928_vm10 = vcmp.ge.f32.partialorder %v859_v16, 0.0 }
 0x18b   :  { %vm897_vm9 = vcmp.ge.f32.partialorder %v781_v15, 0.0  ;;  %v961_v17 = vmul.f32 0.2, %v781_v15  ;;  %v1056_v30 = vsel %vm928_vm10, %v859_v16, %v992_v25 }
 0x18c   :  { %v691_v18 = vpop.f32.mrf.mxu2 }
 0x18d   :  { %v1025_v20 = vsel %vm897_vm9, %v781_v15, %v961_v17  ;;  %v692_v21 = vadd.f32 %v2382_v22, %v691_v18  ;;  %v860_v23 = vpop.f32.mrf.mxu3 }
 0x18e   :  { %v1665_v56 = vpack.c.bf16 %v1025_v20, %v1024_v19  ;;  %v614_v24 = vpop.f32.mrf.mxu0 }
 0x18f   :  { %v861_v26 = vadd.f32 %v860_v23, %v692_v21  ;;  %v783_v27 = vpop.f32.mrf.mxu1  ;;  %v615_v29 = vadd.f32 %v2382_v22, %v614_v24 }
 0x190   :  { %1765 = vst [vmem:[%s2426_s3 + $0x70] sm:$0xff] %v1665_v56  }
 0x191   :  { %vm929_vm11 = vcmp.ge.f32.partialorder %v861_v26, 0.0  ;;  %v993_v28 = vmul.f32 0.2, %v861_v26  ;;  %v784_v34 = vadd.f32 %v783_v27, %v615_v29 }
 0x193   :  { %v1057_v31 = vsel %vm929_vm11, %v861_v26, %v993_v28  ;;  %v962_v40 = vmul.f32 0.2, %v784_v34  ;;  %vm898_vm12 = vcmp.ge.f32.partialorder %v784_v34, 0.0 }
 0x194   :  { %v1745_v32 = vpack.c.bf16 %v1057_v31, %v1056_v30  ;;  %v694_v33 = vpop.f32.mrf.mxu2 }
 0x195   :  { %v863_v35 = vpop.f32.mrf.mxu3  ;;  %v695_v37 = vadd.f32 %v2382_v22, %v694_v33  ;;  %v1026_v45 = vsel %vm898_vm12, %v784_v34, %v962_v40 }
 0x196   :  { %1781 = vst [vmem:[%s2426_s3 + $0xf0] sm:$0xff] %v1745_v32   ;;  %v616_v36 = vpop.f32.mrf.mxu0 }
 0x197   :  { %v617_v38 = vadd.f32 %v2382_v22, %v616_v36  ;;  %v785_v39 = vpop.f32.mrf.mxu1  ;;  %v864_v42 = vadd.f32 %v863_v35, %v695_v37 }
 0x199   :  { %v786_v41 = vadd.f32 %v785_v39, %v617_v38  ;;  %v994_v50 = vmul.f32 0.2, %v864_v42  ;;  %vm930_vm14 = vcmp.ge.f32.partialorder %v864_v42, 0.0 }
 0x19b   :  { %vm899_vm13 = vcmp.ge.f32.partialorder %v786_v41, 0.0  ;;  %v963_v43 = vmul.f32 0.2, %v786_v41  ;;  %v1058_v53 = vsel %vm930_vm14, %v864_v42, %v994_v50 }
 0x19c   :  { %v696_v44 = vpop.f32.mrf.mxu2 }
 0x19d   :  { %v1027_v46 = vsel %vm899_vm13, %v786_v41, %v963_v43  ;;  %v697_v47 = vadd.f32 %v2382_v22, %v696_v44  ;;  %v865_v49 = vpop.f32.mrf.mxu3 }
 0x19e   :  { %v1670_v48 = vpack.c.bf16 %v1027_v46, %v1026_v45 }
 0x19f   :  { %v866_v51 = vadd.f32 %v865_v49, %v697_v47 }
 0x1a0   :  { %1766 = vst [vmem:[%s2426_s3 + $0x78] sm:$0xff] %v1670_v48  }
 0x1a1   :  { %vm931_vm15 = vcmp.ge.f32.partialorder %v866_v51, 0.0  ;;  %v995_v52 = vmul.f32 0.2, %v866_v51 }
 0x1a3   :  { %v1059_v54 = vsel %vm931_vm15, %v866_v51, %v995_v52 }
 0x1a4   :  { %v1750_v55 = vpack.c.bf16 %v1059_v54, %v1058_v53 }
 0x1a6   :  { %1782 = vst [vmem:[%s2426_s3 + $0xf8] sm:$0xff] %v1750_v55  }

// kernel: _forward_impl.16
= control target key start
LH: loop header
LB: loop body
LE: loop exit
PB: predicated region body
PF: predicated region fallthrough
CT: control target
= control target key end

     0   :  { %s3516_s0 = inlined_call_operand.vmem [shape: bf16[2,256,128], index: 0, kind: input, shape index: {}]   ;;  %s3517_s1 = inlined_call_operand.vmem [shape: bf16[2,64,128], index: 1, kind: input, shape index: {}]   ;;  %s3518_s2 = inlined_call_operand.vmem [shape: bf16[2,256,128], index: 2, kind: input, shape index: {}]   ;;  %s3519_s3 = inlined_call_operand.vmem [shape: bf16[2,64,128], index: 3, kind: input, shape index: {}]   ;;  %s3520_s4 = inlined_call_operand.vmem [shape: bf16[128,128], index: 4, kind: input, shape index: {}]   ;;  %s3521_s5 = inlined_call_operand.vmem [shape: bf16[128,128], index: 5, kind: input, shape index: {}]   ;;  %s3522_s6 = inlined_call_operand.vmem [shape: f32[1,128], index: 6, kind: input, shape index: {}]   ;;  %s3523_s7 = inlined_call_operand.vmem [shape: bf16[128,128], index: 7, kind: input, shape index: {}]   ;;  %s3524_s8 = inlined_call_operand.vmem [shape: bf16[128,128], index: 8, kind: input, shape index: {}]   ;;  %s3525_s9 = inlined_call_operand.vmem [shape: f32[1,128], index: 9, kind: input, shape index: {}]   ;;  %s3526_s10 = inlined_call_operand.hbm [shape: bf16[2,256,128], index: 10, kind: output, shape index: {0}]   ;;  %s3527_s11 = inlined_call_operand.hbm [shape: bf16[2,64,128], index: 11, kind: output, shape index: {1}]   ;;  %s3528_s12 = inlined_call_operand.vmem [shape: f32[2,1,128], index: 12, kind: output, shape index: {2}]   ;;  %s3529_s13 = inlined_call_operand.vmem [shape: f32[2,1,128], index: 13, kind: output, shape index: {3}]   ;;  %s3530_s14 = inlined_call_operand.vmem [shape: f32[2,1,128], index: 14, kind: output, shape index: {4}]   ;;  %s3531_s15 = inlined_call_operand.vmem [shape: f32[2,1,128], index: 15, kind: output, shape index: {5}]  }
   0x1   :  { %3537 = sst [smem:[#allocation13_spill]] %s3516_s0 }
   0x2   :  { %3538 = sst [smem:[#allocation14_spill]] %s3517_s1 }
   0x3   :  { %3539 = sst [smem:[#allocation15_spill]] %s3518_s2 }
   0x4   :  { %3540 = sst [smem:[#allocation16_spill]] %s3519_s3 }
   0x5   :  { %21 = vsyncpa [#allocation3], 0 }
   0x6   :  { %23 = vsyncpa [#allocation3 + $0x1], 0 }
   0x7   :  { %24 = vsyncpa [#allocation5], 0 }
   0x8   :  { %26 = vsyncpa [#allocation5 + $0x1], 0  ;;  %s2913_s18 = smov 0   ;;  %s2915_s19 = smov 0  }
   0x9   :  { %s2917_s20 = smov 0   ;;  %s2919_s21 = smov 0  }
   0xa LB: > { %3541 = sst [smem:[#allocation8_spill]] %s2815_s18  ;;  %s2934_s22 = sadd.s32 4294967295, %s2827_s21   ;;  %s2827_s21 = sphi %s2919_s21, %s3554_s21   ;;  %s2823_s20 = sphi %s2917_s20, %s3556_s20   ;;  %s2819_s19 = sphi %s2915_s19, %s3558_s19   ;;  %s2815_s18 = sphi %s2913_s18, %s3557_s18  }
   0xb   : > { %3542 = sst [smem:[#allocation9_spill]] %s2823_s20  ;;  %s2153_s23 = sadd.s32 4294967294, %s2827_s21  }
   0xc   : > { %s2938_s24 = sadd.s32 1, %s2827_s21   ;;  %s269_s25 = sadd.s32 1, %s2823_s20 }
   0xd   : > { %3543 = sst [smem:[#allocation10_spill]] %s2938_s24  ;;  %s266_s26 = ssub.s32 %s2827_s21, %s2938_s24 }
   0xe   : > { %p279_p0 = scmp.ne.s32.totalorder %s2823_s20, %s2819_s19  ;;  %p267_p1 = scmp.eq.s32.totalorder %s266_s26, 0 }
   0xf   : > { %p280_p2 = scmp.eq.s32.totalorder %s2934_s22, 1  ;;  %p285_p3 = scmp.ne.s32.totalorder %s2819_s19, %s2815_s18 }
  0x10   : > { %p286_p4 = scmp.eq.s32.totalorder %s2153_s23, 1  ;;  %p2156_p7 = scmp.ge.s32.totalorder %s2827_s21, 1 }
  0x11   : > { %s2949_s27 = scalar_select %p267_p1, %s2823_s20, %s269_s25  }
  0x12   : > { %p2951_p5 = por %p280_p2, %p279_p0  ;;  %p2955_p6 = por %p286_p4, %p285_p3 }
  0x13   : > { %3544 = sst [smem:[#allocation11_spill]] %s2949_s27  ;;  %p484_p8 = scmp.lt.s32.totalorder %s2827_s21, 3 }
  0x14   : > { %s3546_s29 = scalar_select %p2955_p6, 1, 0 }
  0x15   : > { %p485_p9 = pnand %p2156_p7, %p484_p8 }
  0x16   : > { %3547 = sst [smem:[#allocation12_spill]] %s3546_s29  ;;  %p564_p10 = scmp.lt.s32.totalorder (!%p485_p9), %s2934_s22, 1 }
  0x17   : > { %488 = sbr.rel (%p485_p9) target bundleno = 490 (0x1ea), region = 60  ;;  %s3548_s2 = sld [smem:[#allocation15_spill]] (!%p485_p9) }
  0x18   : > { %s3549_s0 = sld [smem:[#allocation13_spill]] (!%p485_p9)  ;;  %s2539_s29 = sshll.u32 (!%p485_p9), %s2934_s22, 7 }
  0x19   : > { %s3550_s1 = sld [smem:[#allocation14_spill]] (!%p485_p9) }
  0x1a   : > { %s3551_s3 = sld [smem:[#allocation16_spill]] (!%p485_p9) }
  0x1c   : > { %v2514_v0 = vld [vmem:[%s3521_s5 + $0x38] sm:$0xff]  ;;  %v2513_v2 = vld [vmem:[%s3521_s5 + $0x30] sm:$0xff]  ;;  %v2512_v4 = vld [vmem:[%s3521_s5 + $0x28] sm:$0xff]  ;;  %s2999_s30 = scalar_select %p564_p10, %s2934_s22, 1 }
  0x1d   : > { %v2490_v1 = vld [vmem:[%s3520_s4 + $0x38] sm:$0xff]  ;;  %836 = vmatpush.bf16.msra.mxu0 %v2514_v0  ;;  %2659 = vmatpush.bf16.msra.mxu2 %v2514_v0  ;;  %v2489_v3 = vld [vmem:[%s3520_s4 + $0x30] sm:$0xff]  ;;  %v2488_v5 = vld [vmem:[%s3520_s4 + $0x28] sm:$0xff] }
  0x1e   : > { %1069 = vmatpush.bf16.msra.mxu1 %v2490_v1  ;;  %2667 = vmatpush.bf16.msra.mxu3 %v2490_v1  ;;  %v2511_v6 = vld [vmem:[%s3521_s5 + $0x20] sm:$0xff]  ;;  %v2510_v8 = vld [vmem:[%s3521_s5 + $0x18] sm:$0xff]  ;;  %v2509_v10 = vld [vmem:[%s3521_s5 + $0x10] sm:$0xff]  ;;  %s2463_s26 = sshll.u32 %s2999_s30, 7 }
  0x1f   : > { %v2487_v7 = vld [vmem:[%s3520_s4 + $0x20] sm:$0xff]  ;;  %v2486_v9 = vld [vmem:[%s3520_s4 + $0x18] sm:$0xff]  ;;  %v2485_v11 = vld [vmem:[%s3520_s4 + $0x10] sm:$0xff]  ;;  %s3014_s18 = scalar_lea.vmem %s3548_s2, %s2463_s26  ;;  %s3022_s20 = scalar_lea.vmem %s3549_s0, %s2463_s26 }
  0x20   : > { %v2508_v12 = vld [vmem:[%s3521_s5 + $0x8] sm:$0xff]  ;;  %v2507_v14 = vld [vmem:[%s3521_s5] sm:$0xff]  ;;  %v2501_v17 = vld [vmem:[%s3014_s18 + $0x50] sm:$0xff]  ;;  %s2464_s26 = sshll.u32 %s2999_s30, 5  ;;  %s3126_s2 = sand.u32 1, %s2819_s19  }
  0x21   : > { %837 = vmatpush.bf16.msra.mxu0 %v2513_v2  ;;  %2660 = vmatpush.bf16.msra.mxu2 %v2513_v2  ;;  %v2484_v13 = vld [vmem:[%s3520_s4 + $0x8] sm:$0xff]  ;;  %v2483_v15 = vld [vmem:[%s3520_s4] sm:$0xff]  ;;  %v2477_v19 = vld [vmem:[%s3022_s20 + $0x50] sm:$0xff]  ;;  %s3100_s17 = scalar_lea.vmem %s3550_s1, %s2464_s26  ;;  %s3105_s24 = scalar_lea.vmem %s3551_s3, %s2464_s26 }
  0x22   : > { %1070 = vmatpush.bf16.msra.mxu1 %v2489_v3  ;;  %2668 = vmatpush.bf16.msra.mxu3 %v2489_v3  ;;  %v2491_v16 = vld [vmem:[%s3014_s18] sm:$0xff]  ;;  %v2492_v20 = vld [vmem:[%s3014_s18 + $0x8] sm:$0xff]  ;;  %v2502_v21 = vld [vmem:[%s3014_s18 + $0x58] sm:$0xff]  ;;  %s2157_s26 = sshll.u32 %s3126_s2, 7  ;;  %s2158_s16 = sshll.u32 %s3126_s2, 5 }
  0x23   : > { %v2467_v18 = vld [vmem:[%s3022_s20] sm:$0xff]  ;;  %v2468_v22 = vld [vmem:[%s3022_s20 + $0x8] sm:$0xff]  ;;  %v2478_v23 = vld [vmem:[%s3022_s20 + $0x58] sm:$0xff]  ;;  %s3142_s27 = scalar_lea.vmem [#allocation2], %s2157_s26  ;;  %s1885_s23 = scalar_lea.sflag [#allocation3], %s3126_s2 }
  0x24   : > { %v2493_v24 = vld [vmem:[%s3014_s18 + $0x10] sm:$0xff]  ;;  %v2503_v25 = vld [vmem:[%s3014_s18 + $0x60] sm:$0xff]  ;;  %v2538_v28 = vld [vmem:[%s3524_s8 + $0x38] sm:$0xff]  ;;  %s1914_s0 = sshll.u32 %s3142_s27, 4  ;;  %s2753_s3 = scalar_lea.hbm %s3526_s10, 256  ;;  %s1915_s0 = int_to_ptr.vmem [resolvable:$true] %s1914_s0 }
  0x25   : > { %838 = vmatpush.bf16.msra.mxu0 %v2512_v4  ;;  %2661 = vmatpush.bf16.msra.mxu2 %v2512_v4  ;;  %v2469_v26 = vld [vmem:[%s3022_s20 + $0x10] sm:$0xff]  ;;  %v2479_v27 = vld [vmem:[%s3022_s20 + $0x60] sm:$0xff]  ;;  %v2526_v29 = vld [vmem:[%s3523_s7 + $0x38] sm:$0xff] }
  0x26   : > { %1071 = vmatpush.bf16.msra.mxu1 %v2488_v5  ;;  %2669 = vmatpush.bf16.msra.mxu3 %v2488_v5  ;;  %v2537_v30 = vld [vmem:[%s3524_s8 + $0x30] sm:$0xff]  ;;  %v2536_v32 = vld [vmem:[%s3524_s8 + $0x28] sm:$0xff]  ;;  %v2535_v34 = vld [vmem:[%s3524_s8 + $0x20] sm:$0xff] }
  0x27   : > { %v2525_v31 = vld [vmem:[%s3523_s7 + $0x30] sm:$0xff]  ;;  %v2524_v33 = vld [vmem:[%s3523_s7 + $0x28] sm:$0xff]  ;;  %v2523_v35 = vld [vmem:[%s3523_s7 + $0x20] sm:$0xff] }
  0x28   : > { %v2494_v36 = vld [vmem:[%s3014_s18 + $0x18] sm:$0xff]  ;;  %v2504_v37 = vld [vmem:[%s3014_s18 + $0x68] sm:$0xff]  ;;  %v2533_v42 = vld [vmem:[%s3524_s8 + $0x10] sm:$0xff] }
  0x29   : > { %839 = vmatpush.bf16.msra.mxu0 %v2511_v6  ;;  %2662 = vmatpush.bf16.msra.mxu2 %v2511_v6  ;;  %v2470_v38 = vld [vmem:[%s3022_s20 + $0x18] sm:$0xff]  ;;  %v2480_v39 = vld [vmem:[%s3022_s20 + $0x68] sm:$0xff]  ;;  %v2521_v43 = vld [vmem:[%s3523_s7 + $0x10] sm:$0xff] }
  0x2a   : > { %1072 = vmatpush.bf16.msra.mxu1 %v2487_v7  ;;  %2670 = vmatpush.bf16.msra.mxu3 %v2487_v7  ;;  %v2534_v40 = vld [vmem:[%s3524_s8 + $0x18] sm:$0xff]  ;;  %v2532_v44 = vld [vmem:[%s3524_s8 + $0x8] sm:$0xff]  ;;  %v2531_v46 = vld [vmem:[%s3524_s8] sm:$0xff] }
  0x2b   : > { %v2522_v41 = vld [vmem:[%s3523_s7 + $0x18] sm:$0xff]  ;;  %v2520_v45 = vld [vmem:[%s3523_s7 + $0x8] sm:$0xff]  ;;  %v2519_v47 = vld [vmem:[%s3523_s7] sm:$0xff] }
  0x2c   : > { %v2495_v48 = vld [vmem:[%s3014_s18 + $0x20] sm:$0xff]  ;;  %v2505_v49 = vld [vmem:[%s3014_s18 + $0x70] sm:$0xff]  ;;  %v2496_v52 = vld [vmem:[%s3014_s18 + $0x28] sm:$0xff] }
  0x2d   : > { %840 = vmatpush.bf16.msra.mxu0 %v2510_v8  ;;  %2663 = vmatpush.bf16.msra.mxu2 %v2510_v8  ;;  %v2471_v50 = vld [vmem:[%s3022_s20 + $0x20] sm:$0xff]  ;;  %v2481_v51 = vld [vmem:[%s3022_s20 + $0x70] sm:$0xff]  ;;  %v2506_v53 = vld [vmem:[%s3014_s18 + $0x78] sm:$0xff] }
  0x2e   : > { %1073 = vmatpush.bf16.msra.mxu1 %v2486_v9  ;;  %2671 = vmatpush.bf16.msra.mxu3 %v2486_v9  ;;  %v2472_v54 = vld [vmem:[%s3022_s20 + $0x28] sm:$0xff]  ;;  %v2482_v55 = vld [vmem:[%s3022_s20 + $0x78] sm:$0xff]  ;;  %v2497_v56 = vld [vmem:[%s3014_s18 + $0x30] sm:$0xff] }
  0x2f   : > { %v2527_v57 = vld [vmem:[%s3100_s17] sm:$0xff]  ;;  %v2473_v58 = vld [vmem:[%s3022_s20 + $0x30] sm:$0xff]  ;;  %v2498_v60 = vld [vmem:[%s3014_s18 + $0x38] sm:$0xff] }
  0x30   : > { %v2515_v59 = vld [vmem:[%s3105_s24] sm:$0xff]  ;;  %v2528_v61 = vld [vmem:[%s3100_s17 + $0x8] sm:$0xff]  ;;  %v2474_v62 = vld [vmem:[%s3022_s20 + $0x38] sm:$0xff] }
  0x31   : > { %841 = vmatpush.bf16.msra.mxu0 %v2509_v10  ;;  %2664 = vmatpush.bf16.msra.mxu2 %v2509_v10  ;;  %v2516_v63 = vld [vmem:[%s3105_s24 + $0x8] sm:$0xff]  ;;  %v2499_v0 = vld [vmem:[%s3014_s18 + $0x40] sm:$0xff]  ;;  %v2529_v1 = vld [vmem:[%s3100_s17 + $0x10] sm:$0xff] }
  0x32   : > { %1074 = vmatpush.bf16.msra.mxu1 %v2485_v11  ;;  %2672 = vmatpush.bf16.msra.mxu3 %v2485_v11  ;;  %v2475_v3 = vld [vmem:[%s3022_s20 + $0x40] sm:$0xff]  ;;  %v2517_v4 = vld [vmem:[%s3105_s24 + $0x10] sm:$0xff] }
  0x33   : > { %v3122_v7 = vld [vmem:[%s3522_s6] ss:$0 sm:$0xff] }
  0x35   : > { %842 = vmatpush.bf16.msra.mxu0 %v2508_v12  ;;  %2665 = vmatpush.bf16.msra.mxu2 %v2508_v12 }
  0x36   : > { %1075 = vmatpush.bf16.msra.mxu1 %v2484_v13  ;;  %2673 = vmatpush.bf16.msra.mxu3 %v2484_v13 }
  0x39   : > { %843 = vmatpush.bf16.msra.mxu0 %v2507_v14  ;;  %2666 = vmatpush.bf16.msra.mxu2 %v2507_v14 }
  0x3a   : > { %1076 = vmatpush.bf16.msra.mxu1 %v2483_v15  ;;  %2674 = vmatpush.bf16.msra.mxu3 %v2483_v15 }
  0x3c   : > { %844 = vmatmul.bf16.vlgmr.msra.gmra.mxu0 %v2491_v16  ;;  %894 = vmatmul.bf16.vlgmr.msra.gmra.mxu2 %v2501_v17 }
  0x3d   : > { %1077 = vmatmul.bf16.vlgmr.msra.gmra.mxu1 %v2467_v18  ;;  %1127 = vmatmul.bf16.vlgmr.msra.gmra.mxu3 %v2477_v19 }
  0x3e   : > { %1410 = vmatpush.bf16.msrb.mxu2 %v2538_v28  ;;  %1511 = vmatpush.bf16.msrb.mxu3 %v2526_v29  ;;  %v2476_v28 = vld [vmem:[%s3022_s20 + $0x48] sm:$0xff]  ;;  %v2518_v29 = vld [vmem:[%s3105_s24 + $0x18] sm:$0xff]  ;;  %s592_s24 = scalar_lea.vmem %s3530_s14, %s2999_s30  ;;  %s1913_s20 = scalar_lea.hbm %s3526_s10, %s2539_s29 }
  0x42   : > { %1411 = vmatpush.bf16.msrb.mxu2 %v2537_v30  ;;  %1512 = vmatpush.bf16.msrb.mxu3 %v2525_v31 }
  0x46   : > { %1412 = vmatpush.bf16.msrb.mxu2 %v2536_v32  ;;  %1513 = vmatpush.bf16.msrb.mxu3 %v2524_v33 }
  0x4a   : > { %1413 = vmatpush.bf16.msrb.mxu2 %v2535_v34  ;;  %1514 = vmatpush.bf16.msrb.mxu3 %v2523_v35 }
  0x4c   : > { %849 = vmatmul.bf16.gmra.mxu0 %v2492_v20  ;;  %899 = vmatmul.bf16.gmra.mxu2 %v2502_v21  ;;  %v2500_v21 = vld [vmem:[%s3014_s18 + $0x48] sm:$0xff] }
  0x4d   : > { %1082 = vmatmul.bf16.gmra.mxu1 %v2468_v22  ;;  %1132 = vmatmul.bf16.gmra.mxu3 %v2478_v23  ;;  %v2530_v22 = vld [vmem:[%s3100_s17 + $0x18] sm:$0xff]  ;;  %s3266_s17 = scalar_lea.vmem [#allocation4], %s2158_s16  ;;  %s1916_s16 = sshll.u32 %s1913_s20, 4  ;;  %s1917_s16 = int_to_ptr.hbm [resolvable:$true] %s1916_s16 }
  0x4e   : > { %1414 = vmatpush.bf16.msrb.mxu2 %v2534_v40  ;;  %1515 = vmatpush.bf16.msrb.mxu3 %v2522_v41  ;;  %s2747_s25 = sshra.s32 %s1917_s16, 4  ;;  %s2748_s25 = int_to_ptr.hbm [resolvable:$true] %s2747_s25 }
  0x4f   : > { %p2754_p0 = scmp.lt.s32.totalorder %s2748_s25, %s3526_s10 }
  0x52   : > { %1415 = vmatpush.bf16.msrb.mxu2 %v2533_v42  ;;  %1516 = vmatpush.bf16.msrb.mxu3 %v2521_v43 }
  0x56   : > { %1416 = vmatpush.bf16.msrb.mxu2 %v2532_v44  ;;  %1517 = vmatpush.bf16.msrb.mxu3 %v2520_v45 }
  0x5a   : > { %1417 = vmatpush.bf16.msrb.mxu2 %v2531_v46  ;;  %1518 = vmatpush.bf16.msrb.mxu3 %v2519_v47 }
  0x5c   : > { %854 = vmatmul.bf16.gmra.mxu0 %v2493_v24  ;;  %904 = vmatmul.bf16.gmra.mxu2 %v2503_v25 }
  0x5d   : > { %1087 = vmatmul.bf16.gmra.mxu1 %v2469_v26  ;;  %1137 = vmatmul.bf16.gmra.mxu3 %v2479_v27 }
  0x6c   : > { %859 = vmatmul.bf16.gmra.mxu0 %v2494_v36  ;;  %909 = vmatmul.bf16.gmra.mxu2 %v2504_v37 }
  0x6d   : > { %1092 = vmatmul.bf16.gmra.mxu1 %v2470_v38  ;;  %1142 = vmatmul.bf16.gmra.mxu3 %v2480_v39 }
  0x7c   : > { %864 = vmatmul.bf16.gmra.mxu0 %v2495_v48  ;;  %914 = vmatmul.bf16.gmra.mxu2 %v2505_v49 }
  0x7d   : > { %1097 = vmatmul.bf16.gmra.mxu1 %v2471_v50  ;;  %1147 = vmatmul.bf16.gmra.mxu3 %v2481_v51 }
  0x8c   : > { %869 = vmatmul.bf16.gmra.mxu0 %v2496_v52  ;;  %919 = vmatmul.bf16.gmra.mxu2 %v2506_v53 }
  0x8d   : > { %1102 = vmatmul.bf16.gmra.mxu1 %v2472_v54  ;;  %1152 = vmatmul.bf16.gmra.mxu3 %v2482_v55 }
  0x9c   : > { %874 = vmatmul.bf16.gmra.mxu0 %v2497_v56  ;;  %1418 = vmatmul.bf16.vlgmr.msrb.gmra.mxu2 %v2527_v57 }
  0x9d   : > { %1107 = vmatmul.bf16.gmra.mxu1 %v2473_v58  ;;  %1519 = vmatmul.bf16.vlgmr.msrb.gmra.mxu3 %v2515_v59 }
  0xac   : > { %879 = vmatmul.bf16.gmra.mxu0 %v2498_v60  ;;  %1423 = vmatmul.bf16.gmra.mxu2 %v2528_v61 }
  0xad   : > { %1112 = vmatmul.bf16.gmra.mxu1 %v2474_v62  ;;  %1524 = vmatmul.bf16.gmra.mxu3 %v2516_v63 }
  0xb9   : > { %v845_v2 = vpop.f32.mrf.mxu0 }
  0xba   : > { %v1078_v5 = vpop.f32.mrf.mxu1 }
  0xbb   : > { %v1079_v6 = vadd.f32 %v1078_v5, %v845_v2 }
  0xbc   : > { %884 = vmatmul.bf16.gmra.mxu0 %v2499_v0  ;;  %1428 = vmatmul.bf16.gmra.mxu2 %v2529_v1 }
  0xbd   : > { %1117 = vmatmul.bf16.gmra.mxu1 %v2475_v3  ;;  %1529 = vmatmul.bf16.gmra.mxu3 %v2517_v4  ;;  %v1162_v10 = vadd.f32 %v3122_v7, %v1079_v6 }
  0xbf   : > { %v895_v8 = vpop.f32.mrf.mxu2  ;;  %v1226_v15 = vmul.f32 0.2, %v1162_v10  ;;  %vm1194_vm0 = vcmp.ge.f32.partialorder %v1162_v10, 0.0 }
  0xc0   : > { %v1128_v9 = vpop.f32.mrf.mxu3 }
  0xc1   : > { %v1129_v11 = vadd.f32 %v1128_v9, %v895_v8  ;;  %v847_v12 = vpop.f32.mrf.mxu0  ;;  %v3133_v23 = vsel %vm1194_vm0, %v1162_v10, %v1226_v15 }
  0xc2   : > { %v1080_v13 = vpop.f32.mrf.mxu1 }
  0xc3   : > { %v1081_v14 = vadd.f32 %v1080_v13, %v847_v12  ;;  %v1182_v16 = vadd.f32 %v3122_v7, %v1129_v11 }
  0xc5   : > { %v1163_v17 = vadd.f32 %v3122_v7, %v1081_v14  ;;  %v1246_v24 = vmul.f32 0.2, %v1182_v16  ;;  %vm1214_vm2 = vcmp.ge.f32.partialorder %v1182_v16, 0.0 }
  0xc7   : > { %vm1195_vm1 = vcmp.ge.f32.partialorder %v1163_v17, 0.0  ;;  %v1227_v18 = vmul.f32 0.2, %v1163_v17  ;;  %v897_v19 = vpop.f32.mrf.mxu2  ;;  %v3145_v33 = vsel %vm1214_vm2, %v1182_v16, %v1246_v24 }
  0xc8   : > { %v1130_v20 = vpop.f32.mrf.mxu3 }
  0xc9   : > { %v3135_v25 = vsel %vm1195_vm1, %v1163_v17, %v1227_v18  ;;  %v1131_v26 = vadd.f32 %v1130_v20, %v897_v19  ;;  %v850_v27 = vpop.f32.mrf.mxu0 }
  0xca   : > { %v2544_v30 = vpack.c.bf16 %v3135_v25, %v3133_v23  ;;  %v1083_v31 = vpop.f32.mrf.mxu1 }
  0xcb   : > { %v1183_v32 = vadd.f32 %v3122_v7, %v1131_v26  ;;  %v1084_v35 = vadd.f32 %v1083_v31, %v850_v27 }
  0xcc   : > { %2545 = vst [vmem:[%s3142_s27] sm:$0xff] %v2544_v30   ;;  %889 = vmatmul.bf16.gmra.mxu0 %v2500_v21  ;;  %1433 = vmatmul.bf16.gmra.mxu2 %v2530_v22 }
  0xcd   : > { %vm1215_vm3 = vcmp.ge.f32.partialorder %v1183_v32, 0.0  ;;  %v1247_v34 = vmul.f32 0.2, %v1183_v32  ;;  %1122 = vmatmul.bf16.gmra.mxu1 %v2476_v28  ;;  %1534 = vmatmul.bf16.gmra.mxu3 %v2518_v29  ;;  %v1164_v40 = vadd.f32 %v3122_v7, %v1084_v35 }
  0xcf   : > { %v3147_v36 = vsel %vm1215_vm3, %v1183_v32, %v1247_v34  ;;  %v900_v37 = vpop.f32.mrf.mxu2  ;;  %v1228_v45 = vmul.f32 0.2, %v1164_v40  ;;  %vm1196_vm4 = vcmp.ge.f32.partialorder %v1164_v40, 0.0 }
  0xd0   : > { %v2594_v38 = vpack.c.bf16 %v3147_v36, %v3145_v33  ;;  %v1133_v39 = vpop.f32.mrf.mxu3 }
  0xd1   : > { %v1134_v41 = vadd.f32 %v1133_v39, %v900_v37  ;;  %v852_v42 = vpop.f32.mrf.mxu0  ;;  %v3155_v51 = vsel %vm1196_vm4, %v1164_v40, %v1228_v45 }
  0xd2   : > { %2650 = vst [vmem:[%s3142_s27 + $0x50] sm:$0xff] %v2594_v38   ;;  %v1085_v43 = vpop.f32.mrf.mxu1 }
  0xd3   : > { %v1086_v44 = vadd.f32 %v1085_v43, %v852_v42  ;;  %v1184_v46 = vadd.f32 %v3122_v7, %v1134_v41 }
  0xd5   : > { %v1165_v47 = vadd.f32 %v3122_v7, %v1086_v44  ;;  %v1248_v52 = vmul.f32 0.2, %v1184_v46  ;;  %vm1216_vm6 = vcmp.ge.f32.partialorder %v1184_v46, 0.0 }
  0xd7   : > { %vm1197_vm5 = vcmp.ge.f32.partialorder %v1165_v47, 0.0  ;;  %v1229_v48 = vmul.f32 0.2, %v1165_v47  ;;  %v902_v49 = vpop.f32.mrf.mxu2  ;;  %v3163_v59 = vsel %vm1216_vm6, %v1184_v46, %v1248_v52 }
  0xd8   : > { %v1135_v50 = vpop.f32.mrf.mxu3 }
  0xd9   : > { %v3157_v53 = vsel %vm1197_vm5, %v1165_v47, %v1229_v48  ;;  %v1136_v54 = vadd.f32 %v1135_v50, %v902_v49  ;;  %v855_v55 = vpop.f32.mrf.mxu0 }
  0xda   : > { %v2549_v56 = vpack.c.bf16 %v3157_v53, %v3155_v51  ;;  %v1088_v57 = vpop.f32.mrf.mxu1 }
  0xdb   : > { %v1185_v58 = vadd.f32 %v3122_v7, %v1136_v54  ;;  %v1089_v61 = vadd.f32 %v1088_v57, %v855_v55 }
  0xdc   : > { %2641 = vst [vmem:[%s3142_s27 + $0x8] sm:$0xff] %v2549_v56  }
  0xdd   : > { %vm1217_vm7 = vcmp.ge.f32.partialorder %v1185_v58, 0.0  ;;  %v1249_v60 = vmul.f32 0.2, %v1185_v58  ;;  %v1166_v2 = vadd.f32 %v3122_v7, %v1089_v61 }
  0xdf   : > { %v3165_v62 = vsel %vm1217_vm7, %v1185_v58, %v1249_v60  ;;  %v905_v63 = vpop.f32.mrf.mxu2  ;;  %v1230_v8 = vmul.f32 0.2, %v1166_v2  ;;  %vm1198_vm8 = vcmp.ge.f32.partialorder %v1166_v2, 0.0 }
  0xe0   : > { %v2599_v0 = vpack.c.bf16 %v3165_v62, %v3163_v59  ;;  %v1138_v1 = vpop.f32.mrf.mxu3 }
  0xe1   : > { %v1139_v3 = vadd.f32 %v1138_v1, %v905_v63  ;;  %v857_v4 = vpop.f32.mrf.mxu0  ;;  %v3173_v14 = vsel %vm1198_vm8, %v1166_v2, %v1230_v8 }
  0xe2   : > { %2651 = vst [vmem:[%s3142_s27 + $0x58] sm:$0xff] %v2599_v0   ;;  %v1090_v5 = vpop.f32.mrf.mxu1 }
  0xe3   : > { %v1091_v6 = vadd.f32 %v1090_v5, %v857_v4  ;;  %v1186_v9 = vadd.f32 %v3122_v7, %v1139_v3 }
  0xe5   : > { %v1167_v10 = vadd.f32 %v3122_v7, %v1091_v6  ;;  %v1250_v15 = vmul.f32 0.2, %v1186_v9  ;;  %vm1218_vm10 = vcmp.ge.f32.partialorder %v1186_v9, 0.0 }
  0xe7   : > { %vm1199_vm9 = vcmp.ge.f32.partialorder %v1167_v10, 0.0  ;;  %v1231_v11 = vmul.f32 0.2, %v1167_v10  ;;  %v907_v12 = vpop.f32.mrf.mxu2  ;;  %v3181_v22 = vsel %vm1218_vm10, %v1186_v9, %v1250_v15 }
  0xe8   : > { %v1140_v13 = vpop.f32.mrf.mxu3 }
  0xe9   : > { %v3175_v16 = vsel %vm1199_vm9, %v1167_v10, %v1231_v11  ;;  %v1141_v17 = vadd.f32 %v1140_v13, %v907_v12  ;;  %v860_v18 = vpop.f32.mrf.mxu0 }
  0xea   : > { %v2554_v19 = vpack.c.bf16 %v3175_v16, %v3173_v14  ;;  %v1093_v20 = vpop.f32.mrf.mxu1 }
  0xeb   : > { %v1187_v21 = vadd.f32 %v3122_v7, %v1141_v17  ;;  %v1094_v26 = vadd.f32 %v1093_v20, %v860_v18 }
  0xec   : > { %2642 = vst [vmem:[%s3142_s27 + $0x10] sm:$0xff] %v2554_v19  }
  0xed   : > { %vm1219_vm11 = vcmp.ge.f32.partialorder %v1187_v21, 0.0  ;;  %v1251_v24 = vmul.f32 0.2, %v1187_v21  ;;  %v1168_v31 = vadd.f32 %v3122_v7, %v1094_v26 }
  0xef   : > { %v3183_v27 = vsel %vm1219_vm11, %v1187_v21, %v1251_v24  ;;  %v910_v28 = vpop.f32.mrf.mxu2  ;;  %v1232_v38 = vmul.f32 0.2, %v1168_v31  ;;  %vm1200_vm12 = vcmp.ge.f32.partialorder %v1168_v31, 0.0 }
  0xf0   : > { %v2604_v29 = vpack.c.bf16 %v3183_v27, %v3181_v22  ;;  %v1143_v30 = vpop.f32.mrf.mxu3 }
  0xf1   : > { %v1144_v32 = vadd.f32 %v1143_v30, %v910_v28  ;;  %v862_v34 = vpop.f32.mrf.mxu0  ;;  %v3191_v44 = vsel %vm1200_vm12, %v1168_v31, %v1232_v38 }
  0xf2   : > { %2652 = vst [vmem:[%s3142_s27 + $0x60] sm:$0xff] %v2604_v29   ;;  %v1095_v35 = vpop.f32.mrf.mxu1 }
  0xf3   : > { %v1096_v37 = vadd.f32 %v1095_v35, %v862_v34  ;;  %v1188_v39 = vadd.f32 %v3122_v7, %v1144_v32 }
  0xf5   : > { %v1169_v40 = vadd.f32 %v3122_v7, %v1096_v37  ;;  %v1252_v45 = vmul.f32 0.2, %v1188_v39  ;;  %vm1220_vm14 = vcmp.ge.f32.partialorder %v1188_v39, 0.0 }
  0xf7   : > { %vm1201_vm13 = vcmp.ge.f32.partialorder %v1169_v40, 0.0  ;;  %v1233_v41 = vmul.f32 0.2, %v1169_v40  ;;  %v912_v42 = vpop.f32.mrf.mxu2  ;;  %v3199_v54 = vsel %vm1220_vm14, %v1188_v39, %v1252_v45 }
  0xf8   : > { %v1145_v43 = vpop.f32.mrf.mxu3 }
  0xf9   : > { %v3193_v46 = vsel %vm1201_vm13, %v1169_v40, %v1233_v41  ;;  %v1146_v47 = vadd.f32 %v1145_v43, %v912_v42  ;;  %v865_v48 = vpop.f32.mrf.mxu0 }
  0xfa   : > { %v2559_v49 = vpack.c.bf16 %v3193_v46, %v3191_v44  ;;  %v1098_v50 = vpop.f32.mrf.mxu1 }
  0xfb   : > { %v1189_v52 = vadd.f32 %v3122_v7, %v1146_v47  ;;  %v1099_v56 = vadd.f32 %v1098_v50, %v865_v48 }
  0xfc   : > { %2643 = vst [vmem:[%s3142_s27 + $0x18] sm:$0xff] %v2559_v49  }
  0xfd   : > { %vm1221_vm15 = vcmp.ge.f32.partialorder %v1189_v52, 0.0  ;;  %v1253_v55 = vmul.f32 0.2, %v1189_v52  ;;  %v1170_v63 = vadd.f32 %v3122_v7, %v1099_v56 }
  0xff   : > { %v3201_v57 = vsel %vm1221_vm15, %v1189_v52, %v1253_v55  ;;  %v915_v58 = vpop.f32.mrf.mxu2  ;;  %v1234_v4 = vmul.f32 0.2, %v1170_v63  ;;  %vm1202_vm0 = vcmp.ge.f32.partialorder %v1170_v63, 0.0 }
 0x100   : > { %v2609_v60 = vpack.c.bf16 %v3201_v57, %v3199_v54  ;;  %v1148_v61 = vpop.f32.mrf.mxu3 }
 0x101   : > { %v1149_v0 = vadd.f32 %v1148_v61, %v915_v58  ;;  %v867_v1 = vpop.f32.mrf.mxu0  ;;  %v3209_v11 = vsel %vm1202_vm0, %v1170_v63, %v1234_v4 }
 0x102   : > { %2653 = vst [vmem:[%s3142_s27 + $0x68] sm:$0xff] %v2609_v60   ;;  %v1100_v2 = vpop.f32.mrf.mxu1 }
 0x103   : > { %v1101_v3 = vadd.f32 %v1100_v2, %v867_v1  ;;  %v1190_v5 = vadd.f32 %v3122_v7, %v1149_v0 }
 0x105   : > { %v1171_v6 = vadd.f32 %v3122_v7, %v1101_v3  ;;  %v1254_v12 = vmul.f32 0.2, %v1190_v5  ;;  %vm1222_vm2 = vcmp.ge.f32.partialorder %v1190_v5, 0.0 }
 0x107   : > { %vm1203_vm1 = vcmp.ge.f32.partialorder %v1171_v6, 0.0  ;;  %v1235_v8 = vmul.f32 0.2, %v1171_v6  ;;  %v917_v9 = vpop.f32.mrf.mxu2  ;;  %v3217_v21 = vsel %vm1222_vm2, %v1190_v5, %v1254_v12 }
 0x108   : > { %v1150_v10 = vpop.f32.mrf.mxu3 }
 0x109   : > { %v3211_v13 = vsel %vm1203_vm1, %v1171_v6, %v1235_v8  ;;  %v1151_v15 = vadd.f32 %v1150_v10, %v917_v9  ;;  %v870_v17 = vpop.f32.mrf.mxu0  ;;  %v3246_v9 = vld [vmem:[%s3525_s9] ss:$0 sm:$0xff] }
 0x10a   : > { %v2564_v18 = vpack.c.bf16 %v3211_v13, %v3209_v11  ;;  %v1103_v19 = vpop.f32.mrf.mxu1 }
 0x10b   : > { %v1191_v20 = vadd.f32 %v3122_v7, %v1151_v15  ;;  %v1104_v26 = vadd.f32 %v1103_v19, %v870_v17 }
 0x10c   : > { %2644 = vst [vmem:[%s3142_s27 + $0x20] sm:$0xff] %v2564_v18  }
 0x10d   : > { %vm1223_vm3 = vcmp.ge.f32.partialorder %v1191_v20, 0.0  ;;  %v1255_v24 = vmul.f32 0.2, %v1191_v20  ;;  %v1172_v32 = vadd.f32 %v3122_v7, %v1104_v26 }
 0x10f   : > { %v3219_v28 = vsel %vm1223_vm3, %v1191_v20, %v1255_v24  ;;  %v920_v29 = vpop.f32.mrf.mxu2  ;;  %v1236_v39 = vmul.f32 0.2, %v1172_v32  ;;  %vm1204_vm4 = vcmp.ge.f32.partialorder %v1172_v32, 0.0 }
 0x110   : > { %v2614_v30 = vpack.c.bf16 %v3219_v28, %v3217_v21  ;;  %v1153_v31 = vpop.f32.mrf.mxu3 }
 0x111   : > { %v1154_v34 = vadd.f32 %v1153_v31, %v920_v29  ;;  %v872_v35 = vpop.f32.mrf.mxu0  ;;  %v3227_v47 = vsel %vm1204_vm4, %v1172_v32, %v1236_v39 }
 0x112   : > { %2654 = vst [vmem:[%s3142_s27 + $0x70] sm:$0xff] %v2614_v30   ;;  %v1105_v37 = vpop.f32.mrf.mxu1 }
 0x113   : > { %v1106_v38 = vadd.f32 %v1105_v37, %v872_v35  ;;  %v1192_v40 = vadd.f32 %v3122_v7, %v1154_v34 }
 0x115   : > { %v1173_v41 = vadd.f32 %v3122_v7, %v1106_v38  ;;  %v1256_v48 = vmul.f32 0.2, %v1192_v40  ;;  %vm1224_vm6 = vcmp.ge.f32.partialorder %v1192_v40, 0.0 }
 0x117   : > { %vm1205_vm5 = vcmp.ge.f32.partialorder %v1173_v41, 0.0  ;;  %v1237_v42 = vmul.f32 0.2, %v1173_v41  ;;  %v922_v43 = vpop.f32.mrf.mxu2  ;;  %v3235_v60 = vsel %vm1224_vm6, %v1192_v40, %v1256_v48 }
 0x118   : > { %v1155_v45 = vpop.f32.mrf.mxu3 }
 0x119   : > { %v3229_v49 = vsel %vm1205_vm5, %v1173_v41, %v1237_v42  ;;  %v1156_v50 = vadd.f32 %v1155_v45, %v922_v43  ;;  %v875_v52 = vpop.f32.mrf.mxu0 }
 0x11a   : > { %v2569_v55 = vpack.c.bf16 %v3229_v49, %v3227_v47  ;;  %v1108_v56 = vpop.f32.mrf.mxu1 }
 0x11b   : > { %v1193_v58 = vadd.f32 %v3122_v7, %v1156_v50  ;;  %v1109_v63 = vadd.f32 %v1108_v56, %v875_v52 }
 0x11c   : > { %2645 = vst [vmem:[%s3142_s27 + $0x28] sm:$0xff] %v2569_v55  }
 0x11d   : > { %vm1225_vm7 = vcmp.ge.f32.partialorder %v1193_v58, 0.0  ;;  %v1257_v61 = vmul.f32 0.2, %v1193_v58  ;;  %v1174_v4 = vadd.f32 %v3122_v7, %v1109_v63 }
 0x11f   : > { %v3237_v0 = vsel %vm1225_vm7, %v1193_v58, %v1257_v61  ;;  %v1419_v1 = vpop.f32.mrf.mxu2  ;;  %v1238_v12 = vmul.f32 0.2, %v1174_v4  ;;  %vm1206_vm8 = vcmp.ge.f32.partialorder %v1174_v4, 0.0  ;;  %v1656_v61 = vadd.f32 %v3135_v25, %v3133_v23 }
 0x120   : > { %v2619_v2 = vpack.c.bf16 %v3237_v0, %v3235_v60  ;;  %v1520_v3 = vpop.f32.mrf.mxu3 }
 0x121   : > { %v877_v5 = vpop.f32.mrf.mxu0  ;;  %v1521_v8 = vadd.f32 %v1520_v3, %v1419_v1  ;;  %v3250_v24 = vsel %vm1206_vm8, %v1174_v4, %v1238_v12  ;;  %v1657_v3 = vadd.f32 %v1656_v61, %v3155_v51 }
 0x122   : > { %2655 = vst [vmem:[%s3142_s27 + $0x78] sm:$0xff] %v2619_v2   ;;  %v1110_v6 = vpop.f32.mrf.mxu1 }
 0x123   : > { %v1111_v10 = vadd.f32 %v1110_v6, %v877_v5  ;;  %v1544_v17 = vadd.f32 %v3246_v9, %v1521_v8  ;;  %v1658_v12 = vadd.f32 %v1657_v3, %v3157_v53 }
 0x125   : > { %v1175_v15 = vadd.f32 %v3122_v7, %v1111_v10  ;;  %v1560_v34 = vmul.f32 0.2, %v1544_v17  ;;  %vm1552_vm10 = vcmp.ge.f32.partialorder %v1544_v17, 0.0 }
 0x127   : > { %vm1207_vm9 = vcmp.ge.f32.partialorder %v1175_v15, 0.0  ;;  %v1239_v18 = vmul.f32 0.2, %v1175_v15  ;;  %v1421_v19 = vpop.f32.mrf.mxu2  ;;  %v3259_v39 = vsel %vm1552_vm10, %v1544_v17, %v1560_v34 }
 0x128   : > { %v1522_v20 = vpop.f32.mrf.mxu3 }
 0x129   : > { %v3252_v26 = vsel %vm1207_vm9, %v1175_v15, %v1239_v18  ;;  %v1523_v29 = vadd.f32 %v1522_v20, %v1421_v19  ;;  %v880_v30 = vpop.f32.mrf.mxu0  ;;  %v1659_v20 = vadd.f32 %v1658_v12, %v3173_v14 }
 0x12a   : > { %v2574_v31 = vpack.c.bf16 %v3252_v26, %v3250_v24  ;;  %v1113_v32 = vpop.f32.mrf.mxu1 }
 0x12b   : > { %v1545_v35 = vadd.f32 %v3246_v9, %v1523_v29  ;;  %v1114_v38 = vadd.f32 %v1113_v32, %v880_v30 }
 0x12c   : > { %2646 = vst [vmem:[%s3142_s27 + $0x30] sm:$0xff] %v2574_v31   ;;  %v1660_v31 = vadd.f32 %v1659_v20, %v3175_v16 }
 0x12d   : > { %vm1553_vm11 = vcmp.ge.f32.partialorder %v1545_v35, 0.0  ;;  %v1561_v37 = vmul.f32 0.2, %v1545_v35  ;;  %v1176_v45 = vadd.f32 %v3122_v7, %v1114_v38 }
 0x12f   : > { %v3261_v40 = vsel %vm1553_vm11, %v1545_v35, %v1561_v37  ;;  %v1424_v41 = vpop.f32.mrf.mxu2  ;;  %v1240_v56 = vmul.f32 0.2, %v1176_v45  ;;  %vm1208_vm12 = vcmp.ge.f32.partialorder %v1176_v45, 0.0  ;;  %v1661_v37 = vadd.f32 %v1660_v31, %v3191_v44 }
 0x130   : > { %v2624_v42 = vpack.c.bf16 %v3261_v40, %v3259_v39  ;;  %v1525_v43 = vpop.f32.mrf.mxu3 }
 0x131   : > { %v882_v48 = vpop.f32.mrf.mxu0  ;;  %v1526_v52 = vadd.f32 %v1525_v43, %v1424_v41  ;;  %v3274_v5 = vsel %vm1208_vm12, %v1176_v45, %v1240_v56  ;;  %v1662_v45 = vadd.f32 %v1661_v37, %v3193_v46 }
 0x132   : > { %2625 = vst [vmem:[%s3266_s17] sm:$0xff] %v2624_v42   ;;  %v1115_v50 = vpop.f32.mrf.mxu1 }
 0x133   : > { %v1116_v55 = vadd.f32 %v1115_v50, %v882_v48  ;;  %v1546_v63 = vadd.f32 %v3246_v9, %v1526_v52 }
 0x135   : > { %v1177_v58 = vadd.f32 %v3122_v7, %v1116_v55  ;;  %v1562_v18 = vmul.f32 0.2, %v1546_v63  ;;  %vm1554_vm14 = vcmp.ge.f32.partialorder %v1546_v63, 0.0  ;;  %v1663_v55 = vadd.f32 %v1662_v45, %v3209_v11 }
 0x137   : > { %vm1209_vm13 = vcmp.ge.f32.partialorder %v1177_v58, 0.0  ;;  %v1241_v1 = vmul.f32 0.2, %v1177_v58  ;;  %v1426_v2 = vpop.f32.mrf.mxu2  ;;  %v3285_v32 = vsel %vm1554_vm14, %v1546_v63, %v1562_v18  ;;  %v1664_v61 = vadd.f32 %v1663_v55, %v3211_v13 }
 0x138   : > { %v1527_v4 = vpop.f32.mrf.mxu3 }
 0x139   : > { %v3276_v6 = vsel %vm1209_vm13, %v1177_v58, %v1241_v1  ;;  %v1528_v8 = vadd.f32 %v1527_v4, %v1426_v2  ;;  %v885_v10 = vpop.f32.mrf.mxu0  ;;  %v1665_v3 = vadd.f32 %v1664_v61, %v3227_v47  ;;  %v1818_v4 = vadd.f32 %v3261_v40, %v3259_v39 }
 0x13a   : > { %v2579_v15 = vpack.c.bf16 %v3276_v6, %v3274_v5  ;;  %v1118_v17 = vpop.f32.mrf.mxu1 }
 0x13b   : > { %v1547_v19 = vadd.f32 %v3246_v9, %v1528_v8  ;;  %v1119_v30 = vadd.f32 %v1118_v17, %v885_v10  ;;  %v1666_v18 = vadd.f32 %v1665_v3, %v3229_v49  ;;  %v1819_v37 = vadd.f32 %v1818_v4, %v3285_v32 }
 0x13c   : > { %2647 = vst [vmem:[%s3142_s27 + $0x38] sm:$0xff] %v2579_v15   ;;  %v2829_v3 = vmov 64.0  }
 0x13d   : > { %vm1555_vm15 = vcmp.ge.f32.partialorder %v1547_v19, 0.0  ;;  %v1563_v29 = vmul.f32 0.2, %v1547_v19  ;;  %v1178_v42 = vadd.f32 %v3122_v7, %v1119_v30  ;;  %2725 = vrcp.f32 %v2829_v3 }
 0x13f   : > { %v3287_v34 = vsel %vm1555_vm15, %v1547_v19, %v1563_v29  ;;  %v1429_v35 = vpop.f32.mrf.mxu2  ;;  %v1242_v56 = vmul.f32 0.2, %v1178_v42  ;;  %vm1210_vm0 = vcmp.ge.f32.partialorder %v1178_v42, 0.0 }
 0x140   : > { %v2629_v38 = vpack.c.bf16 %v3287_v34, %v3285_v32  ;;  %v1530_v41 = vpop.f32.mrf.mxu3 }
 0x141   : > { %v887_v43 = vpop.f32.mrf.mxu0  ;;  %v1531_v50 = vadd.f32 %v1530_v41, %v1429_v35  ;;  %v3302_v10 = vsel %vm1210_vm0, %v1178_v42, %v1242_v56  ;;  %v1667_v35 = vadd.f32 %v1666_v18, %v3250_v24 }
 0x142   : > { %2656 = vst [vmem:[%s3266_s17 + $0x8] sm:$0xff] %v2629_v38   ;;  %v1120_v48 = vpop.f32.mrf.mxu1 }
 0x143   : > { %v1121_v52 = vadd.f32 %v1120_v48, %v887_v43  ;;  %v1548_v63 = vadd.f32 %v3246_v9, %v1531_v50  ;;  %v1668_v42 = vadd.f32 %v1667_v35, %v3252_v26  ;;  %v2726_v35 = vpop.eup %2725 }
 0x144   : > { %vm1836_vm8 = vweird.f32 %v2726_v35 }
 0x145   : > { %v1179_v58 = vadd.f32 %v3122_v7, %v1121_v52  ;;  %v1564_v29 = vmul.f32 0.2, %v1548_v63  ;;  %vm1556_vm2 = vcmp.ge.f32.partialorder %v1548_v63, 0.0  ;;  %v1669_v50 = vadd.f32 %v1668_v42, %v3274_v5 }
 0x146   : > { %v1820_v52 = vadd.f32 %v1819_v37, %v3287_v34 }
 0x147   : > { %vm1211_vm1 = vcmp.ge.f32.partialorder %v1179_v58, 0.0  ;;  %v1243_v1 = vmul.f32 0.2, %v1179_v58  ;;  %v1431_v2 = vpop.f32.mrf.mxu2  ;;  %v3315_v43 = vsel %vm1556_vm2, %v1548_v63, %v1564_v29 }
 0x148   : > { %v1532_v8 = vpop.f32.mrf.mxu3 }
 0x149   : > { %v3304_v12 = vsel %vm1211_vm1, %v1179_v58, %v1243_v1  ;;  %v1533_v15 = vadd.f32 %v1532_v8, %v1431_v2  ;;  %v890_v17 = vpop.f32.mrf.mxu0  ;;  %v1670_v2 = vadd.f32 %v1669_v50, %v3276_v6 }
 0x14a   : > { %v2584_v19 = vpack.c.bf16 %v3304_v12, %v3302_v10  ;;  %v1123_v20 = vpop.f32.mrf.mxu1 }
 0x14b   : > { %v1549_v30 = vadd.f32 %v3246_v9, %v1533_v15  ;;  %v1124_v31 = vadd.f32 %v1123_v20, %v890_v17  ;;  %v1671_v15 = vadd.f32 %v1670_v2, %v3302_v10  ;;  %v1821_v17 = vadd.f32 %v1820_v52, %v3315_v43 }
 0x14c   : > { %2648 = vst [vmem:[%s3142_s27 + $0x40] sm:$0xff] %v2584_v19  }
 0x14d   : > { %vm1557_vm3 = vcmp.ge.f32.partialorder %v1549_v30, 0.0  ;;  %v1565_v38 = vmul.f32 0.2, %v1549_v30  ;;  %v1180_v41 = vadd.f32 %v3122_v7, %v1124_v31  ;;  %v1672_v29 = vadd.f32 %v1671_v15, %v3304_v12 }
 0x14f   : > { %v3317_v45 = vsel %vm1557_vm3, %v1549_v30, %v1565_v38  ;;  %v1434_v48 = vpop.f32.mrf.mxu2  ;;  %v1244_v58 = vmul.f32 0.2, %v1180_v41  ;;  %vm1212_vm4 = vcmp.ge.f32.partialorder %v1180_v41, 0.0 }
 0x150   : > { %v2634_v55 = vpack.c.bf16 %v3317_v45, %v3315_v43  ;;  %v1535_v56 = vpop.f32.mrf.mxu3  ;;  %v1822_v37 = vadd.f32 %v1821_v17, %v3317_v45 }
 0x151   : > { %v1536_v61 = vadd.f32 %v1535_v56, %v1434_v48  ;;  %v892_v1 = vpop.f32.mrf.mxu0  ;;  %v3328_v18 = vsel %vm1212_vm4, %v1180_v41, %v1244_v58  ;;  %v1832_v56 = vmul.f32 64.0, %v2726_v35 }
 0x152   : > { %2657 = vst [vmem:[%s3266_s17 + $0x10] sm:$0xff] %v2634_v55   ;;  %v1125_v63 = vpop.f32.mrf.mxu1  ;;  %v1673_v38 = vadd.f32 %v1672_v29, %v3328_v18 }
 0x153   : > { %v1550_v4 = vadd.f32 %v3246_v9, %v1536_v61  ;;  %v1126_v8 = vadd.f32 %v1125_v63, %v892_v1  ;;  %v1833_v3 = vsub.f32 1.0, %v1832_v56 }
 0x155   : > { %v1566_v19 = vmul.f32 0.2, %v1550_v4  ;;  %v1181_v20 = vadd.f32 %v3122_v7, %v1126_v8  ;;  %vm1558_vm5 = vcmp.ge.f32.partialorder %v1550_v4, 0.0  ;;  %v1834_v17 = vmul.f32 %v2726_v35, %v1833_v3 }
 0x157   : > { %vm1213_vm6 = vcmp.ge.f32.partialorder %v1181_v20, 0.0  ;;  %v1245_v30 = vmul.f32 0.2, %v1181_v20  ;;  %v1436_v31 = vpop.f32.mrf.mxu2  ;;  %v3334_v48 = vsel %vm1558_vm5, %v1550_v4, %v1566_v19 }
 0x158   : > { %v1537_v42 = vpop.f32.mrf.mxu3  ;;  %v1823_v58 = vadd.f32 %v1822_v37, %v3334_v48  ;;  %v1835_v37 = vadd.f32 %v2726_v35, %v1834_v17 }
 0x159   : > { %v3336_v41 = vsel %vm1213_vm6, %v1181_v20, %v1245_v30  ;;  %v1538_v50 = vadd.f32 %v1537_v42, %v1436_v31  ;;  %v2830_v20 = vmov 256.0  }
 0x15a   : > { %v2589_v7 = vpack.c.bf16 %v3336_v41, %v3328_v18  ;;  %v1674_v52 = vadd.f32 %v1673_v38, %v3336_v41  ;;  %2727 = vrcp.f32 %v2830_v20 }
 0x15b   : > { %v1551_v55 = vadd.f32 %v3246_v9, %v1538_v50 }
 0x15c   : > { %2649 = vst [vmem:[%s3142_s27 + $0x48] sm:$0xff] %v2589_v7   ;;  %v1675_v61 = vadd.f32 %v1674_v52, %v3145_v33 }
 0x15d   : > { %vm1559_vm7 = vcmp.ge.f32.partialorder %v1551_v55, 0.0  ;;  %v1567_v1 = vmul.f32 0.2, %v1551_v55 }
 0x15e   : > { %v1676_v2 = vadd.f32 %v1675_v61, %v3147_v36 }
 0x15f   : > { %v3346_v63 = vsel %vm1559_vm7, %v1551_v55, %v1567_v1  ;;  %v3355_v55 = vsel %vm1836_vm8, %v2726_v35, %v1835_v37 }
 0x160   : > { %v1677_v4 = vadd.f32 %v1676_v2, %v3163_v59  ;;  %v1824_v8 = vadd.f32 %v1823_v58, %v3346_v63  ;;  %v2728_v50 = vpop.eup %2727 }
 0x161   : > { %v1694_v61 = vmul.f32 256.0, %v2728_v50 }
 0x162   : > { %v1678_v15 = vadd.f32 %v1677_v4, %v3165_v62  ;;  %v1825_v9 = vrot.slane %v1824_v8, 4 }
 0x164   : > { %v1679_v19 = vadd.f32 %v1678_v15, %v3181_v22  ;;  %v1826_v29 = vadd.f32 %v1825_v9, %v1824_v8  ;;  %v1695_v15 = vsub.f32 1.0, %v1694_v61 }
 0x166   : > { %v1680_v30 = vadd.f32 %v1679_v19, %v3183_v27  ;;  %v1827_v31 = vrot.slane %v1826_v29, 2 }
 0x168   : > { %v1681_v38 = vadd.f32 %v1680_v30, %v3199_v54  ;;  %v1828_v42 = vadd.f32 %v1827_v31, %v1826_v29 }
 0x16a   : > { %v1682_v7 = vadd.f32 %v1681_v38, %v3201_v57  ;;  %v1829_v52 = vrot.slane %v1828_v42, 1  ;;  %v1696_v38 = vmul.f32 %v2728_v50, %v1695_v15 }
 0x16c   : > { %v1683_v56 = vadd.f32 %v1682_v7, %v3217_v21  ;;  %v1830_v58 = vadd.f32 %v1829_v52, %v1828_v42  ;;  %v1697_v42 = vadd.f32 %v2728_v50, %v1696_v38 }
 0x16e   : > { %v1684_v1 = vadd.f32 %v1683_v56, %v3219_v28  ;;  %v1838_v2 = vmul.f32 %v3355_v55, %v1830_v58 }
 0x170   : > { %v1685_v3 = vadd.f32 %v1684_v1, %v3235_v60  ;;  %1839 = vst [vmem:[%s592_s24] sm:$0x1] %v1838_v2  ;;  %v1840_v35 = vsub.f32 %v3259_v39, %v1838_v2  ;;  %v1841_v4 = vsub.f32 %v3261_v40, %v1838_v2  ;;  %v1842_v8 = vsub.f32 %v3285_v32, %v1838_v2  ;;  %s2749_s24 = scalar_lea.hbm %s2748_s25, 128 }
 0x171   : > { %v1843_v9 = vsub.f32 %v3287_v34, %v1838_v2  ;;  %p2750_p11 = scmp.ne.s32.totalorder %s2748_s25, %s2749_s24  ;;  %p2755_p1 = scmp.lt.s32.totalorder %s2753_s3, %s2749_s24 }
 0x172   : > { %v1686_v17 = vadd.f32 %v1685_v3, %v3237_v0  ;;  %v1848_v19 = vmul.f32 %v1840_v35, %v1840_v35  ;;  %v1849_v20 = vmul.f32 %v1841_v4, %v1841_v4  ;;  %v1850_v29 = vmul.f32 %v1842_v8, %v1842_v8 }
 0x173   : > { %v1851_v31 = vmul.f32 %v1843_v9, %v1843_v9  ;;  %p2751_p12 = pnand %p2750_p11, %p2951_p5  ;;  %p2756_p2 = por %p2755_p1, %p2754_p0 }
 0x174   : > { %v1687_v30 = vrot.slane %v1686_v17, 4  ;;  %v1856_v37 = vadd.f32 %v1849_v20, %v1848_v19 }
 0x175   : > { %p2752_p13 = pneg %p2751_p12 }
 0x176   : > { %v1688_v39 = vadd.f32 %v1687_v30, %v1686_v17  ;;  %v1857_v40 = vadd.f32 %v1856_v37, %v1850_v29 }
 0x177   : > { %p2757_p3 = pnand %p2756_p2, %p2752_p13 }
 0x178   : > { %v1689_v32 = vrot.slane %v1688_v39, 2  ;;  %v1858_v34 = vadd.f32 %v1857_v40, %v1851_v31 }
 0x179   : > { %2760 = shalt.err (!%p2757_p3)
}
 0x17a   : > { %s2831_s18 = smov 64   ;;  %s2832_s20 = smov 4   ;;  %v1690_v7 = vadd.f32 %v1689_v32, %v1688_v39  ;;  %vm1698_vm9 = vweird.f32 %v2728_v50  ;;  %v1844_v52 = vsub.f32 %v3315_v43, %v1838_v2  ;;  %v1845_v1 = vsub.f32 %v3317_v45, %v1838_v2 }
 0x17b   : > { %2675 = dma.vmem_to_hbm [thread:$0]  (%p2951_p5), %s1915_s0, 2048, %s1917_s16, %s1885_s23, %s2831_s18, %s2831_s18, %s2832_s20   ;;  %v3390_v58 = vsel %vm1698_vm9, %v2728_v50, %v1697_v42  ;;  %v1846_v4 = vsub.f32 %v3334_v48, %v1838_v2  ;;  %v1847_v50 = vsub.f32 %v3346_v63, %v1838_v2  ;;  %v2639_v39 = vpack.c.bf16 %v3346_v63, %v3334_v48 }
 0x17c   : > { %v1691_v56 = vrot.slane %v1690_v7, 1  ;;  %v1852_v3 = vmul.f32 %v1844_v52, %v1844_v52  ;;  %s586_s25 = scalar_lea.vmem %s3528_s12, %s2999_s30  ;;  %v1853_v43 = vmul.f32 %v1845_v1, %v1845_v1  ;;  %s2540_s0 = sshll.u32 %s2934_s22, 5 }
 0x17d   : > { %v1854_v15 = vmul.f32 %v1846_v4, %v1846_v4  ;;  %v1855_v19 = vmul.f32 %v1847_v50, %v1847_v50  ;;  %s1930_s24 = scalar_lea.hbm %s3527_s11, %s2540_s0  ;;  %s1931_s22 = sshll.u32 %s3266_s17, 4  ;;  %2658 = vst [vmem:[%s3266_s17 + $0x18] sm:$0xff] %v2639_v39   ;;  %s1932_s22 = int_to_ptr.vmem [resolvable:$true] %s1931_s22 }
 0x17e   : > { %v1692_v61 = vadd.f32 %v1691_v56, %v1690_v7  ;;  %v1859_v8 = vadd.f32 %v1858_v34, %v1852_v3  ;;  %s1933_s27 = sshll.u32 %s1930_s24, 4  ;;  %s1890_s26 = scalar_lea.sflag [#allocation5], %s3126_s2  ;;  %s1934_s27 = int_to_ptr.hbm [resolvable:$true] %s1933_s27 }
 0x17f   : > { %s2775_s29 = sshra.s32 %s1934_s27, 4  ;;  %s2781_s0 = scalar_lea.hbm %s3527_s11, 64  ;;  %s2776_s29 = int_to_ptr.hbm [resolvable:$true] %s2775_s29 }
 0x180   : > { %v3398_v35 = vmul.f32 %v3390_v58, %v1692_v61  ;;  %v1860_v9 = vadd.f32 %v1859_v8, %v1853_v43  ;;  %s2777_s1 = scalar_lea.hbm %s2776_s29, 32  ;;  %p2782_p9 = scmp.lt.s32.totalorder %s2776_s29, %s3527_s11 }
 0x181   : > { %p2778_p4 = scmp.ne.s32.totalorder %s2776_s29, %s2777_s1  ;;  %p2783_p10 = scmp.lt.s32.totalorder %s2781_s0, %s2777_s1 }
 0x182   : > { %1701 = vst [vmem:[%s586_s25] sm:$0x1] %v3398_v35  ;;  %v1702_v45 = vsub.f32 %v3133_v23, %v3398_v35  ;;  %v1703_v17 = vsub.f32 %v3135_v25, %v3398_v35  ;;  %v1861_v20 = vadd.f32 %v1860_v9, %v1854_v15  ;;  %v1704_v29 = vsub.f32 %v3155_v51, %v3398_v35 }
 0x183   : > { %v1705_v23 = vsub.f32 %v3157_v53, %v3398_v35  ;;  %v1706_v25 = vsub.f32 %v3173_v14, %v3398_v35  ;;  %v1707_v40 = vsub.f32 %v3175_v16, %v3398_v35  ;;  %p2779_p7 = pnand %p2778_p4, %p2951_p5  ;;  %p2784_p11 = por %p2783_p10, %p2782_p9 }
 0x184   : > { %v1734_v30 = vmul.f32 %v1702_v45, %v1702_v45  ;;  %v1735_v2 = vmul.f32 %v1703_v17, %v1703_v17  ;;  %v1862_v31 = vadd.f32 %v1861_v20, %v1855_v19  ;;  %v1736_v37 = vmul.f32 %v1704_v29, %v1704_v29 }
 0x185   : > { %v1737_v32 = vmul.f32 %v1705_v23, %v1705_v23  ;;  %p2780_p8 = pneg %p2779_p7 }
 0x186   : > { %v1766_v38 = vadd.f32 %v1735_v2, %v1734_v30  ;;  %v1863_v51 = vrot.slane %v1862_v31, 4 }
 0x187   : > { %p2785_p12 = pnand %p2784_p11, %p2780_p8 }
 0x188   : > { %v1767_v34 = vadd.f32 %v1766_v38, %v1736_v37  ;;  %v1864_v42 = vadd.f32 %v1863_v51, %v1862_v31 }
 0x189   : > { %2788 = shalt.err (!%p2785_p12)
}
 0x18a   : > { %2676 = dma.vmem_to_hbm [thread:$0]  (%p2951_p5), %s1932_s22, 512, %s1934_s27, %s1890_s26, %s2831_s18, %s2831_s18, %s2832_s20   ;;  %v1708_v53 = vsub.f32 %v3191_v44, %v3398_v35  ;;  %v1738_v14 = vmul.f32 %v1706_v25, %v1706_v25  ;;  %v1768_v16 = vadd.f32 %v1767_v34, %v1737_v32  ;;  %v1865_v48 = vrot.slane %v1864_v42, 2 }
 0x18b   : > { %v1709_v63 = vsub.f32 %v3193_v46, %v3398_v35  ;;  %v1739_v7 = vmul.f32 %v1707_v40, %v1707_v40  ;;  %v1710_v61 = vsub.f32 %v3209_v11, %v3398_v35  ;;  %v1711_v43 = vsub.f32 %v3211_v13, %v3398_v35  ;;  %s595_s17 = scalar_lea.vmem %s3531_s15, %s2999_s30  ;;  %s589_s24 = scalar_lea.vmem %s3529_s13, %s2999_s30 }
 0x18c   : > { %v1769_v52 = vadd.f32 %v1768_v16, %v1738_v14  ;;  %v1866_v56 = vadd.f32 %v1865_v48, %v1864_v42  ;;  %v1740_v1 = vmul.f32 %v1708_v53, %v1708_v53  ;;  %v1712_v15 = vsub.f32 %v3227_v47, %v3398_v35 }
 0x18d   : > { %v1741_v8 = vmul.f32 %v1709_v63, %v1709_v63  ;;  %v1742_v9 = vmul.f32 %v1710_v61, %v1710_v61  ;;  %v1713_v17 = vsub.f32 %v3229_v49, %v3398_v35  ;;  %v1743_v11 = vmul.f32 %v1711_v43, %v1711_v43 }
 0x18e   : > { %v1770_v3 = vadd.f32 %v1769_v52, %v1739_v7  ;;  %v1867_v4 = vrot.slane %v1866_v56, 1  ;;  %v1714_v29 = vsub.f32 %v3250_v24, %v3398_v35  ;;  %v1744_v13 = vmul.f32 %v1712_v15, %v1712_v15 }
 0x18f   : > { %v1715_v2 = vsub.f32 %v3252_v26, %v3398_v35  ;;  %v1745_v47 = vmul.f32 %v1713_v17, %v1713_v17  ;;  %v1717_v37 = vsub.f32 %v3276_v6, %v3398_v35  ;;  %v1718_v51 = vsub.f32 %v3302_v10, %v3398_v35 }
 0x190   : > { %v1771_v44 = vadd.f32 %v1770_v3, %v1740_v1  ;;  %v1868_v50 = vadd.f32 %v1867_v4, %v1866_v56  ;;  %v1746_v23 = vmul.f32 %v1714_v29, %v1714_v29  ;;  %v1719_v34 = vsub.f32 %v3304_v12, %v3398_v35 }
 0x191   : > { %v1747_v38 = vmul.f32 %v1715_v2, %v1715_v2  ;;  %v1749_v42 = vmul.f32 %v1717_v37, %v1717_v37  ;;  %v1720_v14 = vsub.f32 %v3328_v18, %v3398_v35  ;;  %v1750_v6 = vmul.f32 %v1718_v51, %v1718_v51 }
 0x192   : > { %v1772_v46 = vadd.f32 %v1771_v44, %v1741_v8  ;;  %v1869_v45 = vmul.f32 %v1868_v50, %v3355_v55  ;;  %v1716_v55 = vsub.f32 %v3274_v5, %v3398_v35  ;;  %v1721_v63 = vsub.f32 %v3336_v41, %v3398_v35 }
 0x193   : > { %v1751_v10 = vmul.f32 %v1719_v34, %v1719_v34  ;;  %v1722_v56 = vsub.f32 %v3145_v33, %v3398_v35  ;;  %v1752_v12 = vmul.f32 %v1720_v14, %v1720_v14  ;;  %v1723_v1 = vsub.f32 %v3147_v36, %v3398_v35 }
 0x194   : > { %v1773_v19 = vadd.f32 %v1772_v46, %v1742_v9  ;;  %v1870_v20 = vadd.f32 1e-05, %v1869_v45  ;;  %v1748_v40 = vmul.f32 %v1716_v55, %v1716_v55  ;;  %v1753_v4 = vmul.f32 %v1721_v63, %v1721_v63 }
 0x195   : > { %v1724_v8 = vsub.f32 %v3163_v59, %v3398_v35  ;;  %v1754_v33 = vmul.f32 %v1722_v56, %v1722_v56  ;;  %v1725_v36 = vsub.f32 %v3165_v62, %v3398_v35  ;;  %v1755_v15 = vmul.f32 %v1723_v1, %v1723_v1 }
 0x196   : > { %v1774_v30 = vadd.f32 %v1773_v19, %v1743_v11  ;;  %2729 = vrsqrt.f32 %v1870_v20  ;;  %vm1878_vm10 = vcmp.eq.f32.partialorder %v1870_v20, inf  ;;  %v1881_v41 = vand.u32 2147483648, %v1870_v20 }
 0x197   : > { %vm1880_vm11 = vcmp.eq.f32.partialorder %v1870_v20, 0.0  ;;  %v1726_v46 = vsub.f32 %v3181_v22, %v3398_v35  ;;  %v1756_v45 = vmul.f32 %v1724_v8, %v1724_v8  ;;  %v1727_v11 = vsub.f32 %v3183_v27, %v3398_v35 }
 0x198   : > { %v1775_v31 = vadd.f32 %v1774_v30, %v1744_v13  ;;  %v1757_v19 = vmul.f32 %v1725_v36, %v1725_v36  ;;  %v1728_v59 = vsub.f32 %v3199_v54, %v3398_v35  ;;  %v1729_v62 = vsub.f32 %v3201_v57, %v3398_v35 }
 0x199   : > { %v1758_v29 = vmul.f32 %v1726_v46, %v1726_v46  ;;  %v1759_v30 = vmul.f32 %v1727_v11, %v1727_v11  ;;  %v1730_v22 = vsub.f32 %v3217_v21, %v3398_v35  ;;  %v1731_v27 = vsub.f32 %v3219_v28, %v3398_v35 }
 0x19a   : > { %v1776_v25 = vadd.f32 %v1775_v31, %v1745_v47  ;;  %v1760_v47 = vmul.f32 %v1728_v59, %v1728_v59  ;;  %v1761_v55 = vmul.f32 %v1729_v62, %v1729_v62  ;;  %v1732_v54 = vsub.f32 %v3235_v60, %v3398_v35 }
 0x19b   : > { %v1733_v57 = vsub.f32 %v3237_v0, %v3398_v35  ;;  %v1763_v37 = vmul.f32 %v1731_v27, %v1731_v27 }
 0x19c   : > { %v2730_v49 = vpop.eup %2729  ;;  %v1777_v39 = vadd.f32 %v1776_v25, %v1746_v23  ;;  %v1762_v25 = vmul.f32 %v1730_v22, %v1730_v22 }
 0x19d   : > { %v1872_v24 = vmul.f32 %v2730_v49, %v1870_v20  ;;  %v1765_v21 = vmul.f32 %v1733_v57, %v1733_v57 }
 0x19e   : > { %v1778_v32 = vadd.f32 %v1777_v39, %v1747_v38  ;;  %v1764_v39 = vmul.f32 %v1732_v54, %v1732_v54 }
 0x19f   : > { %v1873_v26 = vmul.f32 %v2730_v49, %v1872_v24 }
 0x1a0   : > { %v1779_v5 = vadd.f32 %v1778_v32, %v1748_v40 }
 0x1a1   : > { %v1874_v53 = vmul.f32 0.5, %v1873_v26 }
 0x1a2   : > { %v1780_v16 = vadd.f32 %v1779_v5, %v1749_v42 }
 0x1a3   : > { %v1875_v48 = vsub.f32 1.5, %v1874_v53 }
 0x1a4   : > { %v1781_v7 = vadd.f32 %v1780_v16, %v1750_v6 }
 0x1a5   : > { %v1876_v52 = vmul.f32 %v2730_v49, %v1875_v48 }
 0x1a6   : > { %v1782_v61 = vadd.f32 %v1781_v7, %v1751_v10 }
 0x1a7   : > { %v1877_v3 = vmul.f32 %v1876_v52, %v1870_v20 }
 0x1a8   : > { %v1783_v18 = vadd.f32 %v1782_v61, %v1752_v12 }
 0x1a9   : > { %v1879_v43 = vsel %vm1878_vm10, %v1870_v20, %v1877_v3 }
 0x1aa   : > { %v1784_v44 = vadd.f32 %v1783_v18, %v1753_v4  ;;  %v1882_v50 = vsel %vm1880_vm11, %v1881_v41, %v1879_v43 }
 0x1ab   : > { %1883 = vst [vmem:[%s595_s17] sm:$0x1] %v1882_v50 }
 0x1ac   : > { %v1785_v9 = vadd.f32 %v1784_v44, %v1754_v33 }
 0x1ae   : > { %v1786_v17 = vadd.f32 %v1785_v9, %v1755_v15 }
 0x1b0   : > { %v1787_v20 = vadd.f32 %v1786_v17, %v1756_v45 }
 0x1b2   : > { %v1788_v13 = vadd.f32 %v1787_v20, %v1757_v19 }
 0x1b4   : > { %v1789_v2 = vadd.f32 %v1788_v13, %v1758_v29 }
 0x1b6   : > { %v1790_v31 = vadd.f32 %v1789_v2, %v1759_v30 }
 0x1b8   : > { %v1791_v23 = vadd.f32 %v1790_v31, %v1760_v47 }
 0x1ba   : > { %v1792_v49 = vadd.f32 %v1791_v23, %v1761_v55 }
 0x1bc   : > { %v1793_v38 = vadd.f32 %v1792_v49, %v1762_v25 }
 0x1be   : > { %v1794_v24 = vadd.f32 %v1793_v38, %v1763_v37 }
 0x1c0   : > { %v1795_v51 = vadd.f32 %v1794_v24, %v1764_v39 }
 0x1c2   : > { %v1796_v40 = vadd.f32 %v1795_v51, %v1765_v21 }
 0x1c4   : > { %v1797_v32 = vrot.slane %v1796_v40, 4 }
 0x1c6   : > { %v1798_v28 = vadd.f32 %v1797_v32, %v1796_v40 }
 0x1c8   : > { %v1799_v26 = vrot.slane %v1798_v28, 2 }
 0x1ca   : > { %v1800_v34 = vadd.f32 %v1799_v26, %v1798_v28 }
 0x1cc   : > { %v1801_v42 = vrot.slane %v1800_v34, 1 }
 0x1ce   : > { %v1802_v5 = vadd.f32 %v1801_v42, %v1800_v34 }
 0x1d0   : > { %v1803_v60 = vmul.f32 %v1802_v5, %v3390_v58 }
 0x1d2   : > { %v1804_v53 = vadd.f32 1e-05, %v1803_v60 }
 0x1d4   : > { %2731 = vrsqrt.f32 %v1804_v53  ;;  %vm1812_vm12 = vcmp.eq.f32.partialorder %v1804_v53, inf  ;;  %v1815_v10 = vand.u32 2147483648, %v1804_v53  ;;  %vm1814_vm13 = vcmp.eq.f32.partialorder %v1804_v53, 0.0 }
 0x1da   : > { %v2732_v14 = vpop.eup %2731 }
 0x1db   : > { %v1806_v0 = vmul.f32 %v2732_v14, %v1804_v53 }
 0x1dd   : > { %v1807_v35 = vmul.f32 %v2732_v14, %v1806_v0 }
 0x1df   : > { %v1808_v6 = vmul.f32 0.5, %v1807_v35 }
 0x1e1   : > { %v1809_v16 = vsub.f32 1.5, %v1808_v6 }
 0x1e3   : > { %v1810_v48 = vmul.f32 %v2732_v14, %v1809_v16 }
 0x1e5   : > { %v1811_v63 = vmul.f32 %v1810_v48, %v1804_v53 }
 0x1e7   : > { %v1813_v7 = vsel %vm1812_vm12, %v1804_v53, %v1811_v63 }
 0x1e8   : > { %v1816_v52 = vsel %vm1814_vm13, %v1815_v10, %v1813_v7 }
 0x1e9   : > { %1817 = vst [vmem:[%s589_s24] sm:$0x1] %v1816_v52 }
 0x1ea PF: > { %s3552_s22 = sld [smem:[#allocation8_spill]]  ;;  %p2686_p5 = scmp.ge.s32.totalorder %s2827_s21, 2 }
 0x1ec   : > { %p2680_p13 = pnand %p2686_p5, %p2955_p6 }
 0x1ee   : > { %p2681_p0 = pneg %p2680_p13 }
 0x1f0   : > { %s1960_s26 = sand.u32 1, %s3552_s22  }
 0x1f1   : > { %s1961_s29 = scalar_lea.sflag [#allocation3], %s1960_s26 }
 0x1f2   : > { %2806 = dma.done.wait (%p2681_p0), %s1961_s29, 2048  }
 0x1f3   : > { %2808 = vsyncadd (%p2681_p0), %s1961_s29, 4294965248  ;;  %s1971_s1 = scalar_lea.sflag [#allocation5], %s1960_s26 }
 0x1f4   : > { %2810 = dma.done.wait (%p2681_p0), %s1971_s1, 512  }
 0x1f5   : > { %2812 = vsyncadd (%p2681_p0), %s1971_s1, 4294966784  ;;  %s3554_s21 = sld [smem:[#allocation10_spill]]  ;;  %s3557_s18 = smov %s2819_s19 }
 0x1f6   : > { %s3555_s30 = sld [smem:[#allocation9_spill]] }
 0x1f7   : > { %s3556_s20 = sld [smem:[#allocation11_spill]] }
 0x1fb   : > { %p29_p1 = scmp.ge.s32.totalorder %s3554_s21, 4  }
 0x1fc   : > { %s3558_s19 = smov %s3555_s30 }
 0x1fd   :  { %31 = sbr.rel (!%p29_p1) target bundleno = 10 (0xa), region = 169 }
 0x202   :  { %2001 = vsyncpa [#allocation3], 1 }
 0x203   :  { %2003 = vsyncpa [#allocation3 + $0x1], 1 }
 0x204   :  { %2004 = vsyncpa [#allocation5], 1 }
 0x205   :  { %2006 = vsyncpa [#allocation5 + $0x1], 1 }

// kernel: _forward_impl.12
= control target key start
LH: loop header
LB: loop body
LE: loop exit
PB: predicated region body
PF: predicated region fallthrough
CT: control target
= control target key end

     0   :  { %s3671_s0 = inlined_call_operand.vmem [shape: bf16[2,256,128], index: 0, kind: input, shape index: {}]   ;;  %s3672_s1 = inlined_call_operand.vmem [shape: bf16[2,64,128], index: 1, kind: input, shape index: {}]   ;;  %s3673_s2 = inlined_call_operand.vmem [shape: bf16[2,256,128], index: 2, kind: input, shape index: {}]   ;;  %s3674_s3 = inlined_call_operand.vmem [shape: bf16[2,64,128], index: 3, kind: input, shape index: {}]   ;;  %s3675_s4 = inlined_call_operand.vmem [shape: bf16[128,128], index: 4, kind: input, shape index: {}]   ;;  %s3676_s5 = inlined_call_operand.vmem [shape: bf16[128,128], index: 5, kind: input, shape index: {}]   ;;  %s3677_s6 = inlined_call_operand.vmem [shape: f32[1,128], index: 6, kind: input, shape index: {}]   ;;  %s3678_s7 = inlined_call_operand.vmem [shape: bf16[128,128], index: 7, kind: input, shape index: {}]   ;;  %s3679_s8 = inlined_call_operand.vmem [shape: bf16[128,128], index: 8, kind: input, shape index: {}]   ;;  %s3680_s9 = inlined_call_operand.vmem [shape: f32[1,128], index: 9, kind: input, shape index: {}]   ;;  %s3681_s10 = inlined_call_operand.vmem [shape: bf16[2,256,128], index: 10, kind: output, shape index: {0}]   ;;  %s3682_s11 = inlined_call_operand.vmem [shape: bf16[2,64,128], index: 11, kind: output, shape index: {1}]   ;;  %s3683_s12 = inlined_call_operand.hbm [shape: f32[2,1,128], index: 12, kind: output, shape index: {2}]   ;;  %s3684_s13 = inlined_call_operand.hbm [shape: f32[2,1,128], index: 13, kind: output, shape index: {3}]   ;;  %s3685_s14 = inlined_call_operand.hbm [shape: f32[2,1,128], index: 14, kind: output, shape index: {4}]   ;;  %s3686_s15 = inlined_call_operand.hbm [shape: f32[2,1,128], index: 15, kind: output, shape index: {5}]  }
   0x1   :  { %3693 = sst [smem:[#allocation17_spill]] %s3671_s0 }
   0x2   :  { %3694 = sst [smem:[#allocation18_spill]] %s3673_s2 }
   0x3   :  { %3695 = sst [smem:[#allocation19_spill]] %s3675_s4 }
   0x4   :  { %21 = vsyncpa [#allocation3], 0 }
   0x5   :  { %23 = vsyncpa [#allocation3 + $0x1], 0 }
   0x6   :  { %24 = vsyncpa [#allocation5], 0 }
   0x7   :  { %26 = vsyncpa [#allocation5 + $0x1], 0 }
   0x8   :  { %27 = vsyncpa [#allocation8], 0 }
   0x9   :  { %29 = vsyncpa [#allocation8 + $0x1], 0  ;;  %s3013_s18 = smov 0   ;;  %s3015_s19 = smov 0  }
   0xa   :  { %s3017_s20 = smov 0   ;;  %s3019_s21 = smov 0  }
   0xb LB: > { %3696 = sst [smem:[#allocation12_spill]] %s2917_s18  ;;  %s3034_s22 = sadd.s32 4294967295, %s2929_s21   ;;  %s2929_s21 = sphi %s3019_s21, %s3709_s21   ;;  %s2925_s20 = sphi %s3017_s20, %s3711_s20   ;;  %s2921_s19 = sphi %s3015_s19, %s3713_s19   ;;  %s2917_s18 = sphi %s3013_s18, %s3712_s18  }
   0xc   : > { %3697 = sst [smem:[#allocation13_spill]] %s2925_s20  ;;  %s3687_s23 = sadd.s32 4294967294, %s2929_s21  }
   0xd   : > { %s3038_s24 = sadd.s32 1, %s2929_s21   ;;  %s324_s25 = sadd.s32 1, %s2925_s20 }
   0xe   : > { %3698 = sst [smem:[#allocation14_spill]] %s3038_s24  ;;  %s321_s26 = ssub.s32 %s2929_s21, %s3038_s24 }
   0xf   : > { %p334_p0 = scmp.ne.s32.totalorder %s2925_s20, %s2921_s19  ;;  %p322_p1 = scmp.eq.s32.totalorder %s321_s26, 0 }
  0x10   : > { %p335_p2 = scmp.eq.s32.totalorder %s3034_s22, 1  ;;  %p340_p3 = scmp.ne.s32.totalorder %s2921_s19, %s2917_s18 }
  0x11   : > { %p341_p4 = scmp.eq.s32.totalorder %s3687_s23, 1  ;;  %p2194_p7 = scmp.ge.s32.totalorder %s2929_s21, 1 }
  0x12   : > { %s3051_s27 = scalar_select %p322_p1, %s2925_s20, %s324_s25  }
  0x13   : > { %p3053_p5 = por %p335_p2, %p334_p0  ;;  %p3057_p6 = por %p341_p4, %p340_p3 }
  0x14   : > { %3699 = sst [smem:[#allocation15_spill]] %s3051_s27  ;;  %p487_p8 = scmp.lt.s32.totalorder %s2929_s21, 3 }
  0x15   : > { %s3701_s29 = scalar_select %p3057_p6, 1, 0 }
  0x16   : > { %p488_p9 = pnand %p2194_p7, %p487_p8 }
  0x17   : > { %3702 = sst [smem:[#allocation16_spill]] %s3701_s29  ;;  %p571_p10 = scmp.lt.s32.totalorder (!%p488_p9), %s3034_s22, 1 }
  0x18   : > { %491 = sbr.rel (%p488_p9) target bundleno = 508 (0x1fc), region = 60  ;;  %s3703_s4 = sld [smem:[#allocation19_spill]] (!%p488_p9) }
  0x19   : > { %s3704_s2 = sld [smem:[#allocation18_spill]] (!%p488_p9)  ;;  %s2795_s23 = scalar_lea.hbm (!%p488_p9), %s3683_s12, 2 }
  0x1a   : > { %s3705_s0 = sld [smem:[#allocation17_spill]] (!%p488_p9) }
  0x1d   : > { %v2550_v0 = vld [vmem:[%s3676_s5 + $0x38] sm:$0xff]  ;;  %v2549_v2 = vld [vmem:[%s3676_s5 + $0x30] sm:$0xff]  ;;  %v2548_v4 = vld [vmem:[%s3676_s5 + $0x28] sm:$0xff]  ;;  %s3101_s30 = scalar_select %p571_p10, %s3034_s22, 1 }
  0x1e   : > { %v2526_v1 = vld [vmem:[%s3703_s4 + $0x38] sm:$0xff]  ;;  %841 = vmatpush.bf16.msra.mxu0 %v2550_v0  ;;  %2693 = vmatpush.bf16.msra.mxu2 %v2550_v0  ;;  %v2525_v3 = vld [vmem:[%s3703_s4 + $0x30] sm:$0xff]  ;;  %v2524_v5 = vld [vmem:[%s3703_s4 + $0x28] sm:$0xff] }
  0x1f   : > { %1074 = vmatpush.bf16.msra.mxu1 %v2526_v1  ;;  %2701 = vmatpush.bf16.msra.mxu3 %v2526_v1  ;;  %v2547_v6 = vld [vmem:[%s3676_s5 + $0x20] sm:$0xff]  ;;  %v2546_v8 = vld [vmem:[%s3676_s5 + $0x18] sm:$0xff]  ;;  %v2545_v10 = vld [vmem:[%s3676_s5 + $0x10] sm:$0xff]  ;;  %s3110_s25 = sshll.u32 %s3101_s30, 7  ;;  %s3203_s29 = sshll.u32 %s3101_s30, 5 }
  0x20   : > { %v2523_v7 = vld [vmem:[%s3703_s4 + $0x20] sm:$0xff]  ;;  %v2522_v9 = vld [vmem:[%s3703_s4 + $0x18] sm:$0xff]  ;;  %v2521_v11 = vld [vmem:[%s3703_s4 + $0x10] sm:$0xff]  ;;  %s3119_s16 = scalar_lea.vmem %s3704_s2, %s3110_s25  ;;  %s3128_s20 = scalar_lea.vmem %s3705_s0, %s3110_s25 }
  0x21   : > { %v2544_v12 = vld [vmem:[%s3676_s5 + $0x8] sm:$0xff]  ;;  %v2543_v14 = vld [vmem:[%s3676_s5] sm:$0xff]  ;;  %v2537_v17 = vld [vmem:[%s3119_s16 + $0x50] sm:$0xff]  ;;  %s3209_s26 = scalar_lea.vmem %s3672_s1, %s3203_s29  ;;  %s3215_s18 = scalar_lea.vmem %s3674_s3, %s3203_s29 }
  0x22   : > { %842 = vmatpush.bf16.msra.mxu0 %v2549_v2  ;;  %2694 = vmatpush.bf16.msra.mxu2 %v2549_v2  ;;  %v2520_v13 = vld [vmem:[%s3703_s4 + $0x8] sm:$0xff]  ;;  %v2519_v15 = vld [vmem:[%s3703_s4] sm:$0xff]  ;;  %v2513_v19 = vld [vmem:[%s3128_s20 + $0x50] sm:$0xff]  ;;  %s3245_s27 = scalar_lea.vmem %s3681_s10, %s3110_s25  ;;  %s1926_s30 = scalar_lea.hbm %s3683_s12, %s3034_s22 }
  0x23   : > { %1075 = vmatpush.bf16.msra.mxu1 %v2525_v3  ;;  %2702 = vmatpush.bf16.msra.mxu3 %v2525_v3  ;;  %v2527_v16 = vld [vmem:[%s3119_s16] sm:$0xff]  ;;  %v2528_v20 = vld [vmem:[%s3119_s16 + $0x8] sm:$0xff]  ;;  %v2538_v21 = vld [vmem:[%s3119_s16 + $0x58] sm:$0xff]  ;;  %s1930_s4 = sshll.u32 %s1926_s30, 4  ;;  %s1931_s4 = int_to_ptr.hbm [resolvable:$true] %s1930_s4 }
  0x24   : > { %v2503_v18 = vld [vmem:[%s3128_s20] sm:$0xff]  ;;  %v2504_v22 = vld [vmem:[%s3128_s20 + $0x8] sm:$0xff]  ;;  %v2514_v23 = vld [vmem:[%s3128_s20 + $0x58] sm:$0xff]  ;;  %s2789_s25 = sshra.s32 %s1931_s4, 4  ;;  %s2790_s25 = int_to_ptr.hbm [resolvable:$true] %s2789_s25 }
  0x25   : > { %v2529_v24 = vld [vmem:[%s3119_s16 + $0x10] sm:$0xff]  ;;  %v2539_v25 = vld [vmem:[%s3119_s16 + $0x60] sm:$0xff]  ;;  %v2574_v28 = vld [vmem:[%s3679_s8 + $0x38] sm:$0xff]  ;;  %p2796_p0 = scmp.lt.s32.totalorder %s2790_s25, %s3683_s12 }
  0x26   : > { %843 = vmatpush.bf16.msra.mxu0 %v2548_v4  ;;  %2695 = vmatpush.bf16.msra.mxu2 %v2548_v4  ;;  %v2505_v26 = vld [vmem:[%s3128_s20 + $0x10] sm:$0xff]  ;;  %v2515_v27 = vld [vmem:[%s3128_s20 + $0x60] sm:$0xff]  ;;  %v2562_v29 = vld [vmem:[%s3678_s7 + $0x38] sm:$0xff] }
  0x27   : > { %1076 = vmatpush.bf16.msra.mxu1 %v2524_v5  ;;  %2703 = vmatpush.bf16.msra.mxu3 %v2524_v5  ;;  %v2573_v30 = vld [vmem:[%s3679_s8 + $0x30] sm:$0xff]  ;;  %v2572_v32 = vld [vmem:[%s3679_s8 + $0x28] sm:$0xff]  ;;  %v2571_v34 = vld [vmem:[%s3679_s8 + $0x20] sm:$0xff] }
  0x28   : > { %v2561_v31 = vld [vmem:[%s3678_s7 + $0x30] sm:$0xff]  ;;  %v2560_v33 = vld [vmem:[%s3678_s7 + $0x28] sm:$0xff]  ;;  %v2559_v35 = vld [vmem:[%s3678_s7 + $0x20] sm:$0xff] }
  0x29   : > { %v2530_v36 = vld [vmem:[%s3119_s16 + $0x18] sm:$0xff]  ;;  %v2540_v37 = vld [vmem:[%s3119_s16 + $0x68] sm:$0xff]  ;;  %v2569_v42 = vld [vmem:[%s3679_s8 + $0x10] sm:$0xff] }
  0x2a   : > { %844 = vmatpush.bf16.msra.mxu0 %v2547_v6  ;;  %2696 = vmatpush.bf16.msra.mxu2 %v2547_v6  ;;  %v2506_v38 = vld [vmem:[%s3128_s20 + $0x18] sm:$0xff]  ;;  %v2516_v39 = vld [vmem:[%s3128_s20 + $0x68] sm:$0xff]  ;;  %v2557_v43 = vld [vmem:[%s3678_s7 + $0x10] sm:$0xff] }
  0x2b   : > { %1077 = vmatpush.bf16.msra.mxu1 %v2523_v7  ;;  %2704 = vmatpush.bf16.msra.mxu3 %v2523_v7  ;;  %v2570_v40 = vld [vmem:[%s3679_s8 + $0x18] sm:$0xff]  ;;  %v2568_v44 = vld [vmem:[%s3679_s8 + $0x8] sm:$0xff]  ;;  %v2567_v46 = vld [vmem:[%s3679_s8] sm:$0xff] }
  0x2c   : > { %v2558_v41 = vld [vmem:[%s3678_s7 + $0x18] sm:$0xff]  ;;  %v2556_v45 = vld [vmem:[%s3678_s7 + $0x8] sm:$0xff]  ;;  %v2555_v47 = vld [vmem:[%s3678_s7] sm:$0xff] }
  0x2d   : > { %v2531_v48 = vld [vmem:[%s3119_s16 + $0x20] sm:$0xff]  ;;  %v2541_v49 = vld [vmem:[%s3119_s16 + $0x70] sm:$0xff]  ;;  %v2532_v52 = vld [vmem:[%s3119_s16 + $0x28] sm:$0xff] }
  0x2e   : > { %845 = vmatpush.bf16.msra.mxu0 %v2546_v8  ;;  %2697 = vmatpush.bf16.msra.mxu2 %v2546_v8  ;;  %v2507_v50 = vld [vmem:[%s3128_s20 + $0x20] sm:$0xff]  ;;  %v2517_v51 = vld [vmem:[%s3128_s20 + $0x70] sm:$0xff]  ;;  %v2542_v53 = vld [vmem:[%s3119_s16 + $0x78] sm:$0xff] }
  0x2f   : > { %1078 = vmatpush.bf16.msra.mxu1 %v2522_v9  ;;  %2705 = vmatpush.bf16.msra.mxu3 %v2522_v9  ;;  %v2508_v54 = vld [vmem:[%s3128_s20 + $0x28] sm:$0xff]  ;;  %v2518_v55 = vld [vmem:[%s3128_s20 + $0x78] sm:$0xff]  ;;  %v2533_v56 = vld [vmem:[%s3119_s16 + $0x30] sm:$0xff] }
  0x30   : > { %v2563_v57 = vld [vmem:[%s3209_s26] sm:$0xff]  ;;  %v2509_v58 = vld [vmem:[%s3128_s20 + $0x30] sm:$0xff]  ;;  %v2534_v60 = vld [vmem:[%s3119_s16 + $0x38] sm:$0xff] }
  0x31   : > { %v2551_v59 = vld [vmem:[%s3215_s18] sm:$0xff]  ;;  %v2564_v61 = vld [vmem:[%s3209_s26 + $0x8] sm:$0xff]  ;;  %v2510_v62 = vld [vmem:[%s3128_s20 + $0x38] sm:$0xff] }
  0x32   : > { %846 = vmatpush.bf16.msra.mxu0 %v2545_v10  ;;  %2698 = vmatpush.bf16.msra.mxu2 %v2545_v10  ;;  %v2552_v63 = vld [vmem:[%s3215_s18 + $0x8] sm:$0xff]  ;;  %v2535_v0 = vld [vmem:[%s3119_s16 + $0x40] sm:$0xff]  ;;  %v2565_v1 = vld [vmem:[%s3209_s26 + $0x10] sm:$0xff] }
  0x33   : > { %1079 = vmatpush.bf16.msra.mxu1 %v2521_v11  ;;  %2706 = vmatpush.bf16.msra.mxu3 %v2521_v11  ;;  %v2511_v3 = vld [vmem:[%s3128_s20 + $0x40] sm:$0xff]  ;;  %v2553_v4 = vld [vmem:[%s3215_s18 + $0x10] sm:$0xff] }
  0x34   : > { %v3232_v7 = vld [vmem:[%s3677_s6] ss:$0 sm:$0xff] }
  0x36   : > { %847 = vmatpush.bf16.msra.mxu0 %v2544_v12  ;;  %2699 = vmatpush.bf16.msra.mxu2 %v2544_v12 }
  0x37   : > { %1080 = vmatpush.bf16.msra.mxu1 %v2520_v13  ;;  %2707 = vmatpush.bf16.msra.mxu3 %v2520_v13 }
  0x3a   : > { %848 = vmatpush.bf16.msra.mxu0 %v2543_v14  ;;  %2700 = vmatpush.bf16.msra.mxu2 %v2543_v14 }
  0x3b   : > { %1081 = vmatpush.bf16.msra.mxu1 %v2519_v15  ;;  %2708 = vmatpush.bf16.msra.mxu3 %v2519_v15 }
  0x3d   : > { %849 = vmatmul.bf16.vlgmr.msra.gmra.mxu0 %v2527_v16  ;;  %899 = vmatmul.bf16.vlgmr.msra.gmra.mxu2 %v2537_v17 }
  0x3e   : > { %1082 = vmatmul.bf16.vlgmr.msra.gmra.mxu1 %v2503_v18  ;;  %1132 = vmatmul.bf16.vlgmr.msra.gmra.mxu3 %v2513_v19 }
  0x3f   : > { %1415 = vmatpush.bf16.msrb.mxu2 %v2574_v28  ;;  %1516 = vmatpush.bf16.msrb.mxu3 %v2562_v29  ;;  %v2512_v28 = vld [vmem:[%s3128_s20 + $0x48] sm:$0xff]  ;;  %v2554_v29 = vld [vmem:[%s3215_s18 + $0x18] sm:$0xff] }
  0x43   : > { %1416 = vmatpush.bf16.msrb.mxu2 %v2573_v30  ;;  %1517 = vmatpush.bf16.msrb.mxu3 %v2561_v31 }
  0x47   : > { %1417 = vmatpush.bf16.msrb.mxu2 %v2572_v32  ;;  %1518 = vmatpush.bf16.msrb.mxu3 %v2560_v33 }
  0x4b   : > { %1418 = vmatpush.bf16.msrb.mxu2 %v2571_v34  ;;  %1519 = vmatpush.bf16.msrb.mxu3 %v2559_v35 }
  0x4d   : > { %854 = vmatmul.bf16.gmra.mxu0 %v2528_v20  ;;  %904 = vmatmul.bf16.gmra.mxu2 %v2538_v21  ;;  %v2536_v21 = vld [vmem:[%s3119_s16 + $0x48] sm:$0xff]  ;;  %s2791_s16 = scalar_lea.hbm %s2790_s25, 1 }
  0x4e   : > { %1087 = vmatmul.bf16.gmra.mxu1 %v2504_v22  ;;  %1137 = vmatmul.bf16.gmra.mxu3 %v2514_v23  ;;  %v2566_v22 = vld [vmem:[%s3209_s26 + $0x18] sm:$0xff]  ;;  %s3374_s26 = scalar_lea.vmem %s3682_s11, %s3203_s29  ;;  %s3469_s29 = sand.u32 1, %s2921_s19  }
  0x4f   : > { %1419 = vmatpush.bf16.msrb.mxu2 %v2570_v40  ;;  %1520 = vmatpush.bf16.msrb.mxu3 %v2558_v41  ;;  %s564_s0 = scalar_lea.vmem [#allocation6], %s3469_s29  ;;  %s552_s24 = scalar_lea.vmem [#allocation2], %s3469_s29 }
  0x50   : > { %s1928_s2 = sshll.u32 %s552_s24, 4  ;;  %p2792_p11 = scmp.ne.s32.totalorder %s2790_s25, %s2791_s16  ;;  %s1929_s2 = int_to_ptr.vmem [resolvable:$true] %s1928_s2 }
  0x51   : > { %p2797_p1 = scmp.lt.s32.totalorder %s2795_s23, %s2791_s16 }
  0x52   : > { %p2793_p12 = pnand %p2792_p11, %p3053_p5 }
  0x53   : > { %1420 = vmatpush.bf16.msrb.mxu2 %v2569_v42  ;;  %1521 = vmatpush.bf16.msrb.mxu3 %v2557_v43  ;;  %p2798_p2 = por %p2797_p1, %p2796_p0 }
  0x54   : > { %p2794_p13 = pneg %p2793_p12 }
  0x56   : > { %p2799_p3 = pnand %p2798_p2, %p2794_p13 }
  0x57   : > { %1421 = vmatpush.bf16.msrb.mxu2 %v2568_v44  ;;  %1522 = vmatpush.bf16.msrb.mxu3 %v2556_v45 }
  0x5b   : > { %1422 = vmatpush.bf16.msrb.mxu2 %v2567_v46  ;;  %1523 = vmatpush.bf16.msrb.mxu3 %v2555_v47 }
  0x5d   : > { %859 = vmatmul.bf16.gmra.mxu0 %v2529_v24  ;;  %909 = vmatmul.bf16.gmra.mxu2 %v2539_v25 }
  0x5e   : > { %1092 = vmatmul.bf16.gmra.mxu1 %v2505_v26  ;;  %1142 = vmatmul.bf16.gmra.mxu3 %v2515_v27 }
  0x6d   : > { %864 = vmatmul.bf16.gmra.mxu0 %v2530_v36  ;;  %914 = vmatmul.bf16.gmra.mxu2 %v2540_v37 }
  0x6e   : > { %1097 = vmatmul.bf16.gmra.mxu1 %v2506_v38  ;;  %1147 = vmatmul.bf16.gmra.mxu3 %v2516_v39 }
  0x7d   : > { %869 = vmatmul.bf16.gmra.mxu0 %v2531_v48  ;;  %919 = vmatmul.bf16.gmra.mxu2 %v2541_v49 }
  0x7e   : > { %1102 = vmatmul.bf16.gmra.mxu1 %v2507_v50  ;;  %1152 = vmatmul.bf16.gmra.mxu3 %v2517_v51 }
  0x8d   : > { %874 = vmatmul.bf16.gmra.mxu0 %v2532_v52  ;;  %924 = vmatmul.bf16.gmra.mxu2 %v2542_v53 }
  0x8e   : > { %1107 = vmatmul.bf16.gmra.mxu1 %v2508_v54  ;;  %1157 = vmatmul.bf16.gmra.mxu3 %v2518_v55 }
  0x9d   : > { %879 = vmatmul.bf16.gmra.mxu0 %v2533_v56  ;;  %1423 = vmatmul.bf16.vlgmr.msrb.gmra.mxu2 %v2563_v57 }
  0x9e   : > { %1112 = vmatmul.bf16.gmra.mxu1 %v2509_v58  ;;  %1524 = vmatmul.bf16.vlgmr.msrb.gmra.mxu3 %v2551_v59 }
  0xad   : > { %884 = vmatmul.bf16.gmra.mxu0 %v2534_v60  ;;  %1428 = vmatmul.bf16.gmra.mxu2 %v2564_v61 }
  0xae   : > { %1117 = vmatmul.bf16.gmra.mxu1 %v2510_v62  ;;  %1529 = vmatmul.bf16.gmra.mxu3 %v2552_v63 }
  0xba   : > { %v850_v2 = vpop.f32.mrf.mxu0 }
  0xbb   : > { %v1083_v5 = vpop.f32.mrf.mxu1 }
  0xbc   : > { %v1084_v6 = vadd.f32 %v1083_v5, %v850_v2 }
  0xbd   : > { %889 = vmatmul.bf16.gmra.mxu0 %v2535_v0  ;;  %1433 = vmatmul.bf16.gmra.mxu2 %v2565_v1 }
  0xbe   : > { %1122 = vmatmul.bf16.gmra.mxu1 %v2511_v3  ;;  %1534 = vmatmul.bf16.gmra.mxu3 %v2553_v4  ;;  %v1167_v10 = vadd.f32 %v3232_v7, %v1084_v6 }
  0xc0   : > { %v900_v8 = vpop.f32.mrf.mxu2  ;;  %v1231_v15 = vmul.f32 0.2, %v1167_v10  ;;  %vm1199_vm0 = vcmp.ge.f32.partialorder %v1167_v10, 0.0 }
  0xc1   : > { %v1133_v9 = vpop.f32.mrf.mxu3 }
  0xc2   : > { %v1134_v11 = vadd.f32 %v1133_v9, %v900_v8  ;;  %v852_v12 = vpop.f32.mrf.mxu0  ;;  %v3239_v23 = vsel %vm1199_vm0, %v1167_v10, %v1231_v15 }
  0xc3   : > { %v1085_v13 = vpop.f32.mrf.mxu1 }
  0xc4   : > { %v1086_v14 = vadd.f32 %v1085_v13, %v852_v12  ;;  %v1187_v16 = vadd.f32 %v3232_v7, %v1134_v11 }
  0xc6   : > { %v1168_v17 = vadd.f32 %v3232_v7, %v1086_v14  ;;  %v1251_v24 = vmul.f32 0.2, %v1187_v16  ;;  %vm1219_vm2 = vcmp.ge.f32.partialorder %v1187_v16, 0.0 }
  0xc8   : > { %vm1200_vm1 = vcmp.ge.f32.partialorder %v1168_v17, 0.0  ;;  %v1232_v18 = vmul.f32 0.2, %v1168_v17  ;;  %v902_v19 = vpop.f32.mrf.mxu2  ;;  %v3255_v33 = vsel %vm1219_vm2, %v1187_v16, %v1251_v24 }
  0xc9   : > { %v1135_v20 = vpop.f32.mrf.mxu3 }
  0xca   : > { %v3247_v25 = vsel %vm1200_vm1, %v1168_v17, %v1232_v18  ;;  %v1136_v26 = vadd.f32 %v1135_v20, %v902_v19  ;;  %v855_v27 = vpop.f32.mrf.mxu0 }
  0xcb   : > { %v2578_v30 = vpack.c.bf16 %v3247_v25, %v3239_v23  ;;  %v1088_v31 = vpop.f32.mrf.mxu1 }
  0xcc   : > { %v1188_v32 = vadd.f32 %v3232_v7, %v1136_v26  ;;  %v1089_v35 = vadd.f32 %v1088_v31, %v855_v27 }
  0xcd   : > { %2579 = vst [vmem:[%s3245_s27] sm:$0xff] %v2578_v30   ;;  %894 = vmatmul.bf16.gmra.mxu0 %v2536_v21  ;;  %1438 = vmatmul.bf16.gmra.mxu2 %v2566_v22 }
  0xce   : > { %vm1220_vm3 = vcmp.ge.f32.partialorder %v1188_v32, 0.0  ;;  %v1252_v34 = vmul.f32 0.2, %v1188_v32  ;;  %1127 = vmatmul.bf16.gmra.mxu1 %v2512_v28  ;;  %1539 = vmatmul.bf16.gmra.mxu3 %v2554_v29  ;;  %v1169_v40 = vadd.f32 %v3232_v7, %v1089_v35 }
  0xd0   : > { %v3257_v36 = vsel %vm1220_vm3, %v1188_v32, %v1252_v34  ;;  %v905_v37 = vpop.f32.mrf.mxu2  ;;  %v1233_v45 = vmul.f32 0.2, %v1169_v40  ;;  %vm1201_vm4 = vcmp.ge.f32.partialorder %v1169_v40, 0.0 }
  0xd1   : > { %v2628_v38 = vpack.c.bf16 %v3257_v36, %v3255_v33  ;;  %v1138_v39 = vpop.f32.mrf.mxu3 }
  0xd2   : > { %v1139_v41 = vadd.f32 %v1138_v39, %v905_v37  ;;  %v857_v42 = vpop.f32.mrf.mxu0  ;;  %v3265_v51 = vsel %vm1201_vm4, %v1169_v40, %v1233_v45 }
  0xd3   : > { %2684 = vst [vmem:[%s3245_s27 + $0x50] sm:$0xff] %v2628_v38   ;;  %v1090_v43 = vpop.f32.mrf.mxu1 }
  0xd4   : > { %v1091_v44 = vadd.f32 %v1090_v43, %v857_v42  ;;  %v1189_v46 = vadd.f32 %v3232_v7, %v1139_v41 }
  0xd6   : > { %v1170_v47 = vadd.f32 %v3232_v7, %v1091_v44  ;;  %v1253_v52 = vmul.f32 0.2, %v1189_v46  ;;  %vm1221_vm6 = vcmp.ge.f32.partialorder %v1189_v46, 0.0 }
  0xd8   : > { %vm1202_vm5 = vcmp.ge.f32.partialorder %v1170_v47, 0.0  ;;  %v1234_v48 = vmul.f32 0.2, %v1170_v47  ;;  %v907_v49 = vpop.f32.mrf.mxu2  ;;  %v3273_v59 = vsel %vm1221_vm6, %v1189_v46, %v1253_v52 }
  0xd9   : > { %v1140_v50 = vpop.f32.mrf.mxu3 }
  0xda   : > { %v3267_v53 = vsel %vm1202_vm5, %v1170_v47, %v1234_v48  ;;  %v1141_v54 = vadd.f32 %v1140_v50, %v907_v49  ;;  %v860_v55 = vpop.f32.mrf.mxu0 }
  0xdb   : > { %v2583_v56 = vpack.c.bf16 %v3267_v53, %v3265_v51  ;;  %v1093_v57 = vpop.f32.mrf.mxu1 }
  0xdc   : > { %v1190_v58 = vadd.f32 %v3232_v7, %v1141_v54  ;;  %v1094_v61 = vadd.f32 %v1093_v57, %v860_v55 }
  0xdd   : > { %2675 = vst [vmem:[%s3245_s27 + $0x8] sm:$0xff] %v2583_v56  }
  0xde   : > { %vm1222_vm7 = vcmp.ge.f32.partialorder %v1190_v58, 0.0  ;;  %v1254_v60 = vmul.f32 0.2, %v1190_v58  ;;  %v1171_v2 = vadd.f32 %v3232_v7, %v1094_v61 }
  0xe0   : > { %v3275_v62 = vsel %vm1222_vm7, %v1190_v58, %v1254_v60  ;;  %v910_v63 = vpop.f32.mrf.mxu2  ;;  %v1235_v8 = vmul.f32 0.2, %v1171_v2  ;;  %vm1203_vm8 = vcmp.ge.f32.partialorder %v1171_v2, 0.0 }
  0xe1   : > { %v2633_v0 = vpack.c.bf16 %v3275_v62, %v3273_v59  ;;  %v1143_v1 = vpop.f32.mrf.mxu3 }
  0xe2   : > { %v1144_v3 = vadd.f32 %v1143_v1, %v910_v63  ;;  %v862_v4 = vpop.f32.mrf.mxu0  ;;  %v3283_v14 = vsel %vm1203_vm8, %v1171_v2, %v1235_v8 }
  0xe3   : > { %2685 = vst [vmem:[%s3245_s27 + $0x58] sm:$0xff] %v2633_v0   ;;  %v1095_v5 = vpop.f32.mrf.mxu1 }
  0xe4   : > { %v1096_v6 = vadd.f32 %v1095_v5, %v862_v4  ;;  %v1191_v9 = vadd.f32 %v3232_v7, %v1144_v3 }
  0xe6   : > { %v1172_v10 = vadd.f32 %v3232_v7, %v1096_v6  ;;  %v1255_v15 = vmul.f32 0.2, %v1191_v9  ;;  %vm1223_vm10 = vcmp.ge.f32.partialorder %v1191_v9, 0.0 }
  0xe8   : > { %vm1204_vm9 = vcmp.ge.f32.partialorder %v1172_v10, 0.0  ;;  %v1236_v11 = vmul.f32 0.2, %v1172_v10  ;;  %v912_v12 = vpop.f32.mrf.mxu2  ;;  %v3291_v22 = vsel %vm1223_vm10, %v1191_v9, %v1255_v15 }
  0xe9   : > { %v1145_v13 = vpop.f32.mrf.mxu3 }
  0xea   : > { %v3285_v16 = vsel %vm1204_vm9, %v1172_v10, %v1236_v11  ;;  %v1146_v17 = vadd.f32 %v1145_v13, %v912_v12  ;;  %v865_v18 = vpop.f32.mrf.mxu0 }
  0xeb   : > { %v2588_v19 = vpack.c.bf16 %v3285_v16, %v3283_v14  ;;  %v1098_v20 = vpop.f32.mrf.mxu1 }
  0xec   : > { %v1192_v21 = vadd.f32 %v3232_v7, %v1146_v17  ;;  %v1099_v26 = vadd.f32 %v1098_v20, %v865_v18 }
  0xed   : > { %2676 = vst [vmem:[%s3245_s27 + $0x10] sm:$0xff] %v2588_v19  }
  0xee   : > { %vm1224_vm11 = vcmp.ge.f32.partialorder %v1192_v21, 0.0  ;;  %v1256_v24 = vmul.f32 0.2, %v1192_v21  ;;  %v1173_v31 = vadd.f32 %v3232_v7, %v1099_v26 }
  0xf0   : > { %v3293_v27 = vsel %vm1224_vm11, %v1192_v21, %v1256_v24  ;;  %v915_v28 = vpop.f32.mrf.mxu2  ;;  %v1237_v38 = vmul.f32 0.2, %v1173_v31  ;;  %vm1205_vm12 = vcmp.ge.f32.partialorder %v1173_v31, 0.0 }
  0xf1   : > { %v2638_v29 = vpack.c.bf16 %v3293_v27, %v3291_v22  ;;  %v1148_v30 = vpop.f32.mrf.mxu3 }
  0xf2   : > { %v1149_v32 = vadd.f32 %v1148_v30, %v915_v28  ;;  %v867_v34 = vpop.f32.mrf.mxu0  ;;  %v3301_v44 = vsel %vm1205_vm12, %v1173_v31, %v1237_v38 }
  0xf3   : > { %2686 = vst [vmem:[%s3245_s27 + $0x60] sm:$0xff] %v2638_v29   ;;  %v1100_v35 = vpop.f32.mrf.mxu1 }
  0xf4   : > { %v1101_v37 = vadd.f32 %v1100_v35, %v867_v34  ;;  %v1193_v39 = vadd.f32 %v3232_v7, %v1149_v32 }
  0xf6   : > { %v1174_v40 = vadd.f32 %v3232_v7, %v1101_v37  ;;  %v1257_v45 = vmul.f32 0.2, %v1193_v39  ;;  %vm1225_vm14 = vcmp.ge.f32.partialorder %v1193_v39, 0.0 }
  0xf8   : > { %vm1206_vm13 = vcmp.ge.f32.partialorder %v1174_v40, 0.0  ;;  %v1238_v41 = vmul.f32 0.2, %v1174_v40  ;;  %v917_v42 = vpop.f32.mrf.mxu2  ;;  %v3309_v54 = vsel %vm1225_vm14, %v1193_v39, %v1257_v45 }
  0xf9   : > { %v1150_v43 = vpop.f32.mrf.mxu3 }
  0xfa   : > { %v3303_v46 = vsel %vm1206_vm13, %v1174_v40, %v1238_v41  ;;  %v1151_v47 = vadd.f32 %v1150_v43, %v917_v42  ;;  %v870_v48 = vpop.f32.mrf.mxu0 }
  0xfb   : > { %v2593_v49 = vpack.c.bf16 %v3303_v46, %v3301_v44  ;;  %v1103_v50 = vpop.f32.mrf.mxu1 }
  0xfc   : > { %v1194_v52 = vadd.f32 %v3232_v7, %v1151_v47  ;;  %v1104_v56 = vadd.f32 %v1103_v50, %v870_v48 }
  0xfd   : > { %2677 = vst [vmem:[%s3245_s27 + $0x18] sm:$0xff] %v2593_v49  }
  0xfe   : > { %vm1226_vm15 = vcmp.ge.f32.partialorder %v1194_v52, 0.0  ;;  %v1258_v55 = vmul.f32 0.2, %v1194_v52  ;;  %v1175_v63 = vadd.f32 %v3232_v7, %v1104_v56 }
 0x100   : > { %v3311_v57 = vsel %vm1226_vm15, %v1194_v52, %v1258_v55  ;;  %v920_v58 = vpop.f32.mrf.mxu2  ;;  %v1239_v4 = vmul.f32 0.2, %v1175_v63  ;;  %vm1207_vm0 = vcmp.ge.f32.partialorder %v1175_v63, 0.0 }
 0x101   : > { %v2643_v60 = vpack.c.bf16 %v3311_v57, %v3309_v54  ;;  %v1153_v61 = vpop.f32.mrf.mxu3 }
 0x102   : > { %v1154_v0 = vadd.f32 %v1153_v61, %v920_v58  ;;  %v872_v1 = vpop.f32.mrf.mxu0  ;;  %v3319_v11 = vsel %vm1207_vm0, %v1175_v63, %v1239_v4 }
 0x103   : > { %2687 = vst [vmem:[%s3245_s27 + $0x68] sm:$0xff] %v2643_v60   ;;  %v1105_v2 = vpop.f32.mrf.mxu1 }
 0x104   : > { %v1106_v3 = vadd.f32 %v1105_v2, %v872_v1  ;;  %v1195_v5 = vadd.f32 %v3232_v7, %v1154_v0 }
 0x106   : > { %v1176_v6 = vadd.f32 %v3232_v7, %v1106_v3  ;;  %v1259_v12 = vmul.f32 0.2, %v1195_v5  ;;  %vm1227_vm2 = vcmp.ge.f32.partialorder %v1195_v5, 0.0 }
 0x108   : > { %vm1208_vm1 = vcmp.ge.f32.partialorder %v1176_v6, 0.0  ;;  %v1240_v8 = vmul.f32 0.2, %v1176_v6  ;;  %v922_v9 = vpop.f32.mrf.mxu2  ;;  %v3327_v21 = vsel %vm1227_vm2, %v1195_v5, %v1259_v12 }
 0x109   : > { %v1155_v10 = vpop.f32.mrf.mxu3 }
 0x10a   : > { %v3321_v13 = vsel %vm1208_vm1, %v1176_v6, %v1240_v8  ;;  %v1156_v15 = vadd.f32 %v1155_v10, %v922_v9  ;;  %v875_v17 = vpop.f32.mrf.mxu0  ;;  %v3356_v9 = vld [vmem:[%s3680_s9] ss:$0 sm:$0xff] }
 0x10b   : > { %v2598_v18 = vpack.c.bf16 %v3321_v13, %v3319_v11  ;;  %v1108_v19 = vpop.f32.mrf.mxu1 }
 0x10c   : > { %v1196_v20 = vadd.f32 %v3232_v7, %v1156_v15  ;;  %v1109_v26 = vadd.f32 %v1108_v19, %v875_v17 }
 0x10d   : > { %2678 = vst [vmem:[%s3245_s27 + $0x20] sm:$0xff] %v2598_v18  }
 0x10e   : > { %vm1228_vm3 = vcmp.ge.f32.partialorder %v1196_v20, 0.0  ;;  %v1260_v24 = vmul.f32 0.2, %v1196_v20  ;;  %v1177_v32 = vadd.f32 %v3232_v7, %v1109_v26 }
 0x110   : > { %v3329_v28 = vsel %vm1228_vm3, %v1196_v20, %v1260_v24  ;;  %v925_v29 = vpop.f32.mrf.mxu2  ;;  %v1241_v39 = vmul.f32 0.2, %v1177_v32  ;;  %vm1209_vm4 = vcmp.ge.f32.partialorder %v1177_v32, 0.0 }
 0x111   : > { %v2648_v30 = vpack.c.bf16 %v3329_v28, %v3327_v21  ;;  %v1158_v31 = vpop.f32.mrf.mxu3 }
 0x112   : > { %v1159_v34 = vadd.f32 %v1158_v31, %v925_v29  ;;  %v877_v35 = vpop.f32.mrf.mxu0  ;;  %v3337_v47 = vsel %vm1209_vm4, %v1177_v32, %v1241_v39 }
 0x113   : > { %2688 = vst [vmem:[%s3245_s27 + $0x70] sm:$0xff] %v2648_v30   ;;  %v1110_v37 = vpop.f32.mrf.mxu1 }
 0x114   : > { %v1111_v38 = vadd.f32 %v1110_v37, %v877_v35  ;;  %v1197_v40 = vadd.f32 %v3232_v7, %v1159_v34 }
 0x116   : > { %v1178_v41 = vadd.f32 %v3232_v7, %v1111_v38  ;;  %v1261_v48 = vmul.f32 0.2, %v1197_v40  ;;  %vm1229_vm6 = vcmp.ge.f32.partialorder %v1197_v40, 0.0 }
 0x118   : > { %vm1210_vm5 = vcmp.ge.f32.partialorder %v1178_v41, 0.0  ;;  %v1242_v42 = vmul.f32 0.2, %v1178_v41  ;;  %v927_v43 = vpop.f32.mrf.mxu2  ;;  %v3345_v60 = vsel %vm1229_vm6, %v1197_v40, %v1261_v48 }
 0x119   : > { %v1160_v45 = vpop.f32.mrf.mxu3 }
 0x11a   : > { %v3339_v49 = vsel %vm1210_vm5, %v1178_v41, %v1242_v42  ;;  %v1161_v50 = vadd.f32 %v1160_v45, %v927_v43  ;;  %v880_v52 = vpop.f32.mrf.mxu0 }
 0x11b   : > { %v2603_v55 = vpack.c.bf16 %v3339_v49, %v3337_v47  ;;  %v1113_v56 = vpop.f32.mrf.mxu1 }
 0x11c   : > { %v1198_v58 = vadd.f32 %v3232_v7, %v1161_v50  ;;  %v1114_v63 = vadd.f32 %v1113_v56, %v880_v52 }
 0x11d   : > { %2679 = vst [vmem:[%s3245_s27 + $0x28] sm:$0xff] %v2603_v55  }
 0x11e   : > { %vm1230_vm7 = vcmp.ge.f32.partialorder %v1198_v58, 0.0  ;;  %v1262_v61 = vmul.f32 0.2, %v1198_v58  ;;  %v1179_v4 = vadd.f32 %v3232_v7, %v1114_v63 }
 0x120   : > { %v3347_v0 = vsel %vm1230_vm7, %v1198_v58, %v1262_v61  ;;  %v1424_v1 = vpop.f32.mrf.mxu2  ;;  %v1243_v12 = vmul.f32 0.2, %v1179_v4  ;;  %vm1211_vm8 = vcmp.ge.f32.partialorder %v1179_v4, 0.0  ;;  %v1661_v61 = vadd.f32 %v3247_v25, %v3239_v23 }
 0x121   : > { %v2653_v2 = vpack.c.bf16 %v3347_v0, %v3345_v60  ;;  %v1525_v3 = vpop.f32.mrf.mxu3 }
 0x122   : > { %v882_v5 = vpop.f32.mrf.mxu0  ;;  %v1526_v8 = vadd.f32 %v1525_v3, %v1424_v1  ;;  %v3360_v24 = vsel %vm1211_vm8, %v1179_v4, %v1243_v12  ;;  %v1662_v3 = vadd.f32 %v1661_v61, %v3265_v51 }
 0x123   : > { %2689 = vst [vmem:[%s3245_s27 + $0x78] sm:$0xff] %v2653_v2   ;;  %v1115_v6 = vpop.f32.mrf.mxu1 }
 0x124   : > { %v1116_v10 = vadd.f32 %v1115_v6, %v882_v5  ;;  %v1549_v17 = vadd.f32 %v3356_v9, %v1526_v8  ;;  %v1663_v12 = vadd.f32 %v1662_v3, %v3267_v53 }
 0x126   : > { %v1180_v15 = vadd.f32 %v3232_v7, %v1116_v10  ;;  %v1565_v34 = vmul.f32 0.2, %v1549_v17  ;;  %vm1557_vm10 = vcmp.ge.f32.partialorder %v1549_v17, 0.0 }
 0x128   : > { %vm1212_vm9 = vcmp.ge.f32.partialorder %v1180_v15, 0.0  ;;  %v1244_v18 = vmul.f32 0.2, %v1180_v15  ;;  %v1426_v19 = vpop.f32.mrf.mxu2  ;;  %v3368_v39 = vsel %vm1557_vm10, %v1549_v17, %v1565_v34 }
 0x129   : > { %v1527_v20 = vpop.f32.mrf.mxu3 }
 0x12a   : > { %v3362_v26 = vsel %vm1212_vm9, %v1180_v15, %v1244_v18  ;;  %v1528_v29 = vadd.f32 %v1527_v20, %v1426_v19  ;;  %v885_v30 = vpop.f32.mrf.mxu0  ;;  %v1664_v20 = vadd.f32 %v1663_v12, %v3283_v14 }
 0x12b   : > { %v2608_v31 = vpack.c.bf16 %v3362_v26, %v3360_v24  ;;  %v1118_v32 = vpop.f32.mrf.mxu1 }
 0x12c   : > { %v1550_v35 = vadd.f32 %v3356_v9, %v1528_v29  ;;  %v1119_v38 = vadd.f32 %v1118_v32, %v885_v30 }
 0x12d   : > { %2680 = vst [vmem:[%s3245_s27 + $0x30] sm:$0xff] %v2608_v31   ;;  %v1665_v31 = vadd.f32 %v1664_v20, %v3285_v16 }
 0x12e   : > { %vm1558_vm11 = vcmp.ge.f32.partialorder %v1550_v35, 0.0  ;;  %v1566_v37 = vmul.f32 0.2, %v1550_v35  ;;  %v1181_v45 = vadd.f32 %v3232_v7, %v1119_v38 }
 0x130   : > { %v3376_v40 = vsel %vm1558_vm11, %v1550_v35, %v1566_v37  ;;  %v1429_v41 = vpop.f32.mrf.mxu2  ;;  %v1245_v56 = vmul.f32 0.2, %v1181_v45  ;;  %vm1213_vm12 = vcmp.ge.f32.partialorder %v1181_v45, 0.0  ;;  %v1666_v37 = vadd.f32 %v1665_v31, %v3301_v44 }
 0x131   : > { %v2658_v42 = vpack.c.bf16 %v3376_v40, %v3368_v39  ;;  %v1530_v43 = vpop.f32.mrf.mxu3 }
 0x132   : > { %v887_v48 = vpop.f32.mrf.mxu0  ;;  %v1531_v52 = vadd.f32 %v1530_v43, %v1429_v41  ;;  %v3387_v5 = vsel %vm1213_vm12, %v1181_v45, %v1245_v56  ;;  %v1667_v45 = vadd.f32 %v1666_v37, %v3303_v46 }
 0x133   : > { %2659 = vst [vmem:[%s3374_s26] sm:$0xff] %v2658_v42   ;;  %v1120_v50 = vpop.f32.mrf.mxu1 }
 0x134   : > { %v1121_v55 = vadd.f32 %v1120_v50, %v887_v48  ;;  %v1551_v63 = vadd.f32 %v3356_v9, %v1531_v52 }
 0x136   : > { %v1182_v58 = vadd.f32 %v3232_v7, %v1121_v55  ;;  %v1567_v18 = vmul.f32 0.2, %v1551_v63  ;;  %vm1559_vm14 = vcmp.ge.f32.partialorder %v1551_v63, 0.0  ;;  %v1668_v55 = vadd.f32 %v1667_v45, %v3319_v11 }
 0x138   : > { %vm1214_vm13 = vcmp.ge.f32.partialorder %v1182_v58, 0.0  ;;  %v1246_v1 = vmul.f32 0.2, %v1182_v58  ;;  %v1431_v2 = vpop.f32.mrf.mxu2  ;;  %v3398_v32 = vsel %vm1559_vm14, %v1551_v63, %v1567_v18  ;;  %v1669_v61 = vadd.f32 %v1668_v55, %v3321_v13 }
 0x139   : > { %v1532_v4 = vpop.f32.mrf.mxu3 }
 0x13a   : > { %v3389_v6 = vsel %vm1214_vm13, %v1182_v58, %v1246_v1  ;;  %v1533_v8 = vadd.f32 %v1532_v4, %v1431_v2  ;;  %v890_v10 = vpop.f32.mrf.mxu0  ;;  %v1670_v3 = vadd.f32 %v1669_v61, %v3337_v47  ;;  %v1823_v4 = vadd.f32 %v3376_v40, %v3368_v39 }
 0x13b   : > { %v2613_v15 = vpack.c.bf16 %v3389_v6, %v3387_v5  ;;  %v1123_v17 = vpop.f32.mrf.mxu1 }
 0x13c   : > { %v1552_v19 = vadd.f32 %v3356_v9, %v1533_v8  ;;  %v1124_v30 = vadd.f32 %v1123_v17, %v890_v10  ;;  %v1671_v18 = vadd.f32 %v1670_v3, %v3339_v49  ;;  %v1824_v37 = vadd.f32 %v1823_v4, %v3398_v32 }
 0x13d   : > { %2681 = vst [vmem:[%s3245_s27 + $0x38] sm:$0xff] %v2613_v15   ;;  %v2931_v3 = vmov 64.0  }
 0x13e   : > { %vm1560_vm15 = vcmp.ge.f32.partialorder %v1552_v19, 0.0  ;;  %v1568_v29 = vmul.f32 0.2, %v1552_v19  ;;  %v1183_v42 = vadd.f32 %v3232_v7, %v1124_v30  ;;  %2767 = vrcp.f32 %v2931_v3 }
 0x140   : > { %v3400_v34 = vsel %vm1560_vm15, %v1552_v19, %v1568_v29  ;;  %v1434_v35 = vpop.f32.mrf.mxu2  ;;  %v1247_v56 = vmul.f32 0.2, %v1183_v42  ;;  %vm1215_vm0 = vcmp.ge.f32.partialorder %v1183_v42, 0.0 }
 0x141   : > { %v2663_v38 = vpack.c.bf16 %v3400_v34, %v3398_v32  ;;  %v1535_v41 = vpop.f32.mrf.mxu3 }
 0x142   : > { %v892_v43 = vpop.f32.mrf.mxu0  ;;  %v1536_v50 = vadd.f32 %v1535_v41, %v1434_v35  ;;  %v3415_v10 = vsel %vm1215_vm0, %v1183_v42, %v1247_v56  ;;  %v1672_v35 = vadd.f32 %v1671_v18, %v3360_v24 }
 0x143   : > { %2690 = vst [vmem:[%s3374_s26 + $0x8] sm:$0xff] %v2663_v38   ;;  %v1125_v48 = vpop.f32.mrf.mxu1 }
 0x144   : > { %v1126_v52 = vadd.f32 %v1125_v48, %v892_v43  ;;  %v1553_v63 = vadd.f32 %v3356_v9, %v1536_v50  ;;  %v1673_v42 = vadd.f32 %v1672_v35, %v3362_v26  ;;  %v2768_v35 = vpop.eup %2767 }
 0x145   : > { %vm1841_vm8 = vweird.f32 %v2768_v35 }
 0x146   : > { %v1184_v58 = vadd.f32 %v3232_v7, %v1126_v52  ;;  %v1569_v29 = vmul.f32 0.2, %v1553_v63  ;;  %vm1561_vm2 = vcmp.ge.f32.partialorder %v1553_v63, 0.0  ;;  %v1674_v50 = vadd.f32 %v1673_v42, %v3387_v5 }
 0x147   : > { %v1825_v52 = vadd.f32 %v1824_v37, %v3400_v34 }
 0x148   : > { %vm1216_vm1 = vcmp.ge.f32.partialorder %v1184_v58, 0.0  ;;  %v1248_v1 = vmul.f32 0.2, %v1184_v58  ;;  %v1436_v2 = vpop.f32.mrf.mxu2  ;;  %v3428_v43 = vsel %vm1561_vm2, %v1553_v63, %v1569_v29 }
 0x149   : > { %v1537_v8 = vpop.f32.mrf.mxu3 }
 0x14a   : > { %v3417_v12 = vsel %vm1216_vm1, %v1184_v58, %v1248_v1  ;;  %v1538_v15 = vadd.f32 %v1537_v8, %v1436_v2  ;;  %v895_v17 = vpop.f32.mrf.mxu0  ;;  %v1675_v2 = vadd.f32 %v1674_v50, %v3389_v6 }
 0x14b   : > { %v2618_v19 = vpack.c.bf16 %v3417_v12, %v3415_v10  ;;  %v1128_v20 = vpop.f32.mrf.mxu1 }
 0x14c   : > { %v1554_v30 = vadd.f32 %v3356_v9, %v1538_v15  ;;  %v1129_v31 = vadd.f32 %v1128_v20, %v895_v17  ;;  %v1676_v15 = vadd.f32 %v1675_v2, %v3415_v10  ;;  %v1826_v17 = vadd.f32 %v1825_v52, %v3428_v43 }
 0x14d   : > { %2682 = vst [vmem:[%s3245_s27 + $0x40] sm:$0xff] %v2618_v19  }
 0x14e   : > { %vm1562_vm3 = vcmp.ge.f32.partialorder %v1554_v30, 0.0  ;;  %v1570_v38 = vmul.f32 0.2, %v1554_v30  ;;  %v1185_v41 = vadd.f32 %v3232_v7, %v1129_v31  ;;  %v1677_v29 = vadd.f32 %v1676_v15, %v3417_v12 }
 0x150   : > { %v3430_v45 = vsel %vm1562_vm3, %v1554_v30, %v1570_v38  ;;  %v1439_v48 = vpop.f32.mrf.mxu2  ;;  %v1249_v58 = vmul.f32 0.2, %v1185_v41  ;;  %vm1217_vm4 = vcmp.ge.f32.partialorder %v1185_v41, 0.0 }
 0x151   : > { %v2668_v55 = vpack.c.bf16 %v3430_v45, %v3428_v43  ;;  %v1540_v56 = vpop.f32.mrf.mxu3  ;;  %v1827_v37 = vadd.f32 %v1826_v17, %v3430_v45 }
 0x152   : > { %v1541_v61 = vadd.f32 %v1540_v56, %v1439_v48  ;;  %v897_v1 = vpop.f32.mrf.mxu0  ;;  %v3441_v18 = vsel %vm1217_vm4, %v1185_v41, %v1249_v58  ;;  %v1837_v56 = vmul.f32 64.0, %v2768_v35 }
 0x153   : > { %2691 = vst [vmem:[%s3374_s26 + $0x10] sm:$0xff] %v2668_v55   ;;  %v1130_v63 = vpop.f32.mrf.mxu1  ;;  %v1678_v38 = vadd.f32 %v1677_v29, %v3441_v18 }
 0x154   : > { %v1555_v4 = vadd.f32 %v3356_v9, %v1541_v61  ;;  %v1131_v8 = vadd.f32 %v1130_v63, %v897_v1  ;;  %v1838_v3 = vsub.f32 1.0, %v1837_v56 }
 0x156   : > { %v1571_v19 = vmul.f32 0.2, %v1555_v4  ;;  %v1186_v20 = vadd.f32 %v3232_v7, %v1131_v8  ;;  %vm1563_vm5 = vcmp.ge.f32.partialorder %v1555_v4, 0.0  ;;  %v1839_v17 = vmul.f32 %v2768_v35, %v1838_v3 }
 0x158   : > { %vm1218_vm6 = vcmp.ge.f32.partialorder %v1186_v20, 0.0  ;;  %v1250_v30 = vmul.f32 0.2, %v1186_v20  ;;  %v1441_v31 = vpop.f32.mrf.mxu2  ;;  %v3447_v48 = vsel %vm1563_vm5, %v1555_v4, %v1571_v19 }
 0x159   : > { %v1542_v42 = vpop.f32.mrf.mxu3  ;;  %v1828_v58 = vadd.f32 %v1827_v37, %v3447_v48  ;;  %v1840_v37 = vadd.f32 %v2768_v35, %v1839_v17 }
 0x15a   : > { %v3449_v41 = vsel %vm1218_vm6, %v1186_v20, %v1250_v30  ;;  %v1543_v50 = vadd.f32 %v1542_v42, %v1441_v31  ;;  %v2932_v20 = vmov 256.0  }
 0x15b   : > { %v2623_v7 = vpack.c.bf16 %v3449_v41, %v3441_v18  ;;  %v1679_v52 = vadd.f32 %v1678_v38, %v3449_v41  ;;  %2769 = vrcp.f32 %v2932_v20 }
 0x15c   : > { %v1556_v55 = vadd.f32 %v3356_v9, %v1543_v50 }
 0x15d   : > { %2683 = vst [vmem:[%s3245_s27 + $0x48] sm:$0xff] %v2623_v7   ;;  %v1680_v61 = vadd.f32 %v1679_v52, %v3255_v33  ;;  %s1900_s27 = scalar_lea.sflag [#allocation3], %s3469_s29 }
 0x15e   : > { %vm1564_vm7 = vcmp.ge.f32.partialorder %v1556_v55, 0.0  ;;  %v1572_v1 = vmul.f32 0.2, %v1556_v55 }
 0x15f   : > { %v1681_v2 = vadd.f32 %v1680_v61, %v3257_v36 }
 0x160   : > { %v3459_v63 = vsel %vm1564_vm7, %v1556_v55, %v1572_v1  ;;  %v3471_v55 = vsel %vm1841_vm8, %v2768_v35, %v1840_v37 }
 0x161   : > { %v1682_v4 = vadd.f32 %v1681_v2, %v3273_v59  ;;  %v1829_v8 = vadd.f32 %v1828_v58, %v3459_v63  ;;  %v2770_v50 = vpop.eup %2769 }
 0x162   : > { %v1699_v61 = vmul.f32 256.0, %v2770_v50  ;;  %vm1703_vm9 = vweird.f32 %v2770_v50 }
 0x163   : > { %v1683_v15 = vadd.f32 %v1682_v4, %v3275_v62  ;;  %v1830_v9 = vrot.slane %v1829_v8, 4 }
 0x164   : > { %v1700_v35 = vsub.f32 1.0, %v1699_v61 }
 0x165   : > { %v1684_v19 = vadd.f32 %v1683_v15, %v3291_v22  ;;  %v1831_v29 = vadd.f32 %v1830_v9, %v1829_v8 }
 0x166   : > { %v1701_v37 = vmul.f32 %v2770_v50, %v1700_v35 }
 0x167   : > { %v1685_v30 = vadd.f32 %v1684_v19, %v3293_v27  ;;  %v1832_v31 = vrot.slane %v1831_v29, 2 }
 0x169   : > { %v1686_v38 = vadd.f32 %v1685_v30, %v3309_v54  ;;  %v1833_v42 = vadd.f32 %v1832_v31, %v1831_v29 }
 0x16b   : > { %v1687_v7 = vadd.f32 %v1686_v38, %v3311_v57  ;;  %v1834_v52 = vrot.slane %v1833_v42, 1 }
 0x16d   : > { %v1688_v56 = vadd.f32 %v1687_v7, %v3327_v21  ;;  %v1835_v58 = vadd.f32 %v1834_v52, %v1833_v42  ;;  %v1702_v7 = vadd.f32 %v2770_v50, %v1701_v37 }
 0x16f   : > { %v1689_v1 = vadd.f32 %v1688_v56, %v3329_v28  ;;  %v1843_v2 = vmul.f32 %v3471_v55, %v1835_v58  ;;  %v3490_v58 = vsel %vm1703_vm9, %v2770_v50, %v1702_v7 }
 0x171   : > { %v1690_v3 = vadd.f32 %v1689_v1, %v3345_v60  ;;  %v1845_v4 = vsub.f32 %v3368_v39, %v1843_v2  ;;  %v1846_v8 = vsub.f32 %v3376_v40, %v1843_v2  ;;  %v1847_v15 = vsub.f32 %v3398_v32, %v1843_v2  ;;  %1844 = vst [vmem:[%s564_s0] sm:$0x1] %v1843_v2 }
 0x172   : > { %v1848_v9 = vsub.f32 %v3400_v34, %v1843_v2  ;;  %v1849_v34 = vsub.f32 %v3428_v43, %v1843_v2  ;;  %v1850_v1 = vsub.f32 %v3430_v45, %v1843_v2  ;;  %v1851_v43 = vsub.f32 %v3447_v48, %v1843_v2 }
 0x173   : > { %v1691_v17 = vadd.f32 %v1690_v3, %v3347_v0  ;;  %v1853_v19 = vmul.f32 %v1845_v4, %v1845_v4  ;;  %v1854_v20 = vmul.f32 %v1846_v8, %v1846_v8  ;;  %v1855_v29 = vmul.f32 %v1847_v15, %v1847_v15 }
 0x174   : > { %v1856_v31 = vmul.f32 %v1848_v9, %v1848_v9  ;;  %v1857_v3 = vmul.f32 %v1849_v34, %v1849_v34  ;;  %v1858_v8 = vmul.f32 %v1850_v1, %v1850_v1 }
 0x175   : > { %v1692_v30 = vrot.slane %v1691_v17, 4  ;;  %v1861_v39 = vadd.f32 %v1854_v20, %v1853_v19 }
 0x177   : > { %v1693_v40 = vadd.f32 %v1692_v30, %v1691_v17  ;;  %v1862_v38 = vadd.f32 %v1861_v39, %v1855_v29 }
 0x179   : > { %v1694_v32 = vrot.slane %v1693_v40, 2  ;;  %v1863_v42 = vadd.f32 %v1862_v38, %v1856_v31 }
 0x17b   : > { %v1695_v52 = vadd.f32 %v1694_v32, %v1693_v40  ;;  %v1864_v15 = vadd.f32 %v1863_v42, %v1857_v3 }
 0x17d   : > { %v1696_v56 = vrot.slane %v1695_v52, 1 }
 0x17f   : > { %v1697_v61 = vadd.f32 %v1696_v56, %v1695_v52 }
 0x181   : > { %v3495_v4 = vmul.f32 %v3490_v58, %v1697_v61 }
 0x183   : > { %1706 = vst [vmem:[%s552_s24] sm:$0x1] %v3495_v4 }
 0x184   : > { %2802 = shalt.err (!%p2799_p3)
}
 0x185   : > { %2709 = dma.vmem_to_hbm [thread:$0]  (%p3053_p5), %s1929_s2, 16, %s1931_s4, %s1900_s27   ;;  %v1852_v45 = vsub.f32 %v3459_v63, %v1843_v2  ;;  %v1859_v50 = vmul.f32 %v1851_v43, %v1851_v43  ;;  %v1865_v35 = vadd.f32 %v1864_v15, %v1858_v8  ;;  %v1707_v9 = vsub.f32 %v3239_v23, %v3495_v4 }
 0x186   : > { %v1708_v17 = vsub.f32 %v3247_v25, %v3495_v4  ;;  %v1709_v29 = vsub.f32 %v3265_v51, %v3495_v4  ;;  %v1710_v2 = vsub.f32 %v3267_v53, %v3495_v4  ;;  %v1711_v37 = vsub.f32 %v3283_v14, %v3495_v4  ;;  %s1965_s2 = scalar_lea.hbm %s3686_s15, %s3034_s22  ;;  %s570_s4 = scalar_lea.vmem [#allocation7], %s3469_s29 }
 0x187   : > { %v1860_v19 = vmul.f32 %v1852_v45, %v1852_v45  ;;  %v1866_v20 = vadd.f32 %v1865_v35, %v1859_v50  ;;  %v1739_v30 = vmul.f32 %v1707_v9, %v1707_v9  ;;  %v2673_v25 = vpack.c.bf16 %v3459_v63, %v3447_v48  ;;  %s3562_s27 = sshll.u32 %s570_s4, 4  ;;  %s3564_s25 = sshll.u32 %s1965_s2, 4  ;;  %s1968_s27 = int_to_ptr.vmem [resolvable:$true] %s3562_s27  ;;  %s1970_s25 = int_to_ptr.hbm [resolvable:$true] %s3564_s25 }
 0x188   : > { %v1740_v31 = vmul.f32 %v1708_v17, %v1708_v17  ;;  %v1741_v40 = vmul.f32 %v1709_v29, %v1709_v29  ;;  %v1712_v32 = vsub.f32 %v3285_v16, %v3495_v4  ;;  %v1742_v42 = vmul.f32 %v1710_v2, %v1710_v2  ;;  %s1912_s16 = scalar_lea.sflag [#allocation8], %s3469_s29  ;;  %s2817_s20 = sshra.s32 %s1970_s25, 4  ;;  %s2818_s20 = int_to_ptr.hbm [resolvable:$true] %s2817_s20 }
 0x189   : > { %v1867_v39 = vadd.f32 %v1866_v20, %v1860_v19  ;;  %2692 = vst [vmem:[%s3374_s26 + $0x18] sm:$0xff] %v2673_v25   ;;  %v1713_v52 = vsub.f32 %v3301_v44, %v3495_v4  ;;  %v1743_v53 = vmul.f32 %v1711_v37, %v1711_v37  ;;  %v1714_v14 = vsub.f32 %v3303_v46, %v3495_v4  ;;  %s2819_s17 = scalar_lea.hbm %s2818_s20, 1  ;;  %s2823_s30 = scalar_lea.hbm %s3686_s15, 2 }
 0x18a   : > { %v1771_v23 = vadd.f32 %v1740_v31, %v1739_v30  ;;  %v1744_v61 = vmul.f32 %v1712_v32, %v1712_v32  ;;  %v1715_v63 = vsub.f32 %v3319_v11, %v3495_v4  ;;  %v1716_v8 = vsub.f32 %v3321_v13, %v3495_v4  ;;  %p2820_p4 = scmp.ne.s32.totalorder %s2818_s20, %s2819_s17  ;;  %p2824_p9 = scmp.lt.s32.totalorder %s2818_s20, %s3686_s15 }
 0x18b   : > { %v1868_v38 = vrot.slane %v1867_v39, 4  ;;  %v1745_v16 = vmul.f32 %v1713_v52, %v1713_v52  ;;  %v1746_v15 = vmul.f32 %v1714_v14, %v1714_v14  ;;  %v1717_v50 = vsub.f32 %v3337_v47, %v3495_v4  ;;  %p2825_p10 = scmp.lt.s32.totalorder %s2823_s30, %s2819_s17 }
 0x18c   : > { %v1772_v51 = vadd.f32 %v1771_v23, %v1741_v40  ;;  %v1747_v35 = vmul.f32 %v1715_v63, %v1715_v63  ;;  %v1718_v17 = vsub.f32 %v3339_v49, %v3495_v4  ;;  %v1748_v11 = vmul.f32 %v1716_v8, %v1716_v8  ;;  %p2821_p7 = pnand %p2820_p4, %p3053_p5 }
 0x18d   : > { %v1869_v7 = vadd.f32 %v1868_v38, %v1867_v39  ;;  %v1719_v29 = vsub.f32 %v3360_v24, %v3495_v4  ;;  %v1749_v13 = vmul.f32 %v1717_v50, %v1717_v50  ;;  %v1720_v31 = vsub.f32 %v3362_v26, %v3495_v4  ;;  %p2826_p11 = por %p2825_p10, %p2824_p9 }
 0x18e   : > { %v1773_v34 = vadd.f32 %v1772_v51, %v1742_v42  ;;  %v1750_v47 = vmul.f32 %v1718_v17, %v1718_v17  ;;  %v1722_v40 = vsub.f32 %v3389_v6, %v3495_v4  ;;  %v1723_v38 = vsub.f32 %v3415_v10, %v3495_v4  ;;  %p2822_p8 = pneg %p2821_p7 }
 0x18f   : > { %v1870_v56 = vrot.slane %v1869_v7, 2  ;;  %v1751_v2 = vmul.f32 %v1719_v29, %v1719_v29  ;;  %v1752_v23 = vmul.f32 %v1720_v31, %v1720_v31  ;;  %v1724_v51 = vsub.f32 %v3417_v12, %v3495_v4 }
 0x190   : > { %v1774_v1 = vadd.f32 %v1773_v34, %v1743_v53  ;;  %v1725_v6 = vsub.f32 %v3441_v18, %v3495_v4  ;;  %v1755_v53 = vmul.f32 %v1723_v38, %v1723_v38  ;;  %v1726_v10 = vsub.f32 %v3449_v41, %v3495_v4  ;;  %p2827_p12 = pnand %p2826_p11, %p2822_p8 }
 0x191   : > { %v1871_v48 = vadd.f32 %v1870_v56, %v1869_v7  ;;  %v1756_v14 = vmul.f32 %v1724_v51, %v1724_v51  ;;  %v1728_v18 = vsub.f32 %v3257_v36, %v3495_v4  ;;  %v1730_v36 = vsub.f32 %v3275_v62, %v3495_v4 }
 0x192   : > { %v1775_v3 = vadd.f32 %v1774_v1, %v1744_v61  ;;  %v1727_v1 = vsub.f32 %v3255_v33, %v3495_v4  ;;  %v1758_v41 = vmul.f32 %v1726_v10, %v1726_v10  ;;  %v1729_v33 = vsub.f32 %v3273_v59, %v3495_v4 }
 0x193   : > { %v1872_v43 = vrot.slane %v1871_v48, 1  ;;  %v1760_v50 = vmul.f32 %v1728_v18, %v1728_v18 }
 0x194   : > { %v1776_v44 = vadd.f32 %v1775_v3, %v1745_v16 }
 0x195   : > { %v1873_v45 = vadd.f32 %v1872_v43, %v1871_v48  ;;  %v1757_v48 = vmul.f32 %v1725_v6, %v1725_v6 }
 0x196   : > { %v1777_v46 = vadd.f32 %v1776_v44, %v1746_v15  ;;  %v1759_v15 = vmul.f32 %v1727_v1, %v1727_v1 }
 0x197   : > { %v1874_v9 = vmul.f32 %v1873_v45, %v3471_v55  ;;  %v1721_v55 = vsub.f32 %v3387_v5, %v3495_v4  ;;  %v1754_v5 = vmul.f32 %v1722_v40, %v1722_v40 }
 0x198   : > { %v1778_v19 = vadd.f32 %v1777_v46, %v1747_v35 }
 0x199   : > { %v1875_v20 = vadd.f32 1e-05, %v1874_v9  ;;  %v1753_v32 = vmul.f32 %v1721_v55, %v1721_v55 }
 0x19a   : > { %v1779_v30 = vadd.f32 %v1778_v19, %v1748_v11 }
 0x19b   : > { %2771 = vrsqrt.f32 %v1875_v20  ;;  %vm1883_vm10 = vcmp.eq.f32.partialorder %v1875_v20, inf  ;;  %v1886_v43 = vand.u32 2147483648, %v1875_v20  ;;  %vm1885_vm11 = vcmp.eq.f32.partialorder %v1875_v20, 0.0 }
 0x19c   : > { %v1780_v39 = vadd.f32 %v1779_v30, %v1749_v13 }
 0x19e   : > { %v1781_v37 = vadd.f32 %v1780_v39, %v1750_v47 }
 0x1a0   : > { %v1782_v24 = vadd.f32 %v1781_v37, %v1751_v2 }
 0x1a1   : > { %v2772_v49 = vpop.eup %2771 }
 0x1a2   : > { %v1877_v25 = vmul.f32 %v2772_v49, %v1875_v20  ;;  %v1783_v26 = vadd.f32 %v1782_v24, %v1752_v23 }
 0x1a4   : > { %v1878_v42 = vmul.f32 %v2772_v49, %v1877_v25  ;;  %v1784_v7 = vadd.f32 %v1783_v26, %v1753_v32 }
 0x1a6   : > { %v1879_v52 = vmul.f32 0.5, %v1878_v42  ;;  %v1785_v34 = vadd.f32 %v1784_v7, %v1754_v5 }
 0x1a8   : > { %v1880_v56 = vsub.f32 1.5, %v1879_v52  ;;  %v1786_v61 = vadd.f32 %v1785_v34, %v1755_v53 }
 0x1aa   : > { %v1881_v12 = vmul.f32 %v2772_v49, %v1880_v56  ;;  %v1787_v63 = vadd.f32 %v1786_v61, %v1756_v14 }
 0x1ac   : > { %v1882_v16 = vmul.f32 %v1881_v12, %v1875_v20  ;;  %v1788_v3 = vadd.f32 %v1787_v63, %v1757_v48 }
 0x1ae   : > { %v1884_v8 = vsel %vm1883_vm10, %v1875_v20, %v1882_v16  ;;  %v1789_v44 = vadd.f32 %v1788_v3, %v1758_v41 }
 0x1af   : > { %v1887_v45 = vsel %vm1885_vm11, %v1886_v43, %v1884_v8 }
 0x1b0   : > { %1888 = vst [vmem:[%s570_s4] sm:$0x1] %v1887_v45  ;;  %v1790_v35 = vadd.f32 %v1789_v44, %v1759_v15 }
 0x1b1   : > { %2830 = shalt.err (!%p2827_p12)
}
 0x1b2   : > { %2712 = dma.vmem_to_hbm [thread:$0]  (%p3053_p5), %s1968_s27, 16, %s1970_s25, %s1912_s16   ;;  %v1731_v59 = vsub.f32 %v3291_v22, %v3495_v4  ;;  %v1761_v62 = vmul.f32 %v1729_v33, %v1729_v33  ;;  %v1791_v46 = vadd.f32 %v1790_v35, %v1760_v50  ;;  %v1732_v9 = vsub.f32 %v3293_v27, %v3495_v4 }
 0x1b3   : > { %v1762_v17 = vmul.f32 %v1730_v36, %v1730_v36  ;;  %v1733_v19 = vsub.f32 %v3309_v54, %v3495_v4  ;;  %v1734_v13 = vsub.f32 %v3311_v57, %v3495_v4  ;;  %v1735_v22 = vsub.f32 %v3327_v21, %v3495_v4  ;;  %s1939_s27 = scalar_lea.hbm %s3684_s13, %s3034_s22  ;;  %s1952_s20 = scalar_lea.hbm %s3685_s14, %s3034_s22 }
 0x1b4   : > { %v1792_v11 = vadd.f32 %v1791_v46, %v1761_v62  ;;  %v1763_v20 = vmul.f32 %v1731_v59, %v1731_v59  ;;  %v1764_v30 = vmul.f32 %v1732_v9, %v1732_v9  ;;  %v1736_v27 = vsub.f32 %v3329_v28, %v3495_v4  ;;  %s1903_s17 = sand.u32 1, %s3034_s22   ;;  %s558_s23 = scalar_lea.vmem [#allocation4], %s3469_s29 }
 0x1b5   : > { %v1765_v47 = vmul.f32 %v1733_v19, %v1733_v19  ;;  %v1766_v55 = vmul.f32 %v1734_v13, %v1734_v13  ;;  %v1737_v54 = vsub.f32 %v3345_v60, %v3495_v4  ;;  %v1767_v37 = vmul.f32 %v1735_v22, %v1735_v22  ;;  %s3612_s18 = sshll.u32 %s558_s23, 4  ;;  %s3614_s30 = sshll.u32 %s1939_s27, 4  ;;  %s1942_s18 = int_to_ptr.vmem [resolvable:$true] %s3612_s18  ;;  %s1944_s30 = int_to_ptr.hbm [resolvable:$true] %s3614_s30 }
 0x1b6   : > { %v1793_v29 = vadd.f32 %v1792_v11, %v1762_v17  ;;  %v1738_v57 = vsub.f32 %v3347_v0, %v3495_v4  ;;  %v1768_v40 = vmul.f32 %v1736_v27, %v1736_v27  ;;  %s3618_s26 = sshll.u32 %s564_s0, 4  ;;  %s3620_s24 = sshll.u32 %s1952_s20, 4  ;;  %s1955_s26 = int_to_ptr.vmem [resolvable:$true] %s3618_s26  ;;  %s1957_s24 = int_to_ptr.hbm [resolvable:$true] %s3620_s24 }
 0x1b7   : > { %v1769_v24 = vmul.f32 %v1737_v54, %v1737_v54  ;;  %s1904_s22 = scalar_lea.sflag [#allocation5], %s1903_s17  ;;  %s2845_s2 = sshra.s32 %s1944_s30, 4  ;;  %s2846_s2 = int_to_ptr.hbm [resolvable:$true] %s2845_s2 }
 0x1b8   : > { %v1794_v31 = vadd.f32 %v1793_v29, %v1763_v20  ;;  %v1770_v21 = vmul.f32 %v1738_v57, %v1738_v57  ;;  %s2847_s29 = scalar_lea.hbm %s2846_s2, 1  ;;  %s2851_s27 = scalar_lea.hbm %s3684_s13, 2 }
 0x1b9   : > { %p2848_p13 = scmp.ne.s32.totalorder %s2846_s2, %s2847_s29  ;;  %p2852_p2 = scmp.lt.s32.totalorder %s2846_s2, %s3684_s13 }
 0x1ba   : > { %v1795_v39 = vadd.f32 %v1794_v31, %v1764_v30  ;;  %p2853_p3 = scmp.lt.s32.totalorder %s2851_s27, %s2847_s29 }
 0x1bb   : > { %p2849_p0 = pnand %p2848_p13, %p3053_p5 }
 0x1bc   : > { %v1796_v2 = vadd.f32 %v1795_v39, %v1765_v47  ;;  %p2854_p4 = por %p2853_p3, %p2852_p2 }
 0x1bd   : > { %p2850_p1 = pneg %p2849_p0 }
 0x1be   : > { %v1797_v49 = vadd.f32 %v1796_v2, %v1766_v55 }
 0x1bf   : > { %p2855_p7 = pnand %p2854_p4, %p2850_p1 }
 0x1c0   : > { %v1798_v23 = vadd.f32 %v1797_v49, %v1767_v37 }
 0x1c2   : > { %v1799_v25 = vadd.f32 %v1798_v23, %v1768_v40 }
 0x1c4   : > { %v1800_v38 = vadd.f32 %v1799_v25, %v1769_v24 }
 0x1c6   : > { %v1801_v32 = vadd.f32 %v1800_v38, %v1770_v21 }
 0x1c8   : > { %v1802_v28 = vrot.slane %v1801_v32, 4 }
 0x1ca   : > { %v1803_v26 = vadd.f32 %v1802_v28, %v1801_v32 }
 0x1cc   : > { %v1804_v42 = vrot.slane %v1803_v26, 2 }
 0x1ce   : > { %v1805_v60 = vadd.f32 %v1804_v42, %v1803_v26 }
 0x1d0   : > { %v1806_v51 = vrot.slane %v1805_v60, 1 }
 0x1d2   : > { %v1807_v5 = vadd.f32 %v1806_v51, %v1805_v60 }
 0x1d4   : > { %v1808_v7 = vmul.f32 %v1807_v5, %v3490_v58 }
 0x1d6   : > { %v1809_v0 = vadd.f32 1e-05, %v1808_v7 }
 0x1d8   : > { %2773 = vrsqrt.f32 %v1809_v0  ;;  %vm1817_vm12 = vcmp.eq.f32.partialorder %v1809_v0, inf  ;;  %v1820_v10 = vand.u32 2147483648, %v1809_v0  ;;  %vm1819_vm13 = vcmp.eq.f32.partialorder %v1809_v0, 0.0 }
 0x1de   : > { %v2774_v4 = vpop.eup %2773 }
 0x1df   : > { %v1811_v52 = vmul.f32 %v2774_v4, %v1809_v0 }
 0x1e1   : > { %v1812_v6 = vmul.f32 %v2774_v4, %v1811_v52 }
 0x1e3   : > { %v1813_v53 = vmul.f32 0.5, %v1812_v6 }
 0x1e5   : > { %v1814_v34 = vsub.f32 1.5, %v1813_v53 }
 0x1e7   : > { %v1815_v56 = vmul.f32 %v2774_v4, %v1814_v34 }
 0x1e9   : > { %v1816_v58 = vmul.f32 %v1815_v56, %v1809_v0 }
 0x1eb   : > { %v1818_v14 = vsel %vm1817_vm12, %v1809_v0, %v1816_v58 }
 0x1ec   : > { %v1821_v61 = vsel %vm1819_vm13, %v1820_v10, %v1818_v14 }
 0x1ed   : > { %1822 = vst [vmem:[%s558_s23] sm:$0x1] %v1821_v61 }
 0x1ee   : > { %2858 = shalt.err (!%p2855_p7)
}
 0x1ef   : > { %2710 = dma.vmem_to_hbm [thread:$0]  (%p3053_p5), %s1942_s18, 16, %s1944_s30, %s1904_s22  }
 0x1f0   : > { %s2873_s20 = sshra.s32 %s1957_s24, 4  ;;  %s2879_s2 = scalar_lea.hbm %s3685_s14, 2  ;;  %s2874_s20 = int_to_ptr.hbm [resolvable:$true] %s2873_s20 }
 0x1f1   : > { %s2875_s17 = scalar_lea.hbm %s2874_s20, 1  ;;  %p2880_p11 = scmp.lt.s32.totalorder %s2874_s20, %s3685_s14 }
 0x1f2   : > { %p2876_p8 = scmp.ne.s32.totalorder %s2874_s20, %s2875_s17  ;;  %p2881_p12 = scmp.lt.s32.totalorder %s2879_s2, %s2875_s17 }
 0x1f4   : > { %p2877_p9 = pnand %p2876_p8, %p3053_p5  ;;  %p2882_p13 = por %p2881_p12, %p2880_p11 }
 0x1f6   : > { %p2878_p10 = pneg %p2877_p9 }
 0x1f8   : > { %p2883_p0 = pnand %p2882_p13, %p2878_p10 }
 0x1fa   : > { %2886 = shalt.err (!%p2883_p0)
}
 0x1fb   : > { %2711 = dma.vmem_to_hbm [thread:$0]  (%p3053_p5), %s1955_s26, 16, %s1957_s24, %s1904_s22  }
 0x1fc PF: > { %s3706_s18 = sld [smem:[#allocation12_spill]]  ;;  %p2730_p1 = scmp.ge.s32.totalorder %s2929_s21, 2 }
 0x1fe   : > { %p2718_p2 = pnand %p2730_p1, %p3057_p6 }
 0x200   : > { %p2719_p3 = pneg %p2718_p2 }
 0x202   : > { %s1997_s27 = sand.u32 1, %s3706_s18  }
 0x203   : > { %s1998_s25 = scalar_lea.sflag [#allocation3], %s1997_s27 }
 0x204   : > { %2904 = dma.done.wait (%p2719_p3), %s1998_s25, 16  }
 0x205   : > { %2906 = vsyncadd (%p2719_p3), %s1998_s25, 4294967280  ;;  %s3708_s16 = sadd.s32 4294967294, %s2929_s21  }
 0x206   : > { %s2006_s28 = sand.u32 1, %s3708_s16  }
 0x207   : > { %s2007_s20 = scalar_lea.sflag [#allocation5], %s2006_s28 }
 0x208   : > { %2908 = dma.done.wait (%p2719_p3), %s2007_s20, 32  }
 0x209   : > { %2910 = vsyncadd (%p2719_p3), %s2007_s20, 4294967264  ;;  %s2025_s17 = scalar_lea.sflag [#allocation8], %s1997_s27 }
 0x20a   : > { %2912 = dma.done.wait (%p2719_p3), %s2025_s17, 16  }
 0x20b   : > { %2914 = vsyncadd (%p2719_p3), %s2025_s17, 4294967280  ;;  %s3709_s21 = sld [smem:[#allocation14_spill]]  ;;  %s3712_s18 = smov %s2921_s19 }
 0x20c   : > { %s3710_s26 = sld [smem:[#allocation13_spill]] }
 0x20d   : > { %s3711_s20 = sld [smem:[#allocation15_spill]] }
 0x211   : > { %p32_p5 = scmp.ge.s32.totalorder %s3709_s21, 4  }
 0x212   : > { %s3713_s19 = smov %s3710_s26 }
 0x213   :  { %34 = sbr.rel (!%p32_p5) target bundleno = 11 (0xb), region = 177 }
 0x218   :  { %2030 = vsyncpa [#allocation3], 1 }
 0x219   :  { %2032 = vsyncpa [#allocation3 + $0x1], 1 }
 0x21a   :  { %2033 = vsyncpa [#allocation5], 1 }
 0x21b   :  { %2035 = vsyncpa [#allocation5 + $0x1], 1 }
 0x21c   :  { %2036 = vsyncpa [#allocation8], 1 }
 0x21d   :  { %2038 = vsyncpa [#allocation8 + $0x1], 1 }

// kernel: _forward_impl.17
= control target key start
LH: loop header
LB: loop body
LE: loop exit
PB: predicated region body
PF: predicated region fallthrough
CT: control target
= control target key end

     0   :  { %s3444_s24 = smov 0   ;;  %s4978_s0 = inlined_call_operand.vmem [shape: bf16[2,256,128], index: 0, kind: input, shape index: {}]   ;;  %s4979_s1 = inlined_call_operand.vmem [shape: bf16[2,64,128], index: 1, kind: input, shape index: {}]   ;;  %s4980_s2 = inlined_call_operand.vmem [shape: bf16[2,256,128], index: 2, kind: input, shape index: {}]   ;;  %s4981_s3 = inlined_call_operand.vmem [shape: f32[2,1,128], index: 3, kind: input, shape index: {}]   ;;  %s4982_s4 = inlined_call_operand.vmem [shape: f32[2,1,128], index: 4, kind: input, shape index: {}]   ;;  %s4983_s5 = inlined_call_operand.vmem [shape: f32[2,1,128], index: 5, kind: input, shape index: {}]   ;;  %s4984_s6 = inlined_call_operand.vmem [shape: f32[2,1,128], index: 6, kind: input, shape index: {}]   ;;  %s4985_s7 = inlined_call_operand.vmem [shape: bf16[128,256], index: 7, kind: input, shape index: {}]   ;;  %s4986_s8 = inlined_call_operand.vmem [shape: bf16[128,128], index: 8, kind: input, shape index: {}]   ;;  %s4987_s9 = inlined_call_operand.vmem [shape: f32[1,128], index: 9, kind: input, shape index: {}]   ;;  %s4988_s10 = inlined_call_operand.vmem [shape: bf16[128,128], index: 10, kind: input, shape index: {}]   ;;  %s4989_s11 = inlined_call_operand.vmem [shape: f32[1,128], index: 11, kind: input, shape index: {}]   ;;  %s4990_s12 = inlined_call_operand.vmem [shape: bf16[128,128], index: 12, kind: input, shape index: {}]   ;;  %s4991_s13 = inlined_call_operand.vmem [shape: bf16[128,128], index: 13, kind: input, shape index: {}]   ;;  %s4992_s14 = inlined_call_operand.vmem [shape: f32[1,128], index: 14, kind: input, shape index: {}]   ;;  %s4993_s15 = inlined_call_operand.vmem [shape: bf16[64,256], index: 15, kind: input, shape index: {}]   ;;  %s4994_s16 = inlined_call_operand.vmem [shape: f32[2,256,128], index: 16, kind: output, shape index: {0}]   ;;  %s4995_s17 = inlined_call_operand.vmem [shape: f32[2,64,128], index: 17, kind: output, shape index: {1}]  }
   0x1   :  { %4996 = sst [smem:[#allocation2_spill]] %s4978_s0 }
   0x2   :  { %4997 = sst [smem:[#allocation3_spill]] %s4979_s1 }
   0x3 LB: > { %s2838_s25 = sadd.s32 4294967295, %s3350_s24   ;;  %p2842_p0 = scmp.ge.s32.totalorder %s3350_s24, 1  ;;  %s3350_s24 = sphi %s3444_s24, %s28_s24  }
   0x4   : > { %p542_p1 = scmp.lt.s32.totalorder %s3350_s24, 3 }
   0x6   : > { %p543_p2 = pnand %p2842_p0, %p542_p1 }
   0x7   : > { %p621_p3 = scmp.lt.s32.totalorder (!%p543_p2), %s2838_s25, 1  ;;  %s4998_s20 = sld [smem:[#allocation2_spill]] (!%p543_p2) }
   0x8   : > { %546 = sbr.rel (%p543_p2) target bundleno = 1062 (0x426), region = 84  ;;  %s4999_s22 = sld [smem:[#allocation3_spill]] (!%p543_p2) }
   0xd   : > { %v3098_v0 = vld [vmem:[%s4985_s7 + $0x74] sm:$0xf]  ;;  %v2913_v1 = vld [vmem:[%s4985_s7 + $0x78] sm:$0xf0]  ;;  %v3096_v2 = vld [vmem:[%s4985_s7 + $0x64] sm:$0xf] }
   0xe   : > { %v2916_v3 = vor.u32 %v3098_v0, %v2913_v1  ;;  %v2905_v4 = vld [vmem:[%s4985_s7 + $0x68] sm:$0xf0]  ;;  %v3094_v6 = vld [vmem:[%s4985_s7 + $0x54] sm:$0xf]  ;;  %v2897_v7 = vld [vmem:[%s4985_s7 + $0x58] sm:$0xf0] }
   0xf   : > { %v2908_v5 = vor.u32 %v3096_v2, %v2905_v4  ;;  %v2900_v8 = vor.u32 %v3094_v6, %v2897_v7  ;;  %s5005_s25 = smov (!%p621_p3, %s2838_s25), 1  ;;  %v3092_v9 = vld [vmem:[%s4985_s7 + $0x44] sm:$0xf]  ;;  %v2889_v10 = vld [vmem:[%s4985_s7 + $0x48] sm:$0xf0] }
  0x10   : > { %1723 = vmatpush.bf16.msra.mxu1 %v2916_v3  ;;  %s3079_s29 = sshll.u32 %s5005_s25, 7  ;;  %s638_s18 = scalar_lea.vmem %s4981_s3, %s5005_s25  ;;  %v2892_v11 = vor.u32 %v3092_v9, %v2889_v10  ;;  %v3090_v12 = vld [vmem:[%s4985_s7 + $0x34] sm:$0xf]  ;;  %v2881_v13 = vld [vmem:[%s4985_s7 + $0x38] sm:$0xf0] }
  0x11   : > { %s3488_s21 = scalar_lea.vmem %s4998_s20, %s3079_s29  ;;  %v2884_v15 = vor.u32 %v3090_v12, %v2881_v13  ;;  %s641_s30 = scalar_lea.vmem %s4982_s4, %s5005_s25  ;;  %v3088_v17 = vld [vmem:[%s4985_s7 + $0x24] sm:$0xf]  ;;  %v2873_v18 = vld [vmem:[%s4985_s7 + $0x28] sm:$0xf0]  ;;  %v3086_v24 = vld [vmem:[%s4985_s7 + $0x14] sm:$0xf] }
  0x12   : > { %v3497_v14 = vld [vmem:[%s3488_s21] sm:$0xff]   ;;  %v3504_v16 = vld [vmem:[%s3488_s21 + $0x8] sm:$0xff]   ;;  %v2876_v22 = vor.u32 %v3088_v17, %v2873_v18  ;;  %v3516_v23 = vld [vmem:[%s3488_s21 + $0x10] sm:$0xff]   ;;  %s3935_s27 = scalar_lea.vmem %s4984_s6, %s5005_s25  ;;  %s3941_s19 = scalar_lea.vmem %s4983_s5, %s5005_s25 }
  0x13   : > { %v3142_v19 = vunpack.c.l.bf16 %v3497_v14  ;;  %v3143_v20 = vunpack.c.h.bf16 %v3497_v14  ;;  %v3146_v21 = vunpack.c.l.bf16 %v3504_v16  ;;  %v2865_v25 = vld [vmem:[%s4985_s7 + $0x18] sm:$0xf0]  ;;  %v3147_v26 = vunpack.c.h.bf16 %v3504_v16  ;;  %v3084_v32 = vld [vmem:[%s4985_s7 + $0x4] sm:$0xf]  ;;  %v2857_v33 = vld [vmem:[%s4985_s7 + $0x8] sm:$0xf0]  ;;  %s4092_s26 = scalar_lea.vmem %s4980_s2, %s3079_s29 }
  0x14   : > { %1724 = vmatpush.bf16.msra.mxu1 %v2908_v5  ;;  %v3150_v28 = vunpack.c.l.bf16 %v3516_v23  ;;  %v2868_v30 = vor.u32 %v3086_v24, %v2865_v25  ;;  %v3533_v31 = vld [vmem:[%s3488_s21 + $0x18] sm:$0xff]   ;;  %v3151_v34 = vunpack.c.h.bf16 %v3516_v23  ;;  %v2860_v38 = vor.u32 %v3084_v32, %v2857_v33  ;;  %v3548_v39 = vld [vmem:[%s3488_s21 + $0x20] sm:$0xff]   ;;  %v3557_v44 = vld [vmem:[%s3488_s21 + $0x28] sm:$0xff]   ;;  %s3080_s1 = sshll.u32 %s5005_s25, 5 }
  0x15   : > { %v802_v27 = vadd.f32 %v3143_v20, %v3142_v19  ;;  %v3154_v36 = vunpack.c.l.bf16 %v3533_v31  ;;  %v3155_v40 = vunpack.c.h.bf16 %v3533_v31  ;;  %v3158_v42 = vunpack.c.l.bf16 %v3548_v39  ;;  %v3566_v49 = vld [vmem:[%s3488_s21 + $0x30] sm:$0xff]   ;;  %v3575_v54 = vld [vmem:[%s3488_s21 + $0x38] sm:$0xff]   ;;  %v3584_v59 = vld [vmem:[%s3488_s21 + $0x40] sm:$0xff]   ;;  %s630_s23 = scalar_lea.vmem %s4999_s22, %s3080_s1 }
  0x16   : > { %v3159_v45 = vunpack.c.h.bf16 %v3548_v39  ;;  %v3162_v47 = vunpack.c.l.bf16 %v3557_v44  ;;  %v3163_v50 = vunpack.c.h.bf16 %v3557_v44  ;;  %v3166_v52 = vunpack.c.l.bf16 %v3566_v49  ;;  %v3593_v0 = vld [vmem:[%s3488_s21 + $0x48] sm:$0xff]   ;;  %v3602_v5 = vld [vmem:[%s3488_s21 + $0x50] sm:$0xff]   ;;  %v3611_v10 = vld [vmem:[%s3488_s21 + $0x58] sm:$0xff]  }
  0x17   : > { %v803_v29 = vadd.f32 %v3146_v21, %v802_v27  ;;  %v3167_v55 = vunpack.c.h.bf16 %v3566_v49  ;;  %v3170_v57 = vunpack.c.l.bf16 %v3575_v54  ;;  %v3171_v60 = vunpack.c.h.bf16 %v3575_v54  ;;  %v3620_v17 = vld [vmem:[%s3488_s21 + $0x60] sm:$0xff]   ;;  %v3629_v27 = vld [vmem:[%s3488_s21 + $0x68] sm:$0xff]  }
  0x18   : > { %1725 = vmatpush.bf16.msra.mxu1 %v2900_v8  ;;  %v3174_v62 = vunpack.c.l.bf16 %v3584_v59  ;;  %v3175_v1 = vunpack.c.h.bf16 %v3584_v59  ;;  %v3178_v3 = vunpack.c.l.bf16 %v3593_v0  ;;  %v3179_v6 = vunpack.c.h.bf16 %v3593_v0 }
  0x19   : > { %v804_v35 = vadd.f32 %v3147_v26, %v803_v29  ;;  %v3182_v8 = vunpack.c.l.bf16 %v3602_v5  ;;  %v3186_v13 = vunpack.c.l.bf16 %v3611_v10  ;;  %v3187_v18 = vunpack.c.h.bf16 %v3611_v10 }
  0x1a   : > { %v3190_v24 = vunpack.c.l.bf16 %v3620_v17  ;;  %v3191_v29 = vunpack.c.h.bf16 %v3620_v17  ;;  %v3194_v32 = vunpack.c.l.bf16 %v3629_v27 }
  0x1b   : > { %v805_v37 = vadd.f32 %v3150_v28, %v804_v35  ;;  %v3638_v35 = vld [vmem:[%s3488_s21 + $0x70] sm:$0xff]  }
  0x1c   : > { %1726 = vmatpush.bf16.msra.mxu1 %v2892_v11  ;;  %v3183_v11 = vunpack.c.h.bf16 %v3602_v5 }
  0x1d   : > { %v806_v41 = vadd.f32 %v3151_v34, %v805_v37  ;;  %v3195_v37 = vunpack.c.h.bf16 %v3629_v27 }
  0x1f   : > { %v807_v43 = vadd.f32 %v3154_v36, %v806_v41  ;;  %v3198_v41 = vunpack.c.l.bf16 %v3638_v35 }
  0x20   : > { %1727 = vmatpush.bf16.msra.mxu1 %v2884_v15 }
  0x21   : > { %v808_v46 = vadd.f32 %v3155_v40, %v807_v43 }
  0x23   : > { %v809_v48 = vadd.f32 %v3158_v42, %v808_v46  ;;  %v3647_v46 = vld [vmem:[%s3488_s21 + $0x78] sm:$0xff]   ;;  %s3082_s21 = sshll.u32 %s5005_s25, 8 }
  0x24   : > { %1728 = vmatpush.bf16.msra.mxu1 %v2876_v22 }
  0x25   : > { %v810_v51 = vadd.f32 %v3159_v45, %v809_v48  ;;  %v3199_v48 = vunpack.c.h.bf16 %v3638_v35 }
  0x27   : > { %v811_v53 = vadd.f32 %v3162_v47, %v810_v51 }
  0x28   : > { %1729 = vmatpush.bf16.msra.mxu1 %v2868_v30 }
  0x29   : > { %v812_v56 = vadd.f32 %v3163_v50, %v811_v53  ;;  %v3352_v53 = vmov 256.0  }
  0x2a   : > { %3334 = vrcp.f32 %v3352_v53 }
  0x2b   : > { %v813_v58 = vadd.f32 %v3166_v52, %v812_v56  ;;  %v3202_v56 = vunpack.c.l.bf16 %v3647_v46 }
  0x2c   : > { %1730 = vmatpush.bf16.msra.mxu1 %v2860_v38 }
  0x2d   : > { %v814_v61 = vadd.f32 %v3167_v55, %v813_v58 }
  0x2f   : > { %v815_v63 = vadd.f32 %v3170_v57, %v814_v61  ;;  %v3203_v61 = vunpack.c.h.bf16 %v3647_v46 }
  0x31   : > { %v816_v2 = vadd.f32 %v3171_v60, %v815_v63 }
  0x33   : > { %v817_v4 = vadd.f32 %v3174_v62, %v816_v2  ;;  %v3335_v2 = vpop.eup %3334 }
  0x34   : > { %vm844_vm0 = vweird.f32 %v3335_v2 }
  0x35   : > { %v818_v7 = vadd.f32 %v3175_v1, %v817_v4 }
  0x37   : > { %v819_v9 = vadd.f32 %v3178_v3, %v818_v7 }
  0x39   : > { %v820_v12 = vadd.f32 %v3179_v6, %v819_v9  ;;  %v840_v9 = vmul.f32 256.0, %v3335_v2 }
  0x3b   : > { %v821_v15 = vadd.f32 %v3182_v8, %v820_v12 }
  0x3d   : > { %v822_v22 = vadd.f32 %v3183_v11, %v821_v15 }
  0x3f   : > { %v823_v25 = vadd.f32 %v3186_v13, %v822_v22  ;;  %v841_v22 = vsub.f32 1.0, %v840_v9 }
  0x41   : > { %v824_v30 = vadd.f32 %v3187_v18, %v823_v25 }
  0x43   : > { %v825_v33 = vadd.f32 %v3190_v24, %v824_v30 }
  0x45   : > { %v826_v38 = vadd.f32 %v3191_v29, %v825_v33  ;;  %v842_v33 = vmul.f32 %v3335_v2, %v841_v22 }
  0x47   : > { %v827_v43 = vadd.f32 %v3194_v32, %v826_v38 }
  0x49   : > { %v828_v51 = vadd.f32 %v3195_v37, %v827_v43  ;;  %v843_v43 = vadd.f32 %v3335_v2, %v842_v33 }
  0x4b   : > { %v829_v58 = vadd.f32 %v3198_v41, %v828_v51  ;;  %v3662_v53 = vsel %vm844_vm0, %v3335_v2, %v843_v43 }
  0x4d   : > { %v830_v63 = vadd.f32 %v3199_v48, %v829_v58 }
  0x4f   : > { %v831_v4 = vadd.f32 %v3202_v56, %v830_v63 }
  0x51   : > { %v832_v7 = vadd.f32 %v3203_v61, %v831_v4 }
  0x53   : > { %v833_v12 = vrot.slane %v832_v7, 4 }
  0x55   : > { %v834_v15 = vadd.f32 %v833_v12, %v832_v7 }
  0x57   : > { %v835_v25 = vrot.slane %v834_v15, 2 }
  0x59   : > { %v836_v30 = vadd.f32 %v835_v25, %v834_v15 }
  0x5b   : > { %v837_v38 = vrot.slane %v836_v30, 1 }
  0x5d   : > { %v838_v51 = vadd.f32 %v837_v38, %v836_v30 }
  0x5f   : > { %v3665_v58 = vmul.f32 %v3662_v53, %v838_v51 }
  0x61   : > { %v3670_v63 = vsub.f32 %v3142_v19, %v3665_v58  ;;  %v3675_v4 = vsub.f32 %v3143_v20, %v3665_v58  ;;  %v3680_v7 = vsub.f32 %v3146_v21, %v3665_v58  ;;  %v3685_v2 = vsub.f32 %v3147_v26, %v3665_v58 }
  0x62   : > { %v3694_v14 = vsub.f32 %v3150_v28, %v3665_v58  ;;  %v3701_v16 = vsub.f32 %v3151_v34, %v3665_v58  ;;  %v3708_v12 = vsub.f32 %v3154_v36, %v3665_v58  ;;  %v3715_v22 = vsub.f32 %v3155_v40, %v3665_v58 }
  0x63   : > { %v879_v9 = vmul.f32 %v3670_v63, %v3670_v63  ;;  %v880_v19 = vmul.f32 %v3675_v4, %v3675_v4  ;;  %v881_v20 = vmul.f32 %v3680_v7, %v3680_v7  ;;  %v882_v21 = vmul.f32 %v3685_v2, %v3685_v2 }
  0x64   : > { %v883_v28 = vmul.f32 %v3694_v14, %v3694_v14  ;;  %v884_v23 = vmul.f32 %v3701_v16, %v3701_v16  ;;  %v3722_v25 = vsub.f32 %v3158_v42, %v3665_v58  ;;  %v885_v36 = vmul.f32 %v3708_v12, %v3708_v12 }
  0x65   : > { %v911_v26 = vadd.f32 %v880_v19, %v879_v9  ;;  %v3729_v33 = vsub.f32 %v3159_v45, %v3665_v58  ;;  %v886_v31 = vmul.f32 %v3715_v22, %v3715_v22  ;;  %v3736_v38 = vsub.f32 %v3162_v47, %v3665_v58 }
  0x66   : > { %v887_v42 = vmul.f32 %v3722_v25, %v3722_v25  ;;  %v3743_v51 = vsub.f32 %v3163_v50, %v3665_v58  ;;  %v3750_v9 = vsub.f32 %v3166_v52, %v3665_v58 }
  0x67   : > { %v912_v15 = vadd.f32 %v911_v26, %v881_v20  ;;  %v888_v39 = vmul.f32 %v3729_v33, %v3729_v33  ;;  %v889_v47 = vmul.f32 %v3736_v38, %v3736_v38  ;;  %v3757_v20 = vsub.f32 %v3167_v55, %v3665_v58 }
  0x68   : > { %v890_v44 = vmul.f32 %v3743_v51, %v3743_v51  ;;  %v891_v52 = vmul.f32 %v3750_v9, %v3750_v9 }
  0x69   : > { %v913_v34 = vadd.f32 %v912_v15, %v882_v21  ;;  %v3764_v21 = vsub.f32 %v3170_v57, %v3665_v58  ;;  %v892_v49 = vmul.f32 %v3757_v20, %v3757_v20  ;;  %v3778_v15 = vsub.f32 %v3174_v62, %v3665_v58 }
  0x6b   : > { %v914_v30 = vadd.f32 %v913_v34, %v883_v28  ;;  %v3771_v28 = vsub.f32 %v3171_v60, %v3665_v58  ;;  %v893_v57 = vmul.f32 %v3764_v21, %v3764_v21  ;;  %v3785_v34 = vsub.f32 %v3175_v1, %v3665_v58 }
  0x6c   : > { %v895_v62 = vmul.f32 %v3778_v15, %v3778_v15 }
  0x6d   : > { %v915_v40 = vadd.f32 %v914_v30, %v884_v23  ;;  %v894_v54 = vmul.f32 %v3771_v28, %v3771_v28  ;;  %v896_v59 = vmul.f32 %v3785_v34, %v3785_v34 }
  0x6f   : > { %v916_v43 = vadd.f32 %v915_v40, %v885_v36  ;;  %v3792_v36 = vsub.f32 %v3178_v3, %v3665_v58  ;;  %v3806_v40 = vsub.f32 %v3182_v8, %v3665_v58 }
  0x71   : > { %v917_v45 = vadd.f32 %v916_v43, %v886_v31  ;;  %v3799_v31 = vsub.f32 %v3179_v6, %v3665_v58  ;;  %v897_v3 = vmul.f32 %v3792_v36, %v3792_v36  ;;  %v3813_v43 = vsub.f32 %v3183_v11, %v3665_v58 }
  0x72   : > { %v899_v8 = vmul.f32 %v3806_v40, %v3806_v40 }
  0x73   : > { %v918_v19 = vadd.f32 %v917_v45, %v887_v42  ;;  %v898_v0 = vmul.f32 %v3799_v31, %v3799_v31  ;;  %v900_v5 = vmul.f32 %v3813_v43, %v3813_v43 }
  0x75   : > { %v919_v50 = vadd.f32 %v918_v19, %v888_v39  ;;  %v3820_v39 = vsub.f32 %v3186_v13, %v3665_v58  ;;  %v3834_v19 = vsub.f32 %v3190_v24, %v3665_v58 }
  0x77   : > { %v920_v26 = vadd.f32 %v919_v50, %v889_v47  ;;  %v3827_v47 = vsub.f32 %v3187_v18, %v3665_v58  ;;  %v901_v13 = vmul.f32 %v3820_v39, %v3820_v39  ;;  %v3841_v50 = vsub.f32 %v3191_v29, %v3665_v58 }
  0x78   : > { %v903_v24 = vmul.f32 %v3834_v19, %v3834_v19 }
  0x79   : > { %v921_v55 = vadd.f32 %v920_v26, %v890_v44  ;;  %v902_v10 = vmul.f32 %v3827_v47, %v3827_v47  ;;  %v904_v17 = vmul.f32 %v3841_v50, %v3841_v50 }
  0x7b   : > { %v922_v23 = vadd.f32 %v921_v55, %v891_v52  ;;  %v3848_v52 = vsub.f32 %v3194_v32, %v3665_v58  ;;  %v3862_v55 = vsub.f32 %v3198_v41, %v3665_v58 }
  0x7d   : > { %v923_v60 = vadd.f32 %v922_v23, %v892_v49  ;;  %v3855_v49 = vsub.f32 %v3195_v37, %v3665_v58  ;;  %v905_v32 = vmul.f32 %v3848_v52, %v3848_v52  ;;  %v3869_v23 = vsub.f32 %v3199_v48, %v3665_v58 }
  0x7e   : > { %v907_v41 = vmul.f32 %v3862_v55, %v3862_v55 }
  0x7f   : > { %v924_v30 = vadd.f32 %v923_v60, %v893_v57  ;;  %v906_v27 = vmul.f32 %v3855_v49, %v3855_v49  ;;  %v908_v35 = vmul.f32 %v3869_v23, %v3869_v23 }
  0x81   : > { %v925_v1 = vadd.f32 %v924_v30, %v894_v54  ;;  %v3876_v54 = vsub.f32 %v3202_v56, %v3665_v58 }
  0x83   : > { %v926_v42 = vadd.f32 %v925_v1, %v895_v62  ;;  %v3883_v62 = vsub.f32 %v3203_v61, %v3665_v58  ;;  %v909_v30 = vmul.f32 %v3876_v54, %v3876_v54 }
  0x85   : > { %v927_v6 = vadd.f32 %v926_v42, %v896_v59  ;;  %v910_v56 = vmul.f32 %v3883_v62, %v3883_v62 }
  0x87   : > { %v928_v45 = vadd.f32 %v927_v6, %v897_v3 }
  0x89   : > { %v929_v11 = vadd.f32 %v928_v45, %v898_v0 }
  0x8b   : > { %v930_v44 = vadd.f32 %v929_v11, %v899_v8 }
  0x8d   : > { %v931_v18 = vadd.f32 %v930_v44, %v900_v5 }
  0x8f   : > { %v932_v26 = vadd.f32 %v931_v18, %v901_v13 }
  0x91   : > { %v933_v29 = vadd.f32 %v932_v26, %v902_v10  ;;  %v3897_v26 = vld [vmem:[%s641_s30] ss:$0 sm:$0xff] }
  0x93   : > { %v934_v57 = vadd.f32 %v933_v29, %v903_v24 }
  0x95   : > { %v935_v37 = vadd.f32 %v934_v57, %v904_v17 }
  0x97   : > { %v936_v60 = vadd.f32 %v935_v37, %v905_v32  ;;  %v3910_v32 = vld [vmem:[%s638_s18] ss:$0 sm:$0xff]  ;;  %s3083_s18 = sshll.u32 %s5005_s25, 6 }
  0x98   : > { %s4915_s0 = scalar_lea.vmem %s4995_s17, %s3083_s18 }
  0x99   : > { %v937_v48 = vadd.f32 %v936_v60, %v906_v27 }
  0x9b   : > { %v938_v59 = vadd.f32 %v937_v48, %v907_v41 }
  0x9d   : > { %v939_v1 = vadd.f32 %v938_v59, %v908_v35 }
  0x9f   : > { %v940_v3 = vadd.f32 %v939_v1, %v909_v30 }
  0xa1   : > { %v941_v42 = vadd.f32 %v940_v3, %v910_v56 }
  0xa3   : > { %v942_v0 = vrot.slane %v941_v42, 4 }
  0xa5   : > { %v943_v6 = vadd.f32 %v942_v0, %v941_v42 }
  0xa7   : > { %v944_v8 = vrot.slane %v943_v6, 2 }
  0xa9   : > { %v945_v46 = vadd.f32 %v944_v8, %v943_v6 }
  0xab   : > { %v946_v61 = vrot.slane %v945_v46, 1 }
  0xad   : > { %v947_v58 = vadd.f32 %v946_v61, %v945_v46 }
  0xaf   : > { %v948_v45 = vmul.f32 %v947_v58, %v3662_v53 }
  0xb1   : > { %v949_v5 = vadd.f32 1e-05, %v948_v45 }
  0xb3   : > { %3336 = vrsqrt.f32 %v949_v5  ;;  %vm956_vm1 = vweird.f32 %v949_v5 }
  0xb9   : > { %v3337_v11 = vpop.eup %3336 }
  0xba   : > { %v951_v13 = vmul.f32 %v3337_v11, %v949_v5  ;;  %vm957_vm2 = vweird.f32 %v3337_v11 }
  0xbb   : > { %vm958_vm3 = vmor %vm956_vm1, %vm957_vm2 }
  0xbc   : > { %v952_v44 = vmul.f32 %v3337_v11, %v951_v13  ;;  %v3954_v13 = vld [vmem:[%s630_s23] sm:$0xff]  }
  0xbe   : > { %v953_v10 = vmul.f32 0.5, %v952_v44  ;;  %v3206_v44 = vunpack.c.l.bf16 %v3954_v13 }
  0xc0   : > { %v954_v18 = vsub.f32 1.5, %v953_v10  ;;  %v3207_v10 = vunpack.c.h.bf16 %v3954_v13 }
  0xc2   : > { %v955_v24 = vmul.f32 %v3337_v11, %v954_v18 }
  0xc4   : > { %v3899_v17 = vsel %vm958_vm3, %v3337_v11, %v955_v24 }
  0xc5   : > { %v1022_v53 = vmul.f32 %v3899_v17, %v3670_v63  ;;  %v1023_v29 = vmul.f32 %v3899_v17, %v3675_v4  ;;  %v1024_v63 = vmul.f32 %v3899_v17, %v3680_v7  ;;  %v1025_v4 = vmul.f32 %v3899_v17, %v3685_v2 }
  0xc6   : > { %v1026_v8 = vmul.f32 %v3899_v17, %v3694_v14  ;;  %v1027_v46 = vmul.f32 %v3899_v17, %v3701_v16 }
  0xc7   : > { %v1058_v57 = vmul.f32 %v3897_v26, %v1022_v53  ;;  %v1059_v27 = vmul.f32 %v3897_v26, %v1023_v29  ;;  %v1060_v59 = vmul.f32 %v3897_v26, %v1024_v63  ;;  %v1061_v56 = vmul.f32 %v3897_v26, %v1025_v4 }
  0xc8   : > { %v1062_v58 = vmul.f32 %v3897_v26, %v1026_v8  ;;  %v1063_v45 = vmul.f32 %v3897_v26, %v1027_v46  ;;  %v1028_v53 = vmul.f32 %v3899_v17, %v3708_v12  ;;  %v1029_v29 = vmul.f32 %v3899_v17, %v3715_v22 }
  0xc9   : > { %v1094_v37 = vadd.f32 %v3910_v32, %v1058_v57  ;;  %v1095_v41 = vadd.f32 %v3910_v32, %v1059_v27  ;;  %v1096_v7 = vadd.f32 %v3910_v32, %v1060_v59  ;;  %v1097_v2 = vadd.f32 %v3910_v32, %v1061_v56  ;;  %v3962_v57 = vld [vmem:[%s630_s23 + $0x8] sm:$0xff]  }
  0xca   : > { %v1098_v14 = vadd.f32 %v3910_v32, %v1062_v58  ;;  %v1099_v16 = vadd.f32 %v3910_v32, %v1063_v45  ;;  %v3210_v27 = vunpack.c.l.bf16 %v3962_v57  ;;  %v3211_v63 = vunpack.c.h.bf16 %v3962_v57 }
  0xcb   : > { %vm1126_vm4 = vcmp.ge.f32.partialorder %v1094_v37, 0.0  ;;  %vm1127_vm5 = vcmp.ge.f32.partialorder %v1095_v41, 0.0  ;;  %v1158_v60 = vmul.f32 0.2, %v1094_v37  ;;  %v1159_v35 = vmul.f32 0.2, %v1095_v41 }
  0xcc   : > { %v1160_v3 = vmul.f32 0.2, %v1096_v7  ;;  %v1161_v42 = vmul.f32 0.2, %v1097_v2  ;;  %vm1128_vm6 = vcmp.ge.f32.partialorder %v1096_v7, 0.0  ;;  %vm1129_vm7 = vcmp.ge.f32.partialorder %v1097_v2, 0.0 }
  0xcd   : > { %v1190_v48 = vsel %vm1126_vm4, %v1094_v37, %v1158_v60  ;;  %v1191_v30 = vsel %vm1127_vm5, %v1095_v41, %v1159_v35  ;;  %v1162_v5 = vmul.f32 0.2, %v1098_v14  ;;  %v1163_v11 = vmul.f32 0.2, %v1099_v16 }
  0xce   : > { %v3922_v1 = vpack.c.bf16 %v1191_v30, %v1190_v48  ;;  %v1192_v0 = vsel %vm1128_vm6, %v1096_v7, %v1160_v3  ;;  %v1193_v6 = vsel %vm1129_vm7, %v1097_v2, %v1161_v42  ;;  %vm1130_vm8 = vcmp.ge.f32.partialorder %v1098_v14, 0.0  ;;  %v3970_v48 = vld [vmem:[%s630_s23 + $0x10] sm:$0xff]   ;;  %v3977_v2 = vld [vmem:[%s630_s23 + $0x18] sm:$0xff]   ;;  %s4868_s23 = scalar_lea.vmem %s4994_s16, %s3082_s21 }
  0xcf   : > { %v3943_v61 = vpack.c.bf16 %v1193_v6, %v1192_v0  ;;  %vm1131_vm9 = vcmp.ge.f32.partialorder %v1099_v16, 0.0  ;;  %v1194_v18 = vsel %vm1130_vm8, %v1098_v14, %v1162_v5  ;;  %v960_v37 = vadd.f32 %v3207_v10, %v3206_v44 }
  0xd0   : > { %1731 = vmatmul.bf16.vlgmr.msra.gmra.mxu1 %v3922_v1  ;;  %v1195_v24 = vsel %vm1131_vm9, %v1099_v16, %v1163_v11  ;;  %v1064_v60 = vmul.f32 %v3897_v26, %v1028_v53  ;;  %v1065_v35 = vmul.f32 %v3897_v26, %v1029_v29  ;;  %v3214_v12 = vunpack.c.l.bf16 %v3970_v48 }
  0xd1   : > { %v3965_v41 = vpack.c.bf16 %v1195_v24, %v1194_v18  ;;  %v961_v4 = vadd.f32 %v3210_v27, %v960_v37  ;;  %v3215_v22 = vunpack.c.h.bf16 %v3970_v48  ;;  %v3218_v3 = vunpack.c.l.bf16 %v3977_v2 }
  0xd2   : > { %v1100_v56 = vadd.f32 %v3910_v32, %v1064_v60  ;;  %v1101_v7 = vadd.f32 %v3910_v32, %v1065_v35  ;;  %v3219_v0 = vunpack.c.h.bf16 %v3977_v2  ;;  %v3353_v58 = vmov 64.0  }
  0xd3   : > { %v962_v30 = vadd.f32 %v3211_v63, %v961_v4  ;;  %3338 = vrcp.f32 %v3353_v58  ;;  %v1030_v14 = vmul.f32 %v3899_v17, %v3722_v25  ;;  %v1031_v16 = vmul.f32 %v3899_v17, %v3729_v33 }
  0xd4   : > { %v1164_v8 = vmul.f32 0.2, %v1100_v56  ;;  %v1165_v46 = vmul.f32 0.2, %v1101_v7  ;;  %vm1132_vm10 = vcmp.ge.f32.partialorder %v1100_v56, 0.0  ;;  %vm1133_vm11 = vcmp.ge.f32.partialorder %v1101_v7, 0.0 }
  0xd5   : > { %v963_v59 = vadd.f32 %v3214_v12, %v962_v30  ;;  %v1066_v29 = vmul.f32 %v3897_v26, %v1030_v14  ;;  %v1067_v57 = vmul.f32 %v3897_v26, %v1031_v16 }
  0xd6   : > { %v1196_v5 = vsel %vm1132_vm10, %v1100_v56, %v1164_v8  ;;  %v1197_v11 = vsel %vm1133_vm11, %v1101_v7, %v1165_v46 }
  0xd7   : > { %v964_v42 = vadd.f32 %v3215_v22, %v963_v59  ;;  %v3987_v53 = vpack.c.bf16 %v1197_v11, %v1196_v5  ;;  %v1102_v25 = vadd.f32 %v3910_v32, %v1066_v29  ;;  %v1103_v33 = vadd.f32 %v3910_v32, %v1067_v57 }
  0xd8   : > { %v1032_v5 = vmul.f32 %v3899_v17, %v3736_v38  ;;  %v1033_v11 = vmul.f32 %v3899_v17, %v3743_v51 }
  0xd9   : > { %v965_v6 = vadd.f32 %v3218_v3, %v964_v42  ;;  %v3339_v18 = vpop.eup %3338  ;;  %v1166_v7 = vmul.f32 0.2, %v1102_v25  ;;  %v1167_v42 = vmul.f32 0.2, %v1103_v33  ;;  %vm1134_vm13 = vcmp.ge.f32.partialorder %v1102_v25, 0.0 }
  0xda   : > { %v974_v37 = vmul.f32 64.0, %v3339_v18  ;;  %vm978_vm12 = vweird.f32 %v3339_v18  ;;  %vm1135_vm14 = vcmp.ge.f32.partialorder %v1103_v33, 0.0  ;;  %v1068_v29 = vmul.f32 %v3897_v26, %v1032_v5 }
  0xdb   : > { %v966_v45 = vadd.f32 %v3219_v0, %v965_v6  ;;  %v1199_v14 = vsel %vm1135_vm14, %v1103_v33, %v1167_v42  ;;  %v1069_v57 = vmul.f32 %v3897_v26, %v1033_v11 }
  0xdc   : > { %v975_v60 = vsub.f32 1.0, %v974_v37 }
  0xdd   : > { %v967_v13 = vrot.slane %v966_v45, 4  ;;  %v1105_v33 = vadd.f32 %v3910_v32, %v1069_v57 }
  0xde   : > { %v976_v48 = vmul.f32 %v3339_v18, %v975_v60 }
  0xdf   : > { %v968_v24 = vadd.f32 %v967_v13, %v966_v45  ;;  %v1198_v45 = vsel %vm1134_vm13, %v1102_v25, %v1166_v7  ;;  %v1104_v25 = vadd.f32 %v3910_v32, %v1068_v29  ;;  %v1169_v7 = vmul.f32 0.2, %v1105_v33 }
  0xe0   : > { %1736 = vmatmul.bf16.gmra.mxu1 %v3943_v61  ;;  %v977_v59 = vadd.f32 %v3339_v18, %v976_v48  ;;  %vm1137_vm0 = vcmp.ge.f32.partialorder %v1105_v33, 0.0 }
  0xe1   : > { %v969_v4 = vrot.slane %v968_v24, 2  ;;  %vm1136_vm15 = vcmp.ge.f32.partialorder %v1104_v25, 0.0  ;;  %v1201_v2 = vsel %vm1137_vm0, %v1105_v33, %v1169_v7 }
  0xe2   : > { %v3994_v6 = vsel %vm978_vm12, %v3339_v18, %v977_v59 }
  0xe3   : > { %v970_v35 = vadd.f32 %v969_v4, %v968_v24  ;;  %v4021_v24 = vpack.c.bf16 %v1199_v14, %v1198_v45  ;;  %v1034_v14 = vmul.f32 %v3899_v17, %v3750_v9  ;;  %v3107_v9 = vld [vmem:[%s4986_s8 + $0x38] sm:$0xff] }
  0xe4   : > { %1876 = vmatpush.bf16.msra.mxu2 %v3107_v9 }
  0xe5   : > { %v971_v30 = vrot.slane %v970_v35, 1 }
  0xe7   : > { %v972_v56 = vadd.f32 %v971_v30, %v970_v35 }
  0xe9   : > { %v3997_v8 = vmul.f32 %v3994_v6, %v972_v56  ;;  %v1168_v56 = vmul.f32 0.2, %v1104_v25 }
  0xeb   : > { %v4000_v46 = vsub.f32 %v3206_v44, %v3997_v8  ;;  %v4003_v58 = vsub.f32 %v3207_v10, %v3997_v8  ;;  %v4006_v16 = vsub.f32 %v3210_v27, %v3997_v8  ;;  %v4017_v10 = vsub.f32 %v3211_v63, %v3997_v8 }
  0xec   : > { %v4024_v38 = vsub.f32 %v3214_v12, %v3997_v8  ;;  %v4031_v63 = vsub.f32 %v3215_v22, %v3997_v8  ;;  %v4037_v12 = vsub.f32 %v3218_v3, %v3997_v8  ;;  %v4046_v22 = vsub.f32 %v3219_v0, %v3997_v8 }
  0xed   : > { %v989_v13 = vmul.f32 %v4000_v46, %v4000_v46  ;;  %v990_v44 = vmul.f32 %v4003_v58, %v4003_v58  ;;  %v991_v18 = vmul.f32 %v4006_v16, %v4006_v16  ;;  %v992_v51 = vmul.f32 %v4017_v10, %v4017_v10 }
  0xee   : > { %v993_v4 = vmul.f32 %v4024_v38, %v4024_v38  ;;  %v994_v35 = vmul.f32 %v4031_v63, %v4031_v63  ;;  %v995_v30 = vmul.f32 %v4037_v12, %v4037_v12  ;;  %v996_v3 = vmul.f32 %v4046_v22, %v4046_v22 }
  0xef   : > { %v997_v27 = vadd.f32 %v990_v44, %v989_v13  ;;  %v1200_v5 = vsel %vm1136_vm15, %v1104_v25, %v1168_v56  ;;  %v1035_v0 = vmul.f32 %v3899_v17, %v3757_v20  ;;  %v1037_v56 = vmul.f32 %v3899_v17, %v3771_v28 }
  0xf0   : > { %1741 = vmatmul.bf16.gmra.mxu1 %v3965_v41  ;;  %v4056_v44 = vpack.c.bf16 %v1201_v2, %v1200_v5 }
  0xf1   : > { %v998_v37 = vadd.f32 %v997_v27, %v991_v18  ;;  %v1070_v18 = vmul.f32 %v3897_v26, %v1034_v14  ;;  %v1071_v27 = vmul.f32 %v3897_v26, %v1035_v0 }
  0xf3   : > { %v999_v60 = vadd.f32 %v998_v37, %v992_v51  ;;  %v1106_v57 = vadd.f32 %v3910_v32, %v1070_v18  ;;  %v1107_v20 = vadd.f32 %v3910_v32, %v1071_v27 }
  0xf5   : > { %v1000_v48 = vadd.f32 %v999_v60, %v993_v4  ;;  %v3106_v4 = vld [vmem:[%s4986_s8 + $0x30] sm:$0xff]  ;;  %vm1138_vm1 = vcmp.ge.f32.partialorder %v1106_v57, 0.0  ;;  %v1171_v25 = vmul.f32 0.2, %v1107_v20  ;;  %vm1139_vm2 = vcmp.ge.f32.partialorder %v1107_v20, 0.0 }
  0xf6   : > { %1877 = vmatpush.bf16.msra.mxu2 %v3106_v4  ;;  %v1039_v4 = vmul.f32 %v3899_v17, %v3785_v34 }
  0xf7   : > { %v1001_v59 = vadd.f32 %v1000_v48, %v994_v35  ;;  %v1170_v35 = vmul.f32 0.2, %v1106_v57 }
  0xf9   : > { %v1002_v42 = vadd.f32 %v1001_v59, %v995_v30  ;;  %v1202_v30 = vsel %vm1138_vm1, %v1106_v57, %v1170_v35  ;;  %v1203_v59 = vsel %vm1139_vm2, %v1107_v20, %v1171_v25 }
  0xfa   : > { %v4074_v7 = vpack.c.bf16 %v1203_v59, %v1202_v30 }
  0xfb   : > { %v1003_v45 = vadd.f32 %v1002_v42, %v996_v3  ;;  %v1036_v3 = vmul.f32 %v3899_v17, %v3764_v21  ;;  %v3105_v42 = vld [vmem:[%s4986_s8 + $0x28] sm:$0xff]  ;;  %v3104_v21 = vld [vmem:[%s4986_s8 + $0x20] sm:$0xff] }
  0xfc   : > { %1878 = vmatpush.bf16.msra.mxu2 %v3105_v42  ;;  %v1075_v42 = vmul.f32 %v3897_v26, %v1039_v4 }
  0xfd   : > { %v1004_v11 = vrot.slane %v1003_v45, 4 }
  0xff   : > { %v1005_v13 = vadd.f32 %v1004_v11, %v1003_v45  ;;  %v1073_v45 = vmul.f32 %v3897_v26, %v1037_v56  ;;  %v3103_v11 = vld [vmem:[%s4986_s8 + $0x18] sm:$0xff] }
 0x100   : > { %1746 = vmatmul.bf16.gmra.mxu1 %v3987_v53  ;;  %1879 = vmatpush.bf16.msra.mxu2 %v3104_v21 }
 0x101   : > { %v1006_v51 = vrot.slane %v1005_v13, 2  ;;  %v1109_v2 = vadd.f32 %v3910_v32, %v1073_v45  ;;  %v4123_v45 = vld [vmem:[%s3941_s19] ss:$0 sm:$0xff] }
 0x103   : > { %v1007_v29 = vadd.f32 %v1006_v51, %v1005_v13  ;;  %v1173_v27 = vmul.f32 0.2, %v1109_v2  ;;  %v3221_v51 = vld [vmem:[%s4092_s26] sm:$0xff]   ;;  %vm1141_vm4 = vcmp.ge.f32.partialorder %v1109_v2, 0.0 }
 0x104   : > { %1880 = vmatpush.bf16.msra.mxu2 %v3103_v11  ;;  %v3222_v57 = vunpack.c.l.bf16 %v3221_v51  ;;  %v3223_v9 = vunpack.c.h.bf16 %v3221_v51  ;;  %v3100_v11 = vld [vmem:[%s4986_s8] sm:$0xff] }
 0x105   : > { %v1008_v37 = vrot.slane %v1007_v29, 1  ;;  %v1205_v30 = vsel %vm1141_vm4, %v1109_v2, %v1173_v27 }
 0x106   : > { %v1298_v35 = vsub.f32 %v3222_v57, %v3997_v8  ;;  %v1299_v25 = vsub.f32 %v3223_v9, %v3997_v8 }
 0x107   : > { %v1009_v60 = vadd.f32 %v1008_v37, %v1007_v29  ;;  %v3102_v29 = vld [vmem:[%s4986_s8 + $0x10] sm:$0xff]  ;;  %v1038_v37 = vmul.f32 %v3899_v17, %v3778_v15 }
 0x108   : > { %1881 = vmatpush.bf16.msra.mxu2 %v3102_v29 }
 0x109   : > { %v1010_v33 = vmul.f32 %v1009_v60, %v3994_v6  ;;  %v1072_v6 = vmul.f32 %v3897_v26, %v1036_v3  ;;  %v4111_v3 = vld [vmem:[%s3935_s27] ss:$0 sm:$0xff]  ;;  %v1074_v56 = vmul.f32 %v3897_v26, %v1038_v37 }
 0x10b   : > { %v1011_v48 = vadd.f32 1e-05, %v1010_v33  ;;  %v1108_v5 = vadd.f32 %v3910_v32, %v1072_v6  ;;  %v3101_v6 = vld [vmem:[%s4986_s8 + $0x8] sm:$0xff]  ;;  %v1110_v2 = vadd.f32 %v3910_v32, %v1074_v56 }
 0x10c   : > { %1882 = vmatpush.bf16.msra.mxu2 %v3101_v6 }
 0x10d   : > { %3340 = vrsqrt.f32 %v1011_v48  ;;  %vm1140_vm3 = vcmp.ge.f32.partialorder %v1108_v5, 0.0  ;;  %v1172_v18 = vmul.f32 0.2, %v1108_v5  ;;  %vm1018_vm5 = vweird.f32 %v1011_v48 }
 0x10e   : > { %v1174_v57 = vmul.f32 0.2, %v1110_v2  ;;  %vm1142_vm10 = vcmp.ge.f32.partialorder %v1110_v2, 0.0 }
 0x10f   : > { %v1204_v33 = vsel %vm1140_vm3, %v1108_v5, %v1172_v18 }
 0x110   : > { %1751 = vmatmul.bf16.gmra.mxu1 %v4021_v24  ;;  %v4115_v34 = vpack.c.bf16 %v1205_v30, %v1204_v33  ;;  %1883 = vmatpush.bf16.msra.mxu2 %v3100_v11  ;;  %v1040_v30 = vmul.f32 %v3899_v17, %v3792_v36 }
 0x113   : > { %v3341_v14 = vpop.eup %3340 }
 0x114   : > { %v1013_v28 = vmul.f32 %v3341_v14, %v1011_v48  ;;  %vm1019_vm6 = vweird.f32 %v3341_v14 }
 0x115   : > { %vm1020_vm7 = vmor %vm1018_vm5, %vm1019_vm6 }
 0x116   : > { %v1014_v0 = vmul.f32 %v3341_v14, %v1013_v28 }
 0x118   : > { %v1015_v13 = vmul.f32 0.5, %v1014_v0  ;;  %v1111_v0 = vadd.f32 %v3910_v32, %v1075_v42 }
 0x11a   : > { %v1016_v20 = vsub.f32 1.5, %v1015_v13  ;;  %v1175_v9 = vmul.f32 0.2, %v1111_v0  ;;  %vm1143_vm11 = vcmp.ge.f32.partialorder %v1111_v0, 0.0 }
 0x11c   : > { %v1017_v60 = vmul.f32 %v3341_v14, %v1016_v20  ;;  %v3302_v20 = vld [vmem:[%s4092_s26 + $0x8] sm:$0xff]   ;;  %v1207_v33 = vsel %vm1143_vm11, %v1111_v0, %v1175_v9 }
 0x11d   : > { %v3226_v37 = vunpack.c.l.bf16 %v3302_v20  ;;  %v3227_v4 = vunpack.c.h.bf16 %v3302_v20  ;;  %v3303_v20 = vld [vmem:[%s4092_s26 + $0x10] sm:$0xff]  }
 0x11e   : > { %v4108_v59 = vsel %vm1020_vm7, %v3341_v14, %v1017_v60 }
 0x11f   : > { %v1330_v15 = vmul.f32 %v1298_v35, %v4108_v59  ;;  %v1331_v48 = vmul.f32 %v1299_v25, %v4108_v59  ;;  %v1300_v60 = vsub.f32 %v3226_v37, %v3997_v8  ;;  %v1301_v35 = vsub.f32 %v3227_v4, %v3997_v8 }
 0x120   : > { %1756 = vmatmul.bf16.gmra.mxu1 %v4056_v44  ;;  %v1206_v25 = vsel %vm1142_vm10, %v1110_v2, %v1174_v57  ;;  %v3230_v37 = vunpack.c.l.bf16 %v3303_v20  ;;  %v3231_v4 = vunpack.c.h.bf16 %v3303_v20 }
 0x121   : > { %v1362_v14 = vmul.f32 %v4111_v3, %v1330_v15  ;;  %v1363_v21 = vmul.f32 %v4111_v3, %v1331_v48  ;;  %v1041_v15 = vmul.f32 %v3899_v17, %v3799_v31  ;;  %v1332_v48 = vmul.f32 %v1300_v60, %v4108_v59 }
 0x122   : > { %v1333_v56 = vmul.f32 %v1301_v35, %v4108_v59  ;;  %v4144_v42 = vpack.c.bf16 %v1207_v33, %v1206_v25  ;;  %v1302_v35 = vsub.f32 %v3230_v37, %v3997_v8  ;;  %v1303_v25 = vsub.f32 %v3231_v4, %v3997_v8  ;;  %v3304_v4 = vld [vmem:[%s4092_s26 + $0x18] sm:$0xff]  }
 0x123   : > { %v1394_v28 = vadd.f32 %v4123_v45, %v1362_v14  ;;  %v1395_v5 = vadd.f32 %v4123_v45, %v1363_v21  ;;  %v1364_v6 = vmul.f32 %v4111_v3, %v1332_v48  ;;  %v1043_v48 = vmul.f32 %v3899_v17, %v3813_v43 }
 0x124   : > { %v1365_v14 = vmul.f32 %v4111_v3, %v1333_v56  ;;  %v1334_v56 = vmul.f32 %v1302_v35, %v4108_v59  ;;  %v3234_v35 = vunpack.c.l.bf16 %v3304_v4 }
 0x125   : > { %vm1426_vm8 = vcmp.ge.f32.partialorder %v1394_v28, 0.0  ;;  %vm1427_vm9 = vcmp.ge.f32.partialorder %v1395_v5, 0.0  ;;  %v1458_v13 = vmul.f32 0.2, %v1394_v28  ;;  %v1459_v18 = vmul.f32 0.2, %v1395_v5 }
 0x126   : > { %v1396_v36 = vadd.f32 %v4123_v45, %v1364_v6  ;;  %v1397_v31 = vadd.f32 %v4123_v45, %v1365_v14  ;;  %v1335_v6 = vmul.f32 %v1303_v25, %v4108_v59  ;;  %v3235_v25 = vunpack.c.h.bf16 %v3304_v4 }
 0x127   : > { %v1490_v27 = vsel %vm1426_vm8, %v1394_v28, %v1458_v13  ;;  %v1491_v51 = vsel %vm1427_vm9, %v1395_v5, %v1459_v18  ;;  %v1076_v28 = vmul.f32 %v3897_v26, %v1040_v30  ;;  %v1077_v5 = vmul.f32 %v3897_v26, %v1041_v15 }
 0x128   : > { %v1522_v29 = vpack.c.bf16 %v1491_v51, %v1490_v27  ;;  %v1460_v2 = vmul.f32 0.2, %v1396_v36  ;;  %v1461_v0 = vmul.f32 0.2, %v1397_v31  ;;  %vm1428_vm12 = vcmp.ge.f32.partialorder %v1396_v36, 0.0 }
 0x129   : > { %v1112_v11 = vadd.f32 %v3910_v32, %v1076_v28  ;;  %v1113_v13 = vadd.f32 %v3910_v32, %v1077_v5  ;;  %vm1429_vm13 = vcmp.ge.f32.partialorder %v1397_v31, 0.0  ;;  %v1042_v15 = vmul.f32 %v3899_v17, %v3806_v40 }
 0x12a   : > { %1884 = vmatmul.bf16.vlgmr.msra.gmra.mxu2 %v1522_v29  ;;  %v1492_v18 = vsel %vm1428_vm12, %v1396_v36, %v1460_v2  ;;  %v1493_v27 = vsel %vm1429_vm13, %v1397_v31, %v1461_v0  ;;  %v1366_v28 = vmul.f32 %v4111_v3, %v1334_v56  ;;  %v1367_v5 = vmul.f32 %v4111_v3, %v1335_v6 }
 0x12b   : > { %v1523_v51 = vpack.c.bf16 %v1493_v27, %v1492_v18  ;;  %vm1144_vm14 = vcmp.ge.f32.partialorder %v1112_v11, 0.0  ;;  %v1176_v57 = vmul.f32 0.2, %v1112_v11  ;;  %v1177_v9 = vmul.f32 0.2, %v1113_v13 }
 0x12c   : > { %vm1145_vm15 = vcmp.ge.f32.partialorder %v1113_v13, 0.0  ;;  %v1078_v31 = vmul.f32 %v3897_v26, %v1042_v15  ;;  %v1079_v2 = vmul.f32 %v3897_v26, %v1043_v48  ;;  %v1398_v40 = vadd.f32 %v4123_v45, %v1366_v28 }
 0x12d   : > { %v1208_v33 = vsel %vm1144_vm14, %v1112_v11, %v1176_v57  ;;  %v1209_v30 = vsel %vm1145_vm15, %v1113_v13, %v1177_v9  ;;  %v1399_v43 = vadd.f32 %v4123_v45, %v1367_v5  ;;  %v1305_v15 = vsub.f32 %v3235_v25, %v3997_v8 }
 0x12e   : > { %v4170_v14 = vpack.c.bf16 %v1209_v30, %v1208_v33  ;;  %v1462_v0 = vmul.f32 0.2, %v1398_v40  ;;  %v1114_v13 = vadd.f32 %v3910_v32, %v1078_v31  ;;  %v1115_v18 = vadd.f32 %v3910_v32, %v1079_v2 }
 0x12f   : > { %v1463_v11 = vmul.f32 0.2, %v1399_v43  ;;  %vm1430_vm0 = vcmp.ge.f32.partialorder %v1398_v40, 0.0  ;;  %vm1431_vm1 = vcmp.ge.f32.partialorder %v1399_v43, 0.0  ;;  %v1304_v30 = vsub.f32 %v3234_v35, %v3997_v8 }
 0x130   : > { %1761 = vmatmul.bf16.gmra.mxu1 %v4074_v7  ;;  %v1494_v27 = vsel %vm1430_vm0, %v1398_v40, %v1462_v0  ;;  %vm1146_vm2 = vcmp.ge.f32.partialorder %v1114_v13, 0.0  ;;  %v1178_v20 = vmul.f32 0.2, %v1114_v13  ;;  %v1179_v37 = vmul.f32 0.2, %v1115_v18 }
 0x131   : > { %vm1147_vm3 = vcmp.ge.f32.partialorder %v1115_v18, 0.0  ;;  %v1044_v6 = vmul.f32 %v3899_v17, %v3820_v39  ;;  %v1045_v28 = vmul.f32 %v3899_v17, %v3827_v47  ;;  %v1336_v5 = vmul.f32 %v1304_v30, %v4108_v59 }
 0x132   : > { %v1210_v48 = vsel %vm1146_vm2, %v1114_v13, %v1178_v20  ;;  %v1211_v56 = vsel %vm1147_vm3, %v1115_v18, %v1179_v37  ;;  %v1337_v31 = vmul.f32 %v1305_v15, %v4108_v59  ;;  %v3305_v15 = vld [vmem:[%s4092_s26 + $0x20] sm:$0xff]  }
 0x133   : > { %v4196_v2 = vpack.c.bf16 %v1211_v56, %v1210_v48  ;;  %v1368_v40 = vmul.f32 %v4111_v3, %v1336_v5  ;;  %v1081_v13 = vmul.f32 %v3897_v26, %v1045_v28  ;;  %v3238_v48 = vunpack.c.l.bf16 %v3305_v15 }
 0x134   : > { %v3239_v56 = vunpack.c.h.bf16 %v3305_v15  ;;  %v1046_v28 = vmul.f32 %v3899_v17, %v3834_v19  ;;  %v1047_v5 = vmul.f32 %v3899_v17, %v3841_v50 }
 0x135   : > { %v1400_v39 = vadd.f32 %v4123_v45, %v1368_v40 }
 0x136   : > { %v1307_v40 = vsub.f32 %v3239_v56, %v3997_v8 }
 0x137   : > { %v1464_v18 = vmul.f32 0.2, %v1400_v39  ;;  %vm1432_vm4 = vcmp.ge.f32.partialorder %v1400_v39, 0.0 }
 0x139   : > { %v1496_v20 = vsel %vm1432_vm4, %v1400_v39, %v1464_v18  ;;  %v1339_v39 = vmul.f32 %v1307_v40, %v4108_v59  ;;  %v1083_v18 = vmul.f32 %v3897_v26, %v1047_v5  ;;  %v3306_v40 = vld [vmem:[%s4092_s26 + $0x28] sm:$0xff]  }
 0x13a   : > { %1889 = vmatmul.bf16.gmra.mxu2 %v1523_v51  ;;  %v1495_v51 = vsel %vm1431_vm1, %v1399_v43, %v1463_v11  ;;  %v1369_v43 = vmul.f32 %v4111_v3, %v1337_v31  ;;  %v1080_v11 = vmul.f32 %v3897_v26, %v1044_v6  ;;  %v1306_v31 = vsub.f32 %v3238_v48, %v3997_v8 }
 0x13b   : > { %v1524_v57 = vpack.c.bf16 %v1495_v51, %v1494_v27  ;;  %v1371_v50 = vmul.f32 %v4111_v3, %v1339_v39 }
 0x13c   : > { %v1401_v47 = vadd.f32 %v4123_v45, %v1369_v43  ;;  %v1116_v51 = vadd.f32 %v3910_v32, %v1080_v11 }
 0x13e   : > { %v1465_v27 = vmul.f32 0.2, %v1401_v47  ;;  %vm1433_vm5 = vcmp.ge.f32.partialorder %v1401_v47, 0.0  ;;  %vm1148_vm6 = vcmp.ge.f32.partialorder %v1116_v51, 0.0  ;;  %v1180_v25 = vmul.f32 0.2, %v1116_v51 }
 0x140   : > { %1766 = vmatmul.bf16.gmra.mxu1 %v4115_v34  ;;  %v1497_v37 = vsel %vm1433_vm5, %v1401_v47, %v1465_v27  ;;  %v1212_v43 = vsel %vm1148_vm6, %v1116_v51, %v1180_v25  ;;  %v1082_v47 = vmul.f32 %v3897_v26, %v1046_v28  ;;  %v1403_v51 = vadd.f32 %v4123_v45, %v1371_v50 }
 0x141   : > { %v1525_v4 = vpack.c.bf16 %v1497_v37, %v1496_v20 }
 0x142   : > { %vm1435_vm9 = vcmp.ge.f32.partialorder %v1403_v51, 0.0 }
 0x14a   : > { %1894 = vmatmul.bf16.gmra.mxu2 %v1524_v57  ;;  %v1117_v57 = vadd.f32 %v3910_v32, %v1081_v13  ;;  %v1338_v13 = vmul.f32 %v1306_v31, %v4108_v59 }
 0x14c   : > { %v1181_v30 = vmul.f32 0.2, %v1117_v57  ;;  %vm1149_vm7 = vcmp.ge.f32.partialorder %v1117_v57, 0.0  ;;  %v1370_v19 = vmul.f32 %v4111_v3, %v1338_v13 }
 0x14d   : > { %v4148_v21 = vpop.f32.mrf.mxu1 }
 0x14e   : > { %v1213_v11 = vsel %vm1149_vm7, %v1117_v57, %v1181_v30  ;;  %v1402_v37 = vadd.f32 %v4123_v45, %v1370_v19  ;;  %v1118_v57 = vadd.f32 %v3910_v32, %v1082_v47  ;;  %v1467_v30 = vmul.f32 0.2, %v1403_v51 }
 0x14f   : > { %v4224_v27 = vpack.c.bf16 %v1213_v11, %v1212_v43  ;;  %v3242_v43 = vunpack.c.l.bf16 %v3306_v40  ;;  %v3243_v11 = vunpack.c.h.bf16 %v3306_v40  ;;  %v1049_v19 = vmul.f32 %v3899_v17, %v3855_v49  ;;  %v2911_v40 = vld [vmem:[%s4985_s7 + $0x70] sm:$0xf] }
 0x150   : > { %1771 = vmatmul.bf16.gmra.mxu1 %v4144_v42  ;;  %v1466_v25 = vmul.f32 0.2, %v1402_v37  ;;  %vm1434_vm8 = vcmp.ge.f32.partialorder %v1402_v37, 0.0  ;;  %v1499_v48 = vsel %vm1435_vm9, %v1403_v51, %v1467_v30  ;;  %v1182_v56 = vmul.f32 0.2, %v1118_v57 }
 0x151   : > { %vm1150_vm10 = vcmp.ge.f32.partialorder %v1118_v57, 0.0  ;;  %v1308_v50 = vsub.f32 %v3242_v43, %v3997_v8  ;;  %v3099_v43 = vld [vmem:[%s4985_s7 + $0x74] sm:$0xf0] }
 0x152   : > { %v1498_v15 = vsel %vm1434_vm8, %v1402_v37, %v1466_v25  ;;  %v1214_v39 = vsel %vm1150_vm10, %v1118_v57, %v1182_v56  ;;  %v1309_v37 = vsub.f32 %v3243_v11, %v3997_v8  ;;  %v1085_v57 = vmul.f32 %v3897_v26, %v1049_v19 }
 0x153   : > { %v1526_v5 = vpack.c.bf16 %v1499_v48, %v1498_v15  ;;  %v1340_v51 = vmul.f32 %v1308_v50, %v4108_v59 }
 0x154   : > { %v1341_v25 = vmul.f32 %v1309_v37, %v4108_v59 }
 0x155   : > { %v4157_v29 = vpop.f32.mrf.mxu1 }
 0x15a   : > { %1899 = vmatmul.bf16.gmra.mxu2 %v1525_v4  ;;  %v1119_v4 = vadd.f32 %v3910_v32, %v1083_v18  ;;  %v1048_v18 = vmul.f32 %v3899_v17, %v3848_v52  ;;  %v1373_v52 = vmul.f32 %v4111_v3, %v1341_v25 }
 0x15c   : > { %v1183_v28 = vmul.f32 0.2, %v1119_v4  ;;  %vm1151_vm11 = vcmp.ge.f32.partialorder %v1119_v4, 0.0  ;;  %v1084_v15 = vmul.f32 %v3897_v26, %v1048_v18  ;;  %v1405_v56 = vadd.f32 %v4123_v45, %v1373_v52 }
 0x15d   : > { %v4174_v36 = vpop.f32.mrf.mxu1 }
 0x15e   : > { %v1215_v47 = vsel %vm1151_vm11, %v1119_v4, %v1183_v28  ;;  %v1372_v4 = vmul.f32 %v4111_v3, %v1340_v51  ;;  %v1120_v28 = vadd.f32 %v3910_v32, %v1084_v15  ;;  %vm1437_vm13 = vcmp.ge.f32.partialorder %v1405_v56, 0.0  ;;  %v2903_v15 = vld [vmem:[%s4985_s7 + $0x60] sm:$0xf] }
 0x15f   : > { %v4248_v30 = vpack.c.bf16 %v1215_v47, %v1214_v39  ;;  %v2912_v39 = vor.u32 %v3099_v43, %v2911_v40  ;;  %v1469_v47 = vmul.f32 0.2, %v1405_v56  ;;  %v1050_v43 = vmul.f32 %v3899_v17, %v3862_v55 }
 0x160   : > { %1776 = vmatmul.bf16.gmra.mxu1 %v4170_v14  ;;  %v1404_v49 = vadd.f32 %v4123_v45, %v1372_v4  ;;  %v1184_v50 = vmul.f32 0.2, %v1120_v28  ;;  %v2895_v4 = vld [vmem:[%s4985_s7 + $0x50] sm:$0xf]  ;;  %vm1152_vm14 = vcmp.ge.f32.partialorder %v1120_v28, 0.0 }
 0x161   : > { %1634 = vmatpush.bf16.msra.mxu0 %v2912_v39  ;;  %v1501_v19 = vsel %vm1437_vm13, %v1405_v56, %v1469_v47  ;;  %v3307_v56 = vld [vmem:[%s4092_s26 + $0x30] sm:$0xff]   ;;  %v1086_v33 = vmul.f32 %v3897_v26, %v1050_v43  ;;  %v3091_v43 = vld [vmem:[%s4985_s7 + $0x34] sm:$0xf0] }
 0x162   : > { %v1468_v11 = vmul.f32 0.2, %v1404_v49  ;;  %vm1436_vm12 = vcmp.ge.f32.partialorder %v1404_v49, 0.0  ;;  %v3246_v40 = vunpack.c.l.bf16 %v3307_v56  ;;  %v3247_v39 = vunpack.c.h.bf16 %v3307_v56 }
 0x163   : > { %v1216_v47 = vsel %vm1152_vm14, %v1120_v28, %v1184_v50  ;;  %v3093_v50 = vld [vmem:[%s4985_s7 + $0x44] sm:$0xf0]  ;;  %v1122_v56 = vadd.f32 %v3910_v32, %v1086_v33 }
 0x164   : > { %v1500_v18 = vsel %vm1436_vm12, %v1404_v49, %v1468_v11  ;;  %v3095_v49 = vld [vmem:[%s4985_s7 + $0x54] sm:$0xf0] }
 0x165   : > { %v4183_v9 = vpop.f32.mrf.mxu1  ;;  %v1527_v51 = vpack.c.bf16 %v1501_v19, %v1500_v18  ;;  %v2896_v11 = vor.u32 %v3095_v49, %v2895_v4  ;;  %v1051_v19 = vmul.f32 %v3899_v17, %v3869_v23  ;;  %v2887_v23 = vld [vmem:[%s4985_s7 + $0x40] sm:$0xf]  ;;  %vm1154_vm2 = vcmp.ge.f32.partialorder %v1122_v56, 0.0 }
 0x167   : > { %v1087_v28 = vmul.f32 %v3897_v26, %v1051_v19 }
 0x16a   : > { %1904 = vmatmul.bf16.gmra.mxu2 %v1526_v5  ;;  %v1121_v5 = vadd.f32 %v3910_v32, %v1085_v57  ;;  %v3097_v57 = vld [vmem:[%s4985_s7 + $0x64] sm:$0xf0] }
 0x16b   : > { %v2904_v52 = vor.u32 %v3097_v57, %v2903_v15  ;;  %v1311_v15 = vsub.f32 %v3247_v39, %v3997_v8  ;;  %v1123_v39 = vadd.f32 %v3910_v32, %v1087_v28  ;;  %v2871_v28 = vld [vmem:[%s4985_s7 + $0x20] sm:$0xf] }
 0x16c   : > { %v1185_v37 = vmul.f32 0.2, %v1121_v5  ;;  %vm1153_vm15 = vcmp.ge.f32.partialorder %v1121_v5, 0.0 }
 0x16d   : > { %v4200_v0 = vpop.f32.mrf.mxu1  ;;  %1635 = vmatpush.bf16.msra.mxu0 %v2904_v52  ;;  %v1343_v55 = vmul.f32 %v1311_v15, %v4108_v59  ;;  %v2888_v52 = vor.u32 %v3093_v50, %v2887_v23  ;;  %v3308_v23 = vld [vmem:[%s4092_s26 + $0x38] sm:$0xff]   ;;  %vm1155_vm3 = vcmp.ge.f32.partialorder %v1123_v39, 0.0  ;;  %v3089_v50 = vld [vmem:[%s4985_s7 + $0x24] sm:$0xf0] }
 0x16e   : > { %v1217_v18 = vsel %vm1153_vm15, %v1121_v5, %v1185_v37 }
 0x16f   : > { %v4289_v60 = vpack.c.bf16 %v1217_v18, %v1216_v47  ;;  %v1375_v37 = vmul.f32 %v4111_v3, %v1343_v55  ;;  %v1187_v55 = vmul.f32 0.2, %v1123_v39 }
 0x170   : > { %1781 = vmatmul.bf16.gmra.mxu1 %v4196_v2 }
 0x171   : > { %1636 = vmatpush.bf16.msra.mxu0 %v2896_v11  ;;  %v1407_v11 = vadd.f32 %v4123_v45, %v1375_v37  ;;  %v3250_v37 = vunpack.c.l.bf16 %v3308_v23 }
 0x173   : > { %vm1439_vm1 = vcmp.ge.f32.partialorder %v1407_v11, 0.0  ;;  %v1471_v19 = vmul.f32 0.2, %v1407_v11 }
 0x175   : > { %v4209_v35 = vpop.f32.mrf.mxu1  ;;  %1637 = vmatpush.bf16.msra.mxu0 %v2888_v52  ;;  %v3251_v52 = vunpack.c.h.bf16 %v3308_v23 }
 0x176   : > { %v2139_v6 = vpack.c.bf16 %v4209_v35, %v4200_v0  ;;  %v5000_v0 = vpack.c.bf16 %v4183_v9, %v4174_v36 }
 0x17a   : > { %1909 = vmatmul.bf16.gmra.mxu2 %v1527_v51  ;;  %v1310_v51 = vsub.f32 %v3246_v40, %v3997_v8  ;;  %v2879_v40 = vld [vmem:[%s4985_s7 + $0x30] sm:$0xf] }
 0x17b   : > { %v2880_v47 = vor.u32 %v3091_v43, %v2879_v40  ;;  %v1312_v40 = vsub.f32 %v3250_v37, %v3997_v8  ;;  %v1313_v43 = vsub.f32 %v3251_v52, %v3997_v8 }
 0x17c   : > { %v1342_v57 = vmul.f32 %v1310_v51, %v4108_v59  ;;  %v1503_v51 = vsel %vm1439_vm1, %v1407_v11, %v1471_v19  ;;  %v1053_v19 = vmul.f32 %v3899_v17, %v3883_v62 }
 0x17d   : > { %v4228_v20 = vpop.f32.mrf.mxu1  ;;  %1638 = vmatpush.bf16.msra.mxu0 %v2880_v47  ;;  %v1219_v47 = vsel %vm1155_vm3, %v1123_v39, %v1187_v55 }
 0x17e   : > { %v1374_v5 = vmul.f32 %v4111_v3, %v1342_v57  ;;  %v1186_v57 = vmul.f32 0.2, %v1122_v56  ;;  %v1089_v23 = vmul.f32 %v3897_v26, %v1053_v19 }
 0x180   : > { %1786 = vmatmul.bf16.gmra.mxu1 %v4224_v27  ;;  %v1406_v49 = vadd.f32 %v4123_v45, %v1374_v5  ;;  %v1218_v11 = vsel %vm1154_vm2, %v1122_v56, %v1186_v57  ;;  %v1345_v56 = vmul.f32 %v1313_v43, %v4108_v59 }
 0x181   : > { %v4338_v57 = vpack.c.bf16 %v1219_v47, %v1218_v11  ;;  %v1125_v11 = vadd.f32 %v3910_v32, %v1089_v23 }
 0x182   : > { %vm1438_vm0 = vcmp.ge.f32.partialorder %v1406_v49, 0.0  ;;  %v1470_v18 = vmul.f32 0.2, %v1406_v49  ;;  %v1377_v62 = vmul.f32 %v4111_v3, %v1345_v56  ;;  %v3309_v56 = vld [vmem:[%s4092_s26 + $0x40] sm:$0xff]  }
 0x183   : > { %vm1157_vm7 = vcmp.ge.f32.partialorder %v1125_v11, 0.0 }
 0x184   : > { %v1502_v33 = vsel %vm1438_vm0, %v1406_v49, %v1470_v18  ;;  %v2872_v49 = vor.u32 %v3089_v50, %v2871_v28  ;;  %v1052_v18 = vmul.f32 %v3899_v17, %v3876_v54  ;;  %v2855_v28 = vld [vmem:[%s4985_s7] sm:$0xf]  ;;  %v3085_v50 = vld [vmem:[%s4985_s7 + $0x4] sm:$0xf0]  ;;  %v1409_v52 = vadd.f32 %v4123_v45, %v1377_v62 }
 0x185   : > { %v4235_v31 = vpop.f32.mrf.mxu1  ;;  %v1528_v5 = vpack.c.bf16 %v1503_v51, %v1502_v33  ;;  %v2863_v33 = vld [vmem:[%s4985_s7 + $0x10] sm:$0xf]  ;;  %v3087_v51 = vld [vmem:[%s4985_s7 + $0x14] sm:$0xf0] }
 0x186   : > { %v2140_v13 = vpack.c.bf16 %v4235_v31, %v4228_v20  ;;  %1639 = vmatpush.bf16.msra.mxu0 %v2872_v49  ;;  %v2864_v39 = vor.u32 %v3087_v51, %v2863_v33  ;;  %v1088_v55 = vmul.f32 %v3897_v26, %v1052_v18  ;;  %v2856_v49 = vor.u32 %v3085_v50, %v2855_v28  ;;  %v3122_v31 = vld [vmem:[%s4988_s10 + $0x30] sm:$0xff] }
 0x187   : > { %v1473_v43 = vmul.f32 0.2, %v1409_v52  ;;  %vm1441_vm5 = vcmp.ge.f32.partialorder %v1409_v52, 0.0 }
 0x188   : > { %v1124_v26 = vadd.f32 %v3910_v32, %v1088_v55 }
 0x189   : > { %v1505_v18 = vsel %vm1441_vm5, %v1409_v52, %v1473_v43 }
 0x18a   : > { %1914 = vmatmul.bf16.gmra.mxu2 %v1528_v5  ;;  %v1344_v5 = vmul.f32 %v1312_v40, %v4108_v59  ;;  %1640 = vmatpush.bf16.msra.mxu0 %v2864_v39  ;;  %v1188_v51 = vmul.f32 0.2, %v1124_v26  ;;  %vm1156_vm6 = vcmp.ge.f32.partialorder %v1124_v26, 0.0  ;;  %v3254_v39 = vunpack.c.l.bf16 %v3309_v56 }
 0x18c   : > { %v1376_v54 = vmul.f32 %v4111_v3, %v1344_v5  ;;  %v1189_v5 = vmul.f32 0.2, %v1125_v11  ;;  %v1314_v62 = vsub.f32 %v3254_v39, %v3997_v8  ;;  %v1220_v55 = vsel %vm1156_vm6, %v1124_v26, %v1188_v51 }
 0x18d   : > { %v4254_v48 = vpop.f32.mrf.mxu1 }
 0x18e   : > { %v1408_v37 = vadd.f32 %v4123_v45, %v1376_v54  ;;  %1641 = vmatpush.bf16.msra.mxu0 %v2856_v49  ;;  %v3255_v54 = vunpack.c.h.bf16 %v3309_v56  ;;  %v1221_v23 = vsel %vm1157_vm7, %v1125_v11, %v1189_v5  ;;  %v1346_v28 = vmul.f32 %v1314_v62, %v4108_v59  ;;  %v3310_v56 = vld [vmem:[%s4092_s26 + $0x48] sm:$0xff]  }
 0x18f   : > { %v3259_v62 = vunpack.c.h.bf16 %v3310_v56 }
 0x190   : > { %1791 = vmatmul.bf16.gmra.mxu1 %v4248_v30  ;;  %v1472_v40 = vmul.f32 0.2, %v1408_v37  ;;  %vm1440_vm4 = vcmp.ge.f32.partialorder %v1408_v37, 0.0  ;;  %v1315_v32 = vsub.f32 %v3255_v54, %v3997_v8  ;;  %v3258_v54 = vunpack.c.l.bf16 %v3310_v56 }
 0x191   : > { %1642 = vmatmul.bf16.vlgmr.msra.gmra.mxu0 %v3922_v1  ;;  %v4363_v1 = vpack.c.bf16 %v1221_v23, %v1220_v55  ;;  %v1317_v55 = vsub.f32 %v3259_v62, %v3997_v8 }
 0x192   : > { %v1504_v47 = vsel %vm1440_vm4, %v1408_v37, %v1472_v40  ;;  %v1347_v50 = vmul.f32 %v1315_v32, %v4108_v59  ;;  %v1378_v37 = vmul.f32 %v4111_v3, %v1346_v28  ;;  %v3123_v40 = vld [vmem:[%s4988_s10 + $0x38] sm:$0xff]  ;;  %v1316_v32 = vsub.f32 %v3258_v54, %v3997_v8 }
 0x193   : > { %v1529_v19 = vpack.c.bf16 %v1505_v18, %v1504_v47  ;;  %2217 = vmatpush.bf16.msrb.mxu1 %v3123_v40 }
 0x194   : > { %v1379_v52 = vmul.f32 %v4111_v3, %v1347_v50  ;;  %v1410_v43 = vadd.f32 %v4123_v45, %v1378_v37  ;;  %v1348_v50 = vmul.f32 %v1316_v32, %v4108_v59  ;;  %v1349_v37 = vmul.f32 %v1317_v55, %v4108_v59 }
 0x195   : > { %v4267_v25 = vpop.f32.mrf.mxu1 }
 0x196   : > { %v1411_v26 = vadd.f32 %v4123_v45, %v1379_v52  ;;  %v1474_v11 = vmul.f32 0.2, %v1410_v43  ;;  %vm1442_vm8 = vcmp.ge.f32.partialorder %v1410_v43, 0.0  ;;  %v1381_v52 = vmul.f32 %v4111_v3, %v1349_v37 }
 0x197   : > { %2218 = vmatpush.bf16.msrb.mxu1 %v3122_v31  ;;  %v3313_v31 = vld [vmem:[%s4092_s26 + $0x60] sm:$0xff]  }
 0x198   : > { %v1475_v47 = vmul.f32 0.2, %v1411_v26  ;;  %vm1443_vm9 = vcmp.ge.f32.partialorder %v1411_v26, 0.0  ;;  %v1506_v18 = vsel %vm1442_vm8, %v1410_v43, %v1474_v11 }
 0x19a   : > { %1919 = vmatmul.bf16.gmra.mxu2 %v1529_v19  ;;  %v1507_v19 = vsel %vm1443_vm9, %v1411_v26, %v1475_v47  ;;  %v1413_v26 = vadd.f32 %v4123_v45, %v1381_v52  ;;  %v2141_v47 = vpack.c.bf16 %v4267_v25, %v4254_v48 }
 0x19b   : > { %v1530_v51 = vpack.c.bf16 %v1507_v19, %v1506_v18 }
 0x19c   : > { %vm1445_vm11 = vcmp.ge.f32.partialorder %v1413_v26, 0.0 }
 0x19d   : > { %v4293_v4 = vpop.f32.mrf.mxu1 }
 0x1a0   : > { %1796 = vmatmul.bf16.gmra.mxu1 %v4289_v60 }
 0x1a1   : > { %1647 = vmatmul.bf16.gmra.mxu0 %v3943_v61  ;;  %v1380_v61 = vmul.f32 %v4111_v3, %v1348_v50 }
 0x1a3   : > { %v1412_v43 = vadd.f32 %v4123_v45, %v1380_v61 }
 0x1a5   : > { %v4315_v15 = vpop.f32.mrf.mxu1  ;;  %vm1444_vm10 = vcmp.ge.f32.partialorder %v1412_v43, 0.0 }
 0x1a6   : > { %v2142_v40 = vpack.c.bf16 %v4315_v15, %v4293_v4  ;;  %v3311_v15 = vld [vmem:[%s4092_s26 + $0x50] sm:$0xff]  }
 0x1a7   : > { %v3262_v56 = vunpack.c.l.bf16 %v3311_v15 }
 0x1a9   : > { %v1318_v48 = vsub.f32 %v3262_v56, %v3997_v8 }
 0x1aa   : > { %1924 = vmatmul.bf16.gmra.mxu2 %v1530_v51 }
 0x1ad   : > { %v4342_v17 = vpop.f32.mrf.mxu1  ;;  %v4377_v23 = vpop.f32.mrf.mxu2 }
 0x1b0   : > { %1801 = vmatmul.bf16.gmra.mxu1 %v4338_v57 }
 0x1b1   : > { %1652 = vmatmul.bf16.gmra.mxu0 %v3965_v41  ;;  %v1350_v41 = vmul.f32 %v1318_v48, %v4108_v59 }
 0x1b3   : > { %v1382_v32 = vmul.f32 %v4111_v3, %v1350_v41 }
 0x1b5   : > { %v1764_v33 = vpop.f32.mrf.mxu1  ;;  %v4390_v11 = vpop.f32.mrf.mxu2 }
 0x1b6   : > { %v2143_v28 = vpack.c.bf16 %v1764_v33, %v4342_v17  ;;  %v1476_v17 = vmul.f32 0.2, %v1412_v43  ;;  %v1477_v33 = vmul.f32 0.2, %v1413_v26 }
 0x1b8   : > { %v1508_v18 = vsel %vm1444_vm10, %v1412_v43, %v1476_v17  ;;  %v1509_v19 = vsel %vm1445_vm11, %v1413_v26, %v1477_v33  ;;  %v3312_v26 = vld [vmem:[%s4092_s26 + $0x58] sm:$0xff]  }
 0x1b9   : > { %v1531_v51 = vpack.c.bf16 %v1509_v19, %v1508_v18  ;;  %v3266_v9 = vunpack.c.l.bf16 %v3312_v26  ;;  %v3267_v17 = vunpack.c.h.bf16 %v3312_v26 }
 0x1bb   : > { %1929 = vmatmul.bf16.gmra.mxu2 %v1531_v51  ;;  %v1320_v33 = vsub.f32 %v3266_v9, %v3997_v8  ;;  %v3121_v9 = vld [vmem:[%s4988_s10 + $0x28] sm:$0xff] }
 0x1bc   : > { %2219 = vmatpush.bf16.msrb.mxu1 %v3121_v9 }
 0x1bd   : > { %v1767_v49 = vpop.f32.mrf.mxu1  ;;  %v4405_v54 = vpop.f32.mrf.mxu2 }
 0x1c0   : > { %1806 = vmatmul.bf16.gmra.mxu1 %v4363_v1 }
 0x1c1   : > { %1657 = vmatmul.bf16.gmra.mxu0 %v3987_v53 }
 0x1c5   : > { %v1769_v5 = vpop.f32.mrf.mxu1  ;;  %v4424_v50 = vpop.f32.mrf.mxu2 }
 0x1c6   : > { %v2144_v39 = vpack.c.bf16 %v1769_v5, %v1767_v49  ;;  %v3116_v5 = vld [vmem:[%s4988_s10] sm:$0xff] }
 0x1c8   : > { %2286 = vmatpush.bf16.msrb.mxu2 %v2144_v39  ;;  %v3263_v39 = vunpack.c.h.bf16 %v3311_v15 }
 0x1ca   : > { %v1319_v25 = vsub.f32 %v3263_v39, %v3997_v8 }
 0x1cc   : > { %2287 = vmatpush.bf16.msrb.mxu2 %v2143_v28  ;;  %v1351_v62 = vmul.f32 %v1319_v25, %v4108_v59 }
 0x1cd   : > { %v4384_v49 = vpop.f32.mrf.mxu1  ;;  %v4437_v18 = vpop.f32.mrf.mxu2 }
 0x1ce   : > { %v1383_v55 = vmul.f32 %v4111_v3, %v1351_v62 }
 0x1d0   : > { %2288 = vmatpush.bf16.msrb.mxu2 %v2142_v40  ;;  %v1415_v28 = vadd.f32 %v4123_v45, %v1383_v55  ;;  %v5001_v40 = vpack.c.bf16 %v4157_v29, %v4148_v21  ;;  %v1352_v21 = vmul.f32 %v1320_v33, %v4108_v59 }
 0x1d1   : > { %1662 = vmatmul.bf16.gmra.mxu0 %v4021_v24 }
 0x1d2   : > { %vm1447_vm13 = vcmp.ge.f32.partialorder %v1415_v28, 0.0  ;;  %v1384_v53 = vmul.f32 %v4111_v3, %v1352_v21 }
 0x1d4   : > { %2289 = vmatpush.bf16.msrb.mxu2 %v2141_v47  ;;  %v1321_v47 = vsub.f32 %v3267_v17, %v3997_v8  ;;  %v1416_v15 = vadd.f32 %v4123_v45, %v1384_v53 }
 0x1d5   : > { %v4395_v4 = vpop.f32.mrf.mxu1  ;;  %v4447_v25 = vpop.f32.mrf.mxu2 }
 0x1d6   : > { %v1353_v29 = vmul.f32 %v1321_v47, %v4108_v59  ;;  %v1480_v39 = vmul.f32 0.2, %v1416_v15  ;;  %vm1448_vm14 = vcmp.ge.f32.partialorder %v1416_v15, 0.0 }
 0x1d8   : > { %2290 = vmatpush.bf16.msrb.mxu2 %v2140_v13  ;;  %v1414_v13 = vadd.f32 %v4123_v45, %v1382_v32  ;;  %v1385_v19 = vmul.f32 %v4111_v3, %v1353_v29  ;;  %v1512_v41 = vsel %vm1448_vm14, %v1416_v15, %v1480_v39  ;;  %v3314_v39 = vld [vmem:[%s4092_s26 + $0x68] sm:$0xff]  }
 0x1da   : > { %v1478_v35 = vmul.f32 0.2, %v1414_v13  ;;  %vm1446_vm12 = vcmp.ge.f32.partialorder %v1414_v13, 0.0  ;;  %v1417_v56 = vadd.f32 %v4123_v45, %v1385_v19 }
 0x1dc   : > { %2291 = vmatpush.bf16.msrb.mxu2 %v2139_v6  ;;  %v1479_v6 = vmul.f32 0.2, %v1415_v28  ;;  %v1510_v37 = vsel %vm1446_vm12, %v1414_v13, %v1478_v35  ;;  %v1481_v48 = vmul.f32 0.2, %v1417_v56  ;;  %vm1449_vm15 = vcmp.ge.f32.partialorder %v1417_v56, 0.0 }
 0x1dd   : > { %v4414_v20 = vpop.f32.mrf.mxu1 }
 0x1de   : > { %v1511_v61 = vsel %vm1447_vm13, %v1415_v28, %v1479_v6  ;;  %v1513_v62 = vsel %vm1449_vm15, %v1417_v56, %v1481_v48  ;;  %v3270_v28 = vunpack.c.l.bf16 %v3313_v31 }
 0x1df   : > { %v1532_v52 = vpack.c.bf16 %v1511_v61, %v1510_v37  ;;  %v1533_v32 = vpack.c.bf16 %v1513_v62, %v1512_v41  ;;  %v4457_v37 = vpop.f32.mrf.mxu2  ;;  %v3274_v41 = vunpack.c.l.bf16 %v3314_v39  ;;  %v3275_v62 = vunpack.c.h.bf16 %v3314_v39 }
 0x1e0   : > { %2292 = vmatpush.bf16.msrb.mxu2 %v5000_v0  ;;  %v3271_v0 = vunpack.c.h.bf16 %v3313_v31  ;;  %v1322_v35 = vsub.f32 %v3270_v28, %v3997_v8 }
 0x1e1   : > { %1934 = vmatmul.bf16.gmra.mxu2 %v1532_v52  ;;  %1667 = vmatmul.bf16.gmra.mxu0 %v4056_v44  ;;  %v1325_v31 = vsub.f32 %v3275_v62, %v3997_v8 }
 0x1e2   : > { %v1323_v6 = vsub.f32 %v3271_v0, %v3997_v8  ;;  %v1354_v61 = vmul.f32 %v1322_v35, %v4108_v59 }
 0x1e3   : > { %v1357_v35 = vmul.f32 %v1325_v31, %v4108_v59 }
 0x1e4   : > { %2293 = vmatpush.bf16.msrb.mxu2 %v5001_v40  ;;  %v1355_v52 = vmul.f32 %v1323_v6, %v4108_v59  ;;  %v1386_v24 = vmul.f32 %v4111_v3, %v1354_v61 }
 0x1e5   : > { %v4430_v43 = vpop.f32.mrf.mxu1  ;;  %v1389_v6 = vmul.f32 %v4111_v3, %v1357_v35 }
 0x1e6   : > { %v1387_v40 = vmul.f32 %v4111_v3, %v1355_v52  ;;  %v1418_v17 = vadd.f32 %v4123_v45, %v1386_v24 }
 0x1e7   : > { %v4470_v29 = vpop.f32.mrf.mxu2  ;;  %v1421_v24 = vadd.f32 %v4123_v45, %v1389_v6  ;;  %v3120_v6 = vld [vmem:[%s4988_s10 + $0x20] sm:$0xff] }
 0x1e8   : > { %v1419_v33 = vadd.f32 %v4123_v45, %v1387_v40  ;;  %v1482_v47 = vmul.f32 0.2, %v1418_v17  ;;  %vm1450_vm0 = vcmp.ge.f32.partialorder %v1418_v17, 0.0  ;;  %2220 = vmatpush.bf16.msrb.mxu1 %v3120_v6  ;;  %v4524_v6 = vld [vmem:[%s3935_s27] ss:$0 sm:$0xff] }
 0x1e9   : > { %v1485_v9 = vmul.f32 0.2, %v1421_v24  ;;  %vm1453_vm3 = vcmp.ge.f32.partialorder %v1421_v24, 0.0 }
 0x1ea   : > { %v1483_v21 = vmul.f32 0.2, %v1419_v33  ;;  %vm1451_vm1 = vcmp.ge.f32.partialorder %v1419_v33, 0.0  ;;  %v1514_v53 = vsel %vm1450_vm0, %v1418_v17, %v1482_v47 }
 0x1eb   : > { %v1517_v47 = vsel %vm1453_vm3, %v1421_v24, %v1485_v9 }
 0x1ec   : > { %v1515_v19 = vsel %vm1451_vm1, %v1419_v33, %v1483_v21 }
 0x1ed   : > { %v4443_v51 = vpop.f32.mrf.mxu1  ;;  %v1534_v15 = vpack.c.bf16 %v1515_v19, %v1514_v53  ;;  %v3315_v19 = vld [vmem:[%s4092_s26 + $0x70] sm:$0xff]  }
 0x1ee   : > { %v3279_v39 = vunpack.c.h.bf16 %v3315_v19 }
 0x1ef   : > { %v4480_v28 = vpop.f32.mrf.mxu2 }
 0x1f0   : > { %v1327_v62 = vsub.f32 %v3279_v39, %v3997_v8 }
 0x1f1   : > { %1939 = vmatmul.bf16.gmra.mxu2 %v1533_v32  ;;  %v1324_v32 = vsub.f32 %v3274_v41, %v3997_v8  ;;  %1672 = vmatmul.bf16.gmra.mxu0 %v4074_v7 }
 0x1f3   : > { %v1356_v0 = vmul.f32 %v1324_v32, %v4108_v59 }
 0x1f5   : > { %v4450_v55 = vpop.f32.mrf.mxu1  ;;  %v1388_v44 = vmul.f32 %v4111_v3, %v1356_v0  ;;  %v1359_v0 = vmul.f32 %v1327_v62, %v4108_v59 }
 0x1f6   : > { %v2147_v13 = vpack.c.bf16 %v4450_v55, %v4443_v51  ;;  %v3113_v51 = vld [vmem:[%s4993_s15 + $0x24] sm:$0xf0]  ;;  %v1242_v55 = vmul.f32 %v4108_v59, %v4024_v38  ;;  %v5003_v38 = vpack.c.bf16 %v4395_v4, %v4384_v49  ;;  %v3138_v49 = vld [vmem:[%s4991_s13 + $0x30] sm:$0xff] }
 0x1f7   : > { %v1420_v52 = vadd.f32 %v4123_v45, %v1388_v44  ;;  %v4490_v17 = vpop.f32.mrf.mxu2  ;;  %v1391_v7 = vmul.f32 %v4111_v3, %v1359_v0 }
 0x1f9   : > { %v1484_v40 = vmul.f32 0.2, %v1420_v52  ;;  %vm1452_vm2 = vcmp.ge.f32.partialorder %v1420_v52, 0.0  ;;  %v1423_v24 = vadd.f32 %v4123_v45, %v1391_v7 }
 0x1fb   : > { %v1516_v33 = vsel %vm1452_vm2, %v1420_v52, %v1484_v40  ;;  %v1487_v9 = vmul.f32 0.2, %v1423_v24  ;;  %vm1455_vm5 = vcmp.ge.f32.partialorder %v1423_v24, 0.0 }
 0x1fc   : > { %v1535_v21 = vpack.c.bf16 %v1517_v47, %v1516_v33 }
 0x1fd   : > { %v4463_v26 = vpop.f32.mrf.mxu1  ;;  %v1519_v47 = vsel %vm1455_vm5, %v1423_v24, %v1487_v9 }
 0x1ff   : > { %v4498_v32 = vpop.f32.mrf.mxu2 }
 0x201   : > { %1944 = vmatmul.bf16.gmra.mxu2 %v1534_v15  ;;  %v3278_v15 = vunpack.c.l.bf16 %v3315_v19  ;;  %1677 = vmatmul.bf16.gmra.mxu0 %v4115_v34 }
 0x203   : > { %v1326_v41 = vsub.f32 %v3278_v15, %v3997_v8  ;;  %v3316_v15 = vld [vmem:[%s4092_s26 + $0x78] sm:$0xff]  }
 0x204   : > { %v3282_v39 = vunpack.c.l.bf16 %v3316_v15 }
 0x205   : > { %v4473_v56 = vpop.f32.mrf.mxu1  ;;  %v1358_v31 = vmul.f32 %v1326_v41, %v4108_v59  ;;  %v3283_v41 = vunpack.c.h.bf16 %v3316_v15 }
 0x206   : > { %v2148_v48 = vpack.c.bf16 %v4473_v56, %v4463_v26  ;;  %v1328_v62 = vsub.f32 %v3282_v39, %v3997_v8  ;;  %v5002_v26 = vpack.c.bf16 %v4430_v43, %v4414_v20  ;;  %v2985_v56 = vld [vmem:[%s4993_s15 + $0x8] sm:$0xf0]  ;;  %v3131_v20 = vld [vmem:[%s4990_s12 + $0x38] sm:$0xff] }
 0x207   : > { %v1390_v35 = vmul.f32 %v4111_v3, %v1358_v31  ;;  %v4511_v33 = vpop.f32.mrf.mxu2  ;;  %v1329_v31 = vsub.f32 %v3283_v41, %v3997_v8 }
 0x209   : > { %v1422_v52 = vadd.f32 %v4123_v45, %v1390_v35  ;;  %v1360_v35 = vmul.f32 %v1328_v62, %v4108_v59  ;;  %v1361_v7 = vmul.f32 %v1329_v31, %v4108_v59  ;;  %v3119_v62 = vld [vmem:[%s4988_s10 + $0x18] sm:$0xff] }
 0x20a   : > { %2221 = vmatpush.bf16.msrb.mxu1 %v3119_v62 }
 0x20b   : > { %v1486_v40 = vmul.f32 0.2, %v1422_v52  ;;  %vm1454_vm4 = vcmp.ge.f32.partialorder %v1422_v52, 0.0  ;;  %v1392_v34 = vmul.f32 %v4524_v6, %v1360_v35  ;;  %v3118_v35 = vld [vmem:[%s4988_s10 + $0x10] sm:$0xff] }
 0x20d   : > { %v4486_v61 = vpop.f32.mrf.mxu1  ;;  %v1518_v3 = vsel %vm1454_vm4, %v1422_v52, %v1486_v40  ;;  %v1393_v52 = vmul.f32 %v4524_v6, %v1361_v7  ;;  %v1424_v40 = vadd.f32 %v4123_v45, %v1392_v34  ;;  %v1238_v34 = vmul.f32 %v4108_v59, %v4000_v46  ;;  %v4562_v46 = vld [vmem:[%s3941_s19] ss:$0 sm:$0xff] }
 0x20e   : > { %2222 = vmatpush.bf16.msrb.mxu1 %v3118_v35 }
 0x20f   : > { %v4519_v0 = vpop.f32.mrf.mxu2  ;;  %v1425_v9 = vadd.f32 %v4123_v45, %v1393_v52  ;;  %vm1456_vm6 = vcmp.ge.f32.partialorder %v1424_v40, 0.0  ;;  %v4538_v45 = vpop.f32.mrf.mxu0  ;;  %v1239_v52 = vmul.f32 %v4108_v59, %v4003_v58 }
 0x211   : > { %1949 = vmatmul.bf16.gmra.mxu2 %v1535_v21  ;;  %v1536_v21 = vpack.c.bf16 %v1519_v47, %v1518_v3  ;;  %v1488_v3 = vmul.f32 0.2, %v1424_v40  ;;  %v1489_v47 = vmul.f32 0.2, %v1425_v9  ;;  %vm1457_vm7 = vcmp.ge.f32.partialorder %v1425_v9, 0.0  ;;  %1682 = vmatmul.bf16.gmra.mxu0 %v4144_v42  ;;  %v3117_v42 = vld [vmem:[%s4988_s10 + $0x8] sm:$0xff] }
 0x212   : > { %2223 = vmatpush.bf16.msrb.mxu1 %v3117_v42 }
 0x213   : > { %v1521_v15 = vsel %vm1457_vm7, %v1425_v9, %v1489_v47  ;;  %v2983_v9 = vld [vmem:[%s4993_s15] sm:$0xf]  ;;  %v1250_v47 = vmul.f32 %v4524_v6, %v1238_v34 }
 0x215   : > { %v4493_v53 = vpop.f32.mrf.mxu1  ;;  %v1262_v58 = vadd.f32 %v4562_v46, %v1250_v47 }
 0x216   : > { %2224 = vmatpush.bf16.msrb.mxu1 %v3116_v5  ;;  %v2991_v5 = vld [vmem:[%s4993_s15 + $0x10] sm:$0xf] }
 0x217   : > { %v4530_v8 = vpop.f32.mrf.mxu2  ;;  %v4566_v35 = vpop.f32.mrf.mxu0  ;;  %v1278_v34 = vmul.f32 0.2, %v1262_v58  ;;  %vm1270_vm8 = vcmp.ge.f32.partialorder %v1262_v58, 0.0 }
 0x21d   : > { %v4504_v44 = vpop.f32.mrf.mxu1 }
 0x21f   : > { %v4536_v31 = vpop.f32.mrf.mxu2 }
 0x221   : > { %1954 = vmatmul.bf16.gmra.mxu2 %v1536_v21  ;;  %v1520_v21 = vsel %vm1456_vm6, %v1424_v40, %v1488_v3  ;;  %v3109_v3 = vld [vmem:[%s4993_s15 + $0x4] sm:$0xf0]  ;;  %1687 = vmatmul.bf16.gmra.mxu0 %v4170_v14  ;;  %v1286_v14 = vsel %vm1270_vm8, %v1262_v58, %v1278_v34 }
 0x222   : > { %v1537_v39 = vpack.c.bf16 %v1521_v15, %v1520_v21  ;;  %v1251_v21 = vmul.f32 %v4524_v6, %v1239_v52  ;;  %v2984_v15 = vor.u32 %v3109_v3, %v2983_v9  ;;  %v3139_v3 = vld [vmem:[%s4991_s13 + $0x38] sm:$0xff] }
 0x223   : > { %2653 = vmatpush.bf16.msrb.mxu0 %v3139_v3  ;;  %v1254_v3 = vmul.f32 %v4524_v6, %v1242_v55 }
 0x225   : > { %v4514_v19 = vpop.f32.mrf.mxu1 }
 0x227   : > { %v4550_v40 = vpop.f32.mrf.mxu2  ;;  %2654 = vmatpush.bf16.msrb.mxu0 %v3138_v49 }
 0x22d   : > { %v1802_v24 = vpop.f32.mrf.mxu1 }
 0x231   : > { %1959 = vmatmul.bf16.gmra.mxu2 %v1537_v39  ;;  %v1263_v39 = vadd.f32 %v4562_v46, %v1251_v21  ;;  %v2150_v21 = vpack.c.bf16 %v4514_v19, %v4504_v44  ;;  %v2149_v44 = vpack.c.bf16 %v4493_v53, %v4486_v61  ;;  %1692 = vmatmul.bf16.gmra.mxu0 %v4196_v2  ;;  %v3108_v2 = vld [vmem:[%s4993_s15 + $0x4] sm:$0xf] }
 0x233   : > { %v1279_v36 = vmul.f32 0.2, %v1263_v39  ;;  %vm1271_vm9 = vcmp.ge.f32.partialorder %v1263_v39, 0.0 }
 0x235   : > { %v1804_v41 = vpop.f32.mrf.mxu1  ;;  %v1287_v52 = vsel %vm1271_vm9, %v1263_v39, %v1279_v36  ;;  %v3111_v36 = vld [vmem:[%s4993_s15 + $0x14] sm:$0xf0] }
 0x236   : > { %v1294_v9 = vpack.c.bf16 %v1287_v52, %v1286_v14  ;;  %v2151_v47 = vpack.c.bf16 %v1804_v41, %v1802_v24  ;;  %v1240_v24 = vmul.f32 %v4108_v59, %v4006_v16  ;;  %v1241_v41 = vmul.f32 %v4108_v59, %v4017_v10 }
 0x238   : > { %2225 = vmatmul.bf16.vlgmr.msrb.gmra.mxu1 %v1294_v9  ;;  %v1252_v58 = vmul.f32 %v4524_v6, %v1240_v24  ;;  %v1253_v39 = vmul.f32 %v4524_v6, %v1241_v41  ;;  %v3130_v41 = vld [vmem:[%s4990_s12 + $0x30] sm:$0xff] }
 0x23a   : > { %v1265_v16 = vadd.f32 %v4562_v46, %v1253_v39  ;;  %v3129_v39 = vld [vmem:[%s4990_s12 + $0x28] sm:$0xff] }
 0x23c   : > { %v1281_v14 = vmul.f32 0.2, %v1265_v16  ;;  %vm1273_vm11 = vcmp.ge.f32.partialorder %v1265_v16, 0.0 }
 0x23d   : > { %v1807_v7 = vpop.f32.mrf.mxu1 }
 0x23e   : > { %v1289_v61 = vsel %vm1273_vm11, %v1265_v16, %v1281_v14  ;;  %v3110_v14 = vld [vmem:[%s4993_s15 + $0x14] sm:$0xf] }
 0x241   : > { %2294 = vmatmul.bf16.vlgmr.msrb.gmra.mxu2 %v2984_v15  ;;  %v4578_v15 = vpop.f32.mrf.mxu0  ;;  %1697 = vmatmul.bf16.gmra.mxu0 %v4224_v27 }
 0x245   : > { %v1809_v62 = vpop.f32.mrf.mxu1 }
 0x246   : > { %v2152_v42 = vpack.c.bf16 %v1809_v62, %v1807_v7  ;;  %v4574_v7 = vpop.f32.mrf.mxu2  ;;  %v2992_v62 = vor.u32 %v3111_v36, %v2991_v5 }
 0x248   : > { %2315 = vmatpush.bf16.msra.mxu3 %v2152_v42  ;;  %v1264_v42 = vadd.f32 %v4562_v46, %v1252_v58 }
 0x249   : > { %v4602_v53 = vpop.f32.mrf.mxu0 }
 0x24a   : > { %v1280_v34 = vmul.f32 0.2, %v1264_v42  ;;  %vm1272_vm10 = vcmp.ge.f32.partialorder %v1264_v42, 0.0 }
 0x24c   : > { %2316 = vmatpush.bf16.msra.mxu3 %v2151_v47  ;;  %v1288_v10 = vsel %vm1272_vm10, %v1264_v42, %v1280_v34  ;;  %v3128_v34 = vld [vmem:[%s4990_s12 + $0x20] sm:$0xff] }
 0x24d   : > { %v1295_v52 = vpack.c.bf16 %v1289_v61, %v1288_v10  ;;  %v2993_v10 = vld [vmem:[%s4993_s15 + $0x18] sm:$0xf0]  ;;  %v3007_v61 = vld [vmem:[%s4993_s15 + $0x30] sm:$0xf] }
 0x24e   : > { %v4592_v19 = vpop.f32.mrf.mxu2 }
 0x24f   : > { %2230 = vmatmul.bf16.gmra.mxu1 %v1295_v52  ;;  %v3115_v52 = vld [vmem:[%s4993_s15 + $0x34] sm:$0xf0] }
 0x250   : > { %2317 = vmatpush.bf16.msra.mxu3 %v2150_v21  ;;  %v2988_v21 = vor.u32 %v3108_v2, %v2985_v56  ;;  %v1244_v2 = vmul.f32 %v4108_v59, %v4037_v12  ;;  %v3127_v56 = vld [vmem:[%s4990_s12 + $0x18] sm:$0xff] }
 0x251   : > { %2299 = vmatmul.bf16.gmra.mxu2 %v2992_v62  ;;  %v4635_v5 = vpop.f32.mrf.mxu0  ;;  %1702 = vmatmul.bf16.gmra.mxu0 %v4248_v30  ;;  %v3125_v30 = vld [vmem:[%s4990_s12 + $0x8] sm:$0xff] }
 0x254   : > { %2318 = vmatpush.bf16.msra.mxu3 %v2149_v44 }
 0x256   : > { %v4604_v9 = vpop.f32.mrf.mxu2 }
 0x258   : > { %2319 = vmatpush.bf16.msra.mxu3 %v2148_v48  ;;  %v2999_v48 = vld [vmem:[%s4993_s15 + $0x20] sm:$0xf] }
 0x259   : > { %v3000_v36 = vor.u32 %v3113_v51, %v2999_v48  ;;  %v4654_v16 = vpop.f32.mrf.mxu0  ;;  %v1256_v51 = vmul.f32 %v4524_v6, %v1244_v2  ;;  %v1966_v2 = vadd.f32 %v4390_v11, %v4566_v35  ;;  %v1967_v35 = vadd.f32 %v4405_v54, %v4578_v15 }
 0x25b   : > { %v1268_v12 = vadd.f32 %v4562_v46, %v1256_v51 }
 0x25c   : > { %2320 = vmatpush.bf16.msra.mxu3 %v2147_v13  ;;  %v1243_v13 = vmul.f32 %v4108_v59, %v4031_v63  ;;  %v1266_v63 = vadd.f32 %v4562_v46, %v1254_v3 }
 0x25d   : > { %vm1276_vm14 = vcmp.ge.f32.partialorder %v1268_v12, 0.0 }
 0x25e   : > { %v4631_v43 = vpop.f32.mrf.mxu2  ;;  %v1255_v47 = vmul.f32 %v4524_v6, %v1243_v13  ;;  %v1282_v44 = vmul.f32 0.2, %v1266_v63  ;;  %vm1274_vm12 = vcmp.ge.f32.partialorder %v1266_v63, 0.0  ;;  %v2996_v13 = vor.u32 %v3110_v14, %v2993_v10 }
 0x260   : > { %2321 = vmatpush.bf16.msra.mxu3 %v5002_v26  ;;  %v1267_v24 = vadd.f32 %v4562_v46, %v1255_v47  ;;  %v1290_v27 = vsel %vm1274_vm12, %v1266_v63, %v1282_v44  ;;  %v1245_v26 = vmul.f32 %v4108_v59, %v4046_v22  ;;  %v3126_v22 = vld [vmem:[%s4990_s12 + $0x10] sm:$0xff]  ;;  %v1284_v59 = vmul.f32 0.2, %v1268_v12  ;;  %v3124_v63 = vld [vmem:[%s4990_s12] sm:$0xff] }
 0x261   : > { %2304 = vmatmul.bf16.gmra.mxu2 %v3000_v36  ;;  %1707 = vmatmul.bf16.gmra.mxu0 %v4289_v60 }
 0x262   : > { %v1283_v58 = vmul.f32 0.2, %v1267_v24  ;;  %vm1275_vm13 = vcmp.ge.f32.partialorder %v1267_v24, 0.0  ;;  %v1257_v55 = vmul.f32 %v4524_v6, %v1245_v26  ;;  %v1292_v6 = vsel %vm1276_vm14, %v1268_v12, %v1284_v59 }
 0x263   : > { %v1968_v12 = vadd.f32 %v4424_v50, %v4602_v53 }
 0x264   : > { %2322 = vmatpush.bf16.msra.mxu3 %v5003_v38  ;;  %v1291_v4 = vsel %vm1275_vm13, %v1267_v24, %v1283_v58  ;;  %v1269_v3 = vadd.f32 %v4562_v46, %v1257_v55  ;;  %v3112_v24 = vld [vmem:[%s4993_s15 + $0x24] sm:$0xf] }
 0x265   : > { %v1296_v62 = vpack.c.bf16 %v1291_v4, %v1290_v27  ;;  %v3137_v27 = vld [vmem:[%s4991_s13 + $0x28] sm:$0xff] }
 0x266   : > { %v4652_v42 = vpop.f32.mrf.mxu2  ;;  %v1285_v47 = vmul.f32 0.2, %v1269_v3  ;;  %vm1277_vm15 = vcmp.ge.f32.partialorder %v1269_v3, 0.0  ;;  %2655 = vmatpush.bf16.msrb.mxu0 %v3137_v27 }
 0x267   : > { %2323 = vmatmul.bf16.vlgmr.msra.gmra.mxu3 %v2988_v21  ;;  %2235 = vmatmul.bf16.gmra.mxu1 %v1296_v62  ;;  %v4688_v21 = vpop.f32.mrf.mxu0  ;;  %v3114_v62 = vld [vmem:[%s4993_s15 + $0x34] sm:$0xf] }
 0x268   : > { %2464 = vmatpush.bf16.msrb.mxu3 %v3131_v20  ;;  %v3008_v20 = vor.u32 %v3115_v52, %v3007_v61  ;;  %v1293_v36 = vsel %vm1277_vm15, %v1269_v3, %v1285_v47  ;;  %v1965_v61 = vadd.f32 %v4377_v23, %v4538_v45  ;;  %v4732_v52 = vld [vmem:[%s4987_s9] ss:$0 sm:$0xff] }
 0x269   : > { %v1297_v46 = vpack.c.bf16 %v1293_v36, %v1292_v6  ;;  %v3136_v3 = vld [vmem:[%s4991_s13 + $0x20] sm:$0xff]  ;;  %v2003_v59 = vadd.f32 %v4732_v52, %v1967_v35  ;;  %v2004_v47 = vadd.f32 %v4732_v52, %v1968_v12 }
 0x26a   : > { %v2001_v26 = vadd.f32 %v4732_v52, %v1965_v61  ;;  %2656 = vmatpush.bf16.msrb.mxu0 %v3136_v3 }
 0x26b   : > { %v2068_v6 = vmul.f32 0.2, %v2004_v47  ;;  %vm2035_vm2 = vcmp.ge.f32.partialorder %v2003_v59, 0.0  ;;  %vm2036_vm3 = vcmp.ge.f32.partialorder %v2004_v47, 0.0 }
 0x26c   : > { %2465 = vmatpush.bf16.msrb.mxu3 %v3130_v41  ;;  %v3001_v41 = vld [vmem:[%s4993_s15 + $0x28] sm:$0xf0]  ;;  %vm2033_vm0 = vcmp.ge.f32.partialorder %v2001_v26, 0.0 }
 0x26d   : > { %v3004_v49 = vor.u32 %v3112_v24, %v3001_v41  ;;  %v2100_v50 = vsel %vm2036_vm3, %v2004_v47, %v2068_v6  ;;  %v3132_v47 = vld [vmem:[%s4991_s13] sm:$0xff] }
 0x26e   : > { %v4678_v48 = vpop.f32.mrf.mxu2 }
 0x26f   : > { %v4704_v44 = vpop.f32.mrf.mxu0 }
 0x270   : > { %2466 = vmatpush.bf16.msrb.mxu3 %v3129_v39 }
 0x271   : > { %2309 = vmatmul.bf16.gmra.mxu2 %v3008_v20  ;;  %1712 = vmatmul.bf16.gmra.mxu0 %v4338_v57  ;;  %v2065_v57 = vmul.f32 0.2, %v2001_v26 }
 0x273   : > { %v2097_v23 = vsel %vm2033_vm0, %v2001_v26, %v2065_v57 }
 0x274   : > { %2467 = vmatpush.bf16.msrb.mxu3 %v3128_v34  ;;  %v3009_v34 = vld [vmem:[%s4993_s15 + $0x38] sm:$0xf0] }
 0x275   : > { %v3012_v60 = vor.u32 %v3114_v62, %v3009_v34 }
 0x276   : > { %v4693_v38 = vpop.f32.mrf.mxu2 }
 0x277   : > { %2328 = vmatmul.bf16.gmra.mxu3 %v2996_v13  ;;  %2240 = vmatmul.bf16.gmra.mxu1 %v1297_v46  ;;  %v4714_v39 = vpop.f32.mrf.mxu0  ;;  %v1970_v46 = vadd.f32 %v4447_v25, %v4654_v16  ;;  %v1971_v25 = vadd.f32 %v4457_v37, %v4688_v21  ;;  %v3134_v37 = vld [vmem:[%s4991_s13 + $0x10] sm:$0xff] }
 0x278   : > { %2468 = vmatpush.bf16.msrb.mxu3 %v3127_v56  ;;  %v2002_v56 = vadd.f32 %v4732_v52, %v1966_v2  ;;  %v1973_v12 = vadd.f32 %v4480_v28, %v4714_v39 }
 0x279   : > { %v2006_v41 = vadd.f32 %v4732_v52, %v1970_v46  ;;  %v2007_v2 = vadd.f32 %v4732_v52, %v1971_v25 }
 0x27a   : > { %v2066_v55 = vmul.f32 0.2, %v2002_v56  ;;  %vm2034_vm1 = vcmp.ge.f32.partialorder %v2002_v56, 0.0 }
 0x27b   : > { %v2070_v62 = vmul.f32 0.2, %v2006_v41  ;;  %vm2038_vm5 = vcmp.ge.f32.partialorder %v2006_v41, 0.0  ;;  %vm2039_vm6 = vcmp.ge.f32.partialorder %v2007_v2, 0.0 }
 0x27c   : > { %2469 = vmatpush.bf16.msrb.mxu3 %v3126_v22  ;;  %v2098_v45 = vsel %vm2034_vm1, %v2002_v56, %v2066_v55  ;;  %v3135_v56 = vld [vmem:[%s4991_s13 + $0x18] sm:$0xff]  ;;  %v2071_v55 = vmul.f32 0.2, %v2007_v2 }
 0x27d   : > { %v2380_v11 = vpack.c.bf16 %v2098_v45, %v2097_v23  ;;  %2657 = vmatpush.bf16.msrb.mxu0 %v3135_v56  ;;  %v3133_v45 = vld [vmem:[%s4991_s13 + $0x8] sm:$0xff] }
 0x27e   : > { %v4706_v58 = vpop.f32.mrf.mxu2  ;;  %v2103_v21 = vsel %vm2039_vm6, %v2007_v2, %v2071_v55  ;;  %v4815_v2 = vld [vmem:[%s4989_s11] ss:$0 sm:$0xff] }
 0x27f   : > { %v4725_v10 = vpop.f32.mrf.mxu0 }
 0x280   : > { %2470 = vmatpush.bf16.msrb.mxu3 %v3125_v30  ;;  %v1969_v30 = vadd.f32 %v4437_v18, %v4635_v5  ;;  %v1972_v5 = vadd.f32 %v4470_v29, %v4704_v44  ;;  %v1974_v3 = vadd.f32 %v4490_v17, %v4725_v10 }
 0x281   : > { %1717 = vmatmul.bf16.gmra.mxu0 %v4363_v1  ;;  %v2067_v1 = vmul.f32 0.2, %v2003_v59 }
 0x282   : > { %v2005_v24 = vadd.f32 %v4732_v52, %v1969_v30  ;;  %v2008_v26 = vadd.f32 %v4732_v52, %v1972_v5  ;;  %2658 = vmatpush.bf16.msrb.mxu0 %v3134_v37  ;;  %v2010_v6 = vadd.f32 %v4732_v52, %v1974_v3 }
 0x283   : > { %v2099_v54 = vsel %vm2035_vm2, %v2003_v59, %v2067_v1  ;;  %v2009_v1 = vadd.f32 %v4732_v52, %v1973_v12 }
 0x284   : > { %2471 = vmatpush.bf16.msrb.mxu3 %v3124_v63  ;;  %v2381_v53 = vpack.c.bf16 %v2100_v50, %v2099_v54  ;;  %v2069_v27 = vmul.f32 0.2, %v2005_v24  ;;  %vm2037_vm4 = vcmp.ge.f32.partialorder %v2005_v24, 0.0  ;;  %v2072_v23 = vmul.f32 0.2, %v2008_v26 }
 0x285   : > { %vm2040_vm7 = vcmp.ge.f32.partialorder %v2008_v26, 0.0  ;;  %v2073_v50 = vmul.f32 0.2, %v2009_v1  ;;  %vm2041_vm8 = vcmp.ge.f32.partialorder %v2009_v1, 0.0  ;;  %vm2042_vm9 = vcmp.ge.f32.partialorder %v2010_v6, 0.0 }
 0x286   : > { %v4712_v4 = vpop.f32.mrf.mxu2  ;;  %v2101_v34 = vsel %vm2037_vm4, %v2005_v24, %v2069_v27  ;;  %v2104_v44 = vsel %vm2040_vm7, %v2008_v26, %v2072_v23  ;;  %2659 = vmatpush.bf16.msrb.mxu0 %v3133_v45 }
 0x287   : > { %2333 = vmatmul.bf16.gmra.mxu3 %v3004_v49  ;;  %v4740_v13 = vpop.f32.mrf.mxu0  ;;  %v2105_v17 = vsel %vm2041_vm8, %v2009_v1, %v2073_v50 }
 0x288   : > { %v1975_v24 = vadd.f32 %v4498_v32, %v4740_v13 }
 0x28a   : > { %2660 = vmatpush.bf16.msrb.mxu0 %v3132_v47 }
 0x28e   : > { %v4722_v14 = vpop.f32.mrf.mxu2 }
 0x28f   : > { %v4752_v22 = vpop.f32.mrf.mxu0 }
 0x296   : > { %v4738_v51 = vpop.f32.mrf.mxu2 }
 0x297   : > { %2338 = vmatmul.bf16.gmra.mxu3 %v3012_v60  ;;  %v4758_v15 = vpop.f32.mrf.mxu0  ;;  %v2102_v60 = vsel %vm2038_vm5, %v2006_v41, %v2070_v62  ;;  %v1976_v41 = vadd.f32 %v4511_v33, %v4752_v22 }
 0x298   : > { %v2382_v18 = vpack.c.bf16 %v2102_v60, %v2101_v34  ;;  %v2011_v34 = vadd.f32 %v4732_v52, %v1975_v24  ;;  %v1977_v12 = vadd.f32 %v4519_v0, %v4758_v15 }
 0x299   : > { %v2012_v60 = vadd.f32 %v4732_v52, %v1976_v41 }
 0x29a   : > { %v2075_v26 = vmul.f32 0.2, %v2011_v34  ;;  %vm2043_vm10 = vcmp.ge.f32.partialorder %v2011_v34, 0.0 }
 0x29b   : > { %v2076_v32 = vmul.f32 0.2, %v2012_v60  ;;  %vm2044_vm11 = vcmp.ge.f32.partialorder %v2012_v60, 0.0 }
 0x29c   : > { %v2107_v55 = vsel %vm2043_vm10, %v2011_v34, %v2075_v26 }
 0x29d   : > { %v2108_v23 = vsel %vm2044_vm11, %v2012_v60, %v2076_v32 }
 0x29e   : > { %v4742_v20 = vpop.f32.mrf.mxu2 }
 0x29f   : > { %v4768_v49 = vpop.f32.mrf.mxu0 }
 0x2a0   : > { %v1978_v3 = vadd.f32 %v4530_v8, %v4768_v49 }
 0x2a6   : > { %v4756_v36 = vpop.f32.mrf.mxu2 }
 0x2a7   : > { %2472 = vmatmul.bf16.vlgmr.msrb.gmra.mxu3 %v2380_v11  ;;  %v4776_v16 = vpop.f32.mrf.mxu0  ;;  %v2383_v11 = vpack.c.bf16 %v2104_v44, %v2103_v21 }
 0x2a8   : > { %v1979_v26 = vadd.f32 %v4536_v31, %v4776_v16 }
 0x2ae   : > { %v4764_v63 = vpop.f32.mrf.mxu2 }
 0x2af   : > { %v4788_v29 = vpop.f32.mrf.mxu0 }
 0x2b0   : > { %v1980_v32 = vadd.f32 %v4550_v40, %v4788_v29 }
 0x2b5   : > { %v2226_v35 = vpop.f32.mrf.mxu1 }
 0x2b6   : > { %v4770_v61 = vpop.f32.mrf.mxu2 }
 0x2b7   : > { %2477 = vmatmul.bf16.gmra.mxu3 %v2381_v53  ;;  %v4802_v54 = vpop.f32.mrf.mxu0  ;;  %v2074_v53 = vmul.f32 0.2, %v2010_v6 }
 0x2b9   : > { %v2106_v10 = vsel %vm2042_vm9, %v2010_v6, %v2074_v53  ;;  %v2013_v53 = vadd.f32 %v4732_v52, %v1977_v12 }
 0x2ba   : > { %v2384_v46 = vpack.c.bf16 %v2106_v10, %v2105_v17 }
 0x2bb   : > { %v2077_v10 = vmul.f32 0.2, %v2013_v53  ;;  %vm2045_vm14 = vcmp.ge.f32.partialorder %v2013_v53, 0.0 }
 0x2bd   : > { %v2228_v28 = vpop.f32.mrf.mxu1 }
 0x2be   : > { %v4783_v57 = vpop.f32.mrf.mxu2 }
 0x2bf   : > { %v4804_v30 = vpop.f32.mrf.mxu0 }
 0x2c6   : > { %v2295_v59 = vpop.f32.mrf.mxu2 }
 0x2c7   : > { %2482 = vmatmul.bf16.gmra.mxu3 %v2382_v18  ;;  %v2296_v27 = vadd.f32 %v2295_v59, %v2226_v35  ;;  %v4817_v13 = vpop.f32.mrf.mxu0  ;;  %v2385_v35 = vpack.c.bf16 %v2108_v23, %v2107_v55 }
 0x2cc   : > { %v2231_v62 = vpop.f32.mrf.mxu1 }
 0x2ce   : > { %v2297_v39 = vpop.f32.mrf.mxu2 }
 0x2cf   : > { %v2298_v33 = vadd.f32 %v2297_v39, %v2228_v28  ;;  %v4825_v47 = vpop.f32.mrf.mxu0  ;;  %v2014_v28 = vadd.f32 %v4732_v52, %v1978_v3 }
 0x2d1   : > { %v2078_v8 = vmul.f32 0.2, %v2014_v28  ;;  %vm2046_vm15 = vcmp.ge.f32.partialorder %v2014_v28, 0.0 }
 0x2d4   : > { %v2233_v21 = vpop.f32.mrf.mxu1 }
 0x2d6   : > { %v2300_v25 = vpop.f32.mrf.mxu2 }
 0x2d7   : > { %2487 = vmatmul.bf16.gmra.mxu3 %v2383_v11  ;;  %v2301_v50 = vadd.f32 %v2300_v25, %v2231_v62  ;;  %v2110_v62 = vsel %vm2046_vm15, %v2014_v28, %v2078_v8  ;;  %v4830_v34 = vpop.f32.mrf.mxu0 }
 0x2de   : > { %v2302_v44 = vpop.f32.mrf.mxu2 }
 0x2df   : > { %v4839_v31 = vpop.f32.mrf.mxu0 }
 0x2e4   : > { %v2236_v15 = vpop.f32.mrf.mxu1 }
 0x2e6   : > { %v2305_v49 = vpop.f32.mrf.mxu2 }
 0x2e7   : > { %2492 = vmatmul.bf16.gmra.mxu3 %v2384_v46  ;;  %v2303_v46 = vadd.f32 %v2302_v44, %v2233_v21  ;;  %v2306_v55 = vadd.f32 %v2305_v49, %v2236_v15  ;;  %v2015_v21 = vadd.f32 %v4732_v52, %v1979_v26  ;;  %v2016_v44 = vadd.f32 %v4732_v52, %v1980_v32 }
 0x2e8   : > { %v1982_v15 = vadd.f32 %v4592_v19, %v4804_v30 }
 0x2e9   : > { %v2079_v40 = vmul.f32 0.2, %v2015_v21  ;;  %v2080_v29 = vmul.f32 0.2, %v2016_v44  ;;  %vm2047_vm2 = vcmp.ge.f32.partialorder %v2015_v21, 0.0  ;;  %vm2048_vm3 = vcmp.ge.f32.partialorder %v2016_v44, 0.0 }
 0x2ea   : > { %v2324_v18 = vpop.f32.mrf.mxu3 }
 0x2eb   : > { %v2325_v5 = vadd.f32 %v2324_v18, %v2296_v27  ;;  %v2109_v27 = vsel %vm2045_vm14, %v2013_v53, %v2077_v10  ;;  %v4847_v10 = vpop.f32.mrf.mxu0 }
 0x2ed   : > { %v2348_v22 = vadd.f32 %v4815_v2, %v2325_v5  ;;  %v2386_v5 = vpack.c.bf16 %v2110_v62, %v2109_v27  ;;  %v2018_v27 = vadd.f32 %v4732_v52, %v1982_v15 }
 0x2ef   : > { %v2364_v45 = vmul.f32 0.2, %v2348_v22  ;;  %vm2356_vm12 = vcmp.ge.f32.partialorder %v2348_v22, 0.0  ;;  %v2082_v30 = vmul.f32 0.2, %v2018_v27  ;;  %vm2050_vm7 = vcmp.ge.f32.partialorder %v2018_v27, 0.0 }
 0x2f1   : > { %v2372_v1 = vsel %vm2356_vm12, %v2348_v22, %v2364_v45  ;;  %v2238_v22 = vpop.f32.mrf.mxu1 }
 0x2f2   : > { %v2326_v56 = vpop.f32.mrf.mxu3 }
 0x2f3   : > { %v2327_v37 = vadd.f32 %v2326_v56, %v2298_v33  ;;  %v2307_v56 = vpop.f32.mrf.mxu2 }
 0x2f5   : > { %v2349_v11 = vadd.f32 %v4815_v2, %v2327_v37 }
 0x2f7   : > { %vm2357_vm13 = vcmp.ge.f32.partialorder %v2349_v11, 0.0  ;;  %v2365_v59 = vmul.f32 0.2, %v2349_v11  ;;  %2497 = vmatmul.bf16.gmra.mxu3 %v2385_v35  ;;  %v2308_v35 = vadd.f32 %v2307_v56, %v2238_v22  ;;  %v2114_v22 = vsel %vm2050_vm7, %v2018_v27, %v2082_v30 }
 0x2f8   : > { %v1987_v27 = vadd.f32 %v4693_v38, %v4847_v10 }
 0x2f9   : > { %v2373_v6 = vsel %vm2357_vm13, %v2349_v11, %v2365_v59  ;;  %v2241_v3 = vpop.f32.mrf.mxu1 }
 0x2fa   : > { %v2329_v39 = vpop.f32.mrf.mxu3  ;;  %v2585_v17 = vpack.c.bf16 %v2373_v6, %v2372_v1  ;;  %v2111_v1 = vsel %vm2047_vm2, %v2015_v21, %v2079_v40  ;;  %v2112_v6 = vsel %vm2048_vm3, %v2016_v44, %v2080_v29  ;;  %v1983_v21 = vadd.f32 %v4604_v9, %v4817_v13 }
 0x2fb   : > { %v2330_v0 = vadd.f32 %v2329_v39, %v2301_v50  ;;  %v2310_v50 = vpop.f32.mrf.mxu2  ;;  %v1984_v44 = vadd.f32 %v4631_v43, %v4825_v47 }
 0x2fc   : > { %2661 = vmatmul.bf16.vlgmr.msrb.gmra.mxu0 %v2585_v17  ;;  %v2387_v17 = vpack.c.bf16 %v2112_v6, %v2111_v1  ;;  %v2311_v49 = vadd.f32 %v2310_v50, %v2241_v3 }
 0x2fd   : > { %v2350_v24 = vadd.f32 %v4815_v2, %v2330_v0  ;;  %v1981_v0 = vadd.f32 %v4574_v7, %v4802_v54  ;;  %v2020_v29 = vadd.f32 %v4732_v52, %v1984_v44 }
 0x2ff   : > { %v2366_v18 = vmul.f32 0.2, %v2350_v24  ;;  %vm2358_vm0 = vcmp.ge.f32.partialorder %v2350_v24, 0.0  ;;  %vm2052_vm11 = vcmp.ge.f32.partialorder %v2020_v29, 0.0 }
 0x301   : > { %v2374_v23 = vsel %vm2358_vm0, %v2350_v24, %v2366_v18  ;;  %v2243_v7 = vpop.f32.mrf.mxu1 }
 0x302   : > { %v2331_v41 = vpop.f32.mrf.mxu3 }
 0x303   : > { %v2332_v60 = vadd.f32 %v2331_v41, %v2303_v46  ;;  %v2017_v41 = vadd.f32 %v4732_v52, %v1981_v0  ;;  %v2312_v54 = vpop.f32.mrf.mxu2 }
 0x305   : > { %v2351_v25 = vadd.f32 %v4815_v2, %v2332_v60  ;;  %v2081_v19 = vmul.f32 0.2, %v2017_v41  ;;  %vm2049_vm6 = vcmp.ge.f32.partialorder %v2017_v41, 0.0 }
 0x307   : > { %v2367_v33 = vmul.f32 0.2, %v2351_v25  ;;  %2502 = vmatmul.bf16.gmra.mxu3 %v2386_v5  ;;  %vm2359_vm1 = vcmp.ge.f32.partialorder %v2351_v25, 0.0  ;;  %v1700_v5 = vpop.f32.mrf.mxu0 }
 0x309   : > { %v2375_v37 = vsel %vm2359_vm1, %v2351_v25, %v2367_v33  ;;  %v2313_v25 = vadd.f32 %v2312_v54, %v2243_v7  ;;  %v2113_v33 = vsel %vm2049_vm6, %v2017_v41, %v2081_v19  ;;  %v2023_v7 = vadd.f32 %v4732_v52, %v1987_v27 }
 0x30a   : > { %v2334_v45 = vpop.f32.mrf.mxu3  ;;  %v2586_v11 = vpack.c.bf16 %v2375_v37, %v2374_v23  ;;  %v2388_v37 = vpack.c.bf16 %v2114_v22, %v2113_v33 }
 0x30b   : > { %v2335_v16 = vadd.f32 %v2334_v45, %v2306_v55  ;;  %v2087_v30 = vmul.f32 0.2, %v2023_v7  ;;  %vm2055_vm14 = vcmp.ge.f32.partialorder %v2023_v7, 0.0 }
 0x30c   : > { %2666 = vmatmul.bf16.gmra.mxu0 %v2586_v11  ;;  %v4861_v11 = vld [vmem:[%s4992_s14] ss:$0 sm:$0xff] }
 0x30d   : > { %v2352_v12 = vadd.f32 %v4815_v2, %v2335_v16  ;;  %v2119_v38 = vsel %vm2055_vm14, %v2023_v7, %v2087_v30 }
 0x30f   : > { %v2368_v28 = vmul.f32 0.2, %v2352_v12  ;;  %vm2360_vm4 = vcmp.ge.f32.partialorder %v2352_v12, 0.0  ;;  %v1703_v13 = vpop.f32.mrf.mxu0 }
 0x310   : > { %v1989_v33 = vadd.f32 %v4712_v4, %v1703_v13 }
 0x311   : > { %v2376_v46 = vsel %vm2360_vm4, %v2352_v12, %v2368_v28  ;;  %v2084_v12 = vmul.f32 0.2, %v2020_v29  ;;  %v1985_v28 = vadd.f32 %v4652_v42, %v4830_v34 }
 0x312   : > { %v2336_v59 = vpop.f32.mrf.mxu3 }
 0x313   : > { %v2337_v53 = vadd.f32 %v2336_v59, %v2308_v35  ;;  %v2116_v1 = vsel %vm2052_vm11, %v2020_v29, %v2084_v12 }
 0x315   : > { %v2353_v39 = vadd.f32 %v4815_v2, %v2337_v53 }
 0x317   : > { %v2369_v8 = vmul.f32 0.2, %v2353_v39  ;;  %2507 = vmatmul.bf16.gmra.mxu3 %v2387_v17  ;;  %vm2361_vm5 = vcmp.ge.f32.partialorder %v2353_v39, 0.0  ;;  %v1705_v50 = vpop.f32.mrf.mxu0  ;;  %v2021_v17 = vadd.f32 %v4732_v52, %v1985_v28 }
 0x318   : > { %v1990_v22 = vadd.f32 %v4722_v14, %v1705_v50 }
 0x319   : > { %v2377_v24 = vsel %vm2361_vm5, %v2353_v39, %v2369_v8  ;;  %v1986_v39 = vadd.f32 %v4678_v48, %v4839_v31  ;;  %vm2053_vm12 = vcmp.ge.f32.partialorder %v2021_v17, 0.0 }
 0x31a   : > { %v2339_v62 = vpop.f32.mrf.mxu3  ;;  %v2587_v60 = vpack.c.bf16 %v2377_v24, %v2376_v46 }
 0x31b   : > { %v2340_v18 = vadd.f32 %v2339_v62, %v2311_v49  ;;  %v2022_v0 = vadd.f32 %v4732_v52, %v1986_v39  ;;  %v2085_v49 = vmul.f32 0.2, %v2021_v17  ;;  %v1988_v62 = vadd.f32 %v4706_v58, %v1700_v5 }
 0x31c   : > { %2671 = vmatmul.bf16.gmra.mxu0 %v2587_v60 }
 0x31d   : > { %v2354_v26 = vadd.f32 %v4815_v2, %v2340_v18  ;;  %v2086_v46 = vmul.f32 0.2, %v2022_v0  ;;  %vm2054_vm13 = vcmp.ge.f32.partialorder %v2022_v0, 0.0  ;;  %v2117_v34 = vsel %vm2053_vm12, %v2021_v17, %v2085_v49 }
 0x31e   : > { %v2024_v54 = vadd.f32 %v4732_v52, %v1988_v62 }
 0x31f   : > { %v2370_v55 = vmul.f32 0.2, %v2354_v26  ;;  %vm2362_vm8 = vcmp.ge.f32.partialorder %v2354_v26, 0.0  ;;  %v1708_v24 = vpop.f32.mrf.mxu0  ;;  %v2118_v41 = vsel %vm2054_vm13, %v2022_v0, %v2086_v46 }
 0x320   : > { %v2390_v31 = vpack.c.bf16 %v2118_v41, %v2117_v34  ;;  %vm2056_vm15 = vcmp.ge.f32.partialorder %v2024_v54, 0.0  ;;  %v1991_v29 = vadd.f32 %v4738_v51, %v1708_v24 }
 0x321   : > { %v2378_v16 = vsel %vm2362_vm8, %v2354_v26, %v2370_v55  ;;  %v2026_v55 = vadd.f32 %v4732_v52, %v1990_v22 }
 0x322   : > { %v2341_v32 = vpop.f32.mrf.mxu3  ;;  %v2027_v13 = vadd.f32 %v4732_v52, %v1991_v29 }
 0x323   : > { %v2342_v56 = vadd.f32 %v2341_v32, %v2313_v25  ;;  %v2088_v25 = vmul.f32 0.2, %v2024_v54  ;;  %vm2058_vm1 = vcmp.ge.f32.partialorder %v2026_v55, 0.0 }
 0x324   : > { %vm2059_vm2 = vcmp.ge.f32.partialorder %v2027_v13, 0.0 }
 0x325   : > { %v2355_v23 = vadd.f32 %v4815_v2, %v2342_v56  ;;  %v2019_v2 = vadd.f32 %v4732_v52, %v1983_v21  ;;  %v2120_v10 = vsel %vm2056_vm15, %v2024_v54, %v2088_v25  ;;  %v2025_v56 = vadd.f32 %v4732_v52, %v1989_v33 }
 0x326   : > { %v2391_v32 = vpack.c.bf16 %v2120_v10, %v2119_v38 }
 0x327   : > { %v2371_v45 = vmul.f32 0.2, %v2355_v23  ;;  %2512 = vmatmul.bf16.gmra.mxu3 %v2388_v37  ;;  %vm2363_vm9 = vcmp.ge.f32.partialorder %v2355_v23, 0.0  ;;  %v2083_v35 = vmul.f32 0.2, %v2019_v2  ;;  %vm2051_vm10 = vcmp.ge.f32.partialorder %v2019_v2, 0.0  ;;  %v1710_v60 = vpop.f32.mrf.mxu0 }
 0x328   : > { %v2089_v44 = vmul.f32 0.2, %v2025_v56  ;;  %vm2057_vm0 = vcmp.ge.f32.partialorder %v2025_v56, 0.0 }
 0x329   : > { %v2379_v40 = vsel %vm2363_vm9, %v2355_v23, %v2371_v45  ;;  %v2115_v59 = vsel %vm2051_vm10, %v2019_v2, %v2083_v35  ;;  %v2090_v45 = vmul.f32 0.2, %v2026_v55 }
 0x32a   : > { %v2473_v9 = vpop.f32.mrf.mxu3  ;;  %v2588_v43 = vpack.c.bf16 %v2379_v40, %v2378_v16  ;;  %v2389_v53 = vpack.c.bf16 %v2116_v1, %v2115_v59  ;;  %v2121_v4 = vsel %vm2057_vm0, %v2025_v56, %v2089_v44 }
 0x32b   : > { %v2474_v47 = vadd.f32 %v4861_v11, %v2473_v9  ;;  %v2122_v40 = vsel %vm2058_vm1, %v2026_v55, %v2090_v45  ;;  %v1992_v9 = vadd.f32 %v4742_v20, %v1710_v60 }
 0x32c   : > { %2676 = vmatmul.bf16.gmra.mxu0 %v2588_v43  ;;  %v2392_v2 = vpack.c.bf16 %v2122_v40, %v2121_v4 }
 0x32d   : > { %2553 = vst [vmem:[%s4868_s23] sm:$0xff] %v2474_v47  ;;  %v2028_v47 = vadd.f32 %v4732_v52, %v1992_v9 }
 0x32f   : > { %v1713_v58 = vpop.f32.mrf.mxu0  ;;  %v2092_v59 = vmul.f32 0.2, %v2028_v47  ;;  %vm2060_vm3 = vcmp.ge.f32.partialorder %v2028_v47, 0.0 }
 0x330   : > { %v1993_v28 = vadd.f32 %v4756_v36, %v1713_v58 }
 0x331   : > { %v2124_v20 = vsel %vm2060_vm3, %v2028_v47, %v2092_v59 }
 0x332   : > { %v2475_v3 = vpop.f32.mrf.mxu3  ;;  %v2029_v0 = vadd.f32 %v4732_v52, %v1993_v28 }
 0x333   : > { %v2476_v6 = vadd.f32 %v4861_v11, %v2475_v3  ;;  %v2091_v3 = vmul.f32 0.2, %v2027_v13 }
 0x334   : > { %vm2061_vm4 = vcmp.ge.f32.partialorder %v2029_v0, 0.0 }
 0x335   : > { %2554 = vst [vmem:[%s4868_s23 + $0x8] sm:$0xff] %v2476_v6  ;;  %v2123_v6 = vsel %vm2059_vm2, %v2027_v13, %v2091_v3 }
 0x337   : > { %2517 = vmatmul.bf16.gmra.mxu3 %v2389_v53  ;;  %v1715_v21 = vpop.f32.mrf.mxu0  ;;  %v2393_v53 = vpack.c.bf16 %v2124_v20, %v2123_v6 }
 0x338   : > { %v1994_v39 = vadd.f32 %v4764_v63, %v1715_v21  ;;  %v2093_v63 = vmul.f32 0.2, %v2029_v0 }
 0x33a   : > { %v2478_v15 = vpop.f32.mrf.mxu3 }
 0x33b   : > { %v2479_v8 = vadd.f32 %v4861_v11, %v2478_v15  ;;  %v2030_v15 = vadd.f32 %v4732_v52, %v1994_v39 }
 0x33d   : > { %2555 = vst [vmem:[%s4868_s23 + $0x10] sm:$0xff] %v2479_v8  ;;  %v2094_v49 = vmul.f32 0.2, %v2030_v15  ;;  %vm2062_vm5 = vcmp.ge.f32.partialorder %v2030_v15, 0.0 }
 0x33f   : > { %v1718_v43 = vpop.f32.mrf.mxu0  ;;  %v2126_v34 = vsel %vm2062_vm5, %v2030_v15, %v2094_v49 }
 0x342   : > { %v2480_v42 = vpop.f32.mrf.mxu3 }
 0x343   : > { %v2481_v48 = vadd.f32 %v4861_v11, %v2480_v42  ;;  %v2125_v42 = vsel %vm2061_vm4, %v2029_v0, %v2093_v63 }
 0x345   : > { %2556 = vst [vmem:[%s4868_s23 + $0x18] sm:$0xff] %v2481_v48  ;;  %v2394_v48 = vpack.c.bf16 %v2126_v34, %v2125_v42 }
 0x347   : > { %2522 = vmatmul.bf16.gmra.mxu3 %v2390_v31  ;;  %v1720_v1 = vpop.f32.mrf.mxu0  ;;  %v1995_v31 = vadd.f32 %v4770_v61, %v1718_v43 }
 0x348   : > { %v1996_v27 = vadd.f32 %v4783_v57, %v1720_v1 }
 0x349   : > { %v2031_v60 = vadd.f32 %v4732_v52, %v1995_v31 }
 0x34a   : > { %v2483_v18 = vpop.f32.mrf.mxu3  ;;  %v2032_v7 = vadd.f32 %v4732_v52, %v1996_v27 }
 0x34b   : > { %v2484_v19 = vadd.f32 %v4861_v11, %v2483_v18  ;;  %vm2063_vm6 = vcmp.ge.f32.partialorder %v2031_v60, 0.0 }
 0x34c   : > { %v2096_v30 = vmul.f32 0.2, %v2032_v7  ;;  %vm2064_vm7 = vcmp.ge.f32.partialorder %v2032_v7, 0.0 }
 0x34d   : > { %2557 = vst [vmem:[%s4868_s23 + $0x20] sm:$0xff] %v2484_v19  ;;  %v2095_v19 = vmul.f32 0.2, %v2031_v60 }
 0x34f   : > { %v2127_v25 = vsel %vm2063_vm6, %v2031_v60, %v2095_v19 }
 0x352   : > { %v2485_v26 = vpop.f32.mrf.mxu3 }
 0x353   : > { %v2486_v5 = vadd.f32 %v4861_v11, %v2485_v26  ;;  %v2128_v26 = vsel %vm2064_vm7, %v2032_v7, %v2096_v30 }
 0x354   : > { %v2395_v38 = vpack.c.bf16 %v2128_v26, %v2127_v25 }
 0x355   : > { %2558 = vst [vmem:[%s4868_s23 + $0x28] sm:$0xff] %v2486_v5 }
 0x357   : > { %2527 = vmatmul.bf16.gmra.mxu3 %v2391_v32 }
 0x35a   : > { %v2488_v23 = vpop.f32.mrf.mxu3 }
 0x35b   : > { %v2489_v37 = vadd.f32 %v4861_v11, %v2488_v23 }
 0x35d   : > { %2559 = vst [vmem:[%s4868_s23 + $0x30] sm:$0xff] %v2489_v37 }
 0x362   : > { %v2490_v16 = vpop.f32.mrf.mxu3 }
 0x363   : > { %v2491_v14 = vadd.f32 %v4861_v11, %v2490_v16 }
 0x365   : > { %2560 = vst [vmem:[%s4868_s23 + $0x38] sm:$0xff] %v2491_v14 }
 0x367   : > { %2532 = vmatmul.bf16.gmra.mxu3 %v2392_v2 }
 0x36a   : > { %v2493_v35 = vpop.f32.mrf.mxu3 }
 0x36b   : > { %v2494_v12 = vadd.f32 %v4861_v11, %v2493_v35 }
 0x36d   : > { %2561 = vst [vmem:[%s4868_s23 + $0x40] sm:$0xff] %v2494_v12 }
 0x372   : > { %v2495_v51 = vpop.f32.mrf.mxu3 }
 0x373   : > { %v2496_v50 = vadd.f32 %v4861_v11, %v2495_v51 }
 0x375   : > { %2562 = vst [vmem:[%s4868_s23 + $0x48] sm:$0xff] %v2496_v50 }
 0x377   : > { %2537 = vmatmul.bf16.gmra.mxu3 %v2393_v53 }
 0x379   : > { %v2662_v17 = vpop.f32.mrf.mxu0 }
 0x37a   : > { %2682 = vst [vmem:[%s4915_s0] sm:$0xff] %v2662_v17  ;;  %v2498_v8 = vpop.f32.mrf.mxu3 }
 0x37b   : > { %v2499_v36 = vadd.f32 %v4861_v11, %v2498_v8 }
 0x37d   : > { %2563 = vst [vmem:[%s4868_s23 + $0x50] sm:$0xff] %v2499_v36 }
 0x381   : > { %v2664_v46 = vpop.f32.mrf.mxu0 }
 0x382   : > { %2683 = vst [vmem:[%s4915_s0 + $0x8] sm:$0xff] %v2664_v46  ;;  %v2500_v24 = vpop.f32.mrf.mxu3 }
 0x383   : > { %v2501_v41 = vadd.f32 %v4861_v11, %v2500_v24 }
 0x385   : > { %2564 = vst [vmem:[%s4868_s23 + $0x58] sm:$0xff] %v2501_v41 }
 0x387   : > { %2542 = vmatmul.bf16.gmra.mxu3 %v2394_v48 }
 0x389   : > { %v2667_v62 = vpop.f32.mrf.mxu0 }
 0x38a   : > { %2684 = vst [vmem:[%s4915_s0 + $0x10] sm:$0xff] %v2667_v62  ;;  %v2503_v54 = vpop.f32.mrf.mxu3 }
 0x38b   : > { %v2504_v18 = vadd.f32 %v4861_v11, %v2503_v54 }
 0x38d   : > { %2565 = vst [vmem:[%s4868_s23 + $0x60] sm:$0xff] %v2504_v18 }
 0x391   : > { %v2669_v61 = vpop.f32.mrf.mxu0 }
 0x392   : > { %2685 = vst [vmem:[%s4915_s0 + $0x18] sm:$0xff] %v2669_v61  ;;  %v2505_v57 = vpop.f32.mrf.mxu3 }
 0x393   : > { %v2506_v52 = vadd.f32 %v4861_v11, %v2505_v57 }
 0x395   : > { %2566 = vst [vmem:[%s4868_s23 + $0x68] sm:$0xff] %v2506_v52 }
 0x397   : > { %2547 = vmatmul.bf16.gmra.mxu3 %v2395_v38 }
 0x399   : > { %v2672_v10 = vpop.f32.mrf.mxu0 }
 0x39a   : > { %2686 = vst [vmem:[%s4915_s0 + $0x20] sm:$0xff] %v2672_v10  ;;  %v2508_v58 = vpop.f32.mrf.mxu3 }
 0x39b   : > { %v2509_v5 = vadd.f32 %v4861_v11, %v2508_v58 }
 0x39d   : > { %2567 = vst [vmem:[%s4868_s23 + $0x70] sm:$0xff] %v2509_v5 }
 0x3a1   : > { %v2674_v32 = vpop.f32.mrf.mxu0 }
 0x3a2   : > { %2687 = vst [vmem:[%s4915_s0 + $0x28] sm:$0xff] %v2674_v32  ;;  %v2510_v33 = vpop.f32.mrf.mxu3 }
 0x3a3   : > { %v2511_v22 = vadd.f32 %v4861_v11, %v2510_v33 }
 0x3a5   : > { %2568 = vst [vmem:[%s4868_s23 + $0x78] sm:$0xff] %v2511_v22 }
 0x3a9   : > { %v2677_v56 = vpop.f32.mrf.mxu0 }
 0x3aa   : > { %2688 = vst [vmem:[%s4915_s0 + $0x30] sm:$0xff] %v2677_v56  ;;  %v2513_v55 = vpop.f32.mrf.mxu3 }
 0x3ab   : > { %v2514_v23 = vadd.f32 %v4861_v11, %v2513_v55 }
 0x3ad   : > { %2569 = vst [vmem:[%s4868_s23 + $0x80] sm:$0xff] %v2514_v23 }
 0x3b1   : > { %v2679_v37 = vpop.f32.mrf.mxu0 }
 0x3b2   : > { %2689 = vst [vmem:[%s4915_s0 + $0x38] sm:$0xff] %v2679_v37  ;;  %v2515_v21 = vpop.f32.mrf.mxu3 }
 0x3b3   : > { %v2516_v44 = vadd.f32 %v4861_v11, %v2515_v21 }
 0x3b5   : > { %2570 = vst [vmem:[%s4868_s23 + $0x88] sm:$0xff] %v2516_v44 }
 0x3ba   : > { %v2518_v45 = vpop.f32.mrf.mxu3 }
 0x3bb   : > { %v2519_v16 = vadd.f32 %v4861_v11, %v2518_v45 }
 0x3bd   : > { %2571 = vst [vmem:[%s4868_s23 + $0x90] sm:$0xff] %v2519_v16 }
 0x3c2   : > { %v2520_v4 = vpop.f32.mrf.mxu3 }
 0x3c3   : > { %v2521_v40 = vadd.f32 %v4861_v11, %v2520_v4 }
 0x3c5   : > { %2572 = vst [vmem:[%s4868_s23 + $0x98] sm:$0xff] %v2521_v40 }
 0x3ca   : > { %v2523_v14 = vpop.f32.mrf.mxu3 }
 0x3cb   : > { %v2524_v2 = vadd.f32 %v4861_v11, %v2523_v14 }
 0x3cd   : > { %2573 = vst [vmem:[%s4868_s23 + $0xa0] sm:$0xff] %v2524_v2 }
 0x3d2   : > { %v2525_v29 = vpop.f32.mrf.mxu3 }
 0x3d3   : > { %v2526_v9 = vadd.f32 %v4861_v11, %v2525_v29 }
 0x3d5   : > { %2574 = vst [vmem:[%s4868_s23 + $0xa8] sm:$0xff] %v2526_v9 }
 0x3da   : > { %v2528_v43 = vpop.f32.mrf.mxu3 }
 0x3db   : > { %v2529_v13 = vadd.f32 %v4861_v11, %v2528_v43 }
 0x3dd   : > { %2575 = vst [vmem:[%s4868_s23 + $0xb0] sm:$0xff] %v2529_v13 }
 0x3e2   : > { %v2530_v47 = vpop.f32.mrf.mxu3 }
 0x3e3   : > { %v2531_v35 = vadd.f32 %v4861_v11, %v2530_v47 }
 0x3e5   : > { %2576 = vst [vmem:[%s4868_s23 + $0xb8] sm:$0xff] %v2531_v35 }
 0x3ea   : > { %v2533_v12 = vpop.f32.mrf.mxu3 }
 0x3eb   : > { %v2534_v3 = vadd.f32 %v4861_v11, %v2533_v12 }
 0x3ed   : > { %2577 = vst [vmem:[%s4868_s23 + $0xc0] sm:$0xff] %v2534_v3 }
 0x3f2   : > { %v2535_v59 = vpop.f32.mrf.mxu3 }
 0x3f3   : > { %v2536_v1 = vadd.f32 %v4861_v11, %v2535_v59 }
 0x3f5   : > { %2578 = vst [vmem:[%s4868_s23 + $0xc8] sm:$0xff] %v2536_v1 }
 0x3fa   : > { %v2538_v51 = vpop.f32.mrf.mxu3 }
 0x3fb   : > { %v2539_v6 = vadd.f32 %v4861_v11, %v2538_v51 }
 0x3fd   : > { %2579 = vst [vmem:[%s4868_s23 + $0xd0] sm:$0xff] %v2539_v6 }
 0x402   : > { %v2540_v20 = vpop.f32.mrf.mxu3 }
 0x403   : > { %v2541_v50 = vadd.f32 %v4861_v11, %v2540_v20 }
 0x405   : > { %2580 = vst [vmem:[%s4868_s23 + $0xd8] sm:$0xff] %v2541_v50 }
 0x40a   : > { %v2543_v53 = vpop.f32.mrf.mxu3 }
 0x40b   : > { %v2544_v28 = vadd.f32 %v4861_v11, %v2543_v53 }
 0x40d   : > { %2581 = vst [vmem:[%s4868_s23 + $0xe0] sm:$0xff] %v2544_v28 }
 0x412   : > { %v2545_v39 = vpop.f32.mrf.mxu3 }
 0x413   : > { %v2546_v17 = vadd.f32 %v4861_v11, %v2545_v39 }
 0x415   : > { %2582 = vst [vmem:[%s4868_s23 + $0xe8] sm:$0xff] %v2546_v17 }
 0x41a   : > { %v2548_v0 = vpop.f32.mrf.mxu3 }
 0x41b   : > { %v2549_v15 = vadd.f32 %v4861_v11, %v2548_v0 }
 0x41d   : > { %2583 = vst [vmem:[%s4868_s23 + $0xf0] sm:$0xff] %v2549_v15 }
 0x422   : > { %v2550_v8 = vpop.f32.mrf.mxu3 }
 0x423   : > { %v2551_v36 = vadd.f32 %v4861_v11, %v2550_v8 }
 0x425   : > { %2584 = vst [vmem:[%s4868_s23 + $0xf8] sm:$0xff] %v2551_v36 }
 0x426 PF: > { %s28_s24 = sadd.s32 1, %s3350_s24  }
 0x427   : > { %p25_p4 = scmp.ge.s32.totalorder %s28_s24, 4  }
 0x429   :  { %27 = sbr.rel (!%p25_p4) target bundleno = 3 (0x3), region = 144 }

</bundles_post_ra>
